<compile_context>
chip_gen: v7x
topology: tpu7x:2x2x1
jax: 0.10.0
libtpu: 0.0.40
codegen_flags: <defaults>
</compile_context>

<pallas_src>
import functools

import jax
import jax.numpy as jnp
from jax.experimental import pallas as pl
from jax.experimental.pallas import tpu as pltpu

N_ATOM_TYPES = 6
BINS_PER_ANGSTROM = 1.0
GRID_XY = 8
GRID_Z = 16
SIGMA = 0.6
BN_EPS = 1e-5
LANE = 128                       # lane-dense output width
N_WIN = 8                        # 2x2x2 maxpool window slabs

_CONV_CFG = (("conv1", 6, 16), ("conv2", 16, 32), ("conv3", 32, 64))  # static!
_CONV_A_BLOCK_BYTES = 4 * 1024 * 1024      # target per-step bf16 A block
_VMEM_LIMIT_BYTES = 32 * 1024 * 1024       # explicit scoped VMEM (safe on v5e/v6e/v7x)


def _round_up(x, m):
    return ((x + m - 1) // m) * m


# ---------------------------------------------------------------------------
# Pallas kernels
# ---------------------------------------------------------------------------
def _gauss_kernel(grid_ref, pos_ref, oh_ref, o_ref, *, inv_two_sigma2):
    """Gaussian blurring as an (env*type one-hot) x (per-atom density) matmul.

    grid_ref: (3, G) f32      -- full meshgrid coordinates
    pos_ref : (Na_blk, 3) f32 -- one block of atom positions
    oh_ref  : (rows_blk, Na_blk) bf16 -- (env*6+type) one-hot rows for this block
    o_ref   : (rows_blk, G) f32       -- accumulated over atom blocks
    """
    @pl.when(pl.program_id(1) == 0)
    def _():
        o_ref[...] = jnp.zeros_like(o_ref)

    gx = grid_ref[0:1, :]                 # (1, G)
    gy = grid_ref[1:2, :]
    gz = grid_ref[2:3, :]
    px = pos_ref[:, 0:1]                  # (Na_blk, 1)
    py = pos_ref[:, 1:2]
    pz = pos_ref[:, 2:3]
    d2 = (px - gx) ** 2 + (py - gy) ** 2 + (pz - gz) ** 2          # (Na_blk, G)
    dens = jnp.exp(-d2 * inv_two_sigma2)
    norm = jnp.sum(dens, axis=1, keepdims=True) + 1e-20            # per-atom sum
    dens = (dens * pl.reciprocal(norm, approx=True)).astype(jnp.bfloat16)
    o_ref[...] += jnp.dot(oh_ref[...], dens, preferred_element_type=jnp.float32)


def _conv_pool_bn_relu_kernel(a_ref, w_ref, s_ref, t_ref, o_ref):
    """Fused Conv3d(im2col) + MaxPool3d(2) + BatchNorm(eval) + ReLU.

    a_ref: (8*Mblk, K) bf16 -- 8 pool-window slabs (window-major) of im2col rows
    w_ref: (K, 128)  bf16   -- Cout zero-padded to 128 lanes
    s_ref, t_ref: (1, 128) f32 -- folded BN scale / (scale*bias + shift)
    o_ref: (Mblk, 128) bf16 -- pooled output rows, channels-last, lane-dense
    """
    mblk = o_ref.shape[0]
    n_win = a_ref.shape[0] // mblk
    m = jnp.dot(a_ref[...], w_ref[...], preferred_element_type=jnp.float32)
    r = m[0:mblk]
    for i in range(1, n_win):                      # maxpool over the 8 slabs
        r = jnp.maximum(r, m[i * mblk:(i + 1) * mblk])
    o_ref[...] = jnp.maximum(r * s_ref[...] + t_ref[...], 0.0).astype(o_ref.dtype)


def _dense_head_kernel(x_ref, w1_ref, s1_ref, t1_ref, w2_ref, b2_ref, o_ref):
    """Fused Linear(256pad->256) + BN1d(eval) + ReLU + Linear(256->40, padded to 128)."""
    h = jnp.dot(x_ref[...], w1_ref[...], preferred_element_type=jnp.float32)
    h = jnp.maximum(h * s1_ref[...] + t1_ref[...], 0.0)
    o_ref[...] = jnp.dot(h.astype(w2_ref.dtype), w2_ref[...],
                         preferred_element_type=jnp.float32) + b2_ref[...]


# ---------------------------------------------------------------------------
# Pallas wrappers
# ---------------------------------------------------------------------------
def gaussian_blur_fields(x_atoms, batch_size, grid_xyz, sigma_p):
    """x_atoms: (N, 5) [env, type, x, y, z] -> fields (B, 6, 8, 8, 16)."""
    n = x_atoms.shape[0]
    env = x_atoms[:, 0].astype(jnp.int32)
    typ = x_atoms[:, 1].astype(jnp.int32)
    pos = x_atoms[:, 2:5].astype(jnp.float32)
    g = grid_xyz.shape[1]

    b6 = batch_size * N_ATOM_TYPES
    rows_blk = min(_round_up(b6, 16), 128)
    b6p = _round_up(b6, rows_blk)
    idx = env * N_ATOM_TYPES + typ
    onehot = (idx[None, :] == jnp.arange(b6p, dtype=jnp.int32)[:, None]
              ).astype(jnp.bfloat16)                               # exact in bf16

    na_blk = min(_round_up(n, 128), 1024)          # atom block, VMEM-safe everywhere
    na = _round_up(n, na_blk)
    pos_p = jnp.pad(pos, ((0, na - n), (0, 0)))
    oh_p = jnp.pad(onehot, ((0, 0), (0, na - n)))  # padded atoms have zero one-hot

    fields = pl.pallas_call(
        functools.partial(_gauss_kernel,
                          inv_two_sigma2=1.0 / (2.0 * sigma_p * sigma_p)),
        out_shape=jax.ShapeDtypeStruct((b6p, g), jnp.float32),
        grid_spec=pltpu.PrefetchScalarGridSpec(
            num_scalar_prefetch=0,
            grid=(b6p // rows_blk, na // na_blk),
            in_specs=[
                pl.BlockSpec((3, g), lambda r, a: (0, 0)),
                pl.BlockSpec((na_blk, 3), lambda r, a: (a, 0)),
                pl.BlockSpec((rows_blk, na_blk), lambda r, a: (r, a)),
            ],
            out_specs=pl.BlockSpec((rows_blk, g), lambda r, a: (r, 0)),
        ),
        compiler_params=pltpu.CompilerParams(
            dimension_semantics=("parallel", "arbitrary"),
            vmem_limit_bytes=_VMEM_LIMIT_BYTES),
    )(grid_xyz, pos_p, oh_p)
    return fields[:b6].reshape(batch_size, N_ATOM_TYPES, GRID_XY, GRID_XY, GRID_Z)


def conv_pool_bn_relu(x, w_p, scale_p, shift_p):
    """x: (B, D, H, W, Cin) -> (B, D/2, H/2, W/2, 128) bf16 (channels zero-padded).

    im2col rows are grouped window-major inside each pooled-row block, so every
    grid step is one (8*Mblk, K)x(K, 128) bf16 MXU dot followed by 7 VPU maxes.
    """
    x = x.astype(jnp.bfloat16)                     # whole glue chain in bf16
    b, d, h, w, c = x.shape
    do, ho, wo = d // 2, h // 2, w // 2
    k = 27 * c
    mpool = b * do * ho * wo

    # VMEM-budget-aware pooled-row block (double-buffered bf16 A block <= ~4 MiB).
    cap = max(16, ((_CONV_A_BLOCK_BYTES // (N_WIN * k * 2)) // 16) * 16)
    mp_blk = min(_round_up(mpool, 16), cap)
    mp = _round_up(mpool, mp_blk)
    nb = mp // mp_blk

    xp = jnp.pad(x, ((0, 0), (1, 1), (1, 1), (1, 1), (0, 0)))
    pats = [xp[:, kd:kd + d, kh:kh + h, kw:kw + w, :]
            for kd in range(3) for kh in range(3) for kw in range(3)]
    p = jnp.stack(pats, axis=4)                          # (B, D, H, W, 27, C)
    p = p.reshape(b, do, 2, ho, 2, wo, 2, k)
    p = jnp.transpose(p, (2, 4, 6, 0, 1, 3, 5, 7))       # (2,2,2, B, Do, Ho, Wo, K)
    a = p.reshape(N_WIN, mpool, k)
    if mp != mpool:
        a = jnp.pad(a, ((0, 0), (0, mp - mpool), (0, 0)))
    # Group the 8 window slabs per pooled-row block -> each grid step reads one
    # contiguous (8*mp_blk, K) slab (no in-kernel relayout needed).
    a = (a.reshape(N_WIN, nb, mp_blk, k)
           .transpose(1, 0, 2, 3)
           .reshape(nb, N_WIN * mp_blk, k))

    out = pl.pallas_call(
        _conv_pool_bn_relu_kernel,
        out_shape=jax.ShapeDtypeStruct((mp, LANE), jnp.bfloat16),
        grid_spec=pltpu.PrefetchScalarGridSpec(
            num_scalar_prefetch=0,
            grid=(nb,),
            in_specs=[
                pl.BlockSpec((None, N_WIN * mp_blk, k), lambda i: (i, 0, 0)),
                pl.BlockSpec((k, LANE), lambda i: (0, 0)),
                pl.BlockSpec((1, LANE), lambda i: (0, 0)),
                pl.BlockSpec((1, LANE), lambda i: (0, 0)),
            ],
            out_specs=pl.BlockSpec((mp_blk, LANE), lambda i: (i, 0)),
        ),
        compiler_params=pltpu.CompilerParams(
            dimension_semantics=("parallel",),
            vmem_limit_bytes=_VMEM_LIMIT_BYTES),
    )(a, w_p, scale_p, shift_p)
    return out[:mpool].reshape(b, do, ho, wo, LANE)


def dense_head(feat, w1_p, s1, t1, w2_p, b2_p, n_out):
    """feat: (B, 256) lane-padded conv3 flatten -> logits (B, n_out)."""
    b, kin = feat.shape
    blk = min(_round_up(b, 16), 256)
    mp = _round_up(b, blk)
    x = jnp.pad(feat, ((0, mp - b), (0, 0)))
    out = pl.pallas_call(
        _dense_head_kernel,
        out_shape=jax.ShapeDtypeStruct((mp, LANE), jnp.float32),
        grid_spec=pltpu.PrefetchScalarGridSpec(
            num_scalar_prefetch=0,
            grid=(mp // blk,),
            in_specs=[
                pl.BlockSpec((blk, kin), lambda i: (i, 0)),
                pl.BlockSpec(w1_p.shape, lambda i: (0, 0)),
                pl.BlockSpec(s1.shape, lambda i: (0, 0)),
                pl.BlockSpec(t1.shape, lambda i: (0, 0)),
                pl.BlockSpec(w2_p.shape, lambda i: (0, 0)),
                pl.BlockSpec(b2_p.shape, lambda i: (0, 0)),
            ],
            out_specs=pl.BlockSpec((blk, LANE), lambda i: (i, 0)),
        ),
        compiler_params=pltpu.CompilerParams(
            dimension_semantics=("parallel",),
            vmem_limit_bytes=_VMEM_LIMIT_BYTES),
    )(x, w1_p, s1, t1, w2_p, b2_p)
    return out[:b, :n_out]


# ---------------------------------------------------------------------------
# Parameters (synthetic, kernel-ready: BN folded, Cout padded to 128 lanes)
# ---------------------------------------------------------------------------
def init_params(key):
    ki = iter(jax.random.split(key, 32))

    def nrm(shape, s=0.1):
        return s * jax.random.normal(next(ki), shape, jnp.float32)

    def bn_affine(c):
        gamma = 1.0 + 0.1 * jax.random.normal(next(ki), (c,), jnp.float32)
        beta = 0.1 * jax.random.normal(next(ki), (c,), jnp.float32)
        mean = 0.1 * jax.random.normal(next(ki), (c,), jnp.float32)
        var = 1.0 + jnp.abs(jax.random.normal(next(ki), (c,), jnp.float32))
        scale = gamma / jnp.sqrt(var + BN_EPS)
        shift = beta - mean * scale
        return scale, shift

    params = {}
    for name, cin, cout in _CONV_CFG:
        w = nrm((27 * cin, cout))
        bias = nrm((cout,))
        scale, shift = bn_affine(cout)
        w_p = jnp.zeros((27 * cin, LANE), jnp.float32).at[:, :cout].set(w)
        s_p = jnp.zeros((1, LANE), jnp.float32).at[0, :cout].set(scale)
        # conv bias folded through the pool (channel-constant commutes with max)
        # into the BN shift:  scale*(max(v)+bias)+shift = scale*max(v) + t
        t_p = jnp.zeros((1, LANE), jnp.float32).at[0, :cout].set(scale * bias + shift)
        params[name] = {"w": w_p.astype(jnp.bfloat16), "scale": s_p, "shift": t_p}

    w1 = nrm((128, 256))
    b1 = nrm((256,))
    s1, t1 = bn_affine(256)
    w2 = nrm((256, 40))
    b2 = nrm((40,))
    # conv3's output stays lane-padded: flatten is (B, 2*128) with real channels
    # at [0:64] and [128:192]; zero rows of w1 fuse the channel-slice into dense1.
    w1_p = (jnp.zeros((2 * LANE, 256), jnp.float32)
            .at[0:64, :].set(w1[0:64])
            .at[LANE:LANE + 64, :].set(w1[64:128]))
    w2_p = jnp.zeros((256, LANE), jnp.float32).at[:, :40].set(w2)
    b2_p = jnp.zeros((1, LANE), jnp.float32).at[0, :40].set(b2)
    params["dense"] = {
        "w1": w1_p.astype(jnp.bfloat16),
        "s1": s1.reshape(1, 256),
        "t1": (s1 * b1 + t1).reshape(1, 256),     # Linear bias folded into BN shift
        "w2": w2_p.astype(jnp.bfloat16),
        "b2": b2_p,
    }
    return params


def make_grid_xyz():
    lin_xy = jnp.linspace(
        -GRID_XY / 2 * BINS_PER_ANGSTROM + BINS_PER_ANGSTROM / 2,
        GRID_XY / 2 * BINS_PER_ANGSTROM - BINS_PER_ANGSTROM / 2, GRID_XY)
    lin_z = jnp.linspace(
        -GRID_Z / 2 * BINS_PER_ANGSTROM + BINS_PER_ANGSTROM / 2,
        GRID_Z / 2 * BINS_PER_ANGSTROM - BINS_PER_ANGSTROM / 2, GRID_Z)
    xx, yy, zz = jnp.meshgrid(lin_xy, lin_xy, lin_z, indexing="ij")
    return jnp.stack([xx.reshape(-1), yy.reshape(-1), zz.reshape(-1)], axis=0)  # (3, G)


# ---------------------------------------------------------------------------
# Full forward
# ---------------------------------------------------------------------------
def cavity_forward(params, x_atoms, grid_xyz, *, batch_size):
    sigma_p = SIGMA * BINS_PER_ANGSTROM
    fields = gaussian_blur_fields(x_atoms, batch_size, grid_xyz, sigma_p)  # (B,6,8,8,16)

    x = jnp.transpose(fields, (0, 2, 3, 4, 1))           # channels-last (B,8,8,16,6)

    for name, _cin, cout in _CONV_CFG:
        lp = params[name]
        x = conv_pool_bn_relu(x, lp["w"], lp["scale"], lp["shift"])
        if name != "conv3":
            x = x[..., :cout]        # static Python-int slice (drops lane padding)
    # conv3 output kept lane-padded; dense1 weight has zero rows at padded lanes.
    feat = x.reshape(batch_size, -1)                     # (B, 2*128) bf16 flatten
    dp = params["dense"]
    out = dense_head(feat, dp["w1"], dp["s1"], dp["t1"], dp["w2"], dp["b2"], 40)
    return out                                           # (B, 40)


# ---------------------------------------------------------------------------
if __name__ == "__main__":
    key = jax.random.PRNGKey(0)
    kp, kx, kz = jax.random.split(key, 3)

    batch_size = 2
    atoms_per_cell = 5                      # atoms per (environment, atom-type)
    n_atoms = batch_size * N_ATOM_TYPES * atoms_per_cell   # 60

    # x: (n_atoms, 5) = [env_id, atom_type, x, y, z]; env ids sorted, every
    # (env, type) combination populated (matches the reference's assumptions).
    env = jnp.repeat(jnp.arange(batch_size), N_ATOM_TYPES * atoms_per_cell)
    typ = jnp.tile(jnp.repeat(jnp.arange(N_ATOM_TYPES), atoms_per_cell), batch_size)
    xy = jax.random.uniform(kx, (n_atoms, 2), minval=-3.5, maxval=3.5)
    zc = jax.random.uniform(kz, (n_atoms, 1), minval=-7.5, maxval=7.5)
    x_atoms = jnp.concatenate(
        [env[:, None].astype(jnp.float32), typ[:, None].astype(jnp.float32), xy, zc],
        axis=1)

    params = init_params(kp)
    grid_xyz = make_grid_xyz()

    fwd = jax.jit(functools.partial(cavity_forward, batch_size=batch_size))
    out = fwd(params, x_atoms, grid_xyz)
    out = jax.block_until_ready(out)
    assert out.shape == (batch_size, 40), out.shape
    assert bool(jnp.all(jnp.isfinite(out)))
    print("KERNEL_OK")
</pallas_src>

<mosaic_0001>
module attributes {stable_mosaic.version = 11 : i64} {
  func.func @_gauss_kernel(%arg0: i32, %arg1: i32, %arg2: memref<3x1024xf32, #tpu.memory_space<vmem>>, %arg3: memref<128x3xf32, #tpu.memory_space<vmem>>, %arg4: memref<16x128xbf16, #tpu.memory_space<vmem>>, %arg5: memref<16x1024xf32, #tpu.memory_space<vmem>>) attributes {dimension_semantics = [#tpu.dimension_semantics<parallel>, #tpu.dimension_semantics<arbitrary>], iteration_bounds = array<i64: 1, 1>, scalar_prefetch = 0 : i64, scratch_operands = 0 : i64, tpu.core_type = #tpu.core_type<tc>, window_params = [{pipeline_mode = #tpu.pipeline_mode<synchronous>, transform_indices = @transform_0, window_bounds = array<i64: 3, 1024>}, {transform_indices = @transform_1, window_bounds = array<i64: 128, 3>}, {transform_indices = @transform_2, window_bounds = array<i64: 16, 128>}, {transform_indices = @transform_3, window_bounds = array<i64: 16, 1024>}]} {
    %c0_i32 = arith.constant 0 : i32
    %0 = arith.cmpi eq, %arg1, %c0_i32 : i32
    %1 = arith.extui %0 : i1 to i32
    %c0_i32_0 = arith.constant 0 : i32
    %2 = arith.cmpi ne, %1, %c0_i32_0 : i32
    scf.if %2 {
      %cst_20 = arith.constant 0.000000e+00 : f32
      %41 = vector.broadcast %cst_20 : f32 to vector<16x1024xf32>
      %c0_21 = arith.constant 0 : index
      %c0_22 = arith.constant 0 : index
      %42 = vector.load %arg5[%c0_21, %c0_22] : memref<16x1024xf32, #tpu.memory_space<vmem>>, vector<16x1024xf32>
      tpu.vector_store %arg5[%c0_21, %c0_22], %41 {strides = array<i32>} : memref<16x1024xf32, #tpu.memory_space<vmem>>, vector<16x1024xf32>,
    } else {
    }
    %c0 = arith.constant 0 : index
    %c0_1 = arith.constant 0 : index
    %3 = vector.load %arg2[%c0, %c0_1] : memref<3x1024xf32, #tpu.memory_space<vmem>>, vector<1x1024xf32>
    %c1 = arith.constant 1 : index
    %c0_2 = arith.constant 0 : index
    %4 = vector.load %arg2[%c1, %c0_2] : memref<3x1024xf32, #tpu.memory_space<vmem>>, vector<1x1024xf32>
    %c2 = arith.constant 2 : index
    %c0_3 = arith.constant 0 : index
    %5 = vector.load %arg2[%c2, %c0_3] : memref<3x1024xf32, #tpu.memory_space<vmem>>, vector<1x1024xf32>
    %c0_4 = arith.constant 0 : index
    %c0_5 = arith.constant 0 : index
    %6 = vector.load %arg3[%c0_4, %c0_5] : memref<128x3xf32, #tpu.memory_space<vmem>>, vector<128x1xf32>
    %c0_6 = arith.constant 0 : index
    %c1_7 = arith.constant 1 : index
    %7 = vector.load %arg3[%c0_6, %c1_7] : memref<128x3xf32, #tpu.memory_space<vmem>>, vector<128x1xf32>
    %c0_8 = arith.constant 0 : index
    %c2_9 = arith.constant 2 : index
    %8 = vector.load %arg3[%c0_8, %c2_9] : memref<128x3xf32, #tpu.memory_space<vmem>>, vector<128x1xf32>
    %9 = vector.broadcast %6 : vector<128x1xf32> to vector<128x1024xf32>
    %10 = vector.broadcast %3 : vector<1x1024xf32> to vector<128x1024xf32>
    %11 = arith.subf %9, %10 : vector<128x1024xf32>
    %12 = arith.mulf %11, %11 : vector<128x1024xf32>
    %13 = vector.broadcast %7 : vector<128x1xf32> to vector<128x1024xf32>
    %14 = vector.broadcast %4 : vector<1x1024xf32> to vector<128x1024xf32>
    %15 = arith.subf %13, %14 : vector<128x1024xf32>
    %16 = arith.mulf %15, %15 : vector<128x1024xf32>
    %17 = arith.addf %12, %16 : vector<128x1024xf32>
    %18 = vector.broadcast %8 : vector<128x1xf32> to vector<128x1024xf32>
    %19 = vector.broadcast %5 : vector<1x1024xf32> to vector<128x1024xf32>
    %20 = arith.subf %18, %19 : vector<128x1024xf32>
    %21 = arith.mulf %20, %20 : vector<128x1024xf32>
    %22 = arith.addf %17, %21 : vector<128x1024xf32>
    %cst = arith.constant 0.000000e+00 : f32
    %23 = vector.broadcast %cst : f32 to vector<128x1024xf32>
    %24 = arith.subf %23, %22 : vector<128x1024xf32>
    %cst_10 = arith.constant 1.38888884 : f32
    %25 = vector.broadcast %cst_10 : f32 to vector<128x1024xf32>
    %26 = arith.mulf %24, %25 : vector<128x1024xf32>
    %27 = math.exp %26 : vector<128x1024xf32>
    %cst_11 = arith.constant dense<0.000000e+00> : vector<128xf32>
    %28 = vector.multi_reduction <add>, %27, %cst_11 [1] : vector<128x1024xf32> to vector<128xf32>
    %29 = vector.shape_cast %28 : vector<128xf32> to vector<128x1xf32>
    %cst_12 = arith.constant 9.99999968E-21 : f32
    %30 = vector.broadcast %cst_12 : f32 to vector<128x1xf32>
    %31 = arith.addf %29, %30 : vector<128x1xf32>
    %32 = tpu.reciprocal %31 {approx = true} : vector<128x1xf32> -> vector<128x1xf32>
    %33 = vector.broadcast %32 : vector<128x1xf32> to vector<128x1024xf32>
    %34 = arith.mulf %27, %33 : vector<128x1024xf32>
    %35 = arith.truncf %34 : vector<128x1024xf32> to vector<128x1024xbf16>
    %c0_13 = arith.constant 0 : index
    %c0_14 = arith.constant 0 : index
    %36 = vector.load %arg5[%c0_13, %c0_14] : memref<16x1024xf32, #tpu.memory_space<vmem>>, vector<16x1024xf32>
    %c0_15 = arith.constant 0 : index
    %c0_16 = arith.constant 0 : index
    %37 = vector.load %arg4[%c0_15, %c0_16] : memref<16x128xbf16, #tpu.memory_space<vmem>>, vector<16x128xbf16>
    %cst_17 = arith.constant dense<0.000000e+00> : vector<16x1024xf32>
    %38 = tpu.matmul %37, %35, %cst_17 {dimension_numbers = #tpu.dot_dimension_numbers<[1], [0], [0], [1], [0, 0, 1, 1], [], []>} : vector<16x128xbf16>, vector<128x1024xbf16>, vector<16x1024xf32> -> vector<16x1024xf32>
    %39 = arith.addf %36, %38 : vector<16x1024xf32>
    %c0_18 = arith.constant 0 : index
    %c0_19 = arith.constant 0 : index
    %40 = vector.load %arg5[%c0_18, %c0_19] : memref<16x1024xf32, #tpu.memory_space<vmem>>, vector<16x1024xf32>
    tpu.vector_store %arg5[%c0_18, %c0_19], %39 {strides = array<i32>} : memref<16x1024xf32, #tpu.memory_space<vmem>>, vector<16x1024xf32>,
    return
  }
  func.func @transform_0(%arg0: i32, %arg1: i32) -> (i32, i32) {
    %c0_i32 = arith.constant 0 : i32
    %c0_i32_0 = arith.constant 0 : i32
    %c0_i32_1 = arith.constant 0 : i32
    return %c0_i32, %c0_i32_0 : i32, i32
  }
  func.func @transform_1(%arg0: i32, %arg1: i32) -> (i32, i32) {
    %c0_i32 = arith.constant 0 : i32
    %c0_i32_0 = arith.constant 0 : i32
    return %arg1, %c0_i32 : i32, i32
  }
  func.func @transform_2(%arg0: i32, %arg1: i32) -> (i32, i32) {
    %c0_i32 = arith.constant 0 : i32
    return %arg0, %arg1 : i32, i32
  }
  func.func @transform_3(%arg0: i32, %arg1: i32) -> (i32, i32) {
    %c0_i32 = arith.constant 0 : i32
    %c0_i32_0 = arith.constant 0 : i32
    return %arg0, %c0_i32 : i32, i32
  }
}

module attributes {stable_mosaic.version = 11 : i64} {
  func.func @_conv_pool_bn_relu_kernel(%arg0: i32, %arg1: memref<1x2048x162xbf16, #tpu.memory_space<vmem>>, %arg2: memref<162x128xbf16, #tpu.memory_space<vmem>>, %arg3: memref<1x128xf32, #tpu.memory_space<vmem>>, %arg4: memref<1x128xf32, #tpu.memory_space<vmem>>, %arg5: memref<256x128xbf16, #tpu.memory_space<vmem>>) attributes {dimension_semantics = [#tpu.dimension_semantics<parallel>], iteration_bounds = array<i64: 1>, scalar_prefetch = 0 : i64, scratch_operands = 0 : i64, tpu.core_type = #tpu.core_type<tc>, window_params = [{transform_indices = @transform_0, window_bounds = array<i64: 1, 2048, 162>}, {pipeline_mode = #tpu.pipeline_mode<synchronous>, transform_indices = @transform_1, window_bounds = array<i64: 162, 128>}, {pipeline_mode = #tpu.pipeline_mode<synchronous>, transform_indices = @transform_2, window_bounds = array<i64: 1, 128>}, {pipeline_mode = #tpu.pipeline_mode<synchronous>, transform_indices = @transform_3, window_bounds = array<i64: 1, 128>}, {transform_indices = @transform_4, window_bounds = array<i64: 256, 128>}]} {
    %c0 = arith.constant 0 : index
    %c0_0 = arith.constant 0 : index
    %c0_1 = arith.constant 0 : index
    %0 = vector.load %arg1[%c0, %c0_0, %c0_1] : memref<1x2048x162xbf16, #tpu.memory_space<vmem>>, vector<1x2048x162xbf16>
    %1 = vector.shape_cast %0 : vector<1x2048x162xbf16> to vector<2048x162xbf16>
    %c0_2 = arith.constant 0 : index
    %c0_3 = arith.constant 0 : index
    %2 = vector.load %arg2[%c0_2, %c0_3] : memref<162x128xbf16, #tpu.memory_space<vmem>>, vector<162x128xbf16>
    %cst = arith.constant dense<0.000000e+00> : vector<2048x128xf32>
    %3 = tpu.matmul %1, %2, %cst {dimension_numbers = #tpu.dot_dimension_numbers<[1], [0], [0], [1], [0, 0, 1, 1], [], []>} : vector<2048x162xbf16>, vector<162x128xbf16>, vector<2048x128xf32> -> vector<2048x128xf32>
    %4 = vector.extract_strided_slice %3 {offsets = [0, 0], sizes = [256, 128], strides = [1, 1]} : vector<2048x128xf32> to vector<256x128xf32>
    %5 = vector.extract_strided_slice %3 {offsets = [256, 0], sizes = [256, 128], strides = [1, 1]} : vector<2048x128xf32> to vector<256x128xf32>
    %6 = arith.maximumf %4, %5 : vector<256x128xf32>
    %7 = vector.extract_strided_slice %3 {offsets = [512, 0], sizes = [256, 128], strides = [1, 1]} : vector<2048x128xf32> to vector<256x128xf32>
    %8 = arith.maximumf %6, %7 : vector<256x128xf32>
    %9 = vector.extract_strided_slice %3 {offsets = [768, 0], sizes = [256, 128], strides = [1, 1]} : vector<2048x128xf32> to vector<256x128xf32>
    %10 = arith.maximumf %8, %9 : vector<256x128xf32>
    %11 = vector.extract_strided_slice %3 {offsets = [1024, 0], sizes = [256, 128], strides = [1, 1]} : vector<2048x128xf32> to vector<256x128xf32>
    %12 = arith.maximumf %10, %11 : vector<256x128xf32>
    %13 = vector.extract_strided_slice %3 {offsets = [1280, 0], sizes = [256, 128], strides = [1, 1]} : vector<2048x128xf32> to vector<256x128xf32>
    %14 = arith.maximumf %12, %13 : vector<256x128xf32>
    %15 = vector.extract_strided_slice %3 {offsets = [1536, 0], sizes = [256, 128], strides = [1, 1]} : vector<2048x128xf32> to vector<256x128xf32>
    %16 = arith.maximumf %14, %15 : vector<256x128xf32>
    %17 = vector.extract_strided_slice %3 {offsets = [1792, 0], sizes = [256, 128], strides = [1, 1]} : vector<2048x128xf32> to vector<256x128xf32>
    %18 = arith.maximumf %16, %17 : vector<256x128xf32>
    %c0_4 = arith.constant 0 : index
    %c0_5 = arith.constant 0 : index
    %19 = vector.load %arg3[%c0_4, %c0_5] : memref<1x128xf32, #tpu.memory_space<vmem>>, vector<1x128xf32>
    %20 = vector.broadcast %19 : vector<1x128xf32> to vector<256x128xf32>
    %21 = arith.mulf %18, %20 : vector<256x128xf32>
    %c0_6 = arith.constant 0 : index
    %c0_7 = arith.constant 0 : index
    %22 = vector.load %arg4[%c0_6, %c0_7] : memref<1x128xf32, #tpu.memory_space<vmem>>, vector<1x128xf32>
    %23 = vector.broadcast %22 : vector<1x128xf32> to vector<256x128xf32>
    %24 = arith.addf %21, %23 : vector<256x128xf32>
    %cst_8 = arith.constant 0.000000e+00 : f32
    %25 = vector.broadcast %cst_8 : f32 to vector<256x128xf32>
    %26 = arith.maximumf %24, %25 : vector<256x128xf32>
    %27 = arith.truncf %26 : vector<256x128xf32> to vector<256x128xbf16>
    %c0_9 = arith.constant 0 : index
    %c0_10 = arith.constant 0 : index
    %28 = vector.load %arg5[%c0_9, %c0_10] : memref<256x128xbf16, #tpu.memory_space<vmem>>, vector<256x128xbf16>
    tpu.vector_store %arg5[%c0_9, %c0_10], %27 {strides = array<i32>} : memref<256x128xbf16, #tpu.memory_space<vmem>>, vector<256x128xbf16>,
    return
  }
  func.func @transform_0(%arg0: i32) -> (i32, i32, i32) {
    %c0_i32 = arith.constant 0 : i32
    %c0_i32_0 = arith.constant 0 : i32
    %c0_i32_1 = arith.constant 0 : i32
    return %arg0, %c0_i32, %c0_i32_0 : i32, i32, i32
  }
  func.func @transform_1(%arg0: i32) -> (i32, i32) {
    %c0_i32 = arith.constant 0 : i32
    %c0_i32_0 = arith.constant 0 : i32
    %c0_i32_1 = arith.constant 0 : i32
    return %c0_i32, %c0_i32_0 : i32, i32
  }
  func.func @transform_2(%arg0: i32) -> (i32, i32) {
    %c0_i32 = arith.constant 0 : i32
    %c0_i32_0 = arith.constant 0 : i32
    %c0_i32_1 = arith.constant 0 : i32
    return %c0_i32, %c0_i32_0 : i32, i32
  }
  func.func @transform_3(%arg0: i32) -> (i32, i32) {
    %c0_i32 = arith.constant 0 : i32
    %c0_i32_0 = arith.constant 0 : i32
    %c0_i32_1 = arith.constant 0 : i32
    return %c0_i32, %c0_i32_0 : i32, i32
  }
  func.func @transform_4(%arg0: i32) -> (i32, i32) {
    %c0_i32 = arith.constant 0 : i32
    %c0_i32_0 = arith.constant 0 : i32
    return %arg0, %c0_i32 : i32, i32
  }
}

module attributes {stable_mosaic.version = 11 : i64} {
  func.func @_conv_pool_bn_relu_kernel(%arg0: i32, %arg1: memref<1x256x432xbf16, #tpu.memory_space<vmem>>, %arg2: memref<432x128xbf16, #tpu.memory_space<vmem>>, %arg3: memref<1x128xf32, #tpu.memory_space<vmem>>, %arg4: memref<1x128xf32, #tpu.memory_space<vmem>>, %arg5: memref<32x128xbf16, #tpu.memory_space<vmem>>) attributes {dimension_semantics = [#tpu.dimension_semantics<parallel>], iteration_bounds = array<i64: 1>, scalar_prefetch = 0 : i64, scratch_operands = 0 : i64, tpu.core_type = #tpu.core_type<tc>, window_params = [{transform_indices = @transform_0, window_bounds = array<i64: 1, 256, 432>}, {pipeline_mode = #tpu.pipeline_mode<synchronous>, transform_indices = @transform_1, window_bounds = array<i64: 432, 128>}, {pipeline_mode = #tpu.pipeline_mode<synchronous>, transform_indices = @transform_2, window_bounds = array<i64: 1, 128>}, {pipeline_mode = #tpu.pipeline_mode<synchronous>, transform_indices = @transform_3, window_bounds = array<i64: 1, 128>}, {transform_indices = @transform_4, window_bounds = array<i64: 32, 128>}]} {
    %c0 = arith.constant 0 : index
    %c0_0 = arith.constant 0 : index
    %c0_1 = arith.constant 0 : index
    %0 = vector.load %arg1[%c0, %c0_0, %c0_1] : memref<1x256x432xbf16, #tpu.memory_space<vmem>>, vector<1x256x432xbf16>
    %1 = vector.shape_cast %0 : vector<1x256x432xbf16> to vector<256x432xbf16>
    %c0_2 = arith.constant 0 : index
    %c0_3 = arith.constant 0 : index
    %2 = vector.load %arg2[%c0_2, %c0_3] : memref<432x128xbf16, #tpu.memory_space<vmem>>, vector<432x128xbf16>
    %cst = arith.constant dense<0.000000e+00> : vector<256x128xf32>
    %3 = tpu.matmul %1, %2, %cst {dimension_numbers = #tpu.dot_dimension_numbers<[1], [0], [0], [1], [0, 0, 1, 1], [], []>} : vector<256x432xbf16>, vector<432x128xbf16>, vector<256x128xf32> -> vector<256x128xf32>
    %4 = vector.extract_strided_slice %3 {offsets = [0, 0], sizes = [32, 128], strides = [1, 1]} : vector<256x128xf32> to vector<32x128xf32>
    %5 = vector.extract_strided_slice %3 {offsets = [32, 0], sizes = [32, 128], strides = [1, 1]} : vector<256x128xf32> to vector<32x128xf32>
    %6 = arith.maximumf %4, %5 : vector<32x128xf32>
    %7 = vector.extract_strided_slice %3 {offsets = [64, 0], sizes = [32, 128], strides = [1, 1]} : vector<256x128xf32> to vector<32x128xf32>
    %8 = arith.maximumf %6, %7 : vector<32x128xf32>
    %9 = vector.extract_strided_slice %3 {offsets = [96, 0], sizes = [32, 128], strides = [1, 1]} : vector<256x128xf32> to vector<32x128xf32>
    %10 = arith.maximumf %8, %9 : vector<32x128xf32>
    %11 = vector.extract_strided_slice %3 {offsets = [128, 0], sizes = [32, 128], strides = [1, 1]} : vector<256x128xf32> to vector<32x128xf32>
    %12 = arith.maximumf %10, %11 : vector<32x128xf32>
    %13 = vector.extract_strided_slice %3 {offsets = [160, 0], sizes = [32, 128], strides = [1, 1]} : vector<256x128xf32> to vector<32x128xf32>
    %14 = arith.maximumf %12, %13 : vector<32x128xf32>
    %15 = vector.extract_strided_slice %3 {offsets = [192, 0], sizes = [32, 128], strides = [1, 1]} : vector<256x128xf32> to vector<32x128xf32>
    %16 = arith.maximumf %14, %15 : vector<32x128xf32>
    %17 = vector.extract_strided_slice %3 {offsets = [224, 0], sizes = [32, 128], strides = [1, 1]} : vector<256x128xf32> to vector<32x128xf32>
    %18 = arith.maximumf %16, %17 : vector<32x128xf32>
    %c0_4 = arith.constant 0 : index
    %c0_5 = arith.constant 0 : index
    %19 = vector.load %arg3[%c0_4, %c0_5] : memref<1x128xf32, #tpu.memory_space<vmem>>, vector<1x128xf32>
    %20 = vector.broadcast %19 : vector<1x128xf32> to vector<32x128xf32>
    %21 = arith.mulf %18, %20 : vector<32x128xf32>
    %c0_6 = arith.constant 0 : index
    %c0_7 = arith.constant 0 : index
    %22 = vector.load %arg4[%c0_6, %c0_7] : memref<1x128xf32, #tpu.memory_space<vmem>>, vector<1x128xf32>
    %23 = vector.broadcast %22 : vector<1x128xf32> to vector<32x128xf32>
    %24 = arith.addf %21, %23 : vector<32x128xf32>
    %cst_8 = arith.constant 0.000000e+00 : f32
    %25 = vector.broadcast %cst_8 : f32 to vector<32x128xf32>
    %26 = arith.maximumf %24, %25 : vector<32x128xf32>
    %27 = arith.truncf %26 : vector<32x128xf32> to vector<32x128xbf16>
    %c0_9 = arith.constant 0 : index
    %c0_10 = arith.constant 0 : index
    %28 = vector.load %arg5[%c0_9, %c0_10] : memref<32x128xbf16, #tpu.memory_space<vmem>>, vector<32x128xbf16>
    tpu.vector_store %arg5[%c0_9, %c0_10], %27 {strides = array<i32>} : memref<32x128xbf16, #tpu.memory_space<vmem>>, vector<32x128xbf16>,
    return
  }
  func.func @transform_0(%arg0: i32) -> (i32, i32, i32) {
    %c0_i32 = arith.constant 0 : i32
    %c0_i32_0 = arith.constant 0 : i32
    %c0_i32_1 = arith.constant 0 : i32
    return %arg0, %c0_i32, %c0_i32_0 : i32, i32, i32
  }
  func.func @transform_1(%arg0: i32) -> (i32, i32) {
    %c0_i32 = arith.constant 0 : i32
    %c0_i32_0 = arith.constant 0 : i32
    %c0_i32_1 = arith.constant 0 : i32
    return %c0_i32, %c0_i32_0 : i32, i32
  }
  func.func @transform_2(%arg0: i32) -> (i32, i32) {
    %c0_i32 = arith.constant 0 : i32
    %c0_i32_0 = arith.constant 0 : i32
    %c0_i32_1 = arith.constant 0 : i32
    return %c0_i32, %c0_i32_0 : i32, i32
  }
  func.func @transform_3(%arg0: i32) -> (i32, i32) {
    %c0_i32 = arith.constant 0 : i32
    %c0_i32_0 = arith.constant 0 : i32
    %c0_i32_1 = arith.constant 0 : i32
    return %c0_i32, %c0_i32_0 : i32, i32
  }
  func.func @transform_4(%arg0: i32) -> (i32, i32) {
    %c0_i32 = arith.constant 0 : i32
    %c0_i32_0 = arith.constant 0 : i32
    return %arg0, %c0_i32 : i32, i32
  }
}

module attributes {stable_mosaic.version = 11 : i64} {
  func.func @_conv_pool_bn_relu_kernel(%arg0: i32, %arg1: memref<1x128x864xbf16, #tpu.memory_space<vmem>>, %arg2: memref<864x128xbf16, #tpu.memory_space<vmem>>, %arg3: memref<1x128xf32, #tpu.memory_space<vmem>>, %arg4: memref<1x128xf32, #tpu.memory_space<vmem>>, %arg5: memref<16x128xbf16, #tpu.memory_space<vmem>>) attributes {dimension_semantics = [#tpu.dimension_semantics<parallel>], iteration_bounds = array<i64: 1>, scalar_prefetch = 0 : i64, scratch_operands = 0 : i64, tpu.core_type = #tpu.core_type<tc>, window_params = [{transform_indices = @transform_0, window_bounds = array<i64: 1, 128, 864>}, {pipeline_mode = #tpu.pipeline_mode<synchronous>, transform_indices = @transform_1, window_bounds = array<i64: 864, 128>}, {pipeline_mode = #tpu.pipeline_mode<synchronous>, transform_indices = @transform_2, window_bounds = array<i64: 1, 128>}, {pipeline_mode = #tpu.pipeline_mode<synchronous>, transform_indices = @transform_3, window_bounds = array<i64: 1, 128>}, {transform_indices = @transform_4, window_bounds = array<i64: 16, 128>}]} {
    %c0 = arith.constant 0 : index
    %c0_0 = arith.constant 0 : index
    %c0_1 = arith.constant 0 : index
    %0 = vector.load %arg1[%c0, %c0_0, %c0_1] : memref<1x128x864xbf16, #tpu.memory_space<vmem>>, vector<1x128x864xbf16>
    %1 = vector.shape_cast %0 : vector<1x128x864xbf16> to vector<128x864xbf16>
    %c0_2 = arith.constant 0 : index
    %c0_3 = arith.constant 0 : index
    %2 = vector.load %arg2[%c0_2, %c0_3] : memref<864x128xbf16, #tpu.memory_space<vmem>>, vector<864x128xbf16>
    %cst = arith.constant dense<0.000000e+00> : vector<128x128xf32>
    %3 = tpu.matmul %1, %2, %cst {dimension_numbers = #tpu.dot_dimension_numbers<[1], [0], [0], [1], [0, 0, 1, 1], [], []>} : vector<128x864xbf16>, vector<864x128xbf16>, vector<128x128xf32> -> vector<128x128xf32>
    %4 = vector.extract_strided_slice %3 {offsets = [0, 0], sizes = [16, 128], strides = [1, 1]} : vector<128x128xf32> to vector<16x128xf32>
    %5 = vector.extract_strided_slice %3 {offsets = [16, 0], sizes = [16, 128], strides = [1, 1]} : vector<128x128xf32> to vector<16x128xf32>
    %6 = arith.maximumf %4, %5 : vector<16x128xf32>
    %7 = vector.extract_strided_slice %3 {offsets = [32, 0], sizes = [16, 128], strides = [1, 1]} : vector<128x128xf32> to vector<16x128xf32>
    %8 = arith.maximumf %6, %7 : vector<16x128xf32>
    %9 = vector.extract_strided_slice %3 {offsets = [48, 0], sizes = [16, 128], strides = [1, 1]} : vector<128x128xf32> to vector<16x128xf32>
    %10 = arith.maximumf %8, %9 : vector<16x128xf32>
    %11 = vector.extract_strided_slice %3 {offsets = [64, 0], sizes = [16, 128], strides = [1, 1]} : vector<128x128xf32> to vector<16x128xf32>
    %12 = arith.maximumf %10, %11 : vector<16x128xf32>
    %13 = vector.extract_strided_slice %3 {offsets = [80, 0], sizes = [16, 128], strides = [1, 1]} : vector<128x128xf32> to vector<16x128xf32>
    %14 = arith.maximumf %12, %13 : vector<16x128xf32>
    %15 = vector.extract_strided_slice %3 {offsets = [96, 0], sizes = [16, 128], strides = [1, 1]} : vector<128x128xf32> to vector<16x128xf32>
    %16 = arith.maximumf %14, %15 : vector<16x128xf32>
    %17 = vector.extract_strided_slice %3 {offsets = [112, 0], sizes = [16, 128], strides = [1, 1]} : vector<128x128xf32> to vector<16x128xf32>
    %18 = arith.maximumf %16, %17 : vector<16x128xf32>
    %c0_4 = arith.constant 0 : index
    %c0_5 = arith.constant 0 : index
    %19 = vector.load %arg3[%c0_4, %c0_5] : memref<1x128xf32, #tpu.memory_space<vmem>>, vector<1x128xf32>
    %20 = vector.broadcast %19 : vector<1x128xf32> to vector<16x128xf32>
    %21 = arith.mulf %18, %20 : vector<16x128xf32>
    %c0_6 = arith.constant 0 : index
    %c0_7 = arith.constant 0 : index
    %22 = vector.load %arg4[%c0_6, %c0_7] : memref<1x128xf32, #tpu.memory_space<vmem>>, vector<1x128xf32>
    %23 = vector.broadcast %22 : vector<1x128xf32> to vector<16x128xf32>
    %24 = arith.addf %21, %23 : vector<16x128xf32>
    %cst_8 = arith.constant 0.000000e+00 : f32
    %25 = vector.broadcast %cst_8 : f32 to vector<16x128xf32>
    %26 = arith.maximumf %24, %25 : vector<16x128xf32>
    %27 = arith.truncf %26 : vector<16x128xf32> to vector<16x128xbf16>
    %c0_9 = arith.constant 0 : index
    %c0_10 = arith.constant 0 : index
    %28 = vector.load %arg5[%c0_9, %c0_10] : memref<16x128xbf16, #tpu.memory_space<vmem>>, vector<16x128xbf16>
    tpu.vector_store %arg5[%c0_9, %c0_10], %27 {strides = array<i32>} : memref<16x128xbf16, #tpu.memory_space<vmem>>, vector<16x128xbf16>,
    return
  }
  func.func @transform_0(%arg0: i32) -> (i32, i32, i32) {
    %c0_i32 = arith.constant 0 : i32
    %c0_i32_0 = arith.constant 0 : i32
    %c0_i32_1 = arith.constant 0 : i32
    return %arg0, %c0_i32, %c0_i32_0 : i32, i32, i32
  }
  func.func @transform_1(%arg0: i32) -> (i32, i32) {
    %c0_i32 = arith.constant 0 : i32
    %c0_i32_0 = arith.constant 0 : i32
    %c0_i32_1 = arith.constant 0 : i32
    return %c0_i32, %c0_i32_0 : i32, i32
  }
  func.func @transform_2(%arg0: i32) -> (i32, i32) {
    %c0_i32 = arith.constant 0 : i32
    %c0_i32_0 = arith.constant 0 : i32
    %c0_i32_1 = arith.constant 0 : i32
    return %c0_i32, %c0_i32_0 : i32, i32
  }
  func.func @transform_3(%arg0: i32) -> (i32, i32) {
    %c0_i32 = arith.constant 0 : i32
    %c0_i32_0 = arith.constant 0 : i32
    %c0_i32_1 = arith.constant 0 : i32
    return %c0_i32, %c0_i32_0 : i32, i32
  }
  func.func @transform_4(%arg0: i32) -> (i32, i32) {
    %c0_i32 = arith.constant 0 : i32
    %c0_i32_0 = arith.constant 0 : i32
    return %arg0, %c0_i32 : i32, i32
  }
}

module attributes {stable_mosaic.version = 11 : i64} {
  func.func @_dense_head_kernel(%arg0: i32, %arg1: memref<16x256xbf16, #tpu.memory_space<vmem>>, %arg2: memref<256x256xbf16, #tpu.memory_space<vmem>>, %arg3: memref<1x256xf32, #tpu.memory_space<vmem>>, %arg4: memref<1x256xf32, #tpu.memory_space<vmem>>, %arg5: memref<256x128xbf16, #tpu.memory_space<vmem>>, %arg6: memref<1x128xf32, #tpu.memory_space<vmem>>, %arg7: memref<16x128xf32, #tpu.memory_space<vmem>>) attributes {dimension_semantics = [#tpu.dimension_semantics<parallel>], iteration_bounds = array<i64: 1>, scalar_prefetch = 0 : i64, scratch_operands = 0 : i64, tpu.core_type = #tpu.core_type<tc>, window_params = [{transform_indices = @transform_0, window_bounds = array<i64: 16, 256>}, {pipeline_mode = #tpu.pipeline_mode<synchronous>, transform_indices = @transform_1, window_bounds = array<i64: 256, 256>}, {pipeline_mode = #tpu.pipeline_mode<synchronous>, transform_indices = @transform_2, window_bounds = array<i64: 1, 256>}, {pipeline_mode = #tpu.pipeline_mode<synchronous>, transform_indices = @transform_3, window_bounds = array<i64: 1, 256>}, {pipeline_mode = #tpu.pipeline_mode<synchronous>, transform_indices = @transform_4, window_bounds = array<i64: 256, 128>}, {pipeline_mode = #tpu.pipeline_mode<synchronous>, transform_indices = @transform_5, window_bounds = array<i64: 1, 128>}, {transform_indices = @transform_6, window_bounds = array<i64: 16, 128>}]} {
    %c0 = arith.constant 0 : index
    %c0_0 = arith.constant 0 : index
    %0 = vector.load %arg1[%c0, %c0_0] : memref<16x256xbf16, #tpu.memory_space<vmem>>, vector<16x256xbf16>
    %c0_1 = arith.constant 0 : index
    %c0_2 = arith.constant 0 : index
    %1 = vector.load %arg2[%c0_1, %c0_2] : memref<256x256xbf16, #tpu.memory_space<vmem>>, vector<256x256xbf16>
    %cst = arith.constant dense<0.000000e+00> : vector<16x256xf32>
    %2 = tpu.matmul %0, %1, %cst {dimension_numbers = #tpu.dot_dimension_numbers<[1], [0], [0], [1], [0, 0, 1, 1], [], []>} : vector<16x256xbf16>, vector<256x256xbf16>, vector<16x256xf32> -> vector<16x256xf32>
    %c0_3 = arith.constant 0 : index
    %c0_4 = arith.constant 0 : index
    %3 = vector.load %arg3[%c0_3, %c0_4] : memref<1x256xf32, #tpu.memory_space<vmem>>, vector<1x256xf32>
    %4 = vector.broadcast %3 : vector<1x256xf32> to vector<16x256xf32>
    %5 = arith.mulf %2, %4 : vector<16x256xf32>
    %c0_5 = arith.constant 0 : index
    %c0_6 = arith.constant 0 : index
    %6 = vector.load %arg4[%c0_5, %c0_6] : memref<1x256xf32, #tpu.memory_space<vmem>>, vector<1x256xf32>
    %7 = vector.broadcast %6 : vector<1x256xf32> to vector<16x256xf32>
    %8 = arith.addf %5, %7 : vector<16x256xf32>
    %cst_7 = arith.constant 0.000000e+00 : f32
    %9 = vector.broadcast %cst_7 : f32 to vector<16x256xf32>
    %10 = arith.maximumf %8, %9 : vector<16x256xf32>
    %11 = arith.truncf %10 : vector<16x256xf32> to vector<16x256xbf16>
    %c0_8 = arith.constant 0 : index
    %c0_9 = arith.constant 0 : index
    %12 = vector.load %arg5[%c0_8, %c0_9] : memref<256x128xbf16, #tpu.memory_space<vmem>>, vector<256x128xbf16>
    %cst_10 = arith.constant dense<0.000000e+00> : vector<16x128xf32>
    %13 = tpu.matmul %11, %12, %cst_10 {dimension_numbers = #tpu.dot_dimension_numbers<[1], [0], [0], [1], [0, 0, 1, 1], [], []>} : vector<16x256xbf16>, vector<256x128xbf16>, vector<16x128xf32> -> vector<16x128xf32>
    %c0_11 = arith.constant 0 : index
    %c0_12 = arith.constant 0 : index
    %14 = vector.load %arg6[%c0_11, %c0_12] : memref<1x128xf32, #tpu.memory_space<vmem>>, vector<1x128xf32>
    %15 = vector.broadcast %14 : vector<1x128xf32> to vector<16x128xf32>
    %16 = arith.addf %13, %15 : vector<16x128xf32>
    %c0_13 = arith.constant 0 : index
    %c0_14 = arith.constant 0 : index
    %17 = vector.load %arg7[%c0_13, %c0_14] : memref<16x128xf32, #tpu.memory_space<vmem>>, vector<16x128xf32>
    tpu.vector_store %arg7[%c0_13, %c0_14], %16 {strides = array<i32>} : memref<16x128xf32, #tpu.memory_space<vmem>>, vector<16x128xf32>,
    return
  }
  func.func @transform_0(%arg0: i32) -> (i32, i32) {
    %c0_i32 = arith.constant 0 : i32
    %c0_i32_0 = arith.constant 0 : i32
    return %arg0, %c0_i32 : i32, i32
  }
  func.func @transform_1(%arg0: i32) -> (i32, i32) {
    %c0_i32 = arith.constant 0 : i32
    %c0_i32_0 = arith.constant 0 : i32
    %c0_i32_1 = arith.constant 0 : i32
    return %c0_i32, %c0_i32_0 : i32, i32
  }
  func.func @transform_2(%arg0: i32) -> (i32, i32) {
    %c0_i32 = arith.constant 0 : i32
    %c0_i32_0 = arith.constant 0 : i32
    %c0_i32_1 = arith.constant 0 : i32
    return %c0_i32, %c0_i32_0 : i32, i32
  }
  func.func @transform_3(%arg0: i32) -> (i32, i32) {
    %c0_i32 = arith.constant 0 : i32
    %c0_i32_0 = arith.constant 0 : i32
    %c0_i32_1 = arith.constant 0 : i32
    return %c0_i32, %c0_i32_0 : i32, i32
  }
  func.func @transform_4(%arg0: i32) -> (i32, i32) {
    %c0_i32 = arith.constant 0 : i32
    %c0_i32_0 = arith.constant 0 : i32
    %c0_i32_1 = arith.constant 0 : i32
    return %c0_i32, %c0_i32_0 : i32, i32
  }
  func.func @transform_5(%arg0: i32) -> (i32, i32) {
    %c0_i32 = arith.constant 0 : i32
    %c0_i32_0 = arith.constant 0 : i32
    %c0_i32_1 = arith.constant 0 : i32
    return %c0_i32, %c0_i32_0 : i32, i32
  }
  func.func @transform_6(%arg0: i32) -> (i32, i32) {
    %c0_i32 = arith.constant 0 : i32
    %c0_i32_0 = arith.constant 0 : i32
    return %arg0, %c0_i32 : i32, i32
  }
}

</mosaic_0001>

<bundles_post_ra>
// kernel: cavity_forward.5
= control target key start
LH: loop header
LB: loop body
LE: loop exit
PB: predicated region body
PF: predicated region fallthrough
CT: control target
= control target key end

     0   :  { %8 = vsyncpa [#allocation3], 0  ;;  %s2880_s12 = smov [#allocation2]   ;;  %s5449_s0 = inlined_call_operand.hbm [shape: f32[3,1024], index: 0, kind: input, shape index: {}]   ;;  %s5450_s1 = inlined_call_operand.vmem [shape: f32[128,3], index: 1, kind: input, shape index: {}]   ;;  %s5451_s2 = inlined_call_operand.vmem [shape: bf16[16,128], index: 2, kind: input, shape index: {}]   ;;  %s5452_s3 = inlined_call_operand.vmem [shape: f32[16,1024], index: 3, kind: output, shape index: {}]  }
   0x1   :  { %s15_s13 = sshll.u32 %s2880_s12, 4  ;;  %s2856_s16 = scalar_lea.hbm %s5449_s0, 512  ;;  %s16_s13 = int_to_ptr.vmem [resolvable:$true] %s15_s13 }
   0x2   :  { %p2857_p0 = scmp.ne.s32.totalorder %s5449_s0, %s2856_s16  ;;  %p2860_p1 = scmp.lt.u32.totalorder %s2856_s16, %s5449_s0 }
   0x4   :  { %p2862_p2 = pnand %p2860_p1, %p2857_p0 }
   0x6   :  { %2865 = shalt.err (!%p2862_p2)
}
   0x7   :  { %s2866_s21 = scalar_lea.vmem %s16_s13, 512  ;;  %p2871_p4 = scmp.lt.s32.totalorder %s16_s13, %s16_s13 }
   0x8   :  { %p2867_p3 = scmp.ne.s32.totalorder %s16_s13, %s2866_s21  ;;  %p2872_p5 = scmp.lt.s32.totalorder %s2866_s21, %s2866_s21 }
   0xa   :  { %p2873_p6 = por %p2872_p5, %p2871_p4 }
   0xc   :  { %p2874_p7 = pnand %p2873_p6, %p2867_p3 }
   0xe   :  { %2877 = shalt.err (!%p2874_p7)
}
   0xf   :  { %18 = dma.hbm_to_vmem [thread:$0]  %s5449_s0, 512, %s16_s13, [#allocation3]  }
  0x10   :  { %2878 = dma.done.wait [#allocation3], 512  }
  0x11   :  { %2879 = vsyncadd [#allocation3], 4294966784  ;;  %v2881_v0 = vmov 1   ;;  %v5453_v1 = vmov 0   ;;  %v52_v2 = vld [vmem:[%s5450_s1] sm:$0xff]  ;;  %v53_v3 = vld [vmem:[%s5450_s1 + $0x8] sm:$0xff]  ;;  %v149_v19 = vlaneseq }
  0x12   :  { %2543 = vset.pattern.permute.xlu1 %v2881_v0  ;;  %2542 = vset.pattern.permute.xlu0 %v5453_v1  ;;  %v55_v4 = vld [vmem:[%s5450_s1 + $0x18] sm:$0xff]  ;;  %v2883_v5 = vmov 2   ;;  %v57_v6 = vld [vmem:[%s5450_s1 + $0x28] sm:$0xff]  ;;  %v54_v7 = vld [vmem:[%s5450_s1 + $0x10] sm:$0xff] }
  0x13   :  { %2359 = vmatprep.mubr.bf16.mxu0 %v5453_v1  ;;  %2402 = vmatprep.mubr.bf16.mxu1 %v5453_v1  ;;  %v59_v8 = vld [vmem:[%s5450_s1 + $0x38] sm:$0xff]  ;;  %v61_v9 = vld [vmem:[%s5450_s1 + $0x48] sm:$0xff]  ;;  %v56_v13 = vld [vmem:[%s5450_s1 + $0x20] sm:$0xff]  ;;  %v150_v20 = vshrl.u32 %v149_v19, 7 }
  0x14   :  { %446 = vperm.xlu1 %2543, %v52_v2   ;;  %70 = vperm.xlu0 %2542, %v52_v2   ;;  %v63_v10 = vld [vmem:[%s5450_s1 + $0x58] sm:$0xff]  ;;  %v2950_v11 = vld [vmem:[%s5450_s1 + $0x68] sm:$0xff]  ;;  %v58_v14 = vld [vmem:[%s5450_s1 + $0x30] sm:$0xff] }
  0x15   :  { %v2957_v12 = vld [vmem:[%s5450_s1 + $0x78] sm:$0xff]  ;;  %v60_v15 = vld [vmem:[%s5450_s1 + $0x40] sm:$0xff]  ;;  %v62_v16 = vld [vmem:[%s5450_s1 + $0x50] sm:$0xff]  ;;  %v151_v21 = vsub.s32 0, %v150_v20  ;;  %v155_v22 = vsub.s32 1, %v150_v20  ;;  %v159_v23 = vsub.s32 2, %v150_v20 }
  0x16   :  { %v64_v17 = vld [vmem:[%s5450_s1 + $0x60] sm:$0xff]  ;;  %v2984_v18 = vld [vmem:[%s5450_s1 + $0x70] sm:$0xff]  ;;  %v163_v24 = vsub.s32 3, %v150_v20  ;;  %v167_v25 = vsub.s32 4, %v150_v20  ;;  %v171_v26 = vsub.s32 5, %v150_v20  ;;  %v175_v27 = vsub.s32 6, %v150_v20 }
  0x17   :  { %v49_v28 = vld [vmem:[#allocation2 + $0x1] ss:$4 sm:$0xff]  ;;  %v47_v29 = vld [vmem:[#allocation2] ss:$4 sm:$0xff]  ;;  %v51_v34 = vld [vmem:[#allocation2 + $0x2] ss:$4 sm:$0xff] }
  0x18   :  { %450 = vperm.xlu1 %2543, %v53_v3   ;;  %75 = vperm.xlu0 %2542, %v53_v3   ;;  %v2998_v30 = vrot.slane %v49_v28, %v151_v21  ;;  %v3000_v31 = vrot.slane %v49_v28, %v155_v22  ;;  %v3002_v32 = vrot.slane %v49_v28, %v159_v23  ;;  %v179_v38 = vsub.s32 7, %v150_v20 }
  0x19   :  { %v3004_v33 = vrot.slane %v49_v28, %v163_v24  ;;  %v3007_v35 = vrot.slane %v49_v28, %v167_v25  ;;  %v3009_v36 = vrot.slane %v49_v28, %v171_v26  ;;  %v3011_v37 = vrot.slane %v49_v28, %v175_v27 }
  0x1a   :  { %v3013_v39 = vrot.slane %v47_v29, %v151_v21  ;;  %v3015_v40 = vrot.slane %v47_v29, %v155_v22  ;;  %v3017_v41 = vrot.slane %v47_v29, %v159_v23  ;;  %v3019_v42 = vrot.slane %v47_v29, %v163_v24 }
  0x1b   :  { %v3021_v43 = vrot.slane %v47_v29, %v167_v25  ;;  %v3023_v44 = vrot.slane %v47_v29, %v171_v26  ;;  %v3025_v45 = vrot.slane %v47_v29, %v175_v27  ;;  %v3027_v46 = vrot.slane %v51_v34, %v151_v21 }
  0x1c   :  { %2544 = vset.pattern.permute.xlu1 %v2883_v5  ;;  %85 = vperm.xlu0 %2542, %v55_v4   ;;  %v3029_v47 = vrot.slane %v51_v34, %v155_v22  ;;  %v3031_v48 = vrot.slane %v51_v34, %v159_v23  ;;  %v3033_v49 = vrot.slane %v51_v34, %v163_v24 }
  0x1d   :  { %939 = vperm.xlu1 %2544, %v53_v3   ;;  %5637 = vst [vmem:[#allocation5_spill] sm:$0xff] %v3025_v45  ;;  %v3035_v50 = vrot.slane %v51_v34, %v167_v25  ;;  %v3042_v53 = vrot.slane %v51_v34, %v171_v26  ;;  %v3044_v54 = vrot.slane %v47_v29, %v179_v38 }
  0x1e   :  { %v3046_v55 = vrot.slane %v49_v28, %v179_v38  ;;  %v3048_v56 = vrot.slane %v51_v34, %v175_v27 }
  0x20   :  { %95 = vperm.xlu0 %2542, %v57_v6   ;;  %5640 = vst [vmem:[#allocation8_spill] sm:$0xff] %v3048_v56 }
  0x21   :  { %2545 = vset.pattern.permute.xlu1 %v5453_v1 }
  0x22   :  { %80 = vperm.xlu1 %2545, %v54_v7  }
  0x24   :  { %105 = vperm.xlu0 %2542, %v59_v8  }
  0x26   :  { %2546 = vset.pattern.permute.xlu1 %v2881_v0 }
  0x27   :  { %454 = vperm.xlu1 %2546, %v54_v7  }
  0x28   :  { %115 = vperm.xlu0 %2542, %v61_v9  }
  0x2b   :  { %458 = vperm.xlu1 %2546, %v55_v4  }
  0x2c   :  { %125 = vperm.xlu0 %2542, %v63_v10  }
  0x2f   :  { %2547 = vset.pattern.permute.xlu1 %v2883_v5 }
  0x30   :  { %947 = vperm.xlu1 %2547, %v55_v4   ;;  %135 = vperm.xlu0 %2542, %v2950_v11  }
  0x34   :  { %2548 = vset.pattern.permute.xlu1 %v5453_v1  ;;  %145 = vperm.xlu0 %2542, %v2957_v12  }
  0x35   :  { %90 = vperm.xlu1 %2548, %v56_v13  }
  0x38   :  { %2564 = vset.pattern.permute.xlu0 %v2883_v5 }
  0x39   :  { %2549 = vset.pattern.permute.xlu1 %v2881_v0  ;;  %935 = vperm.xlu0 %2564, %v52_v2  }
  0x3a   :  { %462 = vperm.xlu1 %2549, %v56_v13  }
  0x3d   :  { %943 = vperm.xlu0 %2564, %v54_v7   ;;  %v3067_v7 = vrot.slane %v51_v34, %v179_v38 }
  0x3e   :  { %466 = vperm.xlu1 %2549, %v57_v6  }
  0x3f   :  { %5641 = vst [vmem:[#allocation9_spill] sm:$0xff] %v3067_v7 }
  0x41   :  { %951 = vperm.xlu0 %2564, %v56_v13  }
  0x42   :  { %2550 = vset.pattern.permute.xlu1 %v2883_v5 }
  0x43   :  { %955 = vperm.xlu1 %2550, %v57_v6  }
  0x45   :  { %959 = vperm.xlu0 %2564, %v58_v14  }
  0x47   :  { %2551 = vset.pattern.permute.xlu1 %v5453_v1 }
  0x48   :  { %100 = vperm.xlu1 %2551, %v58_v14  }
  0x49   :  { %967 = vperm.xlu0 %2564, %v60_v15  }
  0x4c   :  { %2552 = vset.pattern.permute.xlu1 %v2881_v0 }
  0x4d   :  { %470 = vperm.xlu1 %2552, %v58_v14   ;;  %975 = vperm.xlu0 %2564, %v62_v16  }
  0x51   :  { %474 = vperm.xlu1 %2552, %v59_v8   ;;  %983 = vperm.xlu0 %2564, %v64_v17  }
  0x55   :  { %2553 = vset.pattern.permute.xlu1 %v2883_v5  ;;  %991 = vperm.xlu0 %2564, %v2984_v18  }
  0x56   :  { %963 = vperm.xlu1 %2553, %v59_v8  }
  0x5a   :  { %2554 = vset.pattern.permute.xlu1 %v5453_v1 }
  0x5b   :  { %110 = vperm.xlu1 %2554, %v60_v15  }
  0x5f   :  { %2555 = vset.pattern.permute.xlu1 %v2881_v0 }
  0x60   :  { %478 = vperm.xlu1 %2555, %v60_v15  }
  0x64   :  { %482 = vperm.xlu1 %2555, %v61_v9  }
  0x68   :  { %2556 = vset.pattern.permute.xlu1 %v2883_v5 }
  0x69   :  { %971 = vperm.xlu1 %2556, %v61_v9  }
  0x6d   :  { %2557 = vset.pattern.permute.xlu1 %v5453_v1 }
  0x6e   :  { %120 = vperm.xlu1 %2557, %v62_v16  }
  0x72   :  { %2558 = vset.pattern.permute.xlu1 %v2881_v0 }
  0x73   :  { %486 = vperm.xlu1 %2558, %v62_v16  }
  0x77   :  { %490 = vperm.xlu1 %2558, %v63_v10  }
  0x7b   :  { %2559 = vset.pattern.permute.xlu1 %v2883_v5 }
  0x7c   :  { %979 = vperm.xlu1 %2559, %v63_v10  }
  0x80   :  { %2560 = vset.pattern.permute.xlu1 %v5453_v1 }
  0x81   :  { %130 = vperm.xlu1 %2560, %v64_v17  }
  0x85   :  { %2561 = vset.pattern.permute.xlu1 %v2881_v0 }
  0x86   :  { %494 = vperm.xlu1 %2561, %v64_v17  }
  0x8a   :  { %498 = vperm.xlu1 %2561, %v2950_v11  }
  0x8e   :  { %2562 = vset.pattern.permute.xlu1 %v2883_v5 }
  0x8f   :  { %987 = vperm.xlu1 %2562, %v2950_v11  }
  0x93   :  { %2563 = vset.pattern.permute.xlu1 %v5453_v1  ;;  %v3038_v51 = vpop.permute.xlu1 %446  ;;  %v3040_v52 = vpop.permute.xlu0 %70 }
  0x94   :  { %5638 = vst [vmem:[#allocation6_spill] sm:$0xff] %v3038_v51  ;;  %5639 = vst [vmem:[#allocation7_spill] sm:$0xff] %v3040_v52  ;;  %v550_v57 = vsub.f32 %v3038_v51, %v2998_v30  ;;  %v551_v58 = vsub.f32 %v3038_v51, %v3000_v31  ;;  %v552_v59 = vsub.f32 %v3038_v51, %v3002_v32  ;;  %140 = vperm.xlu1 %2563, %v2984_v18  }
  0x95   :  { %v553_v60 = vsub.f32 %v3038_v51, %v3004_v33  ;;  %v554_v61 = vsub.f32 %v3038_v51, %v3007_v35  ;;  %v555_v62 = vsub.f32 %v3038_v51, %v3009_v36  ;;  %v556_v63 = vsub.f32 %v3038_v51, %v3011_v37 }
  0x96   :  { %v189_v2 = vsub.f32 %v3040_v52, %v3013_v39  ;;  %v678_v3 = vmul.f32 %v550_v57, %v550_v57  ;;  %v679_v4 = vmul.f32 %v551_v58, %v551_v58  ;;  %v680_v6 = vmul.f32 %v552_v59, %v552_v59 }
  0x97   :  { %v681_v8 = vmul.f32 %v553_v60, %v553_v60  ;;  %v682_v9 = vmul.f32 %v554_v61, %v554_v61  ;;  %v3069_v10 = vmul.f32 %v555_v62, %v555_v62  ;;  %v190_v11 = vsub.f32 %v3040_v52, %v3015_v40  ;;  %v3073_v13 = vpop.permute.xlu1 %450  ;;  %v3099_v34 = vpop.permute.xlu0 %75 }
  0x98   :  { %v191_v14 = vsub.f32 %v3040_v52, %v3017_v41  ;;  %v192_v15 = vsub.f32 %v3040_v52, %v3019_v42  ;;  %v193_v16 = vsub.f32 %v3040_v52, %v3021_v43  ;;  %v194_v17 = vsub.f32 %v3040_v52, %v3023_v44  ;;  %2565 = vset.pattern.permute.xlu1 %v2881_v0 }
  0x99   :  { %5642 = vst [vmem:[#allocation10_spill] sm:$0xff] %v3069_v10  ;;  %v3084_v19 = vmul.f32 %v556_v63, %v556_v63  ;;  %v195_v20 = vsub.f32 %v3040_v52, %v3025_v45  ;;  %v317_v21 = vmul.f32 %v189_v2, %v189_v2  ;;  %v318_v22 = vmul.f32 %v190_v11, %v190_v11 }
  0x9a   :  { %502 = vperm.xlu1 %2565, %v2984_v18   ;;  %v319_v23 = vmul.f32 %v191_v14, %v191_v14  ;;  %v320_v24 = vmul.f32 %v192_v15, %v192_v15  ;;  %v321_v25 = vmul.f32 %v193_v16, %v193_v16  ;;  %v558_v26 = vsub.f32 %v3073_v13, %v2998_v30 }
  0x9b   :  { %5643 = vst [vmem:[#allocation11_spill] sm:$0xff] %v3084_v19  ;;  %v3091_v27 = vmul.f32 %v194_v17, %v194_v17  ;;  %v3093_v28 = vmul.f32 %v195_v20, %v195_v20  ;;  %v3095_v0 = vadd.f32 %v678_v3, %v317_v21  ;;  %v559_v29 = vsub.f32 %v3073_v13, %v3000_v31 }
  0x9c   :  { %v3101_v38 = vadd.f32 %v679_v4, %v318_v22  ;;  %v3103_v18 = vadd.f32 %v680_v6, %v319_v23  ;;  %v3105_v57 = vadd.f32 %v681_v8, %v320_v24  ;;  %v560_v58 = vsub.f32 %v3073_v13, %v3002_v32  ;;  %v3122_v6 = vpop.permute.xlu1 %939 }
  0x9d   :  { %5644 = vst [vmem:[#allocation12_spill] sm:$0xff] %v3091_v27  ;;  %5645 = vst [vmem:[#allocation13_spill] sm:$0xff] %v3093_v28  ;;  %v3109_v59 = vadd.f32 %v682_v9, %v321_v25  ;;  %v561_v60 = vsub.f32 %v3073_v13, %v3004_v33  ;;  %v562_v61 = vsub.f32 %v3073_v13, %v3007_v35 }
  0x9e   :  { %v563_v62 = vsub.f32 %v3073_v13, %v3009_v36  ;;  %506 = vperm.xlu1 %2565, %v2957_v12   ;;  %v564_v63 = vsub.f32 %v3073_v13, %v3011_v37  ;;  %v686_v2 = vmul.f32 %v558_v26, %v558_v26  ;;  %v687_v3 = vmul.f32 %v559_v29, %v559_v29 }
  0x9f   :  { %5646 = vst [vmem:[#allocation14_spill] sm:$0xff] %v3109_v59  ;;  %v197_v4 = vsub.f32 %v3099_v34, %v3013_v39  ;;  %5647 = vst [vmem:[#allocation15_spill] sm:$0xff] %v3122_v6  ;;  %v688_v8 = vmul.f32 %v560_v58, %v560_v58  ;;  %v689_v9 = vmul.f32 %v561_v60, %v561_v60 }
  0xa0   :  { %v690_v11 = vmul.f32 %v562_v61, %v562_v61  ;;  %v3124_v14 = vmul.f32 %v563_v62, %v563_v62  ;;  %v198_v15 = vsub.f32 %v3099_v34, %v3015_v40  ;;  %v199_v16 = vsub.f32 %v3099_v34, %v3017_v41 }
  0xa1   :  { %v200_v17 = vsub.f32 %v3099_v34, %v3019_v42  ;;  %v201_v20 = vsub.f32 %v3099_v34, %v3021_v43  ;;  %v202_v21 = vsub.f32 %v3099_v34, %v3023_v44  ;;  %v203_v22 = vsub.f32 %v3099_v34, %v3025_v45 }
  0xa2   :  { %5648 = vst [vmem:[#allocation16_spill] sm:$0xff] %v3124_v14  ;;  %v325_v23 = vmul.f32 %v197_v4, %v197_v4  ;;  %v1047_v24 = vsub.f32 %v3122_v6, %v3027_v46  ;;  %2566 = vset.pattern.permute.xlu1 %v2883_v5  ;;  %v326_v25 = vmul.f32 %v198_v15, %v198_v15 }
  0xa3   :  { %v327_v26 = vmul.f32 %v199_v16, %v199_v16  ;;  %v328_v29 = vmul.f32 %v200_v17, %v200_v17  ;;  %v329_v58 = vmul.f32 %v201_v20, %v201_v20  ;;  %995 = vperm.xlu1 %2566, %v2957_v12   ;;  %v3142_v60 = vmul.f32 %v564_v63, %v564_v63  ;;  %v3158_v16 = vpop.permute.xlu0 %85 }
  0xa4   :  { %v3144_v61 = vmul.f32 %v202_v21, %v202_v21  ;;  %v3146_v62 = vmul.f32 %v203_v22, %v203_v22  ;;  %v1048_v4 = vsub.f32 %v3122_v6, %v3029_v47  ;;  %v814_v1 = vadd.f32 %v686_v2, %v325_v23  ;;  %5652 = vst [vmem:[#allocation20_spill] sm:$0xff] %v3158_v16 }
  0xa5   :  { %5649 = vst [vmem:[#allocation17_spill] sm:$0xff] %v3142_v60  ;;  %v815_v59 = vadd.f32 %v687_v3, %v326_v25  ;;  %v816_v19 = vadd.f32 %v688_v8, %v327_v26  ;;  %v817_v28 = vadd.f32 %v689_v9, %v328_v29  ;;  %v1049_v5 = vsub.f32 %v3122_v6, %v3031_v48 }
  0xa6   :  { %5650 = vst [vmem:[#allocation18_spill] sm:$0xff] %v3144_v61  ;;  %5651 = vst [vmem:[#allocation19_spill] sm:$0xff] %v3146_v62  ;;  %v1050_v15 = vsub.f32 %v3122_v6, %v3033_v49  ;;  %v1051_v12 = vsub.f32 %v3122_v6, %v3035_v50  ;;  %v1052_v63 = vsub.f32 %v3122_v6, %v3042_v53 }
  0xa7   :  { %v3160_v17 = vadd.f32 %v690_v11, %v329_v58  ;;  %v1175_v2 = vmul.f32 %v1047_v24, %v1047_v24  ;;  %v1176_v3 = vmul.f32 %v1048_v4, %v1048_v4  ;;  %v213_v8 = vsub.f32 %v3158_v16, %v3013_v39 }
  0xa8   :  { %v1177_v9 = vmul.f32 %v1049_v5, %v1049_v5  ;;  %v1178_v20 = vmul.f32 %v1050_v15, %v1050_v15  ;;  %v3164_v21 = vmul.f32 %v1051_v12, %v1051_v12  ;;  %v214_v22 = vsub.f32 %v3158_v16, %v3015_v40 }
  0xa9   :  { %5653 = vst [vmem:[#allocation21_spill] sm:$0xff] %v3160_v17  ;;  %v1303_v23 = vadd.f32 %v1175_v2, %v814_v1  ;;  %v1304_v25 = vadd.f32 %v1176_v3, %v815_v59  ;;  %v215_v26 = vsub.f32 %v3158_v16, %v3017_v41  ;;  %v216_v11 = vsub.f32 %v3158_v16, %v3019_v42 }
  0xaa   :  { %5654 = vst [vmem:[#allocation22_spill] sm:$0xff] %v3164_v21  ;;  %v3172_v24 = vmul.f32 %v1052_v63, %v1052_v63  ;;  %v1305_v29 = vadd.f32 %v1177_v9, %v816_v19  ;;  %v217_v58 = vsub.f32 %v3158_v16, %v3021_v43  ;;  %v218_v4 = vsub.f32 %v3158_v16, %v3023_v44 }
  0xab   :  { %v3178_v5 = vadd.f32 %v1178_v20, %v817_v28  ;;  %v1431_v15 = vsub.f32 0.0, %v1303_v23  ;;  %v1432_v1 = vsub.f32 0.0, %v1304_v25  ;;  %v219_v59 = vsub.f32 %v3158_v16, %v3025_v45  ;;  %v3192_v28 = vpop.permute.xlu0 %95 }
  0xac   :  { %5655 = vst [vmem:[#allocation23_spill] sm:$0xff] %v3172_v24  ;;  %v1433_v12 = vsub.f32 0.0, %v1305_v29  ;;  %v3182_v2 = vmul.f32 %v213_v8, %v213_v8  ;;  %v3184_v3 = vmul.f32 %v214_v22, %v214_v22  ;;  %v3186_v63 = vmul.f32 %v215_v26, %v215_v26  ;;  %5657 = vst [vmem:[#allocation25_spill] sm:$0xff] %v3192_v28 }
  0xad   :  { %5656 = vst [vmem:[#allocation24_spill] sm:$0xff] %v3178_v5  ;;  %v1559_v19 = vmul.f32 1.3888888, %v1431_v15  ;;  %v1560_v9 = vmul.f32 1.3888888, %v1432_v1  ;;  %v3188_v10 = vmul.f32 %v216_v11, %v216_v11  ;;  %v3190_v27 = vmul.f32 %v217_v58, %v217_v58  ;;  %v3206_v58 = vpop.permute.xlu1 %80 }
  0xae   :  { %v3194_v20 = vmul.f32 1.3888888, %v1433_v12  ;;  %v3196_v23 = vmul.f32 %v218_v4, %v218_v4  ;;  %v229_v8 = vsub.f32 %v3192_v28, %v3013_v39  ;;  %v230_v22 = vsub.f32 %v3192_v28, %v3015_v40  ;;  %5660 = vst [vmem:[#allocation28_spill] sm:$0xff] %v3206_v58 }
  0xaf   :  { %v1695_v25 = vmul.f32 1.442695, %v1559_v19  ;;  %v1697_v26 = vmul.f32 1.442695, %v1560_v9  ;;  %v231_v11 = vsub.f32 %v3192_v28, %v3017_v41  ;;  %v232_v29 = vsub.f32 %v3192_v28, %v3019_v42 }
  0xb0   :  { %5658 = vst [vmem:[#allocation26_spill] sm:$0xff] %v3194_v20  ;;  %5659 = vst [vmem:[#allocation27_spill] sm:$0xff] %v3196_v23  ;;  %v3208_v15 = vmul.f32 %v219_v59, %v219_v59  ;;  %v233_v4 = vsub.f32 %v3192_v28, %v3021_v43  ;;  %v234_v1 = vsub.f32 %v3192_v28, %v3023_v44 }
  0xb1   :  { %v235_v12 = vsub.f32 %v3192_v28, %v3025_v45  ;;  %2568 = vpow2.f32 %v1695_v25  ;;  %v3216_v19 = vmul.f32 %v229_v8, %v229_v8  ;;  %v3218_v9 = vmul.f32 %v230_v22, %v230_v22  ;;  %v3236_v25 = vpop.permute.xlu0 %105  ;;  %v3248_v5 = vpop.permute.xlu1 %454 }
  0xb2   :  { %5661 = vst [vmem:[#allocation29_spill] sm:$0xff] %v3208_v15  ;;  %v3220_v23 = vmul.f32 %v231_v11, %v231_v11  ;;  %2570 = vpow2.f32 %v1697_v26  ;;  %v3222_v16 = vmul.f32 %v232_v29, %v232_v29  ;;  %v3224_v59 = vmul.f32 %v233_v4, %v233_v4  ;;  %5663 = vst [vmem:[#allocation31_spill] sm:$0xff] %v3236_v25 }
  0xb3   :  { %v3226_v15 = vmul.f32 %v234_v1, %v234_v1  ;;  %v205_v51 = vsub.f32 %v3206_v58, %v3013_v39  ;;  %v206_v28 = vsub.f32 %v3206_v58, %v3015_v40  ;;  %v207_v8 = vsub.f32 %v3206_v58, %v3017_v41  ;;  %5665 = vst [vmem:[#allocation33_spill] sm:$0xff] %v3248_v5 }
  0xb4   :  { %v208_v22 = vsub.f32 %v3206_v58, %v3019_v42  ;;  %v209_v26 = vsub.f32 %v3206_v58, %v3021_v43  ;;  %v210_v11 = vsub.f32 %v3206_v58, %v3023_v44  ;;  %v211_v29 = vsub.f32 %v3206_v58, %v3025_v45 }
  0xb5   :  { %5662 = vst [vmem:[#allocation30_spill] sm:$0xff] %v3226_v15  ;;  %v245_v4 = vsub.f32 %v3236_v25, %v3013_v39  ;;  %v3246_v1 = vmul.f32 %v235_v12, %v235_v12  ;;  %v333_v15 = vmul.f32 %v205_v51, %v205_v51  ;;  %v334_v52 = vmul.f32 %v206_v28, %v206_v28 }
  0xb6   :  { %v335_v20 = vmul.f32 %v207_v8, %v207_v8  ;;  %v336_v24 = vmul.f32 %v208_v22, %v208_v22  ;;  %v337_v21 = vmul.f32 %v209_v26, %v209_v26  ;;  %v3250_v17 = vmul.f32 %v210_v11, %v210_v11 }
  0xb7   :  { %5664 = vst [vmem:[#allocation32_spill] sm:$0xff] %v3246_v1  ;;  %v246_v7 = vsub.f32 %v3236_v25, %v3015_v40  ;;  %v247_v58 = vsub.f32 %v3236_v25, %v3017_v41  ;;  %v248_v6 = vsub.f32 %v3236_v25, %v3019_v42  ;;  %v249_v51 = vsub.f32 %v3236_v25, %v3021_v43 }
  0xb8   :  { %5666 = vst [vmem:[#allocation34_spill] sm:$0xff] %v3250_v17  ;;  %v250_v28 = vsub.f32 %v3236_v25, %v3023_v44  ;;  %v3262_v12 = vmul.f32 %v211_v29, %v211_v29  ;;  %v251_v8 = vsub.f32 %v3236_v25, %v3025_v45  ;;  %v3266_v22 = vmul.f32 %v245_v4, %v245_v4 }
  0xb9   :  { %v566_v26 = vsub.f32 %v3248_v5, %v2998_v30  ;;  %v3270_v11 = vmul.f32 %v246_v7, %v246_v7  ;;  %v3272_v1 = vmul.f32 %v247_v58, %v247_v58  ;;  %v3274_v17 = vmul.f32 %v248_v6, %v248_v6 }
  0xba   :  { %5667 = vst [vmem:[#allocation35_spill] sm:$0xff] %v3262_v12  ;;  %5668 = vst [vmem:[#allocation36_spill] sm:$0xff] %v3266_v22  ;;  %v3276_v56 = vmul.f32 %v249_v51, %v249_v51  ;;  %v3278_v60 = vmul.f32 %v250_v28, %v250_v28  ;;  %v567_v29 = vsub.f32 %v3248_v5, %v3000_v31  ;;  %v3294_v28 = vpop.permute.xlu0 %115 }
  0xbb   :  { %5669 = vst [vmem:[#allocation37_spill] sm:$0xff] %v3270_v11  ;;  %5670 = vst [vmem:[#allocation38_spill] sm:$0xff] %v3272_v1  ;;  %v568_v4 = vsub.f32 %v3248_v5, %v3002_v32  ;;  %v569_v25 = vsub.f32 %v3248_v5, %v3004_v33  ;;  %v3286_v12 = vpop.eup %2568  ;;  %v570_v7 = vsub.f32 %v3248_v5, %v3007_v35 }
  0xbc   :  { %5671 = vst [vmem:[#allocation39_spill] sm:$0xff] %v3274_v17  ;;  %5672 = vst [vmem:[#allocation40_spill] sm:$0xff] %v3276_v56  ;;  %v571_v6 = vsub.f32 %v3248_v5, %v3009_v36  ;;  %v572_v58 = vsub.f32 %v3248_v5, %v3011_v37  ;;  %v694_v51 = vmul.f32 %v566_v26, %v566_v26 }
  0xbd   :  { %5673 = vst [vmem:[#allocation41_spill] sm:$0xff] %v3278_v60  ;;  %5674 = vst [vmem:[#allocation42_spill] sm:$0xff] %v3286_v12  ;;  %v3296_v60 = vpop.eup %2570  ;;  %v695_v56 = vmul.f32 %v567_v29, %v567_v29  ;;  %v696_v17 = vmul.f32 %v568_v4, %v568_v4  ;;  %v697_v1 = vmul.f32 %v569_v25, %v569_v25  ;;  %v3314_v25 = vpop.permute.xlu1 %458 }
  0xbe   :  { %5675 = vst [vmem:[#allocation43_spill] sm:$0xff] %v3294_v28  ;;  %5676 = vst [vmem:[#allocation44_spill] sm:$0xff] %v3296_v60  ;;  %v261_v11 = vsub.f32 %v3294_v28, %v3013_v39  ;;  %v3300_v22 = vmul.f32 %v251_v8, %v251_v8  ;;  %v698_v12 = vmul.f32 %v570_v7, %v570_v7 }
  0xbf   :  { %v3302_v62 = vmul.f32 %v571_v6, %v571_v6  ;;  %v3304_v14 = vmul.f32 %v572_v58, %v572_v58  ;;  %v3306_v61 = vadd.f32 %v694_v51, %v333_v15  ;;  %v3308_v26 = vadd.f32 %v695_v56, %v334_v52  ;;  %5680 = vst [vmem:[#allocation48_spill] sm:$0xff] %v3314_v25 }
  0xc0   :  { %5677 = vst [vmem:[#allocation45_spill] sm:$0xff] %v3300_v22  ;;  %v3310_v5 = vadd.f32 %v696_v17, %v335_v20  ;;  %v262_v29 = vsub.f32 %v3294_v28, %v3015_v40  ;;  %v3316_v4 = vadd.f32 %v697_v1, %v336_v24  ;;  %v263_v8 = vsub.f32 %v3294_v28, %v3017_v41 }
  0xc1   :  { %5678 = vst [vmem:[#allocation46_spill] sm:$0xff] %v3302_v62  ;;  %5679 = vst [vmem:[#allocation47_spill] sm:$0xff] %v3304_v14  ;;  %v264_v7 = vsub.f32 %v3294_v28, %v3019_v42  ;;  %v265_v15 = vsub.f32 %v3294_v28, %v3021_v43  ;;  %v3324_v52 = vadd.f32 %v698_v12, %v337_v21 }
  0xc2   :  { %v266_v56 = vsub.f32 %v3294_v28, %v3023_v44  ;;  %v267_v17 = vsub.f32 %v3294_v28, %v3025_v45  ;;  %v3330_v20 = vmul.f32 %v261_v11, %v261_v11  ;;  %v3332_v24 = vmul.f32 %v262_v29, %v262_v29 }
  0xc3   :  { %5681 = vst [vmem:[#allocation49_spill] sm:$0xff] %v3324_v52  ;;  %v3334_v1 = vmul.f32 %v263_v8, %v263_v8  ;;  %v3336_v6 = vmul.f32 %v264_v7, %v264_v7  ;;  %v574_v58 = vsub.f32 %v3314_v25, %v2998_v30  ;;  %v3340_v51 = vmul.f32 %v265_v15, %v265_v15 }
  0xc4   :  { %5682 = vst [vmem:[#allocation50_spill] sm:$0xff] %v3330_v20  ;;  %5683 = vst [vmem:[#allocation51_spill] sm:$0xff] %v3332_v24  ;;  %v3342_v21 = vmul.f32 %v266_v56, %v266_v56  ;;  %v575_v12 = vsub.f32 %v3314_v25, %v3000_v31  ;;  %v576_v11 = vsub.f32 %v3314_v25, %v3002_v32 }
  0xc5   :  { %5684 = vst [vmem:[#allocation52_spill] sm:$0xff] %v3334_v1  ;;  %5685 = vst [vmem:[#allocation53_spill] sm:$0xff] %v3336_v6  ;;  %v577_v29 = vsub.f32 %v3314_v25, %v3004_v33  ;;  %v578_v8 = vsub.f32 %v3314_v25, %v3007_v35  ;;  %v579_v7 = vsub.f32 %v3314_v25, %v3009_v36 }
  0xc6   :  { %5686 = vst [vmem:[#allocation54_spill] sm:$0xff] %v3340_v51  ;;  %5687 = vst [vmem:[#allocation55_spill] sm:$0xff] %v3342_v21  ;;  %v580_v15 = vsub.f32 %v3314_v25, %v3011_v37  ;;  %v3356_v56 = vmul.f32 %v267_v17, %v267_v17  ;;  %v702_v21 = vmul.f32 %v574_v58, %v574_v58  ;;  %v3358_v51 = vpop.permute.xlu0 %125  ;;  %v3370_v58 = vpop.permute.xlu1 %947 }
  0xc7   :  { %v703_v28 = vmul.f32 %v575_v12, %v575_v12  ;;  %v704_v22 = vmul.f32 %v576_v11, %v576_v11  ;;  %5689 = vst [vmem:[#allocation57_spill] sm:$0xff] %v3358_v51  ;;  %v705_v6 = vmul.f32 %v577_v29, %v577_v29  ;;  %v706_v1 = vmul.f32 %v578_v8, %v578_v8 }
  0xc8   :  { %5688 = vst [vmem:[#allocation56_spill] sm:$0xff] %v3356_v56  ;;  %v3360_v24 = vmul.f32 %v579_v7, %v579_v7  ;;  %v277_v20 = vsub.f32 %v3358_v51, %v3013_v39  ;;  %v3364_v52 = vmul.f32 %v580_v15, %v580_v15  ;;  %v830_v14 = vadd.f32 %v702_v21, %v3182_v2 }
  0xc9   :  { %v831_v25 = vadd.f32 %v703_v28, %v3184_v3  ;;  %v278_v17 = vsub.f32 %v3358_v51, %v3015_v40  ;;  %5692 = vst [vmem:[#allocation60_spill] sm:$0xff] %v3370_v58  ;;  %v832_v12 = vadd.f32 %v704_v22, %v3186_v63  ;;  %v833_v11 = vadd.f32 %v705_v6, %v3188_v10 }
  0xca   :  { %5690 = vst [vmem:[#allocation58_spill] sm:$0xff] %v3360_v24  ;;  %5691 = vst [vmem:[#allocation59_spill] sm:$0xff] %v3364_v52  ;;  %v279_v29 = vsub.f32 %v3358_v51, %v3017_v41  ;;  %v280_v8 = vsub.f32 %v3358_v51, %v3019_v42  ;;  %v3379_v7 = vadd.f32 %v706_v1, %v3190_v27  ;;  %v3403_v56 = vpop.permute.xlu0 %135 }
  0xcb   :  { %v281_v2 = vsub.f32 %v3358_v51, %v3021_v43  ;;  %v282_v3 = vsub.f32 %v3358_v51, %v3023_v44  ;;  %v283_v63 = vsub.f32 %v3358_v51, %v3025_v45  ;;  %v3387_v22 = vmul.f32 %v277_v20, %v277_v20  ;;  %5700 = vst [vmem:[#allocation68_spill] sm:$0xff] %v3403_v56 }
  0xcc   :  { %5693 = vst [vmem:[#allocation61_spill] sm:$0xff] %v3379_v7  ;;  %v3389_v10 = vmul.f32 %v278_v17, %v278_v17  ;;  %v3391_v28 = vmul.f32 %v279_v29, %v279_v29  ;;  %v1063_v6 = vsub.f32 %v3370_v58, %v3027_v46  ;;  %v3395_v27 = vmul.f32 %v280_v8, %v280_v8 }
  0xcd   :  { %5694 = vst [vmem:[#allocation62_spill] sm:$0xff] %v3387_v22  ;;  %v3397_v1 = vmul.f32 %v281_v2, %v281_v2  ;;  %v3399_v21 = vmul.f32 %v282_v3, %v282_v3  ;;  %v1064_v15 = vsub.f32 %v3370_v58, %v3029_v47  ;;  %v1065_v20 = vsub.f32 %v3370_v58, %v3031_v48 }
  0xce   :  { %5695 = vst [vmem:[#allocation63_spill] sm:$0xff] %v3389_v10  ;;  %5696 = vst [vmem:[#allocation64_spill] sm:$0xff] %v3391_v28  ;;  %v1066_v17 = vsub.f32 %v3370_v58, %v3033_v49  ;;  %v1067_v29 = vsub.f32 %v3370_v58, %v3035_v50  ;;  %v1068_v8 = vsub.f32 %v3370_v58, %v3042_v53 }
  0xcf   :  { %5697 = vst [vmem:[#allocation65_spill] sm:$0xff] %v3395_v27  ;;  %5698 = vst [vmem:[#allocation66_spill] sm:$0xff] %v3397_v1  ;;  %v3413_v2 = vmul.f32 %v283_v63, %v283_v63  ;;  %v1191_v3 = vmul.f32 %v1063_v6, %v1063_v6  ;;  %v293_v51 = vsub.f32 %v3403_v56, %v3013_v39 }
  0xd0   :  { %5699 = vst [vmem:[#allocation67_spill] sm:$0xff] %v3399_v21  ;;  %v1192_v21 = vmul.f32 %v1064_v15, %v1064_v15  ;;  %v1193_v1 = vmul.f32 %v1065_v20, %v1065_v20  ;;  %v1194_v27 = vmul.f32 %v1066_v17, %v1066_v17  ;;  %v3417_v28 = vmul.f32 %v1067_v29, %v1067_v29 }
  0xd1   :  { %5701 = vst [vmem:[#allocation69_spill] sm:$0xff] %v3413_v2  ;;  %v294_v10 = vsub.f32 %v3403_v56, %v3015_v40  ;;  %v1319_v22 = vadd.f32 %v1191_v3, %v830_v14  ;;  %v295_v7 = vsub.f32 %v3403_v56, %v3017_v41  ;;  %v296_v63 = vsub.f32 %v3403_v56, %v3019_v42  ;;  %v3437_v3 = vpop.permute.xlu0 %145 }
  0xd2   :  { %5702 = vst [vmem:[#allocation70_spill] sm:$0xff] %v3417_v28  ;;  %v1320_v52 = vadd.f32 %v1192_v21, %v831_v25  ;;  %v3425_v6 = vmul.f32 %v1068_v8, %v1068_v8  ;;  %v1321_v15 = vadd.f32 %v1193_v1, %v832_v12  ;;  %v297_v20 = vsub.f32 %v3403_v56, %v3021_v43  ;;  %v3435_v21 = vpop.permute.xlu1 %90 }
  0xd3   :  { %v298_v17 = vsub.f32 %v3403_v56, %v3023_v44  ;;  %v3431_v29 = vadd.f32 %v1194_v27, %v833_v11  ;;  %v1447_v2 = vsub.f32 0.0, %v1319_v22  ;;  %v299_v25 = vsub.f32 %v3403_v56, %v3025_v45  ;;  %5705 = vst [vmem:[#allocation73_spill] sm:$0xff] %v3435_v21  ;;  %5706 = vst [vmem:[#allocation74_spill] sm:$0xff] %v3437_v3 }
  0xd4   :  { %5703 = vst [vmem:[#allocation71_spill] sm:$0xff] %v3425_v6  ;;  %v1448_v14 = vsub.f32 0.0, %v1320_v52  ;;  %v1449_v8 = vsub.f32 0.0, %v1321_v15  ;;  %v3439_v6 = vmul.f32 %v293_v51, %v293_v51  ;;  %v3441_v12 = vmul.f32 %v294_v10, %v294_v10 }
  0xd5   :  { %5704 = vst [vmem:[#allocation72_spill] sm:$0xff] %v3431_v29  ;;  %v3443_v1 = vmul.f32 %v295_v7, %v295_v7  ;;  %v1575_v28 = vmul.f32 1.3888888, %v1447_v2  ;;  %v3445_v11 = vmul.f32 %v296_v63, %v296_v63  ;;  %v3447_v22 = vmul.f32 %v297_v20, %v297_v20 }
  0xd6   :  { %5707 = vst [vmem:[#allocation75_spill] sm:$0xff] %v3439_v6  ;;  %5708 = vst [vmem:[#allocation76_spill] sm:$0xff] %v3441_v12  ;;  %v1576_v58 = vmul.f32 1.3888888, %v1448_v14  ;;  %v3449_v52 = vmul.f32 1.3888888, %v1449_v8  ;;  %v3451_v27 = vmul.f32 %v298_v17, %v298_v17  ;;  %v221_v56 = vsub.f32 %v3435_v21, %v3013_v39 }
  0xd7   :  { %5709 = vst [vmem:[#allocation77_spill] sm:$0xff] %v3443_v1  ;;  %5710 = vst [vmem:[#allocation78_spill] sm:$0xff] %v3445_v11  ;;  %v222_v51 = vsub.f32 %v3435_v21, %v3015_v40  ;;  %v1727_v10 = vmul.f32 1.442695, %v1575_v28  ;;  %v223_v7 = vsub.f32 %v3435_v21, %v3017_v41  ;;  %v224_v2 = vsub.f32 %v3435_v21, %v3019_v42 }
  0xd8   :  { %5711 = vst [vmem:[#allocation79_spill] sm:$0xff] %v3447_v22  ;;  %5712 = vst [vmem:[#allocation80_spill] sm:$0xff] %v3449_v52  ;;  %v1729_v15 = vmul.f32 1.442695, %v1576_v58  ;;  %v3461_v63 = vmul.f32 %v299_v25, %v299_v25  ;;  %v225_v20 = vsub.f32 %v3435_v21, %v3021_v43  ;;  %v226_v17 = vsub.f32 %v3435_v21, %v3023_v44 }
  0xd9   :  { %5713 = vst [vmem:[#allocation81_spill] sm:$0xff] %v3451_v27  ;;  %v227_v14 = vsub.f32 %v3435_v21, %v3025_v45  ;;  %2572 = vpow2.f32 %v1727_v10  ;;  %v3469_v28 = vmul.f32 %v221_v56, %v221_v56  ;;  %v3471_v58 = vmul.f32 %v222_v51, %v222_v51  ;;  %v3475_v27 = vpop.permute.xlu0 %935 }
  0xda   :  { %5714 = vst [vmem:[#allocation82_spill] sm:$0xff] %v3461_v63  ;;  %v3473_v8 = vmul.f32 %v223_v7, %v223_v7  ;;  %5715 = vst [vmem:[#allocation83_spill] sm:$0xff] %v3475_v27  ;;  %2574 = vpow2.f32 %v1729_v15  ;;  %v3477_v25 = vmul.f32 %v224_v2, %v224_v2  ;;  %v3479_v63 = vmul.f32 %v225_v20, %v225_v20 }
  0xdb   :  { %v3481_v22 = vmul.f32 %v226_v17, %v226_v17  ;;  %v309_v11 = vsub.f32 %v3437_v3, %v3013_v39  ;;  %v310_v56 = vsub.f32 %v3437_v3, %v3015_v40  ;;  %v311_v51 = vsub.f32 %v3437_v3, %v3017_v41 }
  0xdc   :  { %v312_v10 = vsub.f32 %v3437_v3, %v3019_v42  ;;  %v313_v15 = vsub.f32 %v3437_v3, %v3021_v43  ;;  %v314_v7 = vsub.f32 %v3437_v3, %v3023_v44  ;;  %v315_v2 = vsub.f32 %v3437_v3, %v3025_v45 }
  0xdd   :  { %5716 = vst [vmem:[#allocation84_spill] sm:$0xff] %v3481_v22  ;;  %v1039_v20 = vsub.f32 %v3475_v27, %v3027_v46  ;;  %v3499_v17 = vmul.f32 %v227_v14, %v227_v14  ;;  %v3501_v1 = vmul.f32 %v309_v11, %v309_v11  ;;  %v3503_v12 = vmul.f32 %v310_v56, %v310_v56  ;;  %v3507_v22 = vpop.permute.xlu1 %462  ;;  %v3555_v60 = vpop.permute.xlu0 %943 }
  0xde   :  { %v3505_v6 = vmul.f32 %v311_v51, %v311_v51  ;;  %5721 = vst [vmem:[#allocation89_spill] sm:$0xff] %v3507_v22  ;;  %v3509_v21 = vmul.f32 %v312_v10, %v312_v10  ;;  %v3511_v52 = vmul.f32 %v313_v15, %v313_v15  ;;  %v3513_v29 = vmul.f32 %v314_v7, %v314_v7 }
  0xdf   :  { %5717 = vst [vmem:[#allocation85_spill] sm:$0xff] %v3499_v17  ;;  %5718 = vst [vmem:[#allocation86_spill] sm:$0xff] %v3501_v1  ;;  %v1040_v3 = vsub.f32 %v3475_v27, %v3029_v47  ;;  %v1041_v14 = vsub.f32 %v3475_v27, %v3031_v48  ;;  %v1042_v11 = vsub.f32 %v3475_v27, %v3033_v49 }
  0xe0   :  { %5719 = vst [vmem:[#allocation87_spill] sm:$0xff] %v3503_v12  ;;  %5720 = vst [vmem:[#allocation88_spill] sm:$0xff] %v3505_v6  ;;  %v1043_v56 = vsub.f32 %v3475_v27, %v3035_v50  ;;  %v1044_v51 = vsub.f32 %v3475_v27, %v3042_v53  ;;  %v3525_v10 = vmul.f32 %v315_v2, %v315_v2 }
  0xe1   :  { %5722 = vst [vmem:[#allocation90_spill] sm:$0xff] %v3509_v21  ;;  %5723 = vst [vmem:[#allocation91_spill] sm:$0xff] %v3511_v52  ;;  %v1167_v15 = vmul.f32 %v1039_v20, %v1039_v20  ;;  %v1168_v7 = vmul.f32 %v1040_v3, %v1040_v3  ;;  %v1169_v52 = vmul.f32 %v1041_v14, %v1041_v14 }
  0xe2   :  { %5724 = vst [vmem:[#allocation92_spill] sm:$0xff] %v3513_v29  ;;  %5725 = vst [vmem:[#allocation93_spill] sm:$0xff] %v3525_v10  ;;  %v582_v29 = vsub.f32 %v3507_v22, %v2998_v30  ;;  %v1170_v21 = vmul.f32 %v1042_v11, %v1042_v11  ;;  %v3529_v6 = vmul.f32 %v1043_v56, %v1043_v56 }
  0xe3   :  { %v583_v12 = vsub.f32 %v3507_v22, %v3000_v31  ;;  %v1295_v1 = vadd.f32 %v1167_v15, %v3095_v0  ;;  %v1296_v17 = vadd.f32 %v1168_v7, %v3101_v38  ;;  %v584_v2 = vsub.f32 %v3507_v22, %v3002_v32  ;;  %v3539_v20 = vpop.eup %2572 }
  0xe4   :  { %5726 = vst [vmem:[#allocation94_spill] sm:$0xff] %v3529_v6  ;;  %v585_v3 = vsub.f32 %v3507_v22, %v3004_v33  ;;  %5727 = vst [vmem:[#allocation95_spill] sm:$0xff] %v3539_v20  ;;  %v3541_v10 = vmul.f32 %v1044_v51, %v1044_v51  ;;  %v1297_v14 = vadd.f32 %v1169_v52, %v3103_v18  ;;  %v3548_v56 = vpop.eup %2574 }
  0xe5   :  { %v586_v11 = vsub.f32 %v3507_v22, %v3007_v35  ;;  %v587_v0 = vsub.f32 %v3507_v22, %v3009_v36  ;;  %5729 = vst [vmem:[#allocation97_spill] sm:$0xff] %v3548_v56  ;;  %v1423_v38 = vsub.f32 0.0, %v1295_v1  ;;  %v1424_v15 = vsub.f32 0.0, %v1296_v17 }
  0xe6   :  { %5728 = vst [vmem:[#allocation96_spill] sm:$0xff] %v3541_v10  ;;  %v588_v7 = vsub.f32 %v3507_v22, %v3011_v37  ;;  %v710_v24 = vmul.f32 %v582_v29, %v582_v29  ;;  %v1425_v62 = vsub.f32 0.0, %v1297_v14  ;;  %v711_v20 = vmul.f32 %v583_v12, %v583_v12 }
  0xe7   :  { %v712_v51 = vmul.f32 %v584_v2, %v584_v2  ;;  %v713_v10 = vmul.f32 %v585_v3, %v585_v3  ;;  %v3553_v18 = vadd.f32 %v1170_v21, %v3105_v57  ;;  %v1551_v52 = vmul.f32 1.3888888, %v1423_v38 }
  0xe8   :  { %v1552_v6 = vmul.f32 1.3888888, %v1424_v15  ;;  %v714_v27 = vmul.f32 %v586_v11, %v586_v11  ;;  %v3557_v45 = vmul.f32 1.3888888, %v1425_v62  ;;  %v3559_v1 = vmul.f32 %v587_v0, %v587_v0 }
  0xe9   :  { %v3561_v17 = vmul.f32 %v588_v7, %v588_v7  ;;  %v3564_v29 = vadd.f32 %v710_v24, %v3469_v28  ;;  %v1679_v12 = vmul.f32 1.442695, %v1551_v52  ;;  %v3567_v3 = vadd.f32 %v711_v20, %v3471_v58  ;;  %v3581_v28 = vpop.permute.xlu1 %466 }
  0xea   :  { %5730 = vst [vmem:[#allocation98_spill] sm:$0xff] %v3559_v1  ;;  %v1681_v2 = vmul.f32 1.442695, %v1552_v6  ;;  %v3570_v57 = vadd.f32 %v712_v51, %v3473_v8  ;;  %v3573_v21 = vadd.f32 %v713_v10, %v3477_v25  ;;  %v1055_v62 = vsub.f32 %v3555_v60, %v3027_v46  ;;  %5732 = vst [vmem:[#allocation100_spill] sm:$0xff] %v3581_v28 }
  0xeb   :  { %5731 = vst [vmem:[#allocation99_spill] sm:$0xff] %v3561_v17  ;;  %v1056_v14 = vsub.f32 %v3555_v60, %v3029_v47  ;;  %v1057_v24 = vsub.f32 %v3555_v60, %v3031_v48  ;;  %v3584_v6 = vadd.f32 %v714_v27, %v3479_v63  ;;  %v1058_v58 = vsub.f32 %v3555_v60, %v3033_v49  ;;  %v3616_v17 = vpop.permute.xlu0 %951 }
  0xec   :  { %v1059_v8 = vsub.f32 %v3555_v60, %v3035_v50  ;;  %v1060_v25 = vsub.f32 %v3555_v60, %v3042_v53  ;;  %2576 = vpow2.f32 %v1679_v12  ;;  %v1183_v10 = vmul.f32 %v1055_v62, %v1055_v62  ;;  %5734 = vst [vmem:[#allocation102_spill] sm:$0xff] %v3616_v17 }
  0xed   :  { %5733 = vst [vmem:[#allocation101_spill] sm:$0xff] %v3584_v6  ;;  %v1184_v20 = vmul.f32 %v1056_v14, %v1056_v14  ;;  %v1185_v11 = vmul.f32 %v1057_v24, %v1057_v24  ;;  %2578 = vpow2.f32 %v1681_v2  ;;  %v1186_v0 = vmul.f32 %v1058_v58, %v1058_v58 }
  0xee   :  { %v3592_v38 = vmul.f32 %v1059_v8, %v1059_v8  ;;  %v590_v27 = vsub.f32 %v3581_v28, %v2998_v30  ;;  %v1311_v63 = vadd.f32 %v1183_v10, %v3306_v61  ;;  %v591_v51 = vsub.f32 %v3581_v28, %v3000_v31 }
  0xef   :  { %v1312_v15 = vadd.f32 %v1184_v20, %v3308_v26  ;;  %v1313_v7 = vadd.f32 %v1185_v11, %v3310_v5  ;;  %v3601_v52 = vmul.f32 %v1060_v25, %v1060_v25  ;;  %v592_v12 = vsub.f32 %v3581_v28, %v3002_v32 }
  0xf0   :  { %v593_v2 = vsub.f32 %v3581_v28, %v3004_v33  ;;  %v594_v62 = vsub.f32 %v3581_v28, %v3007_v35  ;;  %v1439_v14 = vsub.f32 0.0, %v1311_v63  ;;  %v595_v5 = vsub.f32 %v3581_v28, %v3009_v36 }
  0xf1   :  { %v1440_v61 = vsub.f32 0.0, %v1312_v15  ;;  %v1441_v24 = vsub.f32 0.0, %v1313_v7  ;;  %v596_v26 = vsub.f32 %v3581_v28, %v3011_v37  ;;  %v718_v58 = vmul.f32 %v590_v27, %v590_v27 }
  0xf2   :  { %v719_v8 = vmul.f32 %v591_v51, %v591_v51  ;;  %v720_v25 = vmul.f32 %v592_v12, %v592_v12  ;;  %v3614_v10 = vadd.f32 %v1186_v0, %v3316_v4  ;;  %v1567_v20 = vmul.f32 1.3888888, %v1439_v14 }
  0xf3   :  { %v1568_v11 = vmul.f32 1.3888888, %v1440_v61  ;;  %v721_v6 = vmul.f32 %v593_v2, %v593_v2  ;;  %v3618_v63 = vmul.f32 1.3888888, %v1441_v24  ;;  %v722_v15 = vmul.f32 %v594_v62, %v594_v62  ;;  %v3632_v62 = vpop.permute.xlu1 %955 }
  0xf4   :  { %v3620_v7 = vmul.f32 %v595_v5, %v595_v5  ;;  %v3622_v1 = vmul.f32 %v596_v26, %v596_v26  ;;  %v1711_v22 = vmul.f32 1.442695, %v1567_v20  ;;  %v846_v27 = vadd.f32 %v718_v58, %v3216_v19  ;;  %5737 = vst [vmem:[#allocation105_spill] sm:$0xff] %v3632_v62 }
  0xf5   :  { %v1713_v28 = vmul.f32 1.442695, %v1568_v11  ;;  %v847_v51 = vadd.f32 %v719_v8, %v3218_v9  ;;  %v848_v4 = vadd.f32 %v720_v25, %v3220_v23  ;;  %v849_v0 = vadd.f32 %v721_v6, %v3222_v16 }
  0xf6   :  { %5735 = vst [vmem:[#allocation103_spill] sm:$0xff] %v3620_v7  ;;  %5736 = vst [vmem:[#allocation104_spill] sm:$0xff] %v3622_v1  ;;  %v1071_v12 = vsub.f32 %v3616_v17, %v3027_v46  ;;  %v1072_v2 = vsub.f32 %v3616_v17, %v3029_v47  ;;  %v3634_v14 = vpop.eup %2576  ;;  %v3637_v61 = vadd.f32 %v722_v15, %v3224_v59  ;;  %2580 = vpow2.f32 %v1711_v22 }
  0xf7   :  { %5738 = vst [vmem:[#allocation106_spill] sm:$0xff] %v3634_v14  ;;  %v1073_v19 = vsub.f32 %v3616_v17, %v3031_v48  ;;  %v1074_v23 = vsub.f32 %v3616_v17, %v3033_v49  ;;  %v1075_v16 = vsub.f32 %v3616_v17, %v3035_v50  ;;  %v3645_v9 = vpop.eup %2578  ;;  %v1076_v6 = vsub.f32 %v3616_v17, %v3042_v53 }
  0xf8   :  { %5739 = vst [vmem:[#allocation107_spill] sm:$0xff] %v3637_v61  ;;  %5740 = vst [vmem:[#allocation108_spill] sm:$0xff] %v3645_v9  ;;  %v1199_v24 = vmul.f32 %v1071_v12, %v1071_v12  ;;  %v1200_v5 = vmul.f32 %v1072_v2, %v1072_v2  ;;  %2582 = vpow2.f32 %v1713_v28  ;;  %v1079_v58 = vsub.f32 %v3632_v62, %v3027_v46 }
  0xf9   :  { %v1201_v59 = vmul.f32 %v1073_v19, %v1073_v19  ;;  %v1202_v26 = vmul.f32 %v1074_v23, %v1074_v23  ;;  %v3651_v8 = vmul.f32 %v1075_v16, %v1075_v16  ;;  %v1080_v22 = vsub.f32 %v3632_v62, %v3029_v47 }
  0xfa   :  { %v1327_v25 = vadd.f32 %v1199_v24, %v3564_v29  ;;  %v1328_v20 = vadd.f32 %v1200_v5, %v3567_v3  ;;  %v3657_v11 = vmul.f32 %v1076_v6, %v1076_v6  ;;  %v1081_v28 = vsub.f32 %v3632_v62, %v3031_v48 }
  0xfb   :  { %5741 = vst [vmem:[#allocation109_spill] sm:$0xff] %v3651_v8  ;;  %v1329_v15 = vadd.f32 %v1201_v59, %v3570_v57  ;;  %v1082_v12 = vsub.f32 %v3632_v62, %v3033_v49  ;;  %v1083_v29 = vsub.f32 %v3632_v62, %v3035_v50  ;;  %v1084_v3 = vsub.f32 %v3632_v62, %v3042_v53  ;;  %v3700_v62 = vpop.permute.xlu1 %100 }
  0xfc   :  { %5742 = vst [vmem:[#allocation110_spill] sm:$0xff] %v3657_v11  ;;  %v1455_v2 = vsub.f32 0.0, %v1327_v25  ;;  %v1456_v19 = vsub.f32 0.0, %v1328_v20  ;;  %v1207_v16 = vmul.f32 %v1079_v58, %v1079_v58  ;;  %v1208_v6 = vmul.f32 %v1080_v22, %v1080_v22 }
  0xfd   :  { %v1457_v23 = vsub.f32 0.0, %v1329_v15  ;;  %v1209_v24 = vmul.f32 %v1081_v28, %v1081_v28  ;;  %v3669_v57 = vadd.f32 %v1202_v26, %v3573_v21  ;;  %v1210_v61 = vmul.f32 %v1082_v12, %v1082_v12 }
  0xfe   :  { %v1583_v5 = vmul.f32 1.3888888, %v1455_v2  ;;  %v1584_v59 = vmul.f32 1.3888888, %v1456_v19  ;;  %v3673_v25 = vmul.f32 %v1083_v29, %v1083_v29  ;;  %v1335_v20 = vadd.f32 %v1207_v16, %v846_v27  ;;  %v5750_v2 = vld [vmem:[#allocation16_spill] sm:$0xff]  ;;  %v5753_v16 = vld [vmem:[#allocation17_spill] sm:$0xff] }
  0xff   :  { %5743 = vst [vmem:[#allocation111_spill] sm:$0xff] %v3669_v57  ;;  %v3671_v1 = vmul.f32 1.3888888, %v1457_v23  ;;  %v1336_v7 = vadd.f32 %v1208_v6, %v847_v51  ;;  %v3675_v17 = vmul.f32 %v1084_v3, %v1084_v3  ;;  %v1337_v15 = vadd.f32 %v1209_v24, %v848_v4  ;;  %v5749_v51 = vld [vmem:[#allocation18_spill] sm:$0xff]  ;;  %v5752_v23 = vld [vmem:[#allocation19_spill] sm:$0xff]  ;;  %5762 = vst [vmem:[#allocation16_spill] sm:$0xff] %v3700_v62 }
 0x100   :  { %5745 = vst [vmem:[#allocation113_spill] sm:$0xff] %v3673_v25  ;;  %v1743_v11 = vmul.f32 1.442695, %v1583_v5  ;;  %v1745_v8 = vmul.f32 1.442695, %v1584_v59  ;;  %v1463_v58 = vsub.f32 0.0, %v1335_v20  ;;  %v204_v21 = vsub.f32 %v3099_v34, %v3044_v54  ;;  %v3681_v28 = vpop.eup %2580 }
 0x101   :  { %5744 = vst [vmem:[#allocation112_spill] sm:$0xff] %v3671_v1  ;;  %5746 = vst [vmem:[#allocation114_spill] sm:$0xff] %v3675_v17  ;;  %v1464_v22 = vsub.f32 0.0, %v1336_v7  ;;  %v565_v26 = vsub.f32 %v3073_v13, %v3046_v55  ;;  %v3683_v12 = vadd.f32 %v1210_v61, %v849_v0  ;;  %v1465_v27 = vsub.f32 0.0, %v1337_v15  ;;  %v5754_v13 = vld [vmem:[#allocation8_spill] sm:$0xff]  ;;  %v5755_v24 = vld [vmem:[#allocation15_spill] sm:$0xff] }
 0x102   :  { %5747 = vst [vmem:[#allocation115_spill] sm:$0xff] %v3681_v28  ;;  %2584 = vpow2.f32 %v1743_v11  ;;  %v819_v19 = vadd.f32 %v5750_v2, %v5749_v51  ;;  %v3687_v29 = vpop.eup %2582  ;;  %v1591_v4 = vmul.f32 1.3888888, %v1463_v58  ;;  %v332_v7 = vmul.f32 %v204_v21, %v204_v21  ;;  %v5756_v11 = vld [vmem:[#allocation9_spill] sm:$0xff]  ;;  %v5758_v15 = vld [vmem:[#allocation22_spill] sm:$0xff]  ;;  %v5759_v2 = vld [vmem:[#allocation23_spill] sm:$0xff] }
 0x103   :  { %5748 = vst [vmem:[#allocation116_spill] sm:$0xff] %v3683_v12  ;;  %5751 = vst [vmem:[#allocation18_spill] sm:$0xff] %v3687_v29  ;;  %v1592_v3 = vmul.f32 1.3888888, %v1464_v22  ;;  %v820_v34 = vadd.f32 %v5753_v16, %v5752_v23  ;;  %2586 = vpow2.f32 %v1745_v8  ;;  %v693_v6 = vmul.f32 %v565_v26, %v565_v26  ;;  %v5757_v20 = vld [vmem:[#allocation21_spill] sm:$0xff]  ;;  %v5760_v17 = vld [vmem:[#allocation24_spill] sm:$0xff] }
 0x104   :  { %v1053_v5 = vsub.f32 %v5755_v24, %v5754_v13  ;;  %v1054_v0 = vsub.f32 %v5755_v24, %v5756_v11  ;;  %v1759_v61 = vmul.f32 1.442695, %v1591_v4  ;;  %v1307_v51 = vadd.f32 %v5758_v15, %v5757_v20  ;;  %v5761_v16 = vld [vmem:[#allocation26_spill] sm:$0xff] }
 0x105   :  { %v1761_v59 = vmul.f32 1.442695, %v1592_v3  ;;  %v1308_v58 = vadd.f32 %v5759_v2, %v819_v19  ;;  %v821_v22 = vadd.f32 %v693_v6, %v332_v7  ;;  %v1434_v23 = vsub.f32 0.0, %v5760_v17 }
 0x106   :  { %v1181_v21 = vmul.f32 %v1053_v5, %v1053_v5  ;;  %v1182_v12 = vmul.f32 %v1054_v0, %v1054_v0  ;;  %2588 = vpow2.f32 %v1759_v61  ;;  %v1435_v8 = vsub.f32 0.0, %v1307_v51 }
 0x107   :  { %v1436_v26 = vsub.f32 0.0, %v1308_v58  ;;  %v1699_v25 = vmul.f32 1.442695, %v5761_v16  ;;  %2590 = vpow2.f32 %v1761_v59  ;;  %v1562_v24 = vmul.f32 1.3888888, %v1434_v23  ;;  %v5765_v58 = vld [vmem:[#allocation5_spill] sm:$0xff] }
 0x108   :  { %v1309_v4 = vadd.f32 %v1181_v21, %v820_v34  ;;  %v1310_v3 = vadd.f32 %v1182_v12, %v821_v22  ;;  %v3702_v1 = vmul.f32 1.3888888, %v1465_v27  ;;  %v1563_v20 = vmul.f32 1.3888888, %v1435_v8  ;;  %v3720_v21 = vpop.permute.xlu1 %470  ;;  %v5768_v16 = vld [vmem:[#allocation42_spill] sm:$0xff] }
 0x109   :  { %v1564_v19 = vmul.f32 1.3888888, %v1436_v26  ;;  %2592 = vpow2.f32 %v1699_v25  ;;  %v1701_v5 = vmul.f32 1.442695, %v1562_v24  ;;  %v237_v17 = vsub.f32 %v3700_v62, %v3013_v39  ;;  %5766 = vst [vmem:[#allocation8_spill] sm:$0xff] %v3720_v21 }
 0x10a   :  { %5763 = vst [vmem:[#allocation19_spill] sm:$0xff] %v3702_v1  ;;  %v1437_v7 = vsub.f32 0.0, %v1309_v4  ;;  %v1438_v6 = vsub.f32 0.0, %v1310_v3  ;;  %v1703_v0 = vmul.f32 1.442695, %v1563_v20  ;;  %v238_v15 = vsub.f32 %v3700_v62, %v3015_v40  ;;  %v5769_v4 = vld [vmem:[#allocation44_spill] sm:$0xff] }
 0x10b   :  { %v1705_v61 = vmul.f32 1.442695, %v1564_v19  ;;  %v239_v12 = vsub.f32 %v3700_v62, %v3017_v41  ;;  %2594 = vpow2.f32 %v1701_v5  ;;  %v240_v25 = vsub.f32 %v3700_v62, %v3019_v42 }
 0x10c   :  { %v3710_v34 = vpop.eup %2584  ;;  %v1565_v27 = vmul.f32 1.3888888, %v1437_v7  ;;  %v1566_v59 = vmul.f32 1.3888888, %v1438_v6  ;;  %2596 = vpow2.f32 %v1703_v0  ;;  %v241_v51 = vsub.f32 %v3700_v62, %v3021_v43 }
 0x10d   :  { %5764 = vst [vmem:[#allocation17_spill] sm:$0xff] %v3710_v34  ;;  %v242_v2 = vsub.f32 %v3700_v62, %v3023_v44  ;;  %v243_v22 = vsub.f32 %v3700_v62, %v5765_v58  ;;  %v3722_v23 = vpop.eup %2586  ;;  %2598 = vpow2.f32 %v1705_v61  ;;  %v1944_v3 = vadd.f32 %v5769_v4, %v5768_v16  ;;  %v3730_v62 = vpop.permute.xlu0 %959 }
 0x10e   :  { %5767 = vst [vmem:[#allocation15_spill] sm:$0xff] %v3722_v23  ;;  %v1707_v8 = vmul.f32 1.442695, %v1565_v27  ;;  %v1709_v26 = vmul.f32 1.442695, %v1566_v59  ;;  %v365_v24 = vmul.f32 %v237_v17, %v237_v17  ;;  %v366_v20 = vmul.f32 %v238_v15, %v238_v15  ;;  %5771 = vst [vmem:[#allocation21_spill] sm:$0xff] %v3730_v62 }
 0x10f   :  { %v367_v19 = vmul.f32 %v239_v12, %v239_v12  ;;  %v368_v7 = vmul.f32 %v240_v25, %v240_v25  ;;  %v369_v6 = vmul.f32 %v241_v51, %v241_v51  ;;  %v3726_v5 = vmul.f32 %v242_v2, %v242_v2 }
 0x110   :  { %2600 = vpow2.f32 %v1707_v8  ;;  %v598_v0 = vsub.f32 %v3720_v21, %v2998_v30  ;;  %v3732_v1 = vpop.eup %2588  ;;  %v3734_v61 = vmul.f32 %v243_v22, %v243_v22  ;;  %v599_v27 = vsub.f32 %v3720_v21, %v3000_v31 }
 0x111   :  { %5770 = vst [vmem:[#allocation9_spill] sm:$0xff] %v3726_v5  ;;  %5772 = vst [vmem:[#allocation22_spill] sm:$0xff] %v3732_v1  ;;  %v600_v17 = vsub.f32 %v3720_v21, %v3002_v32  ;;  %v601_v15 = vsub.f32 %v3720_v21, %v3004_v33  ;;  %v3742_v12 = vpop.eup %2590  ;;  %v602_v59 = vsub.f32 %v3720_v21, %v3007_v35  ;;  %2602 = vpow2.f32 %v1709_v26 }
 0x112   :  { %5773 = vst [vmem:[#allocation23_spill] sm:$0xff] %v3734_v61  ;;  %5774 = vst [vmem:[#allocation24_spill] sm:$0xff] %v3742_v12  ;;  %v603_v25 = vsub.f32 %v3720_v21, %v3009_v36  ;;  %v604_v51 = vsub.f32 %v3720_v21, %v3011_v37  ;;  %v726_v2 = vmul.f32 %v598_v0, %v598_v0  ;;  %v3759_v0 = vpop.permute.xlu1 %474 }
 0x113   :  { %v3750_v22 = vpop.eup %2592  ;;  %v727_v8 = vmul.f32 %v599_v27, %v599_v27  ;;  %v728_v16 = vmul.f32 %v600_v17, %v600_v17  ;;  %v729_v4 = vmul.f32 %v601_v15, %v601_v15  ;;  %v1087_v61 = vsub.f32 %v3730_v62, %v3027_v46  ;;  %5778 = vst [vmem:[#allocation118_spill] sm:$0xff] %v3759_v0 }
 0x114   :  { %5775 = vst [vmem:[#allocation26_spill] sm:$0xff] %v3750_v22  ;;  %v1945_v5 = vadd.f32 %v3750_v22, %v1944_v3  ;;  %v730_v12 = vmul.f32 %v602_v59, %v602_v59  ;;  %v3755_v1 = vmul.f32 %v603_v25, %v603_v25  ;;  %v3757_v23 = vmul.f32 %v604_v51, %v604_v51 }
 0x115   :  { %v854_v34 = vadd.f32 %v726_v2, %v365_v24  ;;  %v855_v57 = vadd.f32 %v727_v8, %v366_v20  ;;  %v856_v21 = vadd.f32 %v728_v16, %v367_v19  ;;  %v3761_v56 = vpop.eup %2594  ;;  %v857_v27 = vadd.f32 %v729_v4, %v368_v7 }
 0x116   :  { %5776 = vst [vmem:[#allocation5_spill] sm:$0xff] %v3755_v1  ;;  %5777 = vst [vmem:[#allocation117_spill] sm:$0xff] %v3757_v23  ;;  %v1088_v17 = vsub.f32 %v3730_v62, %v3029_v47  ;;  %v1089_v26 = vsub.f32 %v3730_v62, %v3031_v48  ;;  %v1090_v3 = vsub.f32 %v3730_v62, %v3033_v49  ;;  %v3769_v15 = vpop.eup %2596 }
 0x117   :  { %5779 = vst [vmem:[#allocation119_spill] sm:$0xff] %v3761_v56  ;;  %5780 = vst [vmem:[#allocation120_spill] sm:$0xff] %v3769_v15  ;;  %v1946_v24 = vadd.f32 %v3761_v56, %v1945_v5  ;;  %v1091_v16 = vsub.f32 %v3730_v62, %v3035_v50  ;;  %v1092_v20 = vsub.f32 %v3730_v62, %v3042_v53  ;;  %v3776_v19 = vpop.eup %2598 }
 0x118   :  { %v1215_v4 = vmul.f32 %v1087_v61, %v1087_v61  ;;  %5781 = vst [vmem:[#allocation121_spill] sm:$0xff] %v3776_v19  ;;  %v3778_v7 = vadd.f32 %v730_v12, %v369_v6  ;;  %v1216_v59 = vmul.f32 %v1088_v17, %v1088_v17  ;;  %v1217_v25 = vmul.f32 %v1089_v26, %v1089_v26 }
 0x119   :  { %v1218_v51 = vmul.f32 %v1090_v3, %v1090_v3  ;;  %v1947_v2 = vadd.f32 %v3769_v15, %v1946_v24  ;;  %v3781_v8 = vmul.f32 %v1091_v16, %v1091_v16  ;;  %v606_v5 = vsub.f32 %v3759_v0, %v2998_v30  ;;  %v3796_v3 = vpop.permute.xlu1 %963 }
 0x11a   :  { %5782 = vst [vmem:[#allocation122_spill] sm:$0xff] %v3778_v7  ;;  %v1343_v22 = vadd.f32 %v1215_v4, %v854_v34  ;;  %v3785_v56 = vpop.eup %2600  ;;  %v3787_v23 = vmul.f32 %v1092_v20, %v1092_v20  ;;  %v1344_v61 = vadd.f32 %v1216_v59, %v855_v57  ;;  %v1345_v62 = vadd.f32 %v1217_v25, %v856_v21 }
 0x11b   :  { %5783 = vst [vmem:[#allocation123_spill] sm:$0xff] %v3781_v8  ;;  %5784 = vst [vmem:[#allocation124_spill] sm:$0xff] %v3785_v56  ;;  %v607_v6 = vsub.f32 %v3759_v0, %v3000_v31  ;;  %v1948_v12 = vadd.f32 %v3776_v19, %v1947_v2  ;;  %v608_v26 = vsub.f32 %v3759_v0, %v3002_v32  ;;  %v3805_v25 = vpop.eup %2602 }
 0x11c   :  { %5785 = vst [vmem:[#allocation125_spill] sm:$0xff] %v3787_v23  ;;  %v1471_v17 = vsub.f32 0.0, %v1343_v22  ;;  %v609_v34 = vsub.f32 %v3759_v0, %v3004_v33  ;;  %5786 = vst [vmem:[#allocation126_spill] sm:$0xff] %v3796_v3  ;;  %v1472_v24 = vsub.f32 0.0, %v1344_v61  ;;  %v1473_v16 = vsub.f32 0.0, %v1345_v62 }
 0x11d   :  { %v610_v57 = vsub.f32 %v3759_v0, %v3007_v35  ;;  %v611_v21 = vsub.f32 %v3759_v0, %v3009_v36  ;;  %v1949_v20 = vadd.f32 %v3785_v56, %v1948_v12  ;;  %v612_v22 = vsub.f32 %v3759_v0, %v3011_v37  ;;  %5787 = vst [vmem:[#allocation127_spill] sm:$0xff] %v3805_v25  ;;  %v3819_v0 = vpop.permute.xlu1 %110 }
 0x11e   :  { %v1599_v4 = vmul.f32 1.3888888, %v1471_v17  ;;  %v734_v59 = vmul.f32 %v606_v5, %v606_v5  ;;  %v3807_v2 = vadd.f32 %v1218_v51, %v857_v27  ;;  %v1600_v15 = vmul.f32 1.3888888, %v1472_v24  ;;  %v5792_v5 = vld [vmem:[#allocation36_spill] sm:$0xff]  ;;  %v5793_v51 = vld [vmem:[#allocation37_spill] sm:$0xff] }
 0x11f   :  { %v735_v61 = vmul.f32 %v607_v6, %v607_v6  ;;  %v736_v62 = vmul.f32 %v608_v26, %v608_v26  ;;  %v1950_v19 = vadd.f32 %v3805_v25, %v1949_v20  ;;  %v3810_v23 = vmul.f32 1.3888888, %v1473_v16  ;;  %v5794_v6 = vld [vmem:[#allocation38_spill] sm:$0xff]  ;;  %5795 = vst [vmem:[#allocation36_spill] sm:$0xff] %v3819_v0  ;;  %v5796_v16 = vld [vmem:[#allocation39_spill] sm:$0xff] }
 0x120   :  { %5788 = vst [vmem:[#allocation128_spill] sm:$0xff] %v3807_v2  ;;  %v1775_v8 = vmul.f32 1.442695, %v1599_v4  ;;  %v737_v7 = vmul.f32 %v609_v34, %v609_v34  ;;  %v1777_v1 = vmul.f32 1.442695, %v1600_v15  ;;  %v738_v12 = vmul.f32 %v610_v57, %v610_v57 }
 0x121   :  { %5789 = vst [vmem:[#allocation129_spill] sm:$0xff] %v3810_v23  ;;  %v3812_v17 = vmul.f32 %v611_v21, %v611_v21  ;;  %v3814_v56 = vmul.f32 %v612_v22, %v612_v22  ;;  %1951 = vadd.xlane.f32.xlu0 %v1950_v19  ;;  %v862_v27 = vadd.f32 %v734_v59, %v5792_v5  ;;  %v5797_v21 = vld [vmem:[#allocation40_spill] sm:$0xff] }
 0x122   :  { %2604 = vpow2.f32 %v1775_v8  ;;  %v863_v24 = vadd.f32 %v735_v61, %v5793_v51  ;;  %v864_v26 = vadd.f32 %v736_v62, %v5794_v6  ;;  %v865_v20 = vadd.f32 %v737_v7, %v5796_v16 }
 0x123   :  { %5790 = vst [vmem:[#allocation130_spill] sm:$0xff] %v3812_v17  ;;  %5791 = vst [vmem:[#allocation131_spill] sm:$0xff] %v3814_v56  ;;  %2606 = vpow2.f32 %v1777_v1  ;;  %v1095_v15 = vsub.f32 %v3796_v3, %v3027_v46  ;;  %v1096_v34 = vsub.f32 %v3796_v3, %v3029_v47  ;;  %v1097_v19 = vsub.f32 %v3796_v3, %v3031_v48  ;;  %v5813_v56 = vld [vmem:[#allocation11_spill] sm:$0xff]  ;;  %v5814_v17 = vld [vmem:[#allocation14_spill] sm:$0xff] }
 0x124   :  { %v1098_v8 = vsub.f32 %v3796_v3, %v3033_v49  ;;  %v1099_v57 = vsub.f32 %v3796_v3, %v3035_v50  ;;  %v1100_v1 = vsub.f32 %v3796_v3, %v3042_v53  ;;  %v3835_v7 = vadd.f32 %v738_v12, %v5797_v21 }
 0x125   :  { %v1223_v4 = vmul.f32 %v1095_v15, %v1095_v15  ;;  %v1224_v22 = vmul.f32 %v1096_v34, %v1096_v34  ;;  %v253_v59 = vsub.f32 %v3819_v0, %v3013_v39  ;;  %v1225_v61 = vmul.f32 %v1097_v19, %v1097_v19 }
 0x126   :  { %5798 = vst [vmem:[#allocation37_spill] sm:$0xff] %v3835_v7  ;;  %v1226_v62 = vmul.f32 %v1098_v8, %v1098_v8  ;;  %v3839_v5 = vmul.f32 %v1099_v57, %v1099_v57  ;;  %v254_v51 = vsub.f32 %v3819_v0, %v3015_v40  ;;  %v255_v25 = vsub.f32 %v3819_v0, %v3017_v41 }
 0x127   :  { %v1351_v6 = vadd.f32 %v1223_v4, %v862_v27  ;;  %v1352_v16 = vadd.f32 %v1224_v22, %v863_v24  ;;  %v256_v12 = vsub.f32 %v3819_v0, %v3019_v42  ;;  %v3847_v15 = vmul.f32 %v1100_v1, %v1100_v1 }
 0x128   :  { %5799 = vst [vmem:[#allocation38_spill] sm:$0xff] %v3839_v5  ;;  %v1353_v34 = vadd.f32 %v1225_v61, %v864_v26  ;;  %v257_v19 = vsub.f32 %v3819_v0, %v3021_v43  ;;  %v258_v8 = vsub.f32 %v3819_v0, %v3023_v44  ;;  %v3853_v57 = vadd.f32 %v1226_v62, %v865_v20 }
 0x129   :  { %5800 = vst [vmem:[#allocation39_spill] sm:$0xff] %v3847_v15  ;;  %v1479_v21 = vsub.f32 0.0, %v1351_v6  ;;  %v1480_v27 = vsub.f32 0.0, %v1352_v16  ;;  %v259_v24 = vsub.f32 %v3819_v0, %v5765_v58  ;;  %v3857_v22 = vmul.f32 %v253_v59, %v253_v59  ;;  %v5805_v16 = vld [vmem:[#allocation7_spill] sm:$0xff]  ;;  %v5810_v0 = vld [vmem:[#allocation10_spill] sm:$0xff] }
 0x12a   :  { %5801 = vst [vmem:[#allocation40_spill] sm:$0xff] %v3853_v57  ;;  %v1481_v4 = vsub.f32 0.0, %v1353_v34  ;;  %v3859_v5 = vmul.f32 %v254_v51, %v254_v51  ;;  %v3861_v1 = vmul.f32 %v255_v25, %v255_v25  ;;  %v3863_v15 = vmul.f32 %v256_v12, %v256_v12  ;;  %v5806_v51 = vld [vmem:[#allocation6_spill] sm:$0xff] }
 0x12b   :  { %v1607_v26 = vmul.f32 1.3888888, %v1479_v21  ;;  %v1608_v61 = vmul.f32 1.3888888, %v1480_v27  ;;  %v3865_v7 = vmul.f32 %v257_v19, %v257_v19  ;;  %v3871_v6 = vmul.f32 %v258_v8, %v258_v8  ;;  %v5809_v19 = vld [vmem:[#allocation12_spill] sm:$0xff]  ;;  %v5811_v8 = vld [vmem:[#allocation83_spill] sm:$0xff] }
 0x12c   :  { %v3867_v20 = vpop.eup %2604  ;;  %v3869_v62 = vmul.f32 1.3888888, %v1481_v4  ;;  %v196_v59 = vsub.f32 %v5805_v16, %v3044_v54  ;;  %v557_v34 = vsub.f32 %v5806_v51, %v3046_v55  ;;  %v3879_v12 = vmul.f32 %v259_v24, %v259_v24 }
 0x12d   :  { %5802 = vst [vmem:[#allocation132_spill] sm:$0xff] %v3867_v20  ;;  %5804 = vst [vmem:[#allocation134_spill] sm:$0xff] %v3871_v6  ;;  %v3877_v25 = vpop.eup %2606  ;;  %v1791_v21 = vmul.f32 1.442695, %v1607_v26  ;;  %v1793_v27 = vmul.f32 1.442695, %v1608_v61  ;;  %v811_v57 = vadd.f32 %v5810_v0, %v5809_v19  ;;  %v1045_v6 = vsub.f32 %v5811_v8, %v5754_v13  ;;  %v3893_v20 = vpop.permute.xlu1 %478 }
 0x12e   :  { %5803 = vst [vmem:[#allocation133_spill] sm:$0xff] %v3869_v62  ;;  %5807 = vst [vmem:[#allocation7_spill] sm:$0xff] %v3877_v25  ;;  %v324_v3 = vmul.f32 %v196_v59, %v196_v59  ;;  %v685_v4 = vmul.f32 %v557_v34, %v557_v34  ;;  %v1046_v16 = vsub.f32 %v5811_v8, %v5756_v11  ;;  %v5812_v62 = vld [vmem:[#allocation13_spill] sm:$0xff]  ;;  %v5815_v25 = vld [vmem:[#allocation94_spill] sm:$0xff]  ;;  %v1683_v8 = vmul.f32 1.442695, %v3557_v45 }
 0x12f   :  { %5808 = vst [vmem:[#allocation6_spill] sm:$0xff] %v3879_v12  ;;  %v812_v51 = vadd.f32 %v5813_v56, %v5812_v62  ;;  %v1299_v26 = vadd.f32 %v5815_v25, %v5814_v17  ;;  %v5816_v61 = vld [vmem:[#allocation96_spill] sm:$0xff]  ;;  %v1426_v12 = vsub.f32 0.0, %v3553_v18  ;;  %2608 = vpow2.f32 %v1791_v21 }
 0x130   :  { %v1300_v24 = vadd.f32 %v5816_v61, %v811_v57  ;;  %v813_v0 = vadd.f32 %v685_v4, %v324_v3  ;;  %v1173_v59 = vmul.f32 %v1045_v6, %v1045_v6  ;;  %v1174_v34 = vmul.f32 %v1046_v16, %v1046_v16 }
 0x131   :  { %v1427_v19 = vsub.f32 0.0, %v1299_v26  ;;  %v1554_v2 = vmul.f32 1.3888888, %v1426_v12  ;;  %2610 = vpow2.f32 %v1793_v27  ;;  %v614_v17 = vsub.f32 %v3893_v20, %v2998_v30 }
 0x132   :  { %v1428_v23 = vsub.f32 0.0, %v1300_v24  ;;  %v1301_v56 = vadd.f32 %v1173_v59, %v812_v51  ;;  %v1302_v62 = vadd.f32 %v1174_v34, %v813_v0  ;;  %2612 = vpow2.f32 %v1683_v8  ;;  %v3912_v8 = vpop.permute.xlu0 %967 }
 0x133   :  { %v1555_v57 = vmul.f32 1.3888888, %v1427_v19  ;;  %v1685_v18 = vmul.f32 1.442695, %v1554_v2  ;;  %v615_v3 = vsub.f32 %v3893_v20, %v3000_v31  ;;  %v616_v6 = vsub.f32 %v3893_v20, %v3002_v32  ;;  %5817 = vst [vmem:[#allocation12_spill] sm:$0xff] %v3912_v8 }
 0x134   :  { %v1556_v25 = vmul.f32 1.3888888, %v1428_v23  ;;  %v1429_v61 = vsub.f32 0.0, %v1301_v56  ;;  %v1430_v21 = vsub.f32 0.0, %v1302_v62  ;;  %v617_v12 = vsub.f32 %v3893_v20, %v3004_v33 }
 0x135   :  { %2614 = vpow2.f32 %v1685_v18  ;;  %v1687_v45 = vmul.f32 1.442695, %v1555_v57  ;;  %v618_v23 = vsub.f32 %v3893_v20, %v3007_v35  ;;  %v619_v2 = vsub.f32 %v3893_v20, %v3009_v36 }
 0x136   :  { %v1689_v27 = vmul.f32 1.442695, %v1556_v25  ;;  %v1557_v4 = vmul.f32 1.3888888, %v1429_v61  ;;  %v1558_v16 = vmul.f32 1.3888888, %v1430_v21  ;;  %v620_v51 = vsub.f32 %v3893_v20, %v3011_v37 }
 0x137   :  { %2616 = vpow2.f32 %v1687_v45  ;;  %v742_v26 = vmul.f32 %v614_v17, %v614_v17  ;;  %v743_v24 = vmul.f32 %v615_v3, %v615_v3  ;;  %v1935_v34 = vadd.f32 %v3645_v9, %v3634_v14 }
 0x138   :  { %v1691_v0 = vmul.f32 1.442695, %v1557_v4  ;;  %v1693_v59 = vmul.f32 1.442695, %v1558_v16  ;;  %v744_v19 = vmul.f32 %v616_v6, %v616_v6  ;;  %2618 = vpow2.f32 %v1689_v27  ;;  %v5823_v16 = vld [vmem:[#allocation28_spill] sm:$0xff] }
 0x139   :  { %v745_v56 = vmul.f32 %v617_v12, %v617_v12  ;;  %v746_v62 = vmul.f32 %v618_v23, %v618_v23  ;;  %v3914_v57 = vmul.f32 %v619_v2, %v619_v2  ;;  %v3916_v25 = vpop.eup %2608  ;;  %v3918_v18 = vmul.f32 %v620_v51, %v620_v51  ;;  %v5824_v2 = vld [vmem:[#allocation33_spill] sm:$0xff] }
 0x13a   :  { %5819 = vst [vmem:[#allocation83_spill] sm:$0xff] %v3916_v25  ;;  %2620 = vpow2.f32 %v1691_v0  ;;  %v870_v17 = vadd.f32 %v742_v26, %v3857_v22  ;;  %v871_v61 = vadd.f32 %v743_v24, %v3859_v5  ;;  %v872_v21 = vadd.f32 %v744_v19, %v3861_v1 }
 0x13b   :  { %5818 = vst [vmem:[#allocation10_spill] sm:$0xff] %v3914_v57  ;;  %5820 = vst [vmem:[#allocation13_spill] sm:$0xff] %v3918_v18  ;;  %2622 = vpow2.f32 %v1693_v59  ;;  %v873_v3 = vadd.f32 %v745_v56, %v3863_v15  ;;  %v1103_v6 = vsub.f32 %v3912_v8, %v3027_v46  ;;  %v3926_v45 = vpop.eup %2610  ;;  %v1104_v27 = vsub.f32 %v3912_v8, %v3029_v47 }
 0x13c   :  { %5821 = vst [vmem:[#allocation11_spill] sm:$0xff] %v3926_v45  ;;  %v1105_v12 = vsub.f32 %v3912_v8, %v3031_v48  ;;  %v1106_v22 = vsub.f32 %v3912_v8, %v3033_v49  ;;  %v1107_v5 = vsub.f32 %v3912_v8, %v3035_v50  ;;  %v3936_v1 = vpop.eup %2612  ;;  %v1108_v15 = vsub.f32 %v3912_v8, %v3042_v53 }
 0x13d   :  { %5822 = vst [vmem:[#allocation14_spill] sm:$0xff] %v3936_v1  ;;  %v1231_v4 = vmul.f32 %v1103_v6, %v1103_v6  ;;  %v212_v23 = vsub.f32 %v5823_v16, %v3044_v54  ;;  %v573_v51 = vsub.f32 %v5824_v2, %v3046_v55  ;;  %v1936_v26 = vadd.f32 %v3936_v1, %v1935_v34  ;;  %v5829_v1 = vld [vmem:[#allocation46_spill] sm:$0xff] }
 0x13e   :  { %v1232_v24 = vmul.f32 %v1104_v27, %v1104_v27  ;;  %v1233_v0 = vmul.f32 %v1105_v12, %v1105_v12  ;;  %v1234_v59 = vmul.f32 %v1106_v22, %v1106_v22  ;;  %v3948_v56 = vadd.f32 %v746_v62, %v3865_v7  ;;  %v5828_v22 = vld [vmem:[#allocation34_spill] sm:$0xff] }
 0x13f   :  { %v3945_v19 = vpop.eup %2614  ;;  %v3950_v14 = vmul.f32 %v1107_v5, %v1107_v5  ;;  %v3952_v9 = vmul.f32 %v1108_v15, %v1108_v15  ;;  %v1359_v6 = vadd.f32 %v1231_v4, %v870_v17  ;;  %v340_v2 = vmul.f32 %v212_v23, %v212_v23  ;;  %v5830_v15 = vld [vmem:[#allocation35_spill] sm:$0xff] }
 0x140   :  { %5825 = vst [vmem:[#allocation94_spill] sm:$0xff] %v3945_v19  ;;  %v1937_v16 = vadd.f32 %v3945_v19, %v1936_v26  ;;  %v1360_v8 = vadd.f32 %v1232_v24, %v871_v61  ;;  %v1361_v18 = vadd.f32 %v1233_v0, %v872_v21  ;;  %v3957_v34 = vadd.f32 %v1234_v59, %v873_v3 }
 0x141   :  { %5826 = vst [vmem:[#allocation96_spill] sm:$0xff] %v3952_v9  ;;  %v3955_v57 = vpop.eup %2616  ;;  %v1487_v27 = vsub.f32 0.0, %v1359_v6  ;;  %v701_v12 = vmul.f32 %v573_v51, %v573_v51  ;;  %v827_v7 = vadd.f32 %v5829_v1, %v5828_v22  ;;  %v5831_v9 = vld [vmem:[#allocation47_spill] sm:$0xff]  ;;  %v1061_v61 = vsub.f32 %v3555_v60, %v5754_v13  ;;  %v5833_v51 = vld [vmem:[#allocation49_spill] sm:$0xff] }
 0x142   :  { %5827 = vst [vmem:[#allocation28_spill] sm:$0xff] %v3955_v57  ;;  %v1938_v62 = vadd.f32 %v3955_v57, %v1937_v16  ;;  %v1488_v5 = vsub.f32 0.0, %v1360_v8  ;;  %v828_v17 = vadd.f32 %v5831_v9, %v5830_v15  ;;  %v3966_v21 = vpop.eup %2618  ;;  %v1489_v4 = vsub.f32 0.0, %v1361_v18 }
 0x143   :  { %5832 = vst [vmem:[#allocation33_spill] sm:$0xff] %v3966_v21  ;;  %v1615_v23 = vmul.f32 1.3888888, %v1487_v27  ;;  %v1062_v3 = vsub.f32 %v3555_v60, %v5756_v11  ;;  %v1315_v26 = vadd.f32 %v3592_v38, %v5833_v51  ;;  %v829_v0 = vadd.f32 %v701_v12, %v340_v2 }
 0x144   :  { %v3972_v1 = vpop.eup %2620  ;;  %v1939_v8 = vadd.f32 %v3966_v21, %v1938_v62  ;;  %v1616_v24 = vmul.f32 1.3888888, %v1488_v5  ;;  %v1189_v9 = vmul.f32 %v1061_v61, %v1061_v61  ;;  %v1316_v18 = vadd.f32 %v3601_v52, %v827_v7 }
 0x145   :  { %5834 = vst [vmem:[#allocation34_spill] sm:$0xff] %v3972_v1  ;;  %v3975_v59 = vpop.eup %2622  ;;  %v1807_v6 = vmul.f32 1.442695, %v1615_v23  ;;  %v1190_v16 = vmul.f32 %v1062_v3, %v1062_v3  ;;  %v1442_v27 = vsub.f32 0.0, %v3614_v10  ;;  %v1443_v38 = vsub.f32 0.0, %v1315_v26 }
 0x146   :  { %5835 = vst [vmem:[#allocation46_spill] sm:$0xff] %v3975_v59  ;;  %v1940_v60 = vadd.f32 %v3972_v1, %v1939_v8  ;;  %v1809_v22 = vmul.f32 1.442695, %v1616_v24  ;;  %v1317_v15 = vadd.f32 %v1189_v9, %v828_v17  ;;  %v3980_v51 = vmul.f32 1.3888888, %v1489_v4  ;;  %v5836_v4 = vld [vmem:[#allocation20_spill] sm:$0xff] }
 0x147   :  { %v1318_v57 = vadd.f32 %v1190_v16, %v829_v0  ;;  %v1444_v62 = vsub.f32 0.0, %v1316_v18  ;;  %v1570_v5 = vmul.f32 1.3888888, %v1442_v27  ;;  %2624 = vpow2.f32 %v1807_v6  ;;  %v5837_v0 = vld [vmem:[#allocation48_spill] sm:$0xff]  ;;  %v5838_v27 = vld [vmem:[#allocation27_spill] sm:$0xff] }
 0x148   :  { %v1941_v2 = vadd.f32 %v3975_v59, %v1940_v60  ;;  %v1445_v12 = vsub.f32 0.0, %v1317_v15  ;;  %v1571_v61 = vmul.f32 1.3888888, %v1443_v38  ;;  %2626 = vpow2.f32 %v1809_v22  ;;  %v5839_v60 = vld [vmem:[#allocation58_spill] sm:$0xff]  ;;  %v5840_v15 = vld [vmem:[#allocation60_spill] sm:$0xff] }
 0x149   :  { %v1446_v23 = vsub.f32 0.0, %v1318_v57  ;;  %v1572_v52 = vmul.f32 1.3888888, %v1444_v62  ;;  %v1715_v10 = vmul.f32 1.442695, %v3618_v63  ;;  %v220_v26 = vsub.f32 %v5836_v4, %v3044_v54  ;;  %v4002_v4 = vpop.permute.xlu1 %482 }
 0x14a   :  { %1942 = vadd.xlane.f32.xlu1 %v1941_v2  ;;  %v1573_v7 = vmul.f32 1.3888888, %v1445_v12  ;;  %v1717_v3 = vmul.f32 1.442695, %v1570_v5  ;;  %v1719_v17 = vmul.f32 1.442695, %v1571_v61  ;;  %v581_v9 = vsub.f32 %v5837_v0, %v3046_v55 }
 0x14b   :  { %v1574_v8 = vmul.f32 1.3888888, %v1446_v23  ;;  %2628 = vpow2.f32 %v1715_v10  ;;  %v1721_v24 = vmul.f32 1.442695, %v1572_v52  ;;  %v1953_v57 = vadd.f32 %v3687_v29, %v3681_v28  ;;  %v5841_v5 = vld [vmem:[#allocation61_spill] sm:$0xff]  ;;  %v5842_v2 = vld [vmem:[#allocation70_spill] sm:$0xff] }
 0x14c   :  { %2630 = vpow2.f32 %v1717_v3  ;;  %v1723_v6 = vmul.f32 1.442695, %v1573_v7  ;;  %v348_v16 = vmul.f32 %v220_v26, %v220_v26  ;;  %v709_v18 = vmul.f32 %v581_v9, %v581_v9  ;;  %v5843_v61 = vld [vmem:[#allocation29_spill] sm:$0xff]  ;;  %v5844_v23 = vld [vmem:[#allocation59_spill] sm:$0xff]  ;;  %v5846_v3 = vld [vmem:[#allocation72_spill] sm:$0xff]  ;;  %5847 = vst [vmem:[#allocation35_spill] sm:$0xff] %v4002_v4 }
 0x14d   :  { %2632 = vpow2.f32 %v1719_v17  ;;  %v1725_v63 = vmul.f32 1.442695, %v1574_v8  ;;  %v835_v22 = vadd.f32 %v5839_v60, %v5838_v27  ;;  %v1069_v38 = vsub.f32 %v5840_v15, %v5754_v13  ;;  %v5845_v10 = vld [vmem:[#allocation71_spill] sm:$0xff]  ;;  %v5848_v60 = vld [vmem:[#allocation80_spill] sm:$0xff] }
 0x14e   :  { %2634 = vpow2.f32 %v1721_v24  ;;  %v1070_v62 = vsub.f32 %v5840_v15, %v5756_v11  ;;  %v1323_v12 = vadd.f32 %v5842_v2, %v5841_v5  ;;  %v836_v52 = vadd.f32 %v5844_v23, %v5843_v61  ;;  %v5871_v28 = vld [vmem:[#allocation99_spill] sm:$0xff] }
 0x14f   :  { %2636 = vpow2.f32 %v1723_v6  ;;  %v1324_v7 = vadd.f32 %v5845_v10, %v835_v22  ;;  %v1450_v17 = vsub.f32 0.0, %v5846_v3  ;;  %v837_v26 = vadd.f32 %v709_v18, %v348_v16 }
 0x150   :  { %v1197_v8 = vmul.f32 %v1069_v38, %v1069_v38  ;;  %v1198_v24 = vmul.f32 %v1070_v62, %v1070_v62  ;;  %v1451_v0 = vsub.f32 0.0, %v1323_v12  ;;  %2638 = vpow2.f32 %v1725_v63 }
 0x151   :  { %v1452_v9 = vsub.f32 0.0, %v1324_v7  ;;  %v1578_v27 = vmul.f32 1.3888888, %v1450_v17  ;;  %v1731_v15 = vmul.f32 1.442695, %v5848_v60  ;;  %v4005_v5 = vpop.eup %2624  ;;  %v622_v22 = vsub.f32 %v4002_v4, %v2998_v30 }
 0x152   :  { %5849 = vst [vmem:[#allocation47_spill] sm:$0xff] %v4005_v5  ;;  %v1325_v6 = vadd.f32 %v1197_v8, %v836_v52  ;;  %v1326_v2 = vadd.f32 %v1198_v24, %v837_v26  ;;  %v1579_v61 = vmul.f32 1.3888888, %v1451_v0  ;;  %v4009_v23 = vpop.eup %2626  ;;  %v623_v63 = vsub.f32 %v4002_v4, %v3000_v31 }
 0x153   :  { %5850 = vst [vmem:[#allocation49_spill] sm:$0xff] %v4009_v23  ;;  %v1580_v10 = vmul.f32 1.3888888, %v1452_v9  ;;  %2640 = vpow2.f32 %v1731_v15  ;;  %v1733_v16 = vmul.f32 1.442695, %v1578_v27  ;;  %v624_v12 = vsub.f32 %v4002_v4, %v3002_v32  ;;  %v5853_v9 = vld [vmem:[#allocation95_spill] sm:$0xff] }
 0x154   :  { %v1453_v18 = vsub.f32 0.0, %v1325_v6  ;;  %v1454_v38 = vsub.f32 0.0, %v1326_v2  ;;  %v1735_v62 = vmul.f32 1.442695, %v1579_v61  ;;  %v625_v3 = vsub.f32 %v4002_v4, %v3004_v33  ;;  %v5854_v27 = vld [vmem:[#allocation97_spill] sm:$0xff]  ;;  %v5877_v23 = vld [vmem:[#allocation111_spill] sm:$0xff] }
 0x155   :  { %v4015_v52 = vpop.eup %2628  ;;  %2642 = vpow2.f32 %v1733_v16  ;;  %v1737_v7 = vmul.f32 1.442695, %v1580_v10  ;;  %v626_v17 = vsub.f32 %v4002_v4, %v3007_v35  ;;  %v1962_v60 = vadd.f32 %v5854_v27, %v5853_v9 }
 0x156   :  { %5851 = vst [vmem:[#allocation20_spill] sm:$0xff] %v4015_v52  ;;  %v4021_v26 = vpop.eup %2630  ;;  %v1954_v8 = vadd.f32 %v4015_v52, %v1953_v57  ;;  %v1581_v24 = vmul.f32 1.3888888, %v1453_v18  ;;  %v1582_v0 = vmul.f32 1.3888888, %v1454_v38  ;;  %2644 = vpow2.f32 %v1735_v62 }
 0x157   :  { %5852 = vst [vmem:[#allocation48_spill] sm:$0xff] %v4021_v26  ;;  %v4026_v15 = vpop.eup %2632  ;;  %v627_v6 = vsub.f32 %v4002_v4, %v3009_v36  ;;  %v628_v2 = vsub.f32 %v4002_v4, %v3011_v37  ;;  %v750_v61 = vmul.f32 %v622_v22, %v622_v22  ;;  %v751_v38 = vmul.f32 %v623_v63, %v623_v63  ;;  %v5862_v63 = vld [vmem:[#allocation51_spill] sm:$0xff] }
 0x158   :  { %5855 = vst [vmem:[#allocation27_spill] sm:$0xff] %v4026_v15  ;;  %v4032_v10 = vpop.eup %2634  ;;  %v1955_v16 = vadd.f32 %v4021_v26, %v1954_v8  ;;  %v1739_v57 = vmul.f32 1.442695, %v1581_v24  ;;  %v1741_v18 = vmul.f32 1.442695, %v1582_v0  ;;  %2646 = vpow2.f32 %v1737_v7  ;;  %v5861_v8 = vld [vmem:[#allocation50_spill] sm:$0xff] }
 0x159   :  { %5856 = vst [vmem:[#allocation58_spill] sm:$0xff] %v4032_v10  ;;  %v4035_v1 = vpop.eup %2636  ;;  %v752_v59 = vmul.f32 %v624_v12, %v624_v12  ;;  %v753_v21 = vmul.f32 %v625_v3, %v625_v3  ;;  %v754_v62 = vmul.f32 %v626_v17, %v626_v17  ;;  %v4038_v9 = vmul.f32 %v627_v6, %v627_v6  ;;  %v5863_v7 = vld [vmem:[#allocation52_spill] sm:$0xff]  ;;  %v5864_v17 = vld [vmem:[#allocation53_spill] sm:$0xff] }
 0x15a   :  { %5857 = vst [vmem:[#allocation60_spill] sm:$0xff] %v4035_v1  ;;  %v1956_v52 = vadd.f32 %v4026_v15, %v1955_v16  ;;  %2648 = vpow2.f32 %v1739_v57  ;;  %v4040_v27 = vmul.f32 %v628_v2, %v628_v2  ;;  %v4042_v22 = vpop.eup %2638  ;;  %v4045_v24 = vadd.f32 %v750_v61, %v5861_v8  ;;  %v5865_v6 = vld [vmem:[#allocation73_spill] sm:$0xff]  ;;  %v5868_v61 = vld [vmem:[#allocation84_spill] sm:$0xff]  ;;  %v5869_v8 = vld [vmem:[#allocation98_spill] sm:$0xff] }
 0x15b   :  { %5858 = vst [vmem:[#allocation61_spill] sm:$0xff] %v4038_v9  ;;  %5860 = vst [vmem:[#allocation29_spill] sm:$0xff] %v4042_v22  ;;  %2650 = vpow2.f32 %v1741_v18  ;;  %v4048_v0 = vadd.f32 %v751_v38, %v5862_v63  ;;  %v4051_v12 = vadd.f32 %v752_v59, %v5863_v7  ;;  %v4055_v16 = vadd.f32 %v753_v21, %v5864_v17  ;;  %v5866_v57 = vld [vmem:[#allocation89_spill] sm:$0xff]  ;;  %v5872_v7 = vld [vmem:[#allocation102_spill] sm:$0xff] }
 0x15c   :  { %5859 = vst [vmem:[#allocation70_spill] sm:$0xff] %v4040_v27  ;;  %v1957_v3 = vadd.f32 %v4032_v10, %v1956_v52  ;;  %v228_v2 = vsub.f32 %v5865_v6, %v3044_v54  ;;  %v589_v18 = vsub.f32 %v5866_v57, %v3046_v55  ;;  %v843_v38 = vadd.f32 %v5869_v8, %v5868_v61  ;;  %v5870_v63 = vld [vmem:[#allocation85_spill] sm:$0xff] }
 0x15d   :  { %v4061_v15 = vpop.eup %2640  ;;  %v844_v59 = vadd.f32 %v5871_v28, %v5870_v63  ;;  %v1077_v52 = vsub.f32 %v5872_v7, %v5754_v13  ;;  %v1078_v21 = vsub.f32 %v5872_v7, %v5756_v11  ;;  %v5874_v61 = vld [vmem:[#allocation101_spill] sm:$0xff]  ;;  %v5876_v28 = vld [vmem:[#allocation110_spill] sm:$0xff] }
 0x15e   :  { %5867 = vst [vmem:[#allocation59_spill] sm:$0xff] %v4061_v15  ;;  %v1958_v17 = vadd.f32 %v4035_v1, %v1957_v3  ;;  %v1963_v6 = vadd.f32 %v4061_v15, %v1962_v60  ;;  %v356_v10 = vmul.f32 %v228_v2, %v228_v2  ;;  %v717_v57 = vmul.f32 %v589_v18, %v589_v18  ;;  %v5875_v8 = vld [vmem:[#allocation109_spill] sm:$0xff]  ;;  %v5879_v15 = vld [vmem:[#allocation112_spill] sm:$0xff] }
 0x15f   :  { %v4073_v26 = vpop.eup %2642  ;;  %v1205_v29 = vmul.f32 %v1077_v52, %v1077_v52  ;;  %v1206_v19 = vmul.f32 %v1078_v21, %v1078_v21  ;;  %v1331_v27 = vadd.f32 %v5875_v8, %v5874_v61  ;;  %v1332_v63 = vadd.f32 %v5876_v28, %v843_v38  ;;  %v4084_v21 = vpop.permute.xlu1 %971  ;;  %v5881_v38 = vld [vmem:[#allocation54_spill] sm:$0xff] }
 0x160   :  { %5873 = vst [vmem:[#allocation71_spill] sm:$0xff] %v4073_v26  ;;  %v1959_v9 = vadd.f32 %v4042_v22, %v1958_v17  ;;  %v1964_v4 = vadd.f32 %v4073_v26, %v1963_v6  ;;  %v845_v7 = vadd.f32 %v717_v57, %v356_v10  ;;  %v1458_v3 = vsub.f32 0.0, %v5877_v23  ;;  %v4081_v1 = vpop.eup %2644  ;;  %5880 = vst [vmem:[#allocation80_spill] sm:$0xff] %v4084_v21 }
 0x161   :  { %5878 = vst [vmem:[#allocation72_spill] sm:$0xff] %v4081_v1  ;;  %v1333_v60 = vadd.f32 %v1205_v29, %v844_v59  ;;  %v1459_v2 = vsub.f32 0.0, %v1331_v27  ;;  %v1460_v18 = vsub.f32 0.0, %v1332_v63  ;;  %v1747_v52 = vmul.f32 1.442695, %v5879_v15 }
 0x162   :  { %1960 = vadd.xlane.f32.xlu0 %v1959_v9  ;;  %v1965_v61 = vadd.f32 %v4081_v1, %v1964_v4  ;;  %v4088_v8 = vadd.f32 %v754_v62, %v5881_v38  ;;  %v1334_v17 = vadd.f32 %v1206_v19, %v845_v7  ;;  %v1586_v6 = vmul.f32 1.3888888, %v1458_v3  ;;  %v4090_v10 = vpop.eup %2646 }
 0x163   :  { %5883 = vst [vmem:[#allocation51_spill] sm:$0xff] %v4090_v10  ;;  %v1461_v23 = vsub.f32 0.0, %v1333_v60  ;;  %v1587_v57 = vmul.f32 1.3888888, %v1459_v2  ;;  %v1588_v28 = vmul.f32 1.3888888, %v1460_v18  ;;  %2652 = vpow2.f32 %v1747_v52 }
 0x164   :  { %5882 = vst [vmem:[#allocation50_spill] sm:$0xff] %v4088_v8  ;;  %v4092_v29 = vpop.eup %2648  ;;  %v1966_v27 = vadd.f32 %v4090_v10, %v1965_v61  ;;  %v1462_v15 = vsub.f32 0.0, %v1334_v17  ;;  %v1749_v59 = vmul.f32 1.442695, %v1586_v6  ;;  %v1111_v4 = vsub.f32 %v4084_v21, %v3027_v46  ;;  %v5900_v10 = vld [vmem:[#allocation113_spill] sm:$0xff] }
 0x165   :  { %5884 = vst [vmem:[#allocation52_spill] sm:$0xff] %v4092_v29  ;;  %v4097_v9 = vpop.eup %2650  ;;  %v1589_v62 = vmul.f32 1.3888888, %v1461_v23  ;;  %v1751_v19 = vmul.f32 1.442695, %v1587_v57  ;;  %v1112_v7 = vsub.f32 %v4084_v21, %v3029_v47  ;;  %v1113_v2 = vsub.f32 %v4084_v21, %v3031_v48 }
 0x166   :  { %5885 = vst [vmem:[#allocation53_spill] sm:$0xff] %v4097_v9  ;;  %v1753_v63 = vmul.f32 1.442695, %v1588_v28  ;;  %v1967_v3 = vadd.f32 %v4092_v29, %v1966_v27  ;;  %v1590_v60 = vmul.f32 1.3888888, %v1462_v15  ;;  %2654 = vpow2.f32 %v1749_v59  ;;  %v5886_v27 = vld [vmem:[#allocation17_spill] sm:$0xff] }
 0x167   :  { %2656 = vpow2.f32 %v1751_v19  ;;  %v1755_v18 = vmul.f32 1.442695, %v1589_v62  ;;  %v1114_v52 = vsub.f32 %v4084_v21, %v3033_v49  ;;  %v1115_v61 = vsub.f32 %v4084_v21, %v3035_v50  ;;  %v5887_v15 = vld [vmem:[#allocation15_spill] sm:$0xff] }
 0x168   :  { %v1968_v38 = vadd.f32 %v4097_v9, %v1967_v3  ;;  %2658 = vpow2.f32 %v1753_v63  ;;  %v1757_v17 = vmul.f32 1.442695, %v1590_v60  ;;  %v1116_v6 = vsub.f32 %v4084_v21, %v3042_v53  ;;  %v5889_v60 = vld [vmem:[#allocation25_spill] sm:$0xff] }
 0x169   :  { %2660 = vpow2.f32 %v1755_v18  ;;  %v1239_v23 = vmul.f32 %v1111_v4, %v1111_v4  ;;  %v1240_v57 = vmul.f32 %v1112_v7, %v1112_v7  ;;  %v1241_v28 = vmul.f32 %v1113_v2, %v1113_v2  ;;  %v5892_v2 = vld [vmem:[#allocation100_spill] sm:$0xff] }
 0x16a   :  { %1969 = vadd.xlane.f32.xlu1 %v1968_v38  ;;  %2662 = vpow2.f32 %v1757_v17  ;;  %v1971_v59 = vadd.f32 %v5887_v15, %v5886_v27  ;;  %v1242_v62 = vmul.f32 %v1114_v52, %v1114_v52  ;;  %v4113_v19 = vmul.f32 %v1115_v61, %v1115_v61  ;;  %v5893_v52 = vld [vmem:[#allocation30_spill] sm:$0xff]  ;;  %v5894_v61 = vld [vmem:[#allocation103_spill] sm:$0xff] }
 0x16b   :  { %v1367_v29 = vadd.f32 %v1239_v23, %v4045_v24  ;;  %v1368_v63 = vadd.f32 %v1240_v57, %v4048_v0  ;;  %v1369_v3 = vadd.f32 %v1241_v28, %v4051_v12  ;;  %v236_v18 = vsub.f32 %v5889_v60, %v3044_v54  ;;  %v5896_v12 = vld [vmem:[#allocation32_spill] sm:$0xff] }
 0x16c   :  { %5888 = vst [vmem:[#allocation73_spill] sm:$0xff] %v4113_v19  ;;  %v4120_v4 = vmul.f32 %v1116_v6, %v1116_v6  ;;  %v4123_v7 = vadd.f32 %v1242_v62, %v4055_v16  ;;  %v597_v38 = vsub.f32 %v5892_v2, %v3046_v55  ;;  %v851_v17 = vadd.f32 %v5894_v61, %v5893_v52  ;;  %v5897_v57 = vld [vmem:[#allocation104_spill] sm:$0xff]  ;;  %v5898_v16 = vld [vmem:[#allocation105_spill] sm:$0xff]  ;;  %v5899_v61 = vld [vmem:[#allocation107_spill] sm:$0xff] }
 0x16d   :  { %v4129_v1 = vpop.eup %2652  ;;  %v1495_v24 = vsub.f32 0.0, %v1367_v29  ;;  %v1496_v0 = vsub.f32 0.0, %v1368_v63  ;;  %v364_v23 = vmul.f32 %v236_v18, %v236_v18  ;;  %v852_v28 = vadd.f32 %v5897_v57, %v5896_v12  ;;  %v5902_v57 = vld [vmem:[#allocation114_spill] sm:$0xff] }
 0x16e   :  { %5890 = vst [vmem:[#allocation89_spill] sm:$0xff] %v4120_v4  ;;  %5891 = vst [vmem:[#allocation84_spill] sm:$0xff] %v4123_v7  ;;  %v1972_v6 = vadd.f32 %v4129_v1, %v1971_v59  ;;  %v725_v60 = vmul.f32 %v597_v38, %v597_v38  ;;  %v1085_v62 = vsub.f32 %v5898_v16, %v5754_v13  ;;  %v1497_v9 = vsub.f32 0.0, %v1369_v3 }
 0x16f   :  { %5895 = vst [vmem:[#allocation98_spill] sm:$0xff] %v4129_v1  ;;  %v1086_v2 = vsub.f32 %v5898_v16, %v5756_v11  ;;  %v1623_v22 = vmul.f32 1.3888888, %v1495_v24  ;;  %v1624_v52 = vmul.f32 1.3888888, %v1496_v0  ;;  %v1339_v29 = vadd.f32 %v5900_v10, %v5899_v61  ;;  %v5904_v16 = vld [vmem:[#allocation116_spill] sm:$0xff] }
 0x170   :  { %v4140_v63 = vpop.eup %2654  ;;  %v853_v18 = vadd.f32 %v725_v60, %v364_v23  ;;  %v1213_v27 = vmul.f32 %v1085_v62, %v1085_v62  ;;  %v1340_v59 = vadd.f32 %v5902_v57, %v851_v17  ;;  %v1466_v3 = vsub.f32 0.0, %v5904_v16  ;;  %v5908_v62 = vld [vmem:[#allocation19_spill] sm:$0xff]  ;;  %v4157_v16 = vpop.permute.xlu1 %120 }
 0x171   :  { %5901 = vst [vmem:[#allocation85_spill] sm:$0xff] %v4140_v63  ;;  %v1214_v12 = vmul.f32 %v1086_v2, %v1086_v2  ;;  %v4143_v38 = vpop.eup %2656  ;;  %v1973_v1 = vadd.f32 %v4140_v63, %v1972_v6  ;;  %v1823_v15 = vmul.f32 1.442695, %v1623_v22  ;;  %v1825_v26 = vmul.f32 1.442695, %v1624_v52  ;;  %5910 = vst [vmem:[#allocation111_spill] sm:$0xff] %v4157_v16 }
 0x172   :  { %5903 = vst [vmem:[#allocation99_spill] sm:$0xff] %v4143_v38  ;;  %v4147_v24 = vpop.eup %2658  ;;  %v1341_v0 = vadd.f32 %v1213_v27, %v852_v28  ;;  %v1467_v10 = vsub.f32 0.0, %v1339_v29  ;;  %v1468_v61 = vsub.f32 0.0, %v1340_v59  ;;  %v4152_v60 = vmul.f32 1.3888888, %v1497_v9 }
 0x173   :  { %5905 = vst [vmem:[#allocation102_spill] sm:$0xff] %v4147_v24  ;;  %v1342_v7 = vadd.f32 %v1214_v12, %v853_v18  ;;  %v4149_v4 = vpop.eup %2660  ;;  %v1974_v23 = vadd.f32 %v4143_v38, %v1973_v1  ;;  %v1594_v17 = vmul.f32 1.3888888, %v1466_v3  ;;  %v1763_v2 = vmul.f32 1.442695, %v5908_v62 }
 0x174   :  { %5906 = vst [vmem:[#allocation101_spill] sm:$0xff] %v4149_v4  ;;  %5907 = vst [vmem:[#allocation109_spill] sm:$0xff] %v4152_v60  ;;  %v4155_v6 = vpop.eup %2662  ;;  %2664 = vpow2.f32 %v1823_v15  ;;  %v1469_v22 = vsub.f32 0.0, %v1341_v0  ;;  %v1595_v57 = vmul.f32 1.3888888, %v1467_v10  ;;  %v269_v15 = vsub.f32 %v4157_v16, %v3013_v39 }
 0x175   :  { %5909 = vst [vmem:[#allocation110_spill] sm:$0xff] %v4155_v6  ;;  %v1470_v52 = vsub.f32 0.0, %v1342_v7  ;;  %v1975_v27 = vadd.f32 %v4147_v24, %v1974_v23  ;;  %v1596_v28 = vmul.f32 1.3888888, %v1468_v61  ;;  %2666 = vpow2.f32 %v1763_v2  ;;  %v5911_v23 = vld [vmem:[#allocation22_spill] sm:$0xff] }
 0x176   :  { %v1765_v29 = vmul.f32 1.442695, %v1594_v17  ;;  %2668 = vpow2.f32 %v1825_v26  ;;  %v1597_v1 = vmul.f32 1.3888888, %v1469_v22  ;;  %v1767_v18 = vmul.f32 1.442695, %v1595_v57 }
 0x177   :  { %v1598_v9 = vmul.f32 1.3888888, %v1470_v52  ;;  %v1976_v12 = vadd.f32 %v4149_v4, %v1975_v27  ;;  %v1769_v59 = vmul.f32 1.442695, %v1596_v28  ;;  %v270_v0 = vsub.f32 %v4157_v16, %v3015_v40  ;;  %v5912_v17 = vld [vmem:[#allocation24_spill] sm:$0xff]  ;;  %v4176_v52 = vpop.permute.xlu1 %486 }
 0x178   :  { %2670 = vpow2.f32 %v1765_v29  ;;  %v1771_v7 = vmul.f32 1.442695, %v1597_v1  ;;  %v271_v26 = vsub.f32 %v4157_v16, %v3017_v41  ;;  %v272_v61 = vsub.f32 %v4157_v16, %v3019_v42  ;;  %5913 = vst [vmem:[#allocation112_spill] sm:$0xff] %v4176_v52  ;;  %v4180_v29 = vpop.permute.xlu0 %975 }
 0x179   :  { %2672 = vpow2.f32 %v1767_v18  ;;  %v1773_v3 = vmul.f32 1.442695, %v1598_v9  ;;  %v1977_v10 = vadd.f32 %v4155_v6, %v1976_v12  ;;  %v1980_v62 = vadd.f32 %v5912_v17, %v5911_v23  ;;  %5914 = vst [vmem:[#allocation54_spill] sm:$0xff] %v4180_v29 }
 0x17a   :  { %2674 = vpow2.f32 %v1769_v59  ;;  %v273_v2 = vsub.f32 %v4157_v16, %v3021_v43  ;;  %v274_v22 = vsub.f32 %v4157_v16, %v3023_v44  ;;  %v275_v57 = vsub.f32 %v4157_v16, %v5765_v58 }
 0x17b   :  { %2676 = vpow2.f32 %v1771_v7  ;;  %1978 = vadd.xlane.f32.xlu0 %v1977_v10  ;;  %v397_v27 = vmul.f32 %v269_v15, %v269_v15  ;;  %v398_v28 = vmul.f32 %v270_v0, %v270_v0  ;;  %v399_v1 = vmul.f32 %v271_v26, %v271_v26 }
 0x17c   :  { %2678 = vpow2.f32 %v1773_v3  ;;  %v400_v9 = vmul.f32 %v272_v61, %v272_v61  ;;  %v401_v18 = vmul.f32 %v273_v2, %v273_v2  ;;  %v4182_v12 = vmul.f32 %v274_v22, %v274_v22 }
 0x17d   :  { %v630_v59 = vsub.f32 %v4176_v52, %v2998_v30  ;;  %v631_v7 = vsub.f32 %v4176_v52, %v3000_v31  ;;  %v632_v3 = vsub.f32 %v4176_v52, %v3002_v32  ;;  %v633_v15 = vsub.f32 %v4176_v52, %v3004_v33 }
 0x17e   :  { %5915 = vst [vmem:[#allocation25_spill] sm:$0xff] %v4182_v12  ;;  %v4192_v0 = vpop.eup %2664  ;;  %v634_v10 = vsub.f32 %v4176_v52, %v3007_v35  ;;  %v635_v26 = vsub.f32 %v4176_v52, %v3009_v36  ;;  %v636_v61 = vsub.f32 %v4176_v52, %v3011_v37  ;;  %v1119_v2 = vsub.f32 %v4180_v29, %v3027_v46 }
 0x17f   :  { %5916 = vst [vmem:[#allocation100_spill] sm:$0xff] %v4192_v0  ;;  %v4202_v22 = vpop.eup %2666  ;;  %v758_v4 = vmul.f32 %v630_v59, %v630_v59  ;;  %v759_v38 = vmul.f32 %v631_v7, %v631_v7  ;;  %v760_v6 = vmul.f32 %v632_v3, %v632_v3  ;;  %v761_v24 = vmul.f32 %v633_v15, %v633_v15 }
 0x180   :  { %5917 = vst [vmem:[#allocation30_spill] sm:$0xff] %v4202_v22  ;;  %v4204_v23 = vpop.eup %2668  ;;  %v1981_v63 = vadd.f32 %v4202_v22, %v1980_v62  ;;  %v4207_v17 = vmul.f32 %v275_v57, %v275_v57  ;;  %v762_v12 = vmul.f32 %v634_v10, %v634_v10  ;;  %v4209_v16 = vmul.f32 %v635_v26, %v635_v26 }
 0x181   :  { %5918 = vst [vmem:[#allocation103_spill] sm:$0xff] %v4204_v23  ;;  %v4213_v52 = vmul.f32 %v636_v61, %v636_v61  ;;  %v886_v60 = vadd.f32 %v758_v4, %v397_v27  ;;  %v887_v19 = vadd.f32 %v759_v38, %v398_v28  ;;  %v888_v8 = vadd.f32 %v760_v6, %v399_v1  ;;  %v5926_v1 = vld [vmem:[#allocation16_spill] sm:$0xff] }
 0x182   :  { %5919 = vst [vmem:[#allocation32_spill] sm:$0xff] %v4207_v17  ;;  %5920 = vst [vmem:[#allocation104_spill] sm:$0xff] %v4209_v16  ;;  %v4211_v0 = vpop.eup %2670  ;;  %v889_v3 = vadd.f32 %v761_v24, %v400_v9  ;;  %v1120_v62 = vsub.f32 %v4180_v29, %v3029_v47  ;;  %v1121_v57 = vsub.f32 %v4180_v29, %v3031_v48 }
 0x183   :  { %5921 = vst [vmem:[#allocation105_spill] sm:$0xff] %v4211_v0  ;;  %5922 = vst [vmem:[#allocation107_spill] sm:$0xff] %v4213_v52  ;;  %v4215_v59 = vpop.eup %2672  ;;  %v1982_v7 = vadd.f32 %v4211_v0, %v1981_v63  ;;  %v1122_v10 = vsub.f32 %v4180_v29, %v3033_v49  ;;  %v1123_v4 = vsub.f32 %v4180_v29, %v3035_v50 }
 0x184   :  { %5923 = vst [vmem:[#allocation113_spill] sm:$0xff] %v4215_v59  ;;  %v4222_v15 = vpop.eup %2674  ;;  %v1124_v38 = vsub.f32 %v4180_v29, %v3042_v53  ;;  %v1247_v6 = vmul.f32 %v1119_v2, %v1119_v2  ;;  %v1248_v27 = vmul.f32 %v1120_v62, %v1120_v62  ;;  %v1249_v28 = vmul.f32 %v1121_v57, %v1121_v57 }
 0x185   :  { %5924 = vst [vmem:[#allocation114_spill] sm:$0xff] %v4222_v15  ;;  %v4230_v63 = vpop.eup %2676  ;;  %v1983_v24 = vadd.f32 %v4215_v59, %v1982_v7  ;;  %v244_v9 = vsub.f32 %v5926_v1, %v3044_v54  ;;  %v4237_v61 = vadd.f32 %v762_v12, %v401_v18  ;;  %v1250_v22 = vmul.f32 %v1122_v10, %v1122_v10  ;;  %v5932_v1 = vld [vmem:[#allocation8_spill] sm:$0xff]  ;;  %v5933_v10 = vld [vmem:[#allocation9_spill] sm:$0xff] }
 0x186   :  { %5925 = vst [vmem:[#allocation116_spill] sm:$0xff] %v4230_v63  ;;  %v4235_v26 = vpop.eup %2678  ;;  %v4239_v0 = vmul.f32 %v1123_v4, %v1123_v4  ;;  %v1375_v52 = vadd.f32 %v1247_v6, %v886_v60  ;;  %v4242_v2 = vmul.f32 %v1124_v38, %v1124_v38  ;;  %v1376_v17 = vadd.f32 %v1248_v27, %v887_v19  ;;  %v5934_v4 = vld [vmem:[#allocation5_spill] sm:$0xff]  ;;  %v5935_v60 = vld [vmem:[#allocation23_spill] sm:$0xff] }
 0x187   :  { %5927 = vst [vmem:[#allocation19_spill] sm:$0xff] %v4235_v26  ;;  %5928 = vst [vmem:[#allocation16_spill] sm:$0xff] %v4237_v61  ;;  %v1984_v29 = vadd.f32 %v4222_v15, %v1983_v24  ;;  %v1377_v16 = vadd.f32 %v1249_v28, %v888_v8  ;;  %v4244_v7 = vadd.f32 %v1250_v22, %v889_v3  ;;  %v5936_v6 = vld [vmem:[#allocation117_spill] sm:$0xff] }
 0x188   :  { %5929 = vst [vmem:[#allocation135_spill] sm:$0xff] %v4239_v0  ;;  %5930 = vst [vmem:[#allocation136_spill] sm:$0xff] %v4242_v2  ;;  %v1503_v62 = vsub.f32 0.0, %v1375_v52  ;;  %v372_v57 = vmul.f32 %v244_v9, %v244_v9  ;;  %v605_v59 = vsub.f32 %v5932_v1, %v3046_v55  ;;  %v1504_v12 = vsub.f32 0.0, %v1376_v17  ;;  %v5937_v8 = vld [vmem:[#allocation21_spill] sm:$0xff]  ;;  %v5939_v17 = vld [vmem:[#allocation123_spill] sm:$0xff] }
 0x189   :  { %5931 = vst [vmem:[#allocation137_spill] sm:$0xff] %v4244_v7  ;;  %v1985_v18 = vadd.f32 %v4230_v63, %v1984_v29  ;;  %v859_v0 = vadd.f32 %v5934_v4, %v5933_v10  ;;  %v860_v24 = vadd.f32 %v5936_v6, %v5935_v60  ;;  %v1093_v19 = vsub.f32 %v5937_v8, %v5754_v13  ;;  %v5938_v29 = vld [vmem:[#allocation122_spill] sm:$0xff]  ;;  %v5941_v6 = vld [vmem:[#allocation128_spill] sm:$0xff] }
 0x18a   :  { %v1631_v38 = vmul.f32 1.3888888, %v1503_v62  ;;  %v733_v15 = vmul.f32 %v605_v59, %v605_v59  ;;  %v1094_v52 = vsub.f32 %v5937_v8, %v5756_v11  ;;  %v1505_v3 = vsub.f32 0.0, %v1377_v16  ;;  %v5940_v59 = vld [vmem:[#allocation125_spill] sm:$0xff] }
 0x18b   :  { %v1986_v22 = vadd.f32 %v4235_v26, %v1985_v18  ;;  %v1632_v27 = vmul.f32 1.3888888, %v1504_v12  ;;  %v1347_v28 = vadd.f32 %v5939_v17, %v5938_v29  ;;  %v1221_v10 = vmul.f32 %v1093_v19, %v1093_v19  ;;  %v5942_v18 = vld [vmem:[#allocation129_spill] sm:$0xff]  ;;  %v4263_v12 = vpop.permute.xlu1 %490  ;;  %v5959_v26 = vld [vmem:[#allocation66_spill] sm:$0xff] }
 0x18c   :  { %v1839_v9 = vmul.f32 1.442695, %v1631_v38  ;;  %v861_v1 = vadd.f32 %v733_v15, %v372_v57  ;;  %v1222_v4 = vmul.f32 %v1094_v52, %v1094_v52  ;;  %v1348_v60 = vadd.f32 %v5940_v59, %v859_v0  ;;  %5943 = vst [vmem:[#allocation8_spill] sm:$0xff] %v4263_v12 }
 0x18d   :  { %1987 = vadd.xlane.f32.xlu1 %v1986_v22  ;;  %v1841_v62 = vmul.f32 1.442695, %v1632_v27  ;;  %v1474_v63 = vsub.f32 0.0, %v5941_v6  ;;  %v1475_v7 = vsub.f32 0.0, %v1347_v28  ;;  %v1349_v8 = vadd.f32 %v1221_v10, %v860_v24  ;;  %v5945_v6 = vld [vmem:[#allocation132_spill] sm:$0xff] }
 0x18e   :  { %2680 = vpow2.f32 %v1839_v9  ;;  %v1350_v2 = vadd.f32 %v1222_v4, %v861_v1  ;;  %v1779_v16 = vmul.f32 1.442695, %v5942_v18  ;;  %v1476_v29 = vsub.f32 0.0, %v1348_v60 }
 0x18f   :  { %2682 = vpow2.f32 %v1841_v62  ;;  %v1602_v38 = vmul.f32 1.3888888, %v1474_v63  ;;  %v1603_v15 = vmul.f32 1.3888888, %v1475_v7  ;;  %v4265_v57 = vmul.f32 1.3888888, %v1505_v3 }
 0x190   :  { %v1477_v19 = vsub.f32 0.0, %v1349_v8  ;;  %v1478_v52 = vsub.f32 0.0, %v1350_v2  ;;  %2684 = vpow2.f32 %v1779_v16  ;;  %v1604_v0 = vmul.f32 1.3888888, %v1476_v29  ;;  %v5946_v8 = vld [vmem:[#allocation7_spill] sm:$0xff] }
 0x191   :  { %5944 = vst [vmem:[#allocation9_spill] sm:$0xff] %v4265_v57  ;;  %v1781_v22 = vmul.f32 1.442695, %v1602_v38  ;;  %v1783_v27 = vmul.f32 1.442695, %v1603_v15  ;;  %v638_v24 = vsub.f32 %v4263_v12, %v2998_v30  ;;  %v639_v9 = vsub.f32 %v4263_v12, %v3000_v31  ;;  %v4283_v38 = vpop.permute.xlu1 %979 }
 0x192   :  { %v1605_v17 = vmul.f32 1.3888888, %v1477_v19  ;;  %v1606_v28 = vmul.f32 1.3888888, %v1478_v52  ;;  %v640_v63 = vsub.f32 %v4263_v12, %v3002_v32  ;;  %v1785_v7 = vmul.f32 1.442695, %v1604_v0 }
 0x193   :  { %2686 = vpow2.f32 %v1781_v22  ;;  %v641_v2 = vsub.f32 %v4263_v12, %v3004_v33  ;;  %v642_v3 = vsub.f32 %v4263_v12, %v3007_v35  ;;  %v643_v4 = vsub.f32 %v4263_v12, %v3009_v36  ;;  %5947 = vst [vmem:[#allocation5_spill] sm:$0xff] %v4283_v38  ;;  %v5951_v22 = vld [vmem:[#allocation62_spill] sm:$0xff] }
 0x194   :  { %2688 = vpow2.f32 %v1783_v27  ;;  %v1787_v1 = vmul.f32 1.442695, %v1605_v17  ;;  %v1789_v10 = vmul.f32 1.442695, %v1606_v28  ;;  %v644_v62 = vsub.f32 %v4263_v12, %v3011_v37  ;;  %v5953_v28 = vld [vmem:[#allocation64_spill] sm:$0xff] }
 0x195   :  { %2690 = vpow2.f32 %v1785_v7  ;;  %v766_v59 = vmul.f32 %v638_v24, %v638_v24  ;;  %v767_v60 = vmul.f32 %v639_v9, %v639_v9  ;;  %v1989_v18 = vadd.f32 %v5946_v8, %v5945_v6  ;;  %v5952_v24 = vld [vmem:[#allocation63_spill] sm:$0xff]  ;;  %v5954_v7 = vld [vmem:[#allocation65_spill] sm:$0xff] }
 0x196   :  { %2692 = vpow2.f32 %v1787_v1  ;;  %v768_v16 = vmul.f32 %v640_v63, %v640_v63  ;;  %v769_v29 = vmul.f32 %v641_v2, %v641_v2  ;;  %v770_v15 = vmul.f32 %v642_v3, %v642_v3 }
 0x197   :  { %2694 = vpow2.f32 %v1789_v10  ;;  %v4285_v19 = vmul.f32 %v643_v4, %v643_v4  ;;  %v4287_v52 = vmul.f32 %v644_v62, %v644_v62  ;;  %v894_v27 = vadd.f32 %v766_v59, %v5951_v22  ;;  %v5958_v22 = vld [vmem:[#allocation118_spill] sm:$0xff] }
 0x198   :  { %v4289_v0 = vpop.eup %2680  ;;  %v895_v17 = vadd.f32 %v767_v60, %v5952_v24  ;;  %v896_v9 = vadd.f32 %v768_v16, %v5953_v28  ;;  %v897_v1 = vadd.f32 %v769_v29, %v5954_v7  ;;  %v1127_v2 = vsub.f32 %v4283_v38, %v3027_v46  ;;  %v5957_v16 = vld [vmem:[#allocation31_spill] sm:$0xff] }
 0x199   :  { %5948 = vst [vmem:[#allocation23_spill] sm:$0xff] %v4285_v19  ;;  %5949 = vst [vmem:[#allocation117_spill] sm:$0xff] %v4287_v52  ;;  %v4295_v63 = vpop.eup %2682  ;;  %v1128_v3 = vsub.f32 %v4283_v38, %v3029_v47  ;;  %v1129_v10 = vsub.f32 %v4283_v38, %v3031_v48  ;;  %v1130_v4 = vsub.f32 %v4283_v38, %v3033_v49 }
 0x19a   :  { %5950 = vst [vmem:[#allocation21_spill] sm:$0xff] %v4289_v0  ;;  %5955 = vst [vmem:[#allocation122_spill] sm:$0xff] %v4295_v63  ;;  %v4305_v62 = vpop.eup %2684  ;;  %v1131_v59 = vsub.f32 %v4283_v38, %v3035_v50  ;;  %v1132_v60 = vsub.f32 %v4283_v38, %v3042_v53  ;;  %v252_v29 = vsub.f32 %v5957_v16, %v3044_v54 }
 0x19b   :  { %5956 = vst [vmem:[#allocation123_spill] sm:$0xff] %v4305_v62  ;;  %v613_v24 = vsub.f32 %v5958_v22, %v3046_v55  ;;  %v1990_v28 = vadd.f32 %v4305_v62, %v1989_v18  ;;  %v1255_v7 = vmul.f32 %v1127_v2, %v1127_v2  ;;  %v1256_v6 = vmul.f32 %v1128_v3, %v1128_v3  ;;  %v5965_v3 = vld [vmem:[#allocation41_spill] sm:$0xff] }
 0x19c   :  { %v1257_v8 = vmul.f32 %v1129_v10, %v1129_v10  ;;  %v4317_v52 = vadd.f32 %v770_v15, %v5959_v26  ;;  %v1258_v19 = vmul.f32 %v1130_v4, %v1130_v4  ;;  %v4319_v12 = vmul.f32 %v1131_v59, %v1131_v59  ;;  %v5966_v10 = vld [vmem:[#allocation130_spill] sm:$0xff]  ;;  %v5967_v15 = vld [vmem:[#allocation45_spill] sm:$0xff]  ;;  %v5968_v4 = vld [vmem:[#allocation131_spill] sm:$0xff] }
 0x19d   :  { %v380_v63 = vmul.f32 %v252_v29, %v252_v29  ;;  %v4321_v0 = vpop.eup %2686  ;;  %v1383_v38 = vadd.f32 %v1255_v7, %v894_v27  ;;  %v1384_v57 = vadd.f32 %v1256_v6, %v895_v17  ;;  %v741_v61 = vmul.f32 %v613_v24, %v613_v24  ;;  %v5973_v7 = vld [vmem:[#allocation38_spill] sm:$0xff] }
 0x19e   :  { %5960 = vst [vmem:[#allocation125_spill] sm:$0xff] %v4317_v52  ;;  %5961 = vst [vmem:[#allocation128_spill] sm:$0xff] %v4319_v12  ;;  %v1385_v16 = vadd.f32 %v1257_v8, %v896_v9  ;;  %v4323_v23 = vpop.eup %2688  ;;  %v1991_v18 = vadd.f32 %v4321_v0, %v1990_v28  ;;  %v4326_v2 = vmul.f32 %v1132_v60, %v1132_v60  ;;  %v5971_v9 = vld [vmem:[#allocation126_spill] sm:$0xff]  ;;  %v5972_v28 = vld [vmem:[#allocation37_spill] sm:$0xff] }
 0x19f   :  { %5962 = vst [vmem:[#allocation129_spill] sm:$0xff] %v4321_v0  ;;  %5963 = vst [vmem:[#allocation62_spill] sm:$0xff] %v4323_v23  ;;  %v867_v26 = vadd.f32 %v5966_v10, %v5965_v3  ;;  %v868_v59 = vadd.f32 %v5968_v4, %v5967_v15  ;;  %v4332_v22 = vpop.eup %2690  ;;  %v1511_v29 = vsub.f32 0.0, %v1383_v38  ;;  %v1512_v62 = vsub.f32 0.0, %v1384_v57 }
 0x1a0   :  { %5964 = vst [vmem:[#allocation63_spill] sm:$0xff] %v4326_v2  ;;  %5969 = vst [vmem:[#allocation64_spill] sm:$0xff] %v4332_v22  ;;  %v1513_v27 = vsub.f32 0.0, %v1385_v16  ;;  %v869_v6 = vadd.f32 %v741_v61, %v380_v63  ;;  %v4334_v8 = vpop.eup %2692  ;;  %v1992_v17 = vadd.f32 %v4323_v23, %v1991_v18  ;;  %v1101_v60 = vsub.f32 %v5971_v9, %v5754_v13  ;;  %v5976_v61 = vld [vmem:[#allocation39_spill] sm:$0xff]  ;;  %v5977_v23 = vld [vmem:[#allocation40_spill] sm:$0xff] }
 0x1a1   :  { %5970 = vst [vmem:[#allocation65_spill] sm:$0xff] %v4334_v8  ;;  %v1102_v24 = vsub.f32 %v5971_v9, %v5756_v11  ;;  %v1355_v3 = vadd.f32 %v5973_v7, %v5972_v28  ;;  %v4343_v10 = vpop.eup %2694  ;;  %v1639_v15 = vmul.f32 1.3888888, %v1511_v29  ;;  %v1640_v38 = vmul.f32 1.3888888, %v1512_v62 }
 0x1a2   :  { %5974 = vst [vmem:[#allocation31_spill] sm:$0xff] %v4343_v10  ;;  %v4345_v57 = vmul.f32 1.3888888, %v1513_v27  ;;  %v1356_v63 = vadd.f32 %v5976_v61, %v867_v26  ;;  %v1993_v16 = vadd.f32 %v4332_v22, %v1992_v17  ;;  %v1229_v18 = vmul.f32 %v1101_v60, %v1101_v60  ;;  %v5978_v26 = vld [vmem:[#allocation133_spill] sm:$0xff]  ;;  %v4354_v17 = vpop.permute.xlu1 %130 }
 0x1a3   :  { %v1230_v4 = vmul.f32 %v1102_v24, %v1102_v24  ;;  %v1482_v0 = vsub.f32 0.0, %v5977_v23  ;;  %v1855_v2 = vmul.f32 1.442695, %v1639_v15  ;;  %v1857_v12 = vmul.f32 1.442695, %v1640_v38  ;;  %5979 = vst [vmem:[#allocation66_spill] sm:$0xff] %v4354_v17 }
 0x1a4   :  { %5975 = vst [vmem:[#allocation118_spill] sm:$0xff] %v4345_v57  ;;  %v1483_v9 = vsub.f32 0.0, %v1355_v3  ;;  %v1484_v52 = vsub.f32 0.0, %v1356_v63  ;;  %v1994_v28 = vadd.f32 %v4334_v8, %v1993_v16  ;;  %v1357_v7 = vadd.f32 %v1229_v18, %v868_v59 }
 0x1a5   :  { %v1358_v21 = vadd.f32 %v1230_v4, %v869_v6  ;;  %v1610_v29 = vmul.f32 1.3888888, %v1482_v0  ;;  %v4351_v62 = vadd.f32 %v1258_v19, %v897_v1  ;;  %v1795_v61 = vmul.f32 1.442695, %v5978_v26  ;;  %v4377_v26 = vpop.permute.xlu0 %983 }
 0x1a6   :  { %v1611_v27 = vmul.f32 1.3888888, %v1483_v9  ;;  %v1612_v57 = vmul.f32 1.3888888, %v1484_v52  ;;  %v1995_v60 = vadd.f32 %v4343_v10, %v1994_v28  ;;  %2696 = vpow2.f32 %v1855_v2  ;;  %v4373_v28 = vpop.permute.xlu1 %494  ;;  %5982 = vst [vmem:[#allocation45_spill] sm:$0xff] %v4377_v26 }
 0x1a7   :  { %v1485_v23 = vsub.f32 0.0, %v1357_v7  ;;  %v1486_v24 = vsub.f32 0.0, %v1358_v21  ;;  %2698 = vpow2.f32 %v1795_v61  ;;  %v1797_v3 = vmul.f32 1.442695, %v1610_v29  ;;  %5980 = vst [vmem:[#allocation41_spill] sm:$0xff] %v4373_v28 }
 0x1a8   :  { %v1799_v15 = vmul.f32 1.442695, %v1611_v27  ;;  %v1801_v38 = vmul.f32 1.442695, %v1612_v57  ;;  %1996 = vadd.xlane.f32.xlu0 %v1995_v60  ;;  %2700 = vpow2.f32 %v1857_v12  ;;  %v285_v52 = vsub.f32 %v4354_v17, %v3013_v39 }
 0x1a9   :  { %v1613_v0 = vmul.f32 1.3888888, %v1485_v23  ;;  %v1614_v19 = vmul.f32 1.3888888, %v1486_v24  ;;  %2702 = vpow2.f32 %v1797_v3  ;;  %v286_v1 = vsub.f32 %v4354_v17, %v3015_v40 }
 0x1aa   :  { %v287_v2 = vsub.f32 %v4354_v17, %v3017_v41  ;;  %v288_v21 = vsub.f32 %v4354_v17, %v3019_v42  ;;  %2704 = vpow2.f32 %v1799_v15  ;;  %v289_v12 = vsub.f32 %v4354_v17, %v3021_v43 }
 0x1ab   :  { %v1803_v59 = vmul.f32 1.442695, %v1613_v0  ;;  %v1805_v6 = vmul.f32 1.442695, %v1614_v19  ;;  %2706 = vpow2.f32 %v1801_v38  ;;  %v1998_v57 = vadd.f32 %v3926_v45, %v3916_v25 }
 0x1ac   :  { %v290_v63 = vsub.f32 %v4354_v17, %v3023_v44  ;;  %v291_v16 = vsub.f32 %v4354_v17, %v5765_v58  ;;  %v413_v18 = vmul.f32 %v285_v52, %v285_v52  ;;  %v414_v4 = vmul.f32 %v286_v1, %v286_v1 }
 0x1ad   :  { %2708 = vpow2.f32 %v1803_v59  ;;  %v415_v9 = vmul.f32 %v287_v2, %v287_v2  ;;  %v416_v7 = vmul.f32 %v288_v21, %v288_v21  ;;  %v417_v29 = vmul.f32 %v289_v12, %v289_v12 }
 0x1ae   :  { %2710 = vpow2.f32 %v1805_v6  ;;  %v4375_v27 = vmul.f32 %v290_v63, %v290_v63  ;;  %v1135_v61 = vsub.f32 %v4377_v26, %v3027_v46  ;;  %v1136_v60 = vsub.f32 %v4377_v26, %v3029_v47 }
 0x1af   :  { %v1137_v23 = vsub.f32 %v4377_v26, %v3031_v48  ;;  %v1138_v24 = vsub.f32 %v4377_v26, %v3033_v49  ;;  %v4387_v3 = vmul.f32 %v291_v16, %v291_v16  ;;  %v1139_v15 = vsub.f32 %v4377_v26, %v3035_v50 }
 0x1b0   :  { %5981 = vst [vmem:[#allocation130_spill] sm:$0xff] %v4375_v27  ;;  %v646_v38 = vsub.f32 %v4373_v28, %v2998_v30  ;;  %v647_v0 = vsub.f32 %v4373_v28, %v3000_v31  ;;  %v4395_v19 = vpop.eup %2696  ;;  %v1140_v52 = vsub.f32 %v4377_v26, %v3042_v53  ;;  %v1263_v1 = vmul.f32 %v1135_v61, %v1135_v61 }
 0x1b1   :  { %5983 = vst [vmem:[#allocation131_spill] sm:$0xff] %v4387_v3  ;;  %v1264_v2 = vmul.f32 %v1136_v60, %v1136_v60  ;;  %v1265_v21 = vmul.f32 %v1137_v23, %v1137_v23  ;;  %v4399_v59 = vpop.eup %2698  ;;  %v4401_v6 = vmul.f32 %v1138_v24, %v1138_v24  ;;  %v4403_v12 = vmul.f32 %v1139_v15, %v1139_v15 }
 0x1b2   :  { %5984 = vst [vmem:[#allocation126_spill] sm:$0xff] %v4399_v59  ;;  %v648_v63 = vsub.f32 %v4373_v28, %v3002_v32  ;;  %v649_v16 = vsub.f32 %v4373_v28, %v3004_v33  ;;  %v4409_v8 = vpop.eup %2700  ;;  %v1999_v10 = vadd.f32 %v4399_v59, %v1998_v57  ;;  %v650_v61 = vsub.f32 %v4373_v28, %v3007_v35 }
 0x1b3   :  { %5985 = vst [vmem:[#allocation37_spill] sm:$0xff] %v4401_v6  ;;  %5986 = vst [vmem:[#allocation38_spill] sm:$0xff] %v4403_v12  ;;  %v651_v60 = vsub.f32 %v4373_v28, %v3009_v36  ;;  %v652_v23 = vsub.f32 %v4373_v28, %v3011_v37  ;;  %v4418_v24 = vpop.eup %2702  ;;  %v774_v15 = vmul.f32 %v646_v38, %v646_v38  ;;  %v4420_v12 = vpop.permute.xlu0 %991 }
 0x1b4   :  { %5987 = vst [vmem:[#allocation39_spill] sm:$0xff] %v4409_v8  ;;  %5988 = vst [vmem:[#allocation40_spill] sm:$0xff] %v4418_v24  ;;  %v775_v22 = vmul.f32 %v647_v0, %v647_v0  ;;  %v776_v25 = vmul.f32 %v648_v63, %v648_v63  ;;  %v777_v45 = vmul.f32 %v649_v16, %v649_v16  ;;  %v4422_v6 = vpop.eup %2704 }
 0x1b5   :  { %5989 = vst [vmem:[#allocation133_spill] sm:$0xff] %v4420_v12  ;;  %5990 = vst [vmem:[#allocation138_spill] sm:$0xff] %v4422_v6  ;;  %v2000_v57 = vadd.f32 %v4418_v24, %v1999_v10  ;;  %v4425_v59 = vmul.f32 %v1140_v52, %v1140_v52  ;;  %v778_v26 = vmul.f32 %v650_v61, %v650_v61  ;;  %v4429_v27 = vpop.eup %2706  ;;  %v1490_v24 = vsub.f32 0.0, %v3957_v34 }
 0x1b6   :  { %v4427_v3 = vmul.f32 %v651_v60, %v651_v60  ;;  %5991 = vst [vmem:[#allocation139_spill] sm:$0xff] %v4429_v27  ;;  %v4431_v28 = vmul.f32 %v652_v23, %v652_v23  ;;  %v902_v17 = vadd.f32 %v774_v15, %v413_v18  ;;  %v903_v38 = vadd.f32 %v775_v22, %v414_v4 }
 0x1b7   :  { %v904_v0 = vadd.f32 %v776_v25, %v415_v9  ;;  %v4433_v63 = vpop.eup %2708  ;;  %v2001_v16 = vadd.f32 %v4422_v6, %v2000_v57  ;;  %v4436_v8 = vadd.f32 %v777_v45, %v416_v7  ;;  %v1151_v10 = vsub.f32 %v4420_v12, %v3027_v46 }
 0x1b8   :  { %5992 = vst [vmem:[#allocation140_spill] sm:$0xff] %v4433_v63  ;;  %v1152_v52 = vsub.f32 %v4420_v12, %v3029_v47  ;;  %v4442_v61 = vpop.eup %2710  ;;  %v4444_v60 = vadd.f32 %v778_v26, %v417_v29  ;;  %v1391_v23 = vadd.f32 %v1263_v1, %v902_v17  ;;  %v1392_v18 = vadd.f32 %v1264_v2, %v903_v38 }
 0x1b9   :  { %5993 = vst [vmem:[#allocation141_spill] sm:$0xff] %v4442_v61  ;;  %v1153_v25 = vsub.f32 %v4420_v12, %v3031_v48  ;;  %v2002_v22 = vadd.f32 %v4429_v27, %v2001_v16  ;;  %v4449_v4 = vadd.f32 %v1265_v21, %v904_v0  ;;  %v1154_v45 = vsub.f32 %v4420_v12, %v3033_v49  ;;  %v5999_v16 = vld [vmem:[#allocation36_spill] sm:$0xff] }
 0x1ba   :  { %v1155_v9 = vsub.f32 %v4420_v12, %v3035_v50  ;;  %v1519_v7 = vsub.f32 0.0, %v1391_v23  ;;  %v1520_v15 = vsub.f32 0.0, %v1392_v18  ;;  %v1156_v29 = vsub.f32 %v4420_v12, %v3042_v53 }
 0x1bb   :  { %5994 = vst [vmem:[#allocation142_spill] sm:$0xff] %v4449_v4  ;;  %v4457_v17 = vmul.f32 %v1151_v10, %v1151_v10  ;;  %v2003_v26 = vadd.f32 %v4433_v63, %v2002_v22  ;;  %v4460_v1 = vmul.f32 %v1152_v52, %v1152_v52  ;;  %v4462_v2 = vmul.f32 %v1153_v25, %v1153_v25  ;;  %v6000_v52 = vld [vmem:[#allocation134_spill] sm:$0xff] }
 0x1bc   :  { %v4464_v21 = vmul.f32 %v1154_v45, %v1154_v45  ;;  %v4466_v57 = vmul.f32 1.3888888, %v1519_v7  ;;  %v4468_v38 = vmul.f32 1.3888888, %v1520_v15  ;;  %v4470_v0 = vmul.f32 %v1155_v9, %v1155_v9  ;;  %v6001_v22 = vld [vmem:[#allocation10_spill] sm:$0xff]  ;;  %v6003_v45 = vld [vmem:[#allocation13_spill] sm:$0xff] }
 0x1bd   :  { %v260_v23 = vsub.f32 %v5999_v16, %v3044_v54  ;;  %v2004_v10 = vadd.f32 %v4442_v61, %v2003_v26  ;;  %v621_v18 = vsub.f32 %v3893_v20, %v3046_v55  ;;  %v875_v25 = vadd.f32 %v6001_v22, %v6000_v52  ;;  %v6002_v63 = vld [vmem:[#allocation6_spill] sm:$0xff]  ;;  %v6004_v15 = vld [vmem:[#allocation12_spill] sm:$0xff]  ;;  %v4490_v22 = vpop.permute.xlu1 %498 }
 0x1be   :  { %5995 = vst [vmem:[#allocation143_spill] sm:$0xff] %v4464_v21  ;;  %5996 = vst [vmem:[#allocation144_spill] sm:$0xff] %v4466_v57  ;;  %v876_v6 = vadd.f32 %v6003_v45, %v6002_v63  ;;  %v1109_v27 = vsub.f32 %v6004_v15, %v5754_v13  ;;  %v1110_v9 = vsub.f32 %v6004_v15, %v5756_v11  ;;  %v6005_v61 = vld [vmem:[#allocation96_spill] sm:$0xff]  ;;  %v1811_v52 = vmul.f32 1.442695, %v3980_v51  ;;  %v6028_v57 = vld [vmem:[#allocation70_spill] sm:$0xff] }
 0x1bf   :  { %5997 = vst [vmem:[#allocation145_spill] sm:$0xff] %v4468_v38  ;;  %5998 = vst [vmem:[#allocation146_spill] sm:$0xff] %v4470_v0  ;;  %v388_v7 = vmul.f32 %v260_v23, %v260_v23  ;;  %v1363_v16 = vadd.f32 %v3950_v14, %v3948_v56  ;;  %2005 = vadd.xlane.f32.xlu1 %v2004_v10  ;;  %v749_v26 = vmul.f32 %v621_v18, %v621_v18  ;;  %v6024_v38 = vld [vmem:[#allocation55_spill] sm:$0xff] }
 0x1c0   :  { %v1364_v20 = vadd.f32 %v6005_v61, %v875_v25  ;;  %6006 = vst [vmem:[#allocation36_spill] sm:$0xff] %v4490_v22  ;;  %v4492_v63 = vmul.f32 %v1156_v29, %v1156_v29  ;;  %v1237_v23 = vmul.f32 %v1109_v27, %v1109_v27  ;;  %v1238_v45 = vmul.f32 %v1110_v9, %v1110_v9 }
 0x1c1   :  { %v1491_v0 = vsub.f32 0.0, %v1363_v16  ;;  %v877_v21 = vadd.f32 %v749_v26, %v388_v7  ;;  %v1618_v12 = vmul.f32 1.3888888, %v1490_v24  ;;  %2712 = vpow2.f32 %v1811_v52 }
 0x1c2   :  { %6007 = vst [vmem:[#allocation134_spill] sm:$0xff] %v4492_v63  ;;  %v1492_v15 = vsub.f32 0.0, %v1364_v20  ;;  %v1365_v14 = vadd.f32 %v1237_v23, %v876_v6  ;;  %v654_v61 = vsub.f32 %v4490_v22, %v2998_v30  ;;  %v655_v34 = vsub.f32 %v4490_v22, %v3000_v31  ;;  %v6013_v63 = vld [vmem:[#allocation76_spill] sm:$0xff] }
 0x1c3   :  { %v1619_v56 = vmul.f32 1.3888888, %v1491_v0  ;;  %v1366_v51 = vadd.f32 %v1238_v45, %v877_v21  ;;  %v1813_v18 = vmul.f32 1.442695, %v1618_v12  ;;  %v656_v27 = vsub.f32 %v4490_v22, %v3002_v32  ;;  %v6008_v12 = vld [vmem:[#allocation49_spill] sm:$0xff] }
 0x1c4   :  { %v1620_v10 = vmul.f32 1.3888888, %v1492_v15  ;;  %v1493_v29 = vsub.f32 0.0, %v1365_v14  ;;  %v657_v24 = vsub.f32 %v4490_v22, %v3004_v33  ;;  %v658_v6 = vsub.f32 %v4490_v22, %v3007_v35 }
 0x1c5   :  { %v1815_v25 = vmul.f32 1.442695, %v1619_v56  ;;  %v1494_v0 = vsub.f32 0.0, %v1366_v51  ;;  %2714 = vpow2.f32 %v1813_v18  ;;  %v659_v9 = vsub.f32 %v4490_v22, %v3009_v36  ;;  %v4510_v51 = vpop.permute.xlu1 %987 }
 0x1c6   :  { %v1817_v7 = vmul.f32 1.442695, %v1620_v10  ;;  %v1621_v21 = vmul.f32 1.3888888, %v1493_v29  ;;  %v2007_v16 = vadd.f32 %v6008_v12, %v4005_v5  ;;  %v660_v26 = vsub.f32 %v4490_v22, %v3011_v37  ;;  %6009 = vst [vmem:[#allocation10_spill] sm:$0xff] %v4510_v51  ;;  %v6012_v5 = vld [vmem:[#allocation75_spill] sm:$0xff] }
 0x1c7   :  { %v782_v20 = vmul.f32 %v654_v61, %v654_v61  ;;  %v1622_v52 = vmul.f32 1.3888888, %v1494_v0  ;;  %2716 = vpow2.f32 %v1815_v25  ;;  %v783_v23 = vmul.f32 %v655_v34, %v655_v34  ;;  %v6014_v0 = vld [vmem:[#allocation77_spill] sm:$0xff]  ;;  %v6015_v34 = vld [vmem:[#allocation78_spill] sm:$0xff] }
 0x1c8   :  { %v784_v45 = vmul.f32 %v656_v27, %v656_v27  ;;  %2718 = vpow2.f32 %v1817_v7  ;;  %v1819_v15 = vmul.f32 1.442695, %v1621_v21  ;;  %v785_v14 = vmul.f32 %v657_v24, %v657_v24 }
 0x1c9   :  { %v786_v56 = vmul.f32 %v658_v6, %v658_v6  ;;  %v1821_v10 = vmul.f32 1.442695, %v1622_v52  ;;  %v4512_v18 = vmul.f32 %v659_v9, %v659_v9  ;;  %v4514_v29 = vmul.f32 %v660_v26, %v660_v26 }
 0x1ca   :  { %v910_v12 = vadd.f32 %v782_v20, %v6012_v5  ;;  %2720 = vpow2.f32 %v1819_v15  ;;  %v911_v61 = vadd.f32 %v783_v23, %v6013_v63  ;;  %v912_v25 = vadd.f32 %v784_v45, %v6014_v0  ;;  %v6017_v45 = vld [vmem:[#allocation43_spill] sm:$0xff] }
 0x1cb   :  { %6010 = vst [vmem:[#allocation6_spill] sm:$0xff] %v4512_v18  ;;  %6011 = vst [vmem:[#allocation13_spill] sm:$0xff] %v4514_v29  ;;  %v913_v27 = vadd.f32 %v785_v14, %v6015_v34  ;;  %v4520_v7 = vpop.eup %2712  ;;  %2722 = vpow2.f32 %v1821_v10  ;;  %v1143_v24 = vsub.f32 %v4510_v51, %v3027_v46  ;;  %v1144_v6 = vsub.f32 %v4510_v51, %v3029_v47  ;;  %v6018_v14 = vld [vmem:[#allocation79_spill] sm:$0xff] }
 0x1cc   :  { %6016 = vst [vmem:[#allocation12_spill] sm:$0xff] %v4520_v7  ;;  %v1145_v9 = vsub.f32 %v4510_v51, %v3031_v48  ;;  %v2008_v5 = vadd.f32 %v4520_v7, %v2007_v16  ;;  %v1146_v63 = vsub.f32 %v4510_v51, %v3033_v49  ;;  %v1147_v21 = vsub.f32 %v4510_v51, %v3035_v50  ;;  %v6021_v34 = vld [vmem:[#allocation35_spill] sm:$0xff] }
 0x1cd   :  { %v1148_v26 = vsub.f32 %v4510_v51, %v3042_v53  ;;  %v1271_v20 = vmul.f32 %v1143_v24, %v1143_v24  ;;  %v1272_v52 = vmul.f32 %v1144_v6, %v1144_v6  ;;  %v268_v15 = vsub.f32 %v6017_v45, %v3044_v54 }
 0x1ce   :  { %v1273_v23 = vmul.f32 %v1145_v9, %v1145_v9  ;;  %v4538_v10 = vadd.f32 %v786_v56, %v6018_v14  ;;  %v1274_v0 = vmul.f32 %v1146_v63, %v1146_v63  ;;  %v4540_v16 = vmul.f32 %v1147_v21, %v1147_v21  ;;  %v6025_v56 = vld [vmem:[#allocation61_spill] sm:$0xff] }
 0x1cf   :  { %v629_v7 = vsub.f32 %v6021_v34, %v3046_v55  ;;  %v4544_v29 = vpop.eup %2714  ;;  %v4546_v18 = vmul.f32 %v1148_v26, %v1148_v26  ;;  %v1399_v51 = vadd.f32 %v1271_v20, %v910_v12  ;;  %v1400_v24 = vadd.f32 %v1272_v52, %v911_v61  ;;  %v6027_v34 = vld [vmem:[#allocation56_spill] sm:$0xff] }
 0x1d0   :  { %6019 = vst [vmem:[#allocation96_spill] sm:$0xff] %v4538_v10  ;;  %6020 = vst [vmem:[#allocation75_spill] sm:$0xff] %v4540_v16  ;;  %v1401_v6 = vadd.f32 %v1273_v23, %v912_v25  ;;  %v2009_v9 = vadd.f32 %v4544_v29, %v2008_v5  ;;  %v396_v22 = vmul.f32 %v268_v15, %v268_v15  ;;  %v6030_v25 = vld [vmem:[#allocation80_spill] sm:$0xff]  ;;  %v6033_v23 = vld [vmem:[#allocation73_spill] sm:$0xff] }
 0x1d1   :  { %6022 = vst [vmem:[#allocation76_spill] sm:$0xff] %v4544_v29  ;;  %6023 = vst [vmem:[#allocation77_spill] sm:$0xff] %v4546_v18  ;;  %v757_v45 = vmul.f32 %v629_v7, %v629_v7  ;;  %v883_v14 = vadd.f32 %v6025_v56, %v6024_v38  ;;  %v4551_v63 = vpop.eup %2716  ;;  %v1527_v21 = vsub.f32 0.0, %v1399_v51  ;;  %v1528_v16 = vsub.f32 0.0, %v1400_v24  ;;  %v6032_v51 = vld [vmem:[#allocation50_spill] sm:$0xff] }
 0x1d2   :  { %6026 = vst [vmem:[#allocation78_spill] sm:$0xff] %v4551_v63  ;;  %v1529_v10 = vsub.f32 0.0, %v1401_v6  ;;  %v884_v4 = vadd.f32 %v6028_v57, %v6027_v34  ;;  %v4555_v26 = vpop.eup %2718  ;;  %v2010_v12 = vadd.f32 %v4551_v63, %v2009_v9  ;;  %v1117_v5 = vsub.f32 %v6030_v25, %v5754_v13 }
 0x1d3   :  { %6029 = vst [vmem:[#allocation43_spill] sm:$0xff] %v4555_v26  ;;  %v885_v61 = vadd.f32 %v757_v45, %v396_v22  ;;  %v1118_v7 = vsub.f32 %v6030_v25, %v5756_v11  ;;  %v1655_v38 = vmul.f32 1.3888888, %v1527_v21  ;;  %v1656_v20 = vmul.f32 1.3888888, %v1528_v16  ;;  %v6035_v22 = vld [vmem:[#allocation89_spill] sm:$0xff] }
 0x1d4   :  { %v4562_v52 = vmul.f32 1.3888888, %v1529_v10  ;;  %v1371_v15 = vadd.f32 %v6033_v23, %v6032_v51  ;;  %v4566_v24 = vpop.eup %2720  ;;  %v2011_v57 = vadd.f32 %v4555_v26, %v2010_v12  ;;  %v1245_v6 = vmul.f32 %v1117_v5, %v1117_v5  ;;  %v6037_v25 = vld [vmem:[#allocation84_spill] sm:$0xff]  ;;  %v6038_v5 = vld [vmem:[#allocation109_spill] sm:$0xff]  ;;  %v4577_v26 = vpop.permute.xlu1 %140 }
 0x1d5   :  { %6034 = vst [vmem:[#allocation35_spill] sm:$0xff] %v4566_v24  ;;  %v1246_v9 = vmul.f32 %v1118_v7, %v1118_v7  ;;  %v1372_v45 = vadd.f32 %v6035_v22, %v883_v14  ;;  %v4570_v56 = vpop.eup %2722  ;;  %v1887_v34 = vmul.f32 1.442695, %v1655_v38  ;;  %v1889_v63 = vmul.f32 1.442695, %v1656_v20 }
 0x1d6   :  { %6031 = vst [vmem:[#allocation79_spill] sm:$0xff] %v4562_v52  ;;  %6036 = vst [vmem:[#allocation55_spill] sm:$0xff] %v4570_v56  ;;  %v1498_v21 = vsub.f32 0.0, %v6037_v25  ;;  %v1499_v16 = vsub.f32 0.0, %v1371_v15  ;;  %v2012_v10 = vadd.f32 %v4566_v24, %v2011_v57  ;;  %v1373_v29 = vadd.f32 %v1245_v6, %v884_v4 }
 0x1d7   :  { %v1374_v52 = vadd.f32 %v1246_v9, %v885_v61  ;;  %v1500_v51 = vsub.f32 0.0, %v1372_v45  ;;  %v4574_v23 = vadd.f32 %v1274_v0, %v913_v27  ;;  %v1827_v7 = vmul.f32 1.442695, %v6038_v5  ;;  %v6040_v45 = vld [vmem:[#allocation103_spill] sm:$0xff] }
 0x1d8   :  { %v1626_v18 = vmul.f32 1.3888888, %v1498_v21  ;;  %v1627_v12 = vmul.f32 1.3888888, %v1499_v16  ;;  %v2013_v14 = vadd.f32 %v4570_v56, %v2012_v10  ;;  %2724 = vpow2.f32 %v1887_v34 }
 0x1d9   :  { %v1501_v38 = vsub.f32 0.0, %v1373_v29  ;;  %v1502_v20 = vsub.f32 0.0, %v1374_v52  ;;  %v1628_v22 = vmul.f32 1.3888888, %v1500_v51  ;;  %2726 = vpow2.f32 %v1827_v7 }
 0x1da   :  { %v1829_v15 = vmul.f32 1.442695, %v1626_v18  ;;  %v1831_v57 = vmul.f32 1.442695, %v1627_v12  ;;  %2014 = vadd.xlane.f32.xlu0 %v2013_v14  ;;  %2728 = vpow2.f32 %v1889_v63  ;;  %v301_v0 = vsub.f32 %v4577_v26, %v3013_v39  ;;  %v6039_v63 = vld [vmem:[#allocation100_spill] sm:$0xff] }
 0x1db   :  { %v1629_v4 = vmul.f32 1.3888888, %v1501_v38  ;;  %v1630_v27 = vmul.f32 1.3888888, %v1502_v20  ;;  %v1833_v61 = vmul.f32 1.442695, %v1628_v22  ;;  %v302_v6 = vsub.f32 %v4577_v26, %v3015_v40  ;;  %v4594_v40 = vpop.permute.xlu1 %502 }
 0x1dc   :  { %2730 = vpow2.f32 %v1829_v15  ;;  %v303_v29 = vsub.f32 %v4577_v26, %v3017_v41  ;;  %v304_v18 = vsub.f32 %v4577_v26, %v3019_v42  ;;  %v2016_v34 = vadd.f32 %v6040_v45, %v6039_v63 }
 0x1dd   :  { %2732 = vpow2.f32 %v1831_v57  ;;  %v1835_v52 = vmul.f32 1.442695, %v1629_v4  ;;  %v1837_v9 = vmul.f32 1.442695, %v1630_v27  ;;  %v305_v39 = vsub.f32 %v4577_v26, %v3021_v43  ;;  %v6041_v4 = vld [vmem:[#allocation111_spill] sm:$0xff] }
 0x1de   :  { %2734 = vpow2.f32 %v1833_v61  ;;  %v306_v25 = vsub.f32 %v4577_v26, %v3023_v44  ;;  %v307_v41 = vsub.f32 %v4577_v26, %v5765_v58  ;;  %v429_v21 = vmul.f32 %v301_v0, %v301_v0 }
 0x1df   :  { %2736 = vpow2.f32 %v1835_v52  ;;  %v430_v16 = vmul.f32 %v302_v6, %v302_v6  ;;  %v431_v42 = vmul.f32 %v303_v29, %v303_v29  ;;  %v432_v10 = vmul.f32 %v304_v18, %v304_v18 }
 0x1e0   :  { %2738 = vpow2.f32 %v1837_v9  ;;  %v433_v51 = vmul.f32 %v305_v39, %v305_v39  ;;  %v4598_v12 = vmul.f32 %v306_v25, %v306_v25  ;;  %v662_v43 = vsub.f32 %v4594_v40, %v2998_v30 }
 0x1e1   :  { %v663_v44 = vsub.f32 %v4594_v40, %v3000_v31  ;;  %v664_v5 = vsub.f32 %v4594_v40, %v3002_v32  ;;  %v665_v58 = vsub.f32 %v4594_v40, %v3004_v33  ;;  %v666_v7 = vsub.f32 %v4594_v40, %v3007_v35 }
 0x1e2   :  { %v667_v14 = vsub.f32 %v4594_v40, %v3009_v36  ;;  %v668_v38 = vsub.f32 %v4594_v40, %v3011_v37  ;;  %v4614_v20 = vpop.eup %2724  ;;  %v790_v22 = vmul.f32 %v662_v43, %v662_v43  ;;  %v276_v27 = vsub.f32 %v6041_v4, %v3044_v54 }
 0x1e3   :  { %v791_v15 = vmul.f32 %v663_v44, %v663_v44  ;;  %v792_v57 = vmul.f32 %v664_v5, %v664_v5  ;;  %v4618_v0 = vpop.eup %2726  ;;  %v4620_v61 = vmul.f32 %v307_v41, %v307_v41  ;;  %v793_v6 = vmul.f32 %v665_v58, %v665_v58  ;;  %v6044_v41 = vld [vmem:[#allocation112_spill] sm:$0xff] }
 0x1e4   :  { %6042 = vst [vmem:[#allocation61_spill] sm:$0xff] %v4618_v0  ;;  %v794_v29 = vmul.f32 %v666_v7, %v666_v7  ;;  %v4622_v52 = vmul.f32 %v667_v14, %v667_v14  ;;  %v4624_v9 = vpop.eup %2728  ;;  %v2017_v18 = vadd.f32 %v4618_v0, %v2016_v34  ;;  %v4627_v39 = vmul.f32 %v668_v38, %v668_v38 }
 0x1e5   :  { %v918_v25 = vadd.f32 %v790_v22, %v429_v21  ;;  %v919_v43 = vadd.f32 %v791_v15, %v430_v16  ;;  %v920_v5 = vadd.f32 %v792_v57, %v431_v42  ;;  %v4631_v4 = vadd.f32 %v793_v6, %v432_v10  ;;  %v6046_v42 = vld [vmem:[#allocation25_spill] sm:$0xff]  ;;  %v6047_v10 = vld [vmem:[#allocation104_spill] sm:$0xff]  ;;  %v6049_v57 = vld [vmem:[#allocation107_spill] sm:$0xff] }
 0x1e6   :  { %v4629_v44 = vpop.eup %2730  ;;  %v4633_v63 = vadd.f32 %v794_v29, %v433_v51  ;;  %v637_v58 = vsub.f32 %v6044_v41, %v3046_v55  ;;  %v404_v21 = vmul.f32 %v276_v27, %v276_v27  ;;  %v891_v15 = vadd.f32 %v6047_v10, %v6046_v42  ;;  %v6048_v51 = vld [vmem:[#allocation32_spill] sm:$0xff]  ;;  %v6050_v29 = vld [vmem:[#allocation54_spill] sm:$0xff]  ;;  %v6054_v10 = vld [vmem:[#allocation135_spill] sm:$0xff] }
 0x1e7   :  { %6043 = vst [vmem:[#allocation56_spill] sm:$0xff] %v4629_v44  ;;  %v4637_v7 = vpop.eup %2732  ;;  %v2018_v14 = vadd.f32 %v4629_v44, %v2017_v18  ;;  %v1407_v34 = vadd.f32 %v4457_v17, %v918_v25  ;;  %v1408_v38 = vadd.f32 %v4460_v1, %v919_v43  ;;  %v892_v6 = vadd.f32 %v6049_v57, %v6048_v51  ;;  %v6053_v42 = vld [vmem:[#allocation16_spill] sm:$0xff] }
 0x1e8   :  { %6045 = vst [vmem:[#allocation70_spill] sm:$0xff] %v4637_v7  ;;  %v4642_v16 = vpop.eup %2734  ;;  %v765_v22 = vmul.f32 %v637_v58, %v637_v58  ;;  %v1125_v41 = vsub.f32 %v6050_v29, %v5754_v13  ;;  %v1126_v1 = vsub.f32 %v6050_v29, %v5756_v11  ;;  %v1379_v44 = vadd.f32 %v6054_v10, %v6053_v42  ;;  %v6055_v51 = vld [vmem:[#allocation136_spill] sm:$0xff]  ;;  %v6057_v10 = vld [vmem:[#allocation9_spill] sm:$0xff] }
 0x1e9   :  { %v4650_v0 = vpop.eup %2736  ;;  %v2019_v18 = vadd.f32 %v4637_v7, %v2018_v14  ;;  %v1535_v17 = vsub.f32 0.0, %v1407_v34  ;;  %v1536_v25 = vsub.f32 0.0, %v1408_v38  ;;  %v1380_v57 = vadd.f32 %v6055_v51, %v891_v15  ;;  %v4666_v38 = vpop.permute.xlu1 %506  ;;  %v6056_v7 = vld [vmem:[#allocation137_spill] sm:$0xff] }
 0x1ea   :  { %6051 = vst [vmem:[#allocation80_spill] sm:$0xff] %v4650_v0  ;;  %v4655_v27 = vpop.eup %2738  ;;  %v893_v43 = vadd.f32 %v765_v22, %v404_v21  ;;  %v1253_v58 = vmul.f32 %v1125_v41, %v1125_v41  ;;  %v4662_v24 = vadd.f32 %v4462_v2, %v920_v5  ;;  %v1254_v34 = vmul.f32 %v1126_v1, %v1126_v1 }
 0x1eb   :  { %6052 = vst [vmem:[#allocation50_spill] sm:$0xff] %v4655_v27  ;;  %v2020_v45 = vadd.f32 %v4642_v16, %v2019_v18  ;;  %v4664_v14 = vmul.f32 1.3888888, %v1535_v17  ;;  %v1506_v56 = vsub.f32 0.0, %v6056_v7  ;;  %v1507_v21 = vsub.f32 0.0, %v1379_v44 }
 0x1ec   :  { %v1381_v29 = vadd.f32 %v1253_v58, %v892_v6  ;;  %v1508_v22 = vsub.f32 0.0, %v1380_v57  ;;  %v4670_v42 = vmul.f32 1.3888888, %v1536_v25  ;;  %v1382_v15 = vadd.f32 %v1254_v34, %v893_v43 }
 0x1ed   :  { %v2021_v41 = vadd.f32 %v4650_v0, %v2020_v45  ;;  %v1843_v18 = vmul.f32 1.442695, %v6057_v10  ;;  %v1634_v2 = vmul.f32 1.3888888, %v1506_v56  ;;  %v1635_v5 = vmul.f32 1.3888888, %v1507_v21 }
 0x1ee   :  { %v1509_v51 = vsub.f32 0.0, %v1381_v29  ;;  %v670_v17 = vsub.f32 %v4666_v38, %v2998_v30  ;;  %v1510_v6 = vsub.f32 0.0, %v1382_v15  ;;  %v1636_v58 = vmul.f32 1.3888888, %v1508_v22 }
 0x1ef   :  { %v2022_v1 = vadd.f32 %v4655_v27, %v2021_v41  ;;  %2740 = vpow2.f32 %v1843_v18  ;;  %v1845_v7 = vmul.f32 1.442695, %v1634_v2  ;;  %v1847_v57 = vmul.f32 1.442695, %v1635_v5  ;;  %v4688_v18 = vpop.permute.xlu1 %995 }
 0x1f0   :  { %v1637_v44 = vmul.f32 1.3888888, %v1509_v51  ;;  %v671_v45 = vsub.f32 %v4666_v38, %v3000_v31  ;;  %v1638_v25 = vmul.f32 1.3888888, %v1510_v6  ;;  %v1849_v43 = vmul.f32 1.442695, %v1636_v58 }
 0x1f1   :  { %2023 = vadd.xlane.f32.xlu1 %v2022_v1  ;;  %v672_v56 = vsub.f32 %v4666_v38, %v3002_v32  ;;  %v673_v30 = vsub.f32 %v4666_v38, %v3004_v33  ;;  %2742 = vpow2.f32 %v1845_v7  ;;  %v674_v29 = vsub.f32 %v4666_v38, %v3007_v35  ;;  %v6058_v33 = vld [vmem:[#allocation21_spill] sm:$0xff]  ;;  %v6059_v51 = vld [vmem:[#allocation122_spill] sm:$0xff]  ;;  %v6062_v58 = vld [vmem:[#allocation88_spill] sm:$0xff] }
 0x1f2   :  { %v1851_v34 = vmul.f32 1.442695, %v1637_v44  ;;  %v675_v21 = vsub.f32 %v4666_v38, %v3009_v36  ;;  %2744 = vpow2.f32 %v1847_v57  ;;  %v1853_v22 = vmul.f32 1.442695, %v1638_v25  ;;  %v6060_v1 = vld [vmem:[#allocation86_spill] sm:$0xff] }
 0x1f3   :  { %v676_v31 = vsub.f32 %v4666_v38, %v3011_v37  ;;  %v798_v41 = vmul.f32 %v670_v17, %v670_v17  ;;  %2746 = vpow2.f32 %v1849_v43  ;;  %v799_v15 = vmul.f32 %v671_v45, %v671_v45  ;;  %v6061_v37 = vld [vmem:[#allocation87_spill] sm:$0xff]  ;;  %v6063_v7 = vld [vmem:[#allocation90_spill] sm:$0xff] }
 0x1f4   :  { %v800_v32 = vmul.f32 %v672_v56, %v672_v56  ;;  %v801_v10 = vmul.f32 %v673_v30, %v673_v30  ;;  %2748 = vpow2.f32 %v1851_v34  ;;  %v2025_v2 = vadd.f32 %v6059_v51, %v6058_v33 }
 0x1f5   :  { %v802_v35 = vmul.f32 %v674_v29, %v674_v29  ;;  %v4692_v5 = vmul.f32 %v675_v21, %v675_v21  ;;  %2750 = vpow2.f32 %v1853_v22  ;;  %v4694_v36 = vmul.f32 %v676_v31, %v676_v31 }
 0x1f6   :  { %v926_v6 = vadd.f32 %v798_v41, %v6060_v1  ;;  %v927_v17 = vadd.f32 %v799_v15, %v6061_v37  ;;  %v928_v44 = vadd.f32 %v800_v32, %v6062_v58  ;;  %v929_v57 = vadd.f32 %v801_v10, %v6063_v7  ;;  %v6067_v15 = vld [vmem:[#allocation91_spill] sm:$0xff] }
 0x1f7   :  { %v1159_v45 = vsub.f32 %v4688_v18, %v3027_v46  ;;  %v1160_v25 = vsub.f32 %v4688_v18, %v3029_v47  ;;  %v1161_v43 = vsub.f32 %v4688_v18, %v3031_v48  ;;  %v1162_v56 = vsub.f32 %v4688_v18, %v3033_v49  ;;  %v6065_v46 = vld [vmem:[#allocation57_spill] sm:$0xff]  ;;  %v6066_v47 = vld [vmem:[#allocation8_spill] sm:$0xff] }
 0x1f8   :  { %v1163_v30 = vsub.f32 %v4688_v18, %v3035_v50  ;;  %v1164_v34 = vsub.f32 %v4688_v18, %v3042_v53  ;;  %v284_v31 = vsub.f32 %v6065_v46, %v3044_v54  ;;  %v645_v41 = vsub.f32 %v6066_v47, %v3046_v55  ;;  %v6071_v47 = vld [vmem:[#allocation23_spill] sm:$0xff] }
 0x1f9   :  { %v4712_v29 = vpop.eup %2740  ;;  %v1287_v21 = vmul.f32 %v1159_v45, %v1159_v45  ;;  %v1288_v22 = vmul.f32 %v1160_v25, %v1160_v25  ;;  %v4720_v49 = vadd.f32 %v802_v35, %v6067_v15  ;;  %v1289_v32 = vmul.f32 %v1161_v43, %v1161_v43 }
 0x1fa   :  { %6064 = vst [vmem:[#allocation73_spill] sm:$0xff] %v4712_v29  ;;  %v2026_v48 = vadd.f32 %v4712_v29, %v2025_v2  ;;  %v1290_v50 = vmul.f32 %v1162_v56, %v1162_v56  ;;  %v4722_v10 = vmul.f32 %v1163_v30, %v1163_v30  ;;  %v4724_v53 = vmul.f32 %v1164_v34, %v1164_v34  ;;  %v6070_v30 = vld [vmem:[#allocation67_spill] sm:$0xff] }
 0x1fb   :  { %v1415_v1 = vadd.f32 %v1287_v21, %v926_v6  ;;  %v1416_v37 = vadd.f32 %v1288_v22, %v927_v17  ;;  %v4726_v58 = vpop.eup %2742  ;;  %v4728_v7 = vadd.f32 %v1289_v32, %v928_v44  ;;  %v412_v25 = vmul.f32 %v284_v31, %v284_v31  ;;  %v6072_v17 = vld [vmem:[#allocation69_spill] sm:$0xff] }
 0x1fc   :  { %6068 = vst [vmem:[#allocation89_spill] sm:$0xff] %v4726_v58  ;;  %v4730_v45 = vadd.f32 %v1290_v50, %v929_v57  ;;  %v773_v46 = vmul.f32 %v645_v41, %v645_v41  ;;  %v4732_v2 = vpop.eup %2744  ;;  %v2027_v35 = vadd.f32 %v4726_v58, %v2026_v48  ;;  %v899_v34 = vadd.f32 %v6071_v47, %v6070_v30  ;;  %v6073_v44 = vld [vmem:[#allocation117_spill] sm:$0xff] }
 0x1fd   :  { %6069 = vst [vmem:[#allocation84_spill] sm:$0xff] %v4732_v2  ;;  %v1543_v43 = vsub.f32 0.0, %v1415_v1  ;;  %v1544_v56 = vsub.f32 0.0, %v1416_v37  ;;  %v4737_v15 = vpop.eup %2746  ;;  %v900_v21 = vadd.f32 %v6073_v44, %v6072_v17  ;;  %v6074_v57 = vld [vmem:[#allocation5_spill] sm:$0xff]  ;;  %v6077_v37 = vld [vmem:[#allocation128_spill] sm:$0xff]  ;;  %v6078_v44 = vld [vmem:[#allocation63_spill] sm:$0xff] }
 0x1fe   :  { %v1133_v22 = vsub.f32 %v6074_v57, %v5754_v13  ;;  %v1134_v31 = vsub.f32 %v6074_v57, %v5756_v11  ;;  %v4746_v41 = vpop.eup %2748  ;;  %v2028_v48 = vadd.f32 %v4732_v2, %v2027_v35  ;;  %v6076_v1 = vld [vmem:[#allocation125_spill] sm:$0xff]  ;;  %v901_v6 = vadd.f32 %v773_v46, %v412_v25 }
 0x1ff   :  { %6075 = vst [vmem:[#allocation109_spill] sm:$0xff] %v4746_v41  ;;  %v1671_v32 = vmul.f32 1.3888888, %v1543_v43  ;;  %v1672_v50 = vmul.f32 1.3888888, %v1544_v56  ;;  %v1387_v30 = vadd.f32 %v6077_v37, %v6076_v1  ;;  %v4751_v47 = vpop.eup %2750  ;;  %v1388_v33 = vadd.f32 %v6078_v44, %v899_v34  ;;  %v6079_v37 = vld [vmem:[#allocation118_spill] sm:$0xff] }
 0x200   :  { %v1261_v29 = vmul.f32 %v1133_v22, %v1133_v22  ;;  %v1262_v17 = vmul.f32 %v1134_v31, %v1134_v31  ;;  %v2029_v58 = vadd.f32 %v4737_v15, %v2028_v48  ;;  %v1514_v0 = vsub.f32 0.0, %v4351_v62 }
 0x201   :  { %v1919_v51 = vmul.f32 1.442695, %v1671_v32  ;;  %v1921_v57 = vmul.f32 1.442695, %v1672_v50  ;;  %v1515_v43 = vsub.f32 0.0, %v1387_v30  ;;  %v1516_v56 = vsub.f32 0.0, %v1388_v33 }
 0x202   :  { %v1389_v27 = vadd.f32 %v1261_v29, %v900_v21  ;;  %v1390_v35 = vadd.f32 %v1262_v17, %v901_v6  ;;  %v2030_v2 = vadd.f32 %v4746_v41, %v2029_v58  ;;  %v1642_v1 = vmul.f32 1.3888888, %v1514_v0  ;;  %v6080_v33 = vld [vmem:[#allocation39_spill] sm:$0xff]  ;;  %v6083_v17 = vld [vmem:[#allocation130_spill] sm:$0xff] }
 0x203   :  { %2752 = vpow2.f32 %v1919_v51  ;;  %v1859_v25 = vmul.f32 1.442695, %v6079_v37  ;;  %v1643_v34 = vmul.f32 1.3888888, %v1515_v43  ;;  %v1644_v48 = vmul.f32 1.3888888, %v1516_v56 }
 0x204   :  { %2754 = vpow2.f32 %v1921_v57  ;;  %v1517_v46 = vsub.f32 0.0, %v1389_v27  ;;  %v1518_v22 = vsub.f32 0.0, %v1390_v35  ;;  %v2031_v31 = vadd.f32 %v4751_v47, %v2030_v2  ;;  %v6081_v51 = vld [vmem:[#allocation66_spill] sm:$0xff]  ;;  %v6082_v27 = vld [vmem:[#allocation41_spill] sm:$0xff]  ;;  %v6084_v43 = vld [vmem:[#allocation131_spill] sm:$0xff] }
 0x205   :  { %2756 = vpow2.f32 %v1859_v25  ;;  %v1861_v32 = vmul.f32 1.442695, %v1642_v1  ;;  %v1863_v6 = vmul.f32 1.442695, %v1643_v34  ;;  %v2034_v21 = vadd.f32 %v6080_v33, %v4395_v19  ;;  %v6085_v1 = vld [vmem:[#allocation45_spill] sm:$0xff] }
 0x206   :  { %v1645_v62 = vmul.f32 1.3888888, %v1517_v46  ;;  %v1646_v29 = vmul.f32 1.3888888, %v1518_v22  ;;  %2032 = vadd.xlane.f32.xlu0 %v2031_v31  ;;  %v1865_v0 = vmul.f32 1.442695, %v1644_v48  ;;  %v292_v58 = vsub.f32 %v6081_v51, %v3044_v54 }
 0x207   :  { %2758 = vpow2.f32 %v1861_v32  ;;  %v653_v50 = vsub.f32 %v6082_v27, %v3046_v55  ;;  %v907_v44 = vadd.f32 %v4427_v3, %v6083_v17  ;;  %v908_v56 = vadd.f32 %v4431_v28, %v6084_v43  ;;  %v6086_v46 = vld [vmem:[#allocation37_spill] sm:$0xff]  ;;  %v6087_v3 = vld [vmem:[#allocation38_spill] sm:$0xff]  ;;  %v6089_v27 = vld [vmem:[#allocation144_spill] sm:$0xff] }
 0x208   :  { %2760 = vpow2.f32 %v1863_v6  ;;  %v1867_v2 = vmul.f32 1.442695, %v1645_v62  ;;  %v1869_v30 = vmul.f32 1.442695, %v1646_v29  ;;  %v420_v57 = vmul.f32 %v292_v58, %v292_v58  ;;  %v6088_v28 = vld [vmem:[#allocation142_spill] sm:$0xff] }
 0x209   :  { %2762 = vpow2.f32 %v1865_v0  ;;  %v781_v35 = vmul.f32 %v653_v50, %v653_v50  ;;  %v1141_v37 = vsub.f32 %v6085_v1, %v5754_v13  ;;  %v1142_v25 = vsub.f32 %v6085_v1, %v5756_v11  ;;  %v6091_v1 = vld [vmem:[#allocation68_spill] sm:$0xff] }
 0x20a   :  { %2764 = vpow2.f32 %v1867_v2  ;;  %v1394_v22 = vadd.f32 %v6086_v46, %v4436_v8  ;;  %v1395_v31 = vadd.f32 %v6087_v3, %v4444_v60  ;;  %v1396_v48 = vadd.f32 %v4425_v59, %v907_v44  ;;  %v6090_v2 = vld [vmem:[#allocation145_spill] sm:$0xff] }
 0x20b   :  { %2766 = vpow2.f32 %v1869_v30  ;;  %v909_v34 = vadd.f32 %v781_v35, %v420_v57  ;;  %v1269_v32 = vmul.f32 %v1141_v37, %v1141_v37  ;;  %v1270_v62 = vmul.f32 %v1142_v25, %v1142_v25 }
 0x20c   :  { %v1521_v29 = vsub.f32 0.0, %v6088_v28  ;;  %v1522_v6 = vsub.f32 0.0, %v1394_v22  ;;  %v1523_v51 = vsub.f32 0.0, %v1395_v31  ;;  %v1524_v58 = vsub.f32 0.0, %v1396_v48 }
 0x20d   :  { %v4779_v0 = vpop.eup %2752  ;;  %v1871_v50 = vmul.f32 1.442695, %v6089_v27  ;;  %v1873_v8 = vmul.f32 1.442695, %v6090_v2  ;;  %v1397_v17 = vadd.f32 %v1269_v32, %v908_v56  ;;  %v1398_v57 = vadd.f32 %v1270_v62, %v909_v34  ;;  %v6095_v27 = vld [vmem:[#allocation81_spill] sm:$0xff] }
 0x20e   :  { %v4783_v30 = vpop.eup %2754  ;;  %v1649_v60 = vmul.f32 1.3888888, %v1521_v29  ;;  %v1650_v35 = vmul.f32 1.3888888, %v1522_v6  ;;  %v1651_v44 = vmul.f32 1.3888888, %v1523_v51  ;;  %v300_v37 = vsub.f32 %v6091_v1, %v3044_v54 }
 0x20f   :  { %v4785_v59 = vpop.eup %2756  ;;  %v1652_v43 = vmul.f32 1.3888888, %v1524_v58  ;;  %2768 = vpow2.f32 %v1871_v50  ;;  %v1525_v46 = vsub.f32 0.0, %v1397_v17  ;;  %v1526_v22 = vsub.f32 0.0, %v1398_v57  ;;  %v6096_v50 = vld [vmem:[#allocation6_spill] sm:$0xff]  ;;  %v6098_v17 = vld [vmem:[#allocation13_spill] sm:$0xff] }
 0x210   :  { %v2035_v25 = vadd.f32 %v4785_v59, %v2034_v21  ;;  %2770 = vpow2.f32 %v1873_v8  ;;  %v1875_v31 = vmul.f32 1.442695, %v1649_v60  ;;  %v1877_v56 = vmul.f32 1.442695, %v1650_v35  ;;  %v6094_v21 = vld [vmem:[#allocation36_spill] sm:$0xff]  ;;  %v6097_v8 = vld [vmem:[#allocation82_spill] sm:$0xff] }
 0x211   :  { %v4790_v3 = vpop.eup %2758  ;;  %v1879_v34 = vmul.f32 1.442695, %v1651_v44  ;;  %v428_v48 = vmul.f32 %v300_v37, %v300_v37  ;;  %v1653_v28 = vmul.f32 1.3888888, %v1525_v46  ;;  %v1654_v29 = vmul.f32 1.3888888, %v1526_v22 }
 0x212   :  { %v4792_v32 = vpop.eup %2760  ;;  %v2036_v62 = vadd.f32 %v4790_v3, %v2035_v25  ;;  %v1881_v6 = vmul.f32 1.442695, %v1652_v43  ;;  %2772 = vpow2.f32 %v1875_v31  ;;  %v661_v58 = vsub.f32 %v6094_v21, %v3046_v55  ;;  %v6099_v25 = vld [vmem:[#allocation10_spill] sm:$0xff]  ;;  %v6100_v21 = vld [vmem:[#allocation96_spill] sm:$0xff] }
 0x213   :  { %6092 = vst [vmem:[#allocation111_spill] sm:$0xff] %v4792_v32  ;;  %v4795_v51 = vpop.eup %2762  ;;  %v915_v2 = vadd.f32 %v6096_v50, %v6095_v27  ;;  %v916_v57 = vadd.f32 %v6098_v17, %v6097_v8  ;;  %2774 = vpow2.f32 %v1877_v56  ;;  %v1883_v44 = vmul.f32 1.442695, %v1653_v28  ;;  %v6101_v27 = vld [vmem:[#allocation75_spill] sm:$0xff] }
 0x214   :  { %6093 = vst [vmem:[#allocation112_spill] sm:$0xff] %v4795_v51  ;;  %v4803_v60 = vpop.eup %2764  ;;  %v2037_v35 = vadd.f32 %v4792_v32, %v2036_v62  ;;  %v1885_v1 = vmul.f32 1.442695, %v1654_v29  ;;  %2776 = vpow2.f32 %v1879_v34  ;;  %v789_v37 = vmul.f32 %v661_v58, %v661_v58  ;;  %v6102_v62 = vld [vmem:[#allocation77_spill] sm:$0xff]  ;;  %v6103_v32 = vld [vmem:[#allocation79_spill] sm:$0xff] }
 0x215   :  { %v4806_v43 = vpop.eup %2766  ;;  %v1149_v46 = vsub.f32 %v6099_v25, %v5754_v13  ;;  %v1150_v22 = vsub.f32 %v6099_v25, %v5756_v11  ;;  %2778 = vpow2.f32 %v1881_v6  ;;  %v1403_v50 = vadd.f32 %v6101_v27, %v6100_v21 }
 0x216   :  { %v2038_v31 = vadd.f32 %v4795_v51, %v2037_v35  ;;  %v1404_v56 = vadd.f32 %v6102_v62, %v915_v2  ;;  %2780 = vpow2.f32 %v1883_v44  ;;  %v917_v28 = vadd.f32 %v789_v37, %v428_v48 }
 0x217   :  { %v1277_v29 = vmul.f32 %v1149_v46, %v1149_v46  ;;  %v1278_v8 = vmul.f32 %v1150_v22, %v1150_v22  ;;  %2782 = vpow2.f32 %v1885_v1  ;;  %v1530_v58 = vsub.f32 0.0, %v4574_v23 }
 0x218   :  { %v2039_v34 = vadd.f32 %v4803_v60, %v2038_v31  ;;  %v1531_v17 = vsub.f32 0.0, %v1403_v50  ;;  %v1532_v6 = vsub.f32 0.0, %v1404_v56  ;;  %v1891_v51 = vmul.f32 1.442695, %v6103_v32 }
 0x219   :  { %v4818_v41 = vpop.eup %2768  ;;  %v1405_v25 = vadd.f32 %v1277_v29, %v916_v57  ;;  %v1406_v35 = vadd.f32 %v1278_v8, %v917_v28  ;;  %v1658_v48 = vmul.f32 1.3888888, %v1530_v58  ;;  %v2052_v37 = vadd.f32 %v4624_v9, %v4614_v20 }
 0x21a   :  { %v4821_v21 = vpop.eup %2770  ;;  %v2040_v2 = vadd.f32 %v4806_v43, %v2039_v34  ;;  %v1659_v44 = vmul.f32 1.3888888, %v1531_v17  ;;  %v1660_v22 = vmul.f32 1.3888888, %v1532_v6  ;;  %2784 = vpow2.f32 %v1891_v51 }
 0x21b   :  { %v2043_v23 = vadd.f32 %v4821_v21, %v4818_v41  ;;  %v1533_v1 = vsub.f32 0.0, %v1405_v25  ;;  %v1534_v46 = vsub.f32 0.0, %v1406_v35  ;;  %v1893_v57 = vmul.f32 1.442695, %v1658_v48 }
 0x21c   :  { %2041 = vadd.xlane.f32.xlu1 %v2040_v2  ;;  %v1895_v31 = vmul.f32 1.442695, %v1659_v44  ;;  %v308_v32 = vsub.f32 %v4577_v26, %v3044_v54  ;;  %v4830_v27 = vpop.eup %2772  ;;  %v1897_v56 = vmul.f32 1.442695, %v1660_v22  ;;  %v669_v28 = vsub.f32 %v4594_v40, %v3046_v55  ;;  %v6106_v2 = vld [vmem:[#allocation133_spill] sm:$0xff] }
 0x21d   :  { %v1661_v50 = vmul.f32 1.3888888, %v1533_v1  ;;  %v1662_v62 = vmul.f32 1.3888888, %v1534_v46  ;;  %v4834_v29 = vpop.eup %2774  ;;  %v2044_v8 = vadd.f32 %v4830_v27, %v2043_v23  ;;  %2786 = vpow2.f32 %v1893_v57  ;;  %v6108_v23 = vld [vmem:[#allocation143_spill] sm:$0xff] }
 0x21e   :  { %v436_v34 = vmul.f32 %v308_v32, %v308_v32  ;;  %v923_v51 = vadd.f32 %v4622_v52, %v4598_v12  ;;  %v4839_v58 = vpop.eup %2776  ;;  %2788 = vpow2.f32 %v1895_v31  ;;  %v797_v25 = vmul.f32 %v669_v28, %v669_v28  ;;  %v6111_v32 = vld [vmem:[#allocation134_spill] sm:$0xff] }
 0x21f   :  { %6104 = vst [vmem:[#allocation25_spill] sm:$0xff] %v4839_v58  ;;  %v1899_v26 = vmul.f32 1.442695, %v1661_v50  ;;  %v1901_v17 = vmul.f32 1.442695, %v1662_v62  ;;  %v4841_v35 = vpop.eup %2778  ;;  %v2045_v6 = vadd.f32 %v4834_v29, %v2044_v8  ;;  %2790 = vpow2.f32 %v1897_v56 }
 0x220   :  { %6105 = vst [vmem:[#allocation104_spill] sm:$0xff] %v4841_v35  ;;  %v924_v40 = vadd.f32 %v4627_v39, %v4620_v61  ;;  %v1157_v48 = vsub.f32 %v6106_v2, %v5754_v13  ;;  %v4848_v44 = vpop.eup %2780  ;;  %v925_v12 = vadd.f32 %v797_v25, %v436_v34  ;;  %v1158_v52 = vsub.f32 %v6106_v2, %v5756_v11  ;;  %v6110_v61 = vld [vmem:[#allocation146_spill] sm:$0xff] }
 0x221   :  { %6107 = vst [vmem:[#allocation32_spill] sm:$0xff] %v4848_v44  ;;  %2792 = vpow2.f32 %v1899_v26  ;;  %v1410_v1 = vadd.f32 %v6108_v23, %v4631_v4  ;;  %v4854_v46 = vpop.eup %2782  ;;  %v2046_v22 = vadd.f32 %v4839_v58, %v2045_v6  ;;  %v1411_v39 = vadd.f32 %v6110_v61, %v4633_v63 }
 0x222   :  { %6109 = vst [vmem:[#allocation107_spill] sm:$0xff] %v4854_v46  ;;  %2794 = vpow2.f32 %v1901_v17  ;;  %v1285_v57 = vmul.f32 %v1157_v48, %v1157_v48  ;;  %v1286_v31 = vmul.f32 %v1158_v52, %v1158_v52  ;;  %v1412_v50 = vadd.f32 %v6111_v32, %v923_v51 }
 0x223   :  { %v1537_v62 = vsub.f32 0.0, %v4662_v24  ;;  %v1538_v56 = vsub.f32 0.0, %v1410_v1  ;;  %v2047_v28 = vadd.f32 %v4841_v35, %v2046_v22  ;;  %v1539_v34 = vsub.f32 0.0, %v1411_v39 }
 0x224   :  { %v1413_v8 = vadd.f32 %v1285_v57, %v924_v40  ;;  %v1903_v4 = vmul.f32 1.442695, %v4664_v14  ;;  %v1414_v26 = vadd.f32 %v1286_v31, %v925_v12  ;;  %v1540_v25 = vsub.f32 0.0, %v1412_v50  ;;  %v4863_v2 = vpop.eup %2784 }
 0x225   :  { %v1665_v6 = vmul.f32 1.3888888, %v1537_v62  ;;  %v1666_v17 = vmul.f32 1.3888888, %v1538_v56  ;;  %v2048_v63 = vadd.f32 %v4848_v44, %v2047_v28  ;;  %v1667_v52 = vmul.f32 1.3888888, %v1539_v34 }
 0x226   :  { %v1541_v48 = vsub.f32 0.0, %v1413_v8  ;;  %2796 = vpow2.f32 %v1903_v4  ;;  %v2053_v24 = vadd.f32 %v4863_v2, %v2052_v37  ;;  %v1542_v51 = vsub.f32 0.0, %v1414_v26  ;;  %v6115_v56 = vld [vmem:[#allocation74_spill] sm:$0xff] }
 0x227   :  { %v1668_v23 = vmul.f32 1.3888888, %v1540_v25  ;;  %v1905_v40 = vmul.f32 1.442695, %v4670_v42  ;;  %v4868_v1 = vpop.eup %2786  ;;  %v2049_v14 = vadd.f32 %v4854_v46, %v2048_v63  ;;  %v1907_v22 = vmul.f32 1.442695, %v1665_v6 }
 0x228   :  { %v1669_v12 = vmul.f32 1.3888888, %v1541_v48  ;;  %v1909_v57 = vmul.f32 1.442695, %v1666_v17  ;;  %v4871_v61 = vpop.eup %2788  ;;  %v2054_v39 = vadd.f32 %v4868_v1, %v2053_v24  ;;  %v1670_v31 = vmul.f32 1.3888888, %v1542_v51 }
 0x229   :  { %6112 = vst [vmem:[#allocation54_spill] sm:$0xff] %v4871_v61  ;;  %2798 = vpow2.f32 %v1905_v40  ;;  %v1911_v32 = vmul.f32 1.442695, %v1667_v52  ;;  %v4874_v50 = vpop.eup %2790  ;;  %v6114_v37 = vsub.f32 0.0, %v4728_v7  ;;  %2050 = vadd.xlane.f32.xlu0 %v2049_v14  ;;  %v1913_v42 = vmul.f32 1.442695, %v1668_v23  ;;  %v1952_v23 = vpop.xlane.xlu0 %1951 }
 0x22a   :  { %6113 = vst [vmem:[#allocation16_spill] sm:$0xff] %v4874_v50  ;;  %2800 = vpow2.f32 %v1907_v22  ;;  %v316_v28 = vsub.f32 %v6115_v56, %v3044_v54  ;;  %v2055_v34 = vadd.f32 %v4871_v61, %v2054_v39  ;;  %v1915_v4 = vmul.f32 1.442695, %v1669_v12  ;;  %v6118_v17 = vld [vmem:[#allocation92_spill] sm:$0xff]  ;;  %v6119_v52 = vld [vmem:[#allocation93_spill] sm:$0xff]  ;;  %v6187_v61 = vld [vmem:[#allocation7_spill] sm:$0xff] }
 0x22b   :  { %v1673_v62 = vmul.f32 1.3888888, %v6114_v37  ;;  %v4880_v8 = vpop.eup %2792  ;;  %2802 = vpow2.f32 %v1909_v57  ;;  %v677_v26 = vsub.f32 %v4666_v38, %v3046_v55  ;;  %v1917_v7 = vmul.f32 1.442695, %v1670_v31  ;;  %v6188_v46 = vld [vmem:[#allocation129_spill] sm:$0xff] }
 0x22c   :  { %6116 = vst [vmem:[#allocation135_spill] sm:$0xff] %v4880_v8  ;;  %v4885_v25 = vpop.eup %2794  ;;  %2804 = vpow2.f32 %v1911_v32  ;;  %v444_v6 = vmul.f32 %v316_v28, %v316_v28  ;;  %v931_v63 = vadd.f32 %v4692_v5, %v6118_v17  ;;  %v2056_v48 = vadd.f32 %v4874_v50, %v2055_v34  ;;  %v1943_v5 = vpop.xlane.xlu1 %1942 }
 0x22d   :  { %6117 = vst [vmem:[#allocation136_spill] sm:$0xff] %v4885_v25  ;;  %v805_v54 = vmul.f32 %v677_v26, %v677_v26  ;;  %v932_v24 = vadd.f32 %v4694_v36, %v6119_v52  ;;  %v1165_v51 = vsub.f32 %v4688_v18, %v5754_v13  ;;  %2806 = vpow2.f32 %v1913_v42 }
 0x22e   :  { %v1166_v55 = vsub.f32 %v4688_v18, %v5756_v11  ;;  %v1419_v38 = vadd.f32 %v4722_v10, %v4720_v49  ;;  %v1420_v40 = vadd.f32 %v4724_v53, %v931_v63  ;;  %v2057_v14 = vadd.f32 %v4880_v8, %v2056_v48  ;;  %v1961_v10 = vpop.xlane.xlu0 %1960 }
 0x22f   :  { %2808 = vpow2.f32 %v1915_v4  ;;  %v933_v12 = vadd.f32 %v805_v54, %v444_v6  ;;  %v1293_v22 = vmul.f32 %v1165_v51, %v1165_v51  ;;  %v1546_v13 = vsub.f32 0.0, %v4730_v45 }
 0x230   :  { %v4900_v36 = vpop.eup %2796  ;;  %v1294_v57 = vmul.f32 %v1166_v55, %v1166_v55  ;;  %v1547_v39 = vsub.f32 0.0, %v1419_v38  ;;  %v1548_v31 = vsub.f32 0.0, %v1420_v40  ;;  %v2058_v11 = vadd.f32 %v4885_v25, %v2057_v14  ;;  %v6190_v25 = vld [vmem:[#allocation123_spill] sm:$0xff] }
 0x231   :  { %2810 = vpow2.f32 %v1917_v7  ;;  %v1421_v18 = vadd.f32 %v1293_v22, %v932_v24  ;;  %v1923_v49 = vmul.f32 1.442695, %v1673_v62  ;;  %v1674_v32 = vmul.f32 1.3888888, %v1546_v13  ;;  %v1970_v62 = vpop.xlane.xlu1 %1969 }
 0x232   :  { %v1422_v53 = vadd.f32 %v1294_v57, %v933_v12  ;;  %v1675_v37 = vmul.f32 1.3888888, %v1547_v39  ;;  %v1676_v42 = vmul.f32 1.3888888, %v1548_v31  ;;  %2059 = vadd.xlane.f32.xlu1 %v2058_v11  ;;  %v2080_v34 = vadd.f32 1e-20, %v1952_v23  ;;  %v1979_v55 = vpop.xlane.xlu0 %1978 }
 0x233   :  { %v4904_v56 = vpop.eup %2798  ;;  %v1549_v28 = vsub.f32 0.0, %v1421_v18  ;;  %2812 = vpow2.f32 %v1923_v49  ;;  %v1925_v7 = vmul.f32 1.442695, %v1674_v32  ;;  %v2079_v23 = vadd.f32 1e-20, %v1943_v5 }
 0x234   :  { %v4906_v4 = vpop.eup %2800  ;;  %v2061_v45 = vadd.f32 %v4904_v56, %v4900_v36  ;;  %v1550_v26 = vsub.f32 0.0, %v1422_v53  ;;  %v1927_v6 = vmul.f32 1.442695, %v1675_v37  ;;  %v1929_v48 = vmul.f32 1.442695, %v1676_v42 }
 0x235   :  { %v4910_v17 = vpop.eup %2802  ;;  %v1677_v63 = vmul.f32 1.3888888, %v1549_v28  ;;  %2814 = vrcp.f32 %v2080_v34  ;;  %v2081_v12 = vadd.f32 1e-20, %v1961_v10  ;;  %v1988_v22 = vpop.xlane.xlu1 %1987  ;;  %v2082_v13 = vadd.f32 1e-20, %v1970_v62 }
 0x236   :  { %v4912_v54 = vpop.eup %2804  ;;  %v2062_v52 = vadd.f32 %v4906_v4, %v2061_v45  ;;  %v1678_v24 = vmul.f32 1.3888888, %v1550_v26  ;;  %2816 = vpow2.f32 %v1925_v7  ;;  %v2070_v31 = vadd.f32 %v4783_v30, %v4779_v0  ;;  %v1997_v26 = vpop.xlane.xlu0 %1996 }
 0x237   :  { %6120 = vst [vmem:[#allocation137_spill] sm:$0xff] %v4912_v54  ;;  %2818 = vpow2.f32 %v1927_v6  ;;  %v1931_v51 = vmul.f32 1.442695, %v1677_v63  ;;  %v4915_v38 = vpop.eup %2806  ;;  %v2083_v5 = vadd.f32 1e-20, %v1979_v55  ;;  %v6129_v55 = vld [vmem:[#allocation119_spill] sm:$0xff] }
 0x238   :  { %6121 = vst [vmem:[#allocation9_spill] sm:$0xff] %v4915_v38  ;;  %v2063_v40 = vadd.f32 %v4910_v17, %v2062_v52  ;;  %2820 = vpow2.f32 %v1929_v48  ;;  %v1933_v14 = vmul.f32 1.442695, %v1678_v24  ;;  %v2084_v18 = vadd.f32 1e-20, %v1988_v22  ;;  %v6128_v48 = vld [vmem:[#allocation44_spill] sm:$0xff] }
 0x239   :  { %v4918_v57 = vpop.eup %2808  ;;  %2822 = vpow2.f32 %v1931_v51  ;;  %v2085_v24 = vadd.f32 1e-20, %v1997_v26  ;;  %v6131_v22 = vld [vmem:[#allocation26_spill] sm:$0xff] }
 0x23a   :  { %6122 = vst [vmem:[#allocation86_spill] sm:$0xff] %v4918_v57  ;;  %v2064_v39 = vadd.f32 %v4912_v54, %v2063_v40  ;;  %2824 = vpow2.f32 %v1933_v14  ;;  %v6130_v14 = vld [vmem:[#allocation42_spill] sm:$0xff] }
 0x23b   :  { %v4923_v11 = vpop.eup %2810  ;;  %2826 = vrcp.f32 %v2079_v23 }
 0x23c   :  { %6123 = vst [vmem:[#allocation87_spill] sm:$0xff] %v4923_v11  ;;  %v2065_v49 = vadd.f32 %v4915_v38, %v2064_v39  ;;  %2828 = vrcp.f32 %v2081_v12 }
 0x23d   :  { %v4926_v10 = vpop.eup %2812  ;;  %2830 = vrcp.f32 %v2082_v13 }
 0x23e   :  { %v2066_v53 = vadd.f32 %v4918_v57, %v2065_v49  ;;  %v2071_v32 = vadd.f32 %v4926_v10, %v2070_v31  ;;  %2832 = vrcp.f32 %v2083_v5  ;;  %v6132_v31 = vld [vmem:[#allocation108_spill] sm:$0xff] }
 0x23f   :  { %v4930_v37 = vpop.eup %2814  ;;  %2834 = vrcp.f32 %v2084_v18  ;;  %v6133_v18 = vld [vmem:[#allocation94_spill] sm:$0xff] }
 0x240   :  { %v4932_v42 = vpop.eup %2816  ;;  %v2067_v28 = vadd.f32 %v4923_v11, %v2066_v53  ;;  %v2120_v52 = vmul.f32 %v4930_v37, %v6128_v48  ;;  %v2122_v40 = vmul.f32 %v4930_v37, %v6129_v55  ;;  %v2119_v12 = vmul.f32 %v4930_v37, %v6130_v14  ;;  %v6134_v53 = vld [vmem:[#allocation106_spill] sm:$0xff]  ;;  %v6137_v14 = vld [vmem:[#allocation48_spill] sm:$0xff] }
 0x241   :  { %v4935_v34 = vpop.eup %2818  ;;  %v2072_v45 = vadd.f32 %v4932_v42, %v2071_v32  ;;  %v2121_v13 = vmul.f32 %v4930_v37, %v6131_v22  ;;  %v6136_v48 = vld [vmem:[#allocation18_spill] sm:$0xff]  ;;  %2836 = vrcp.f32 %v2085_v24 }
 0x242   :  { %6124 = vst [vmem:[#allocation88_spill] sm:$0xff] %v4935_v34  ;;  %v4938_v7 = vpop.eup %2820  ;;  %2068 = vadd.xlane.f32.xlu0 %v2067_v28  ;;  %v6135_v28 = vld [vmem:[#allocation14_spill] sm:$0xff] }
 0x243   :  { %6125 = vst [vmem:[#allocation90_spill] sm:$0xff] %v4938_v7  ;;  %v4940_v6 = vpop.eup %2822  ;;  %v2073_v62 = vadd.f32 %v4935_v34, %v2072_v45 }
 0x244   :  { %6126 = vst [vmem:[#allocation57_spill] sm:$0xff] %v4940_v6  ;;  %v4943_v63 = vpop.eup %2824 }
 0x245   :  { %6127 = vst [vmem:[#allocation8_spill] sm:$0xff] %v4943_v63  ;;  %v4947_v51 = vpop.eup %2826  ;;  %v2074_v23 = vadd.f32 %v4938_v7, %v2073_v62 }
 0x246   :  { %v4956_v39 = vpop.eup %2828  ;;  %v2112_v5 = vmul.f32 %v4947_v51, %v6132_v31  ;;  %v2114_v49 = vmul.f32 %v4947_v51, %v6133_v18  ;;  %v2111_v32 = vmul.f32 %v4947_v51, %v6134_v53  ;;  %v2113_v45 = vmul.f32 %v4947_v51, %v6135_v28  ;;  %v6138_v31 = vld [vmem:[#allocation115_spill] sm:$0xff] }
 0x247   :  { %v4966_v26 = vpop.eup %2830  ;;  %v2075_v62 = vadd.f32 %v4940_v6, %v2074_v23  ;;  %v2128_v55 = vmul.f32 %v4956_v39, %v6136_v48  ;;  %v2130_v22 = vmul.f32 %v4956_v39, %v6137_v14  ;;  %v2127_v57 = vmul.f32 %v4956_v39, %v6138_v31  ;;  %v6139_v23 = vld [vmem:[#allocation97_spill] sm:$0xff]  ;;  %v6140_v48 = vld [vmem:[#allocation71_spill] sm:$0xff]  ;;  %v6142_v31 = vld [vmem:[#allocation20_spill] sm:$0xff] }
 0x248   :  { %v4975_v18 = vpop.eup %2832  ;;  %v2240_v54 = vpack.c.bf16 %v2120_v52, %v2112_v5  ;;  %v2242_v53 = vpack.c.bf16 %v2122_v40, %v2114_v49  ;;  %v2239_v34 = vpack.c.bf16 %v2119_v12, %v2111_v32  ;;  %v2241_v11 = vpack.c.bf16 %v2121_v13, %v2113_v45  ;;  %v6141_v14 = vld [vmem:[#allocation95_spill] sm:$0xff] }
 0x249   :  { %v4977_v28 = vpop.eup %2834  ;;  %v2076_v38 = vadd.f32 %v4943_v63, %v2075_v62  ;;  %v2136_v6 = vmul.f32 %v4966_v26, %v6139_v23  ;;  %v2138_v44 = vmul.f32 %v4966_v26, %v6140_v48  ;;  %v2135_v58 = vmul.f32 %v4966_v26, %v6141_v14  ;;  %v6143_v40 = vld [vmem:[#allocation59_spill] sm:$0xff]  ;;  %v6145_v23 = vld [vmem:[#allocation24_spill] sm:$0xff]  ;;  %v6147_v14 = vld [vmem:[#allocation105_spill] sm:$0xff] }
 0x24a   :  { %2327 = vmatprep.subr.bf16.mxu0 %v2240_v54  ;;  %2370 = vmatprep.subr.bf16.mxu1 %v2242_v53  ;;  %v2129_v52 = vmul.f32 %v4956_v39, %v6142_v31  ;;  %v2137_v12 = vmul.f32 %v4966_v26, %v6143_v40  ;;  %v6144_v13 = vld [vmem:[#allocation15_spill] sm:$0xff]  ;;  %v2152_v54 = vmul.f32 %v4977_v28, %v6145_v23  ;;  %v6146_v53 = vld [vmem:[#allocation85_spill] sm:$0xff] }
 0x24b   :  { %v2144_v5 = vmul.f32 %v4975_v18, %v6144_v13  ;;  %2077 = vadd.xlane.f32.xlu1 %v2076_v38  ;;  %2328 = vmatpush1.bf16.msra.mxu0 %v2239_v34  ;;  %v2248_v49 = vpack.c.bf16 %v2136_v6, %v2128_v55  ;;  %v2250_v32 = vpack.c.bf16 %v2138_v44, %v2130_v22  ;;  %v6148_v40 = vld [vmem:[#allocation17_spill] sm:$0xff]  ;;  %v6149_v34 = vld [vmem:[#allocation22_spill] sm:$0xff] }
 0x24c   :  { %v2247_v45 = vpack.c.bf16 %v2135_v58, %v2127_v57  ;;  %2371 = vmatpush1.bf16.msra.mxu1 %v2241_v11  ;;  %v2249_v62 = vpack.c.bf16 %v2137_v12, %v2129_v52  ;;  %v2146_v48 = vmul.f32 %v4975_v18, %v6146_v53  ;;  %v2154_v31 = vmul.f32 %v4977_v28, %v6147_v14  ;;  %v6150_v44 = vld [vmem:[#allocation98_spill] sm:$0xff]  ;;  %v2006_v11 = vpop.xlane.xlu1 %2005  ;;  %v6152_v13 = vld [vmem:[#allocation121_spill] sm:$0xff]  ;;  %v6154_v53 = vld [vmem:[#allocation120_spill] sm:$0xff] }
 0x24d   :  { %2329 = vmatprep.subr.bf16.mxu0 %v2248_v49  ;;  %2372 = vmatprep.subr.bf16.mxu1 %v2250_v32  ;;  %v2143_v38 = vmul.f32 %v4975_v18, %v6148_v40  ;;  %v2151_v58 = vmul.f32 %v4977_v28, %v6149_v34  ;;  %v2145_v57 = vmul.f32 %v4975_v18, %v6150_v44  ;;  %v6151_v22 = vld [vmem:[#allocation30_spill] sm:$0xff]  ;;  %v2086_v12 = vadd.f32 1e-20, %v2006_v11  ;;  %v6153_v32 = vld [vmem:[#allocation127_spill] sm:$0xff]  ;;  %v6158_v34 = vld [vmem:[#allocation28_spill] sm:$0xff] }
 0x24e   :  { %v2256_v6 = vpack.c.bf16 %v2152_v54, %v2144_v5  ;;  %v2258_v55 = vpack.c.bf16 %v2154_v31, %v2146_v48  ;;  %v2153_v52 = vmul.f32 %v4977_v28, %v6151_v22  ;;  %v5008_v49 = vmul.f32 %v4930_v37, %v6152_v13  ;;  %v6155_v54 = vld [vmem:[#allocation33_spill] sm:$0xff]  ;;  %v6156_v48 = vld [vmem:[#allocation124_spill] sm:$0xff]  ;;  %v6157_v40 = vld [vmem:[#allocation46_spill] sm:$0xff] }
 0x24f   :  { %2330 = vmatpush1.bf16.msra.mxu0 %v2247_v45  ;;  %v2255_v24 = vpack.c.bf16 %v2151_v58, %v2143_v38  ;;  %v5012_v23 = vmul.f32 %v4930_v37, %v6153_v32  ;;  %v5016_v14 = vmul.f32 %v4930_v37, %v6154_v53  ;;  %2838 = vrcp.f32 %v2086_v12  ;;  %v6162_v22 = vld [vmem:[#allocation29_spill] sm:$0xff] }
 0x250   :  { %2373 = vmatpush1.bf16.msra.mxu1 %v2249_v62  ;;  %2331 = vmatprep.subr.bf16.mxu0 %v2256_v6  ;;  %v2257_v5 = vpack.c.bf16 %v2153_v52, %v2145_v57  ;;  %v5020_v45 = vmul.f32 %v4947_v51, %v6155_v54  ;;  %v5024_v31 = vmul.f32 %v4930_v37, %v6156_v48  ;;  %v6159_v62 = vld [vmem:[#allocation34_spill] sm:$0xff]  ;;  %v6161_v6 = vld [vmem:[#allocation51_spill] sm:$0xff]  ;;  %v6163_v12 = vld [vmem:[#allocation53_spill] sm:$0xff] }
 0x251   :  { %2374 = vmatprep.subr.bf16.mxu1 %v2258_v55  ;;  %v5028_v38 = vmul.f32 %v4947_v51, %v6157_v40  ;;  %v5032_v58 = vmul.f32 %v4947_v51, %v6158_v34  ;;  %v5036_v44 = vmul.f32 %v4947_v51, %v6159_v62  ;;  %v6160_v57 = vld [vmem:[#allocation58_spill] sm:$0xff]  ;;  %v5046_v55 = vmul.f32 %v4966_v26, %v6161_v6  ;;  %v6164_v54 = vld [vmem:[#allocation27_spill] sm:$0xff]  ;;  %v6166_v34 = vld [vmem:[#allocation72_spill] sm:$0xff] }
 0x252   :  { %v5040_v11 = vmul.f32 %v4956_v39, %v6160_v57  ;;  %v5050_v52 = vmul.f32 %v4956_v39, %v6162_v22  ;;  %v5054_v13 = vmul.f32 %v4966_v26, %v6163_v12  ;;  %v5064_v48 = vmul.f32 %v4956_v39, %v6164_v54  ;;  %v6167_v57 = vld [vmem:[#allocation60_spill] sm:$0xff]  ;;  %v6171_v54 = vld [vmem:[#allocation102_spill] sm:$0xff] }
 0x253   :  { %2332 = vmatpush1.bf16.msra.mxu0 %v2255_v24  ;;  %v5072_v62 = vmul.f32 %v4966_v26, %v6166_v34  ;;  %v5076_v6 = vmul.f32 %v4956_v39, %v6167_v57  ;;  %v6169_v22 = vld [vmem:[#allocation52_spill] sm:$0xff]  ;;  %v6173_v40 = vld [vmem:[#allocation114_spill] sm:$0xff]  ;;  %v6177_v57 = vld [vmem:[#allocation19_spill] sm:$0xff] }
 0x254   :  { %6165 = vst [vmem:[#allocation91_spill] sm:$0xff] %v5064_v48  ;;  %2375 = vmatpush1.bf16.msra.mxu1 %v2257_v5  ;;  %v5080_v12 = vmul.f32 %v4966_v26, %v6169_v22  ;;  %v5084_v5 = vmul.f32 %v4975_v18, %v6171_v54  ;;  %v5088_v53 = vmul.f32 %v4977_v28, %v6173_v40  ;;  %v6175_v24 = vld [vmem:[#allocation110_spill] sm:$0xff]  ;;  %v6179_v26 = vld [vmem:[#allocation99_spill] sm:$0xff]  ;;  %v6181_v54 = vld [vmem:[#allocation113_spill] sm:$0xff]  ;;  %v2837_v40 = vpop.eup %2836 }
 0x255   :  { %6168 = vst [vmem:[#allocation67_spill] sm:$0xff] %v5076_v6  ;;  %v5092_v34 = vmul.f32 %v4975_v18, %v6175_v24  ;;  %v5098_v32 = vmul.f32 %v4977_v28, %v6177_v57  ;;  %v5102_v22 = vmul.f32 %v4975_v18, %v6179_v26  ;;  %v5106_v51 = vmul.f32 %v4977_v28, %v6181_v54  ;;  %v6183_v39 = vld [vmem:[#allocation101_spill] sm:$0xff]  ;;  %v6185_v57 = vld [vmem:[#allocation116_spill] sm:$0xff]  ;;  %v6193_v26 = vld [vmem:[#allocation83_spill] sm:$0xff] }
 0x256   :  { %6170 = vst [vmem:[#allocation23_spill] sm:$0xff] %v5080_v12  ;;  %6172 = vst [vmem:[#allocation69_spill] sm:$0xff] %v5084_v5  ;;  %v5114_v63 = vmul.f32 %v4975_v18, %v6183_v39  ;;  %v5118_v7 = vmul.f32 %v4977_v28, %v6185_v57  ;;  %v2160_v37 = vmul.f32 %v2837_v40, %v6187_v61  ;;  %v6189_v18 = vld [vmem:[#allocation132_spill] sm:$0xff]  ;;  %v6191_v28 = vld [vmem:[#allocation11_spill] sm:$0xff] }
 0x257   :  { %6174 = vst [vmem:[#allocation117_spill] sm:$0xff] %v5088_v53  ;;  %6176 = vst [vmem:[#allocation5_spill] sm:$0xff] %v5092_v34  ;;  %v2162_v35 = vmul.f32 %v2837_v40, %v6188_v46  ;;  %v2159_v39 = vmul.f32 %v2837_v40, %v6189_v18  ;;  %v2161_v50 = vmul.f32 %v2837_v40, %v6190_v25  ;;  %v6192_v5 = vld [vmem:[#allocation40_spill] sm:$0xff]  ;;  %v6197_v46 = vld [vmem:[#allocation31_spill] sm:$0xff] }
 0x258   :  { %6178 = vst [vmem:[#allocation125_spill] sm:$0xff] %v5098_v32  ;;  %6180 = vst [vmem:[#allocation128_spill] sm:$0xff] %v5102_v22  ;;  %v6194_v32 = vld [vmem:[#allocation126_spill] sm:$0xff]  ;;  %v5138_v6 = vmul.f32 %v2837_v40, %v6197_v46  ;;  %v6211_v46 = vld [vmem:[#allocation49_spill] sm:$0xff] }
 0x259   :  { %6182 = vst [vmem:[#allocation63_spill] sm:$0xff] %v5106_v51  ;;  %6184 = vst [vmem:[#allocation118_spill] sm:$0xff] %v5114_v63  ;;  %v2839_v8 = vpop.eup %2838  ;;  %v6199_v18 = vld [vmem:[#allocation62_spill] sm:$0xff]  ;;  %v6226_v12 = vld [vmem:[#allocation80_spill] sm:$0xff] }
 0x25a   :  { %6186 = vst [vmem:[#allocation39_spill] sm:$0xff] %v5118_v7  ;;  %v2168_v57 = vmul.f32 %v2839_v8, %v6191_v28  ;;  %v2170_v53 = vmul.f32 %v2839_v8, %v6192_v5  ;;  %v2167_v34 = vmul.f32 %v2839_v8, %v6193_v26  ;;  %v2169_v54 = vmul.f32 %v2839_v8, %v6194_v32  ;;  %v6195_v7 = vld [vmem:[#allocation64_spill] sm:$0xff]  ;;  %v6201_v5 = vld [vmem:[#allocation139_spill] sm:$0xff]  ;;  %v6203_v26 = vld [vmem:[#allocation141_spill] sm:$0xff] }
 0x25b   :  { %v5135_v61 = vmul.f32 %v2837_v40, %v6195_v7  ;;  %6198 = vst [vmem:[#allocation41_spill] sm:$0xff] %v5138_v6  ;;  %v5141_v25 = vmul.f32 %v2837_v40, %v6199_v18  ;;  %v5144_v28 = vmul.f32 %v2839_v8, %v6201_v5  ;;  %v5147_v32 = vmul.f32 %v2839_v8, %v6203_v26  ;;  %v6212_v5 = vld [vmem:[#allocation76_spill] sm:$0xff] }
 0x25c   :  { %v2264_v22 = vpack.c.bf16 %v2168_v57, %v2160_v37  ;;  %v2266_v51 = vpack.c.bf16 %v2170_v53, %v2162_v35  ;;  %v2263_v24 = vpack.c.bf16 %v2167_v34, %v2159_v39  ;;  %v2265_v63 = vpack.c.bf16 %v2169_v54, %v2161_v50  ;;  %v6205_v35 = vld [vmem:[#allocation138_spill] sm:$0xff]  ;;  %v6207_v50 = vld [vmem:[#allocation65_spill] sm:$0xff]  ;;  %v6209_v53 = vld [vmem:[#allocation140_spill] sm:$0xff] }
 0x25d   :  { %6196 = vst [vmem:[#allocation66_spill] sm:$0xff] %v5135_v61  ;;  %6200 = vst [vmem:[#allocation130_spill] sm:$0xff] %v5141_v25  ;;  %v5150_v37 = vmul.f32 %v2839_v8, %v6205_v35  ;;  %v5153_v7 = vmul.f32 %v2837_v40, %v6207_v50  ;;  %v5156_v34 = vmul.f32 %v2839_v8, %v6209_v53  ;;  %v6213_v35 = vld [vmem:[#allocation47_spill] sm:$0xff]  ;;  %v6214_v53 = vld [vmem:[#allocation12_spill] sm:$0xff] }
 0x25e   :  { %2333 = vmatprep.subr.bf16.mxu0 %v2264_v22  ;;  %2376 = vmatprep.subr.bf16.mxu1 %v2266_v51  ;;  %6202 = vst [vmem:[#allocation131_spill] sm:$0xff] %v5144_v28  ;;  %6204 = vst [vmem:[#allocation45_spill] sm:$0xff] %v5147_v32  ;;  %v6215_v54 = vld [vmem:[#allocation43_spill] sm:$0xff]  ;;  %v6224_v61 = vld [vmem:[#allocation50_spill] sm:$0xff] }
 0x25f   :  { %6206 = vst [vmem:[#allocation37_spill] sm:$0xff] %v5150_v37  ;;  %2334 = vmatpush1.bf16.msra.mxu0 %v2263_v24  ;;  %2377 = vmatpush1.bf16.msra.mxu1 %v2265_v63  ;;  %6208 = vst [vmem:[#allocation38_spill] sm:$0xff] %v5153_v7  ;;  %v6216_v39 = vld [vmem:[#allocation55_spill] sm:$0xff]  ;;  %v6225_v28 = vld [vmem:[#allocation70_spill] sm:$0xff] }
 0x260   :  { %6210 = vst [vmem:[#allocation142_spill] sm:$0xff] %v5156_v34 }
 0x267   :  { %v2015_v24 = vpop.xlane.xlu0 %2014 }
 0x268   :  { %v2087_v63 = vadd.f32 1e-20, %v2015_v24  ;;  %v6217_v24 = vld [vmem:[#allocation78_spill] sm:$0xff] }
 0x26a   :  { %2840 = vrcp.f32 %v2087_v63 }
 0x274   :  { %v2841_v8 = vpop.eup %2840 }
 0x275   :  { %v2176_v18 = vmul.f32 %v2841_v8, %v6211_v46  ;;  %v2178_v26 = vmul.f32 %v2841_v8, %v6212_v5  ;;  %v2175_v50 = vmul.f32 %v2841_v8, %v6213_v35  ;;  %v2177_v22 = vmul.f32 %v2841_v8, %v6214_v53  ;;  %v6220_v46 = vld [vmem:[#allocation103_spill] sm:$0xff]  ;;  %v6221_v5 = vld [vmem:[#allocation56_spill] sm:$0xff]  ;;  %v6223_v53 = vld [vmem:[#allocation61_spill] sm:$0xff] }
 0x276   :  { %v5171_v25 = vmul.f32 %v2841_v8, %v6215_v54  ;;  %v5174_v7 = vmul.f32 %v2841_v8, %v6216_v39  ;;  %v5177_v63 = vmul.f32 %v2841_v8, %v6217_v24  ;;  %v6222_v35 = vld [vmem:[#allocation100_spill] sm:$0xff] }
 0x27e   :  { %v2024_v40 = vpop.xlane.xlu1 %2023 }
 0x27f   :  { %v2088_v57 = vadd.f32 1e-20, %v2024_v40  ;;  %v6218_v40 = vld [vmem:[#allocation35_spill] sm:$0xff] }
 0x281   :  { %2842 = vrcp.f32 %v2088_v57  ;;  %v5180_v57 = vmul.f32 %v2841_v8, %v6218_v40 }
 0x283   :  { %6219 = vst [vmem:[#allocation144_spill] sm:$0xff] %v5180_v57 }
 0x28b   :  { %v2843_v51 = vpop.eup %2842 }
 0x28c   :  { %v2184_v34 = vmul.f32 %v2843_v51, %v6220_v46  ;;  %v2186_v37 = vmul.f32 %v2843_v51, %v6221_v5  ;;  %v2183_v6 = vmul.f32 %v2843_v51, %v6222_v35  ;;  %v2185_v32 = vmul.f32 %v2843_v51, %v6223_v53  ;;  %v6229_v53 = vld [vmem:[#allocation21_spill] sm:$0xff] }
 0x28d   :  { %v5187_v54 = vmul.f32 %v2843_v51, %v4642_v16  ;;  %v5190_v39 = vmul.f32 %v2843_v51, %v6224_v61  ;;  %v5193_v24 = vmul.f32 %v2843_v51, %v6225_v28  ;;  %v5196_v8 = vmul.f32 %v2843_v51, %v6226_v12  ;;  %v6227_v51 = vld [vmem:[#allocation122_spill] sm:$0xff]  ;;  %v6230_v16 = vld [vmem:[#allocation73_spill] sm:$0xff] }
 0x28e   :  { %v2272_v40 = vpack.c.bf16 %v2184_v34, %v2176_v18  ;;  %v2274_v46 = vpack.c.bf16 %v2186_v37, %v2178_v26  ;;  %v2271_v48 = vpack.c.bf16 %v2183_v6, %v2175_v50  ;;  %v2273_v5 = vpack.c.bf16 %v2185_v32, %v2177_v22  ;;  %v6228_v18 = vld [vmem:[#allocation89_spill] sm:$0xff] }
 0x290   :  { %2335 = vmatprep.subr.bf16.mxu0 %v2272_v40  ;;  %2378 = vmatprep.subr.bf16.mxu1 %v2274_v46 }
 0x291   :  { %2336 = vmatpush1.bf16.msra.mxu0 %v2271_v48  ;;  %2379 = vmatpush1.bf16.msra.mxu1 %v2273_v5 }
 0x293   :  { %v2033_v12 = vpop.xlane.xlu0 %2032 }
 0x294   :  { %v2089_v37 = vadd.f32 1e-20, %v2033_v12 }
 0x296   :  { %2844 = vrcp.f32 %v2089_v37 }
 0x2a0   :  { %v2845_v34 = vpop.eup %2844 }
 0x2a1   :  { %v2192_v22 = vmul.f32 %v2845_v34, %v6227_v51  ;;  %v2194_v26 = vmul.f32 %v2845_v34, %v6228_v18  ;;  %v2191_v61 = vmul.f32 %v2845_v34, %v6229_v53  ;;  %v2193_v28 = vmul.f32 %v2845_v34, %v6230_v16  ;;  %v6232_v16 = vld [vmem:[#allocation84_spill] sm:$0xff]  ;;  %v6233_v18 = vld [vmem:[#allocation111_spill] sm:$0xff] }
 0x2a2   :  { %v5211_v40 = vmul.f32 %v2845_v34, %v4737_v15  ;;  %v5214_v48 = vmul.f32 %v2845_v34, %v4751_v47  ;;  %v5227_v15 = vmul.f32 %v2845_v34, %v6232_v16 }
 0x2a9   :  { %v2042_v6 = vpop.xlane.xlu1 %2041 }
 0x2aa   :  { %v2090_v32 = vadd.f32 1e-20, %v2042_v6  ;;  %v6231_v6 = vld [vmem:[#allocation112_spill] sm:$0xff] }
 0x2ac   :  { %2846 = vrcp.f32 %v2090_v32 }
 0x2b6   :  { %v2847_v50 = vpop.eup %2846  ;;  %v2051_v53 = vpop.xlane.xlu0 %2050 }
 0x2b7   :  { %v2200_v46 = vmul.f32 %v2847_v50, %v6080_v33  ;;  %v2202_v5 = vmul.f32 %v2847_v50, %v4790_v3  ;;  %v2199_v12 = vmul.f32 %v2847_v50, %v4395_v19  ;;  %v2201_v37 = vmul.f32 %v2847_v50, %v4785_v59 }
 0x2b8   :  { %v5221_v32 = vmul.f32 %v2847_v50, %v6231_v6  ;;  %v5224_v51 = vmul.f32 %v2847_v50, %v4806_v43  ;;  %v5230_v47 = vmul.f32 %v2847_v50, %v6233_v18  ;;  %v6234_v6 = vld [vmem:[#allocation109_spill] sm:$0xff]  ;;  %v5242_v18 = vmul.f32 %v2847_v50, %v4803_v60 }
 0x2b9   :  { %v2280_v33 = vpack.c.bf16 %v2200_v46, %v2192_v22  ;;  %v2282_v35 = vpack.c.bf16 %v2202_v5, %v2194_v26  ;;  %v2279_v3 = vpack.c.bf16 %v2199_v12, %v2191_v61  ;;  %v2281_v57 = vpack.c.bf16 %v2201_v37, %v2193_v28 }
 0x2ba   :  { %v2284_v19 = vpack.c.bf16 %v5221_v32, %v5211_v40  ;;  %v2286_v59 = vpack.c.bf16 %v5224_v51, %v5214_v48  ;;  %v2283_v43 = vpack.c.bf16 %v5230_v47, %v5227_v15  ;;  %v5239_v16 = vmul.f32 %v2845_v34, %v6234_v6  ;;  %v6282_v40 = vld [vmem:[#allocation90_spill] sm:$0xff]  ;;  %v6284_v51 = vld [vmem:[#allocation25_spill] sm:$0xff] }
 0x2bb   :  { %2337 = vmatprep.subr.bf16.mxu0 %v2280_v33  ;;  %2380 = vmatprep.subr.bf16.mxu1 %v2282_v35  ;;  %v2091_v22 = vadd.f32 1e-20, %v2051_v53 }
 0x2bc   :  { %2338 = vmatpush1.bf16.msra.mxu0 %v2279_v3  ;;  %2381 = vmatpush1.bf16.msra.mxu1 %v2281_v57  ;;  %v2285_v61 = vpack.c.bf16 %v5242_v18, %v5239_v16  ;;  %v6289_v18 = vld [vmem:[#allocation57_spill] sm:$0xff] }
 0x2bd   :  { %2848 = vrcp.f32 %v2091_v22 }
 0x2bf   :  { %v2060_v28 = vpop.xlane.xlu1 %2059 }
 0x2c0   :  { %v2092_v26 = vadd.f32 1e-20, %v2060_v28 }
 0x2c2   :  { %2850 = vrcp.f32 %v2092_v26 }
 0x2c7   :  { %v5246_v46 = vpop.eup %2848 }
 0x2c8   :  { %v2208_v35 = vmul.f32 %v5246_v46, %v4821_v21  ;;  %v2210_v60 = vmul.f32 %v5246_v46, %v4834_v29  ;;  %v2207_v57 = vmul.f32 %v5246_v46, %v4818_v41  ;;  %v2209_v21 = vmul.f32 %v5246_v46, %v4830_v27 }
 0x2cc   :  { %v5248_v5 = vpop.eup %2850 }
 0x2cd   :  { %v2216_v34 = vmul.f32 %v5248_v5, %v4624_v9  ;;  %v2218_v50 = vmul.f32 %v5248_v5, %v4868_v1  ;;  %v2215_v12 = vmul.f32 %v5248_v5, %v4614_v20  ;;  %v2217_v37 = vmul.f32 %v5248_v5, %v4863_v2 }
 0x2cf   :  { %v2288_v53 = vpack.c.bf16 %v2216_v34, %v2208_v35  ;;  %v2290_v29 = vpack.c.bf16 %v2218_v50, %v2210_v60  ;;  %v2287_v33 = vpack.c.bf16 %v2215_v12, %v2207_v57  ;;  %v2069_v3 = vpop.xlane.xlu0 %2068  ;;  %v2289_v41 = vpack.c.bf16 %v2217_v37, %v2209_v21  ;;  %v6248_v37 = vld [vmem:[#allocation69_spill] sm:$0xff] }
 0x2d0   :  { %v2093_v9 = vadd.f32 1e-20, %v2069_v3  ;;  %v6251_v21 = vld [vmem:[#allocation5_spill] sm:$0xff]  ;;  %v6257_v3 = vld [vmem:[#allocation118_spill] sm:$0xff] }
 0x2d1   :  { %2339 = vmatprep.subr.bf16.mxu0 %v2288_v53  ;;  %2382 = vmatprep.subr.bf16.mxu1 %v2290_v29  ;;  %v6254_v53 = vld [vmem:[#allocation128_spill] sm:$0xff] }
 0x2d2   :  { %2340 = vmatpush1.bf16.msra.mxu0 %v2287_v33  ;;  %2383 = vmatpush1.bf16.msra.mxu1 %v2289_v41  ;;  %2852 = vrcp.f32 %v2093_v9  ;;  %v6256_v33 = vld [vmem:[#allocation39_spill] sm:$0xff]  ;;  %v6260_v9 = vld [vmem:[#allocation66_spill] sm:$0xff] }
 0x2d3   :  { %v6259_v41 = vld [vmem:[#allocation131_spill] sm:$0xff] }
 0x2d8   :  { %v2078_v1 = vpop.xlane.xlu1 %2077 }
 0x2d9   :  { %v2094_v6 = vadd.f32 1e-20, %v2078_v1  ;;  %v6261_v1 = vpack.c.bf16 %v6259_v41, %v6260_v9 }
 0x2db   :  { %2854 = vrcp.f32 %v2094_v6  ;;  %v6262_v6 = vld [vmem:[#allocation45_spill] sm:$0xff] }
 0x2dc   :  { %v5266_v20 = vpop.eup %2852 }
 0x2dd   :  { %v2224_v27 = vmul.f32 %v5266_v20, %v4904_v56  ;;  %v2226_v22 = vmul.f32 %v5266_v20, %v4910_v17  ;;  %v2223_v28 = vmul.f32 %v5266_v20, %v4900_v36  ;;  %v2225_v26 = vmul.f32 %v5266_v20, %v4906_v4  ;;  %v5289_v36 = vld [vmem:[%s5451_s2] sm:$0xff]  }
 0x2de   :  { %v6237_v4 = vpack.c.bf16 %v5016_v14, %v5032_v58  ;;  %v6245_v58 = vld [vmem:[#allocation67_spill] sm:$0xff] }
 0x2e5   :  { %v5268_v2 = vpop.eup %2854 }
 0x2e6   :  { %v2232_v35 = vmul.f32 %v5268_v2, %v4783_v30  ;;  %v2234_v60 = vmul.f32 %v5268_v2, %v4932_v42  ;;  %v2231_v57 = vmul.f32 %v5268_v2, %v4779_v0  ;;  %v2233_v56 = vmul.f32 %v5268_v2, %v4926_v10 }
 0x2e7   :  { %v6235_v30 = vpack.c.bf16 %v5008_v49, %v5020_v45  ;;  %v6236_v0 = vpack.c.bf16 %v5012_v23, %v5028_v38  ;;  %v6238_v10 = vpack.c.bf16 %v5024_v31, %v5036_v44  ;;  %v6239_v42 = vpack.c.bf16 %v5046_v55, %v5040_v11  ;;  %v6242_v45 = vld [vmem:[#allocation91_spill] sm:$0xff]  ;;  %v6247_v44 = vld [vmem:[#allocation117_spill] sm:$0xff] }
 0x2e8   :  { %v2296_v34 = vpack.c.bf16 %v2232_v35, %v2224_v27  ;;  %v2298_v17 = vpack.c.bf16 %v2234_v60, %v2226_v22  ;;  %v2295_v50 = vpack.c.bf16 %v2231_v57, %v2223_v28  ;;  %v2297_v12 = vpack.c.bf16 %v2233_v56, %v2225_v26  ;;  %v6244_v38 = vld [vmem:[#allocation23_spill] sm:$0xff]  ;;  %v6250_v55 = vld [vmem:[#allocation125_spill] sm:$0xff]  ;;  %v6266_v26 = vld [vmem:[#allocation130_spill] sm:$0xff] }
 0x2e9   :  { %v6240_v49 = vpack.c.bf16 %v5054_v13, %v5050_v52  ;;  %v6241_v23 = vmov 0   ;;  %v6243_v14 = vpack.c.bf16 %v5072_v62, %v6242_v45  ;;  %v6246_v31 = vpack.c.bf16 %v6244_v38, %v6245_v58  ;;  %v6253_v13 = vld [vmem:[#allocation63_spill] sm:$0xff]  ;;  %v6263_v27 = vld [vmem:[#allocation41_spill] sm:$0xff]  ;;  %v6268_v60 = vld [vmem:[#allocation142_spill] sm:$0xff] }
 0x2ea   :  { %2341 = vmatprep.subr.bf16.mxu0 %v2296_v34  ;;  %2384 = vmatprep.subr.bf16.mxu1 %v2298_v17  ;;  %v6249_v11 = vpack.c.bf16 %v6247_v44, %v6248_v37  ;;  %v6252_v52 = vpack.c.bf16 %v6250_v55, %v6251_v21  ;;  %v6255_v29 = vpack.c.bf16 %v6253_v13, %v6254_v53  ;;  %v6265_v28 = vld [vmem:[#allocation37_spill] sm:$0xff]  ;;  %v6269_v57 = vld [vmem:[#allocation38_spill] sm:$0xff] }
 0x2eb   :  { %2342 = vmatpush1.bf16.msra.mxu0 %v2295_v50  ;;  %2385 = vmatpush1.bf16.msra.mxu1 %v2297_v12  ;;  %v6258_v62 = vpack.c.bf16 %v6256_v33, %v6257_v3  ;;  %v6264_v22 = vpack.c.bf16 %v6262_v6, %v6263_v27  ;;  %v6267_v35 = vpack.c.bf16 %v6265_v28, %v6266_v26  ;;  %v6273_v50 = vld [vmem:[#allocation16_spill] sm:$0xff]  ;;  %v6286_v38 = vld [vmem:[#allocation9_spill] sm:$0xff]  ;;  %v6291_v21 = vld [vmem:[#allocation86_spill] sm:$0xff] }
 0x2ec   :  { %2413 = vmatprep.subr.bf16.mxu0 %v6235_v30  ;;  %2456 = vmatprep.subr.bf16.mxu1 %v6236_v0  ;;  %v6270_v56 = vpack.c.bf16 %v6268_v60, %v6269_v57  ;;  %v6271_v34 = vpack.c.bf16 %v5187_v54, %v5171_v25  ;;  %v6272_v17 = vpack.c.bf16 %v5190_v39, %v5174_v7  ;;  %v6274_v30 = vld [vmem:[#allocation136_spill] sm:$0xff]  ;;  %v6279_v54 = vld [vmem:[#allocation107_spill] sm:$0xff] }
 0x2ed   :  { %v2220_v12 = vmul.f32 %v5248_v5, %v6273_v50  ;;  %v2222_v0 = vmul.f32 %v5248_v5, %v6274_v30  ;;  %v6278_v25 = vld [vmem:[#allocation104_spill] sm:$0xff]  ;;  %v2214_v39 = vmul.f32 %v5246_v46, %v6279_v54  ;;  %v2236_v32 = vmul.f32 %v5268_v2, %v6282_v40 }
 0x2ee   :  { %2360 = vmatmul.mubr.bf16.vlgmr.msra.gmra.mrb[0].mxu0 %v5289_v36  ;;  %2403 = vmatmul.mubr.bf16.vlgmr.msra.gmra.mrb[0].mxu1 %v5289_v36  ;;  %v2212_v7 = vmul.f32 %v5246_v46, %v6278_v25  ;;  %v2228_v58 = vmul.f32 %v5266_v20, %v6286_v38 }
 0x2ef   :  { %2414 = vmatpush1.bf16.msra.mxu0 %v6237_v4  ;;  %2457 = vmatpush1.bf16.msra.mxu1 %v6238_v10  ;;  %v6275_v4 = vpack.c.bf16 %v5193_v24, %v5177_v63  ;;  %v6276_v10 = vld [vmem:[#allocation144_spill] sm:$0xff]  ;;  %v6280_v63 = vld [vmem:[#allocation54_spill] sm:$0xff]  ;;  %v2294_v45 = vpack.c.bf16 %v2222_v0, %v2214_v39 }
 0x2f0   :  { %2415 = vmatprep.subr.bf16.mxu0 %v6239_v42  ;;  %2458 = vmatprep.subr.bf16.mxu1 %v6240_v49  ;;  %v6277_v42 = vpack.c.bf16 %v5196_v8, %v6276_v10  ;;  %v2219_v24 = vmul.f32 %v5248_v5, %v6280_v63  ;;  %v6281_v49 = vld [vmem:[#allocation135_spill] sm:$0xff]  ;;  %v2300_v37 = vpack.c.bf16 %v2236_v32, %v2228_v58 }
 0x2f1   :  { %2445 = vmatprep.mubr.bf16.mxu0 %v6241_v23  ;;  %2488 = vmatprep.mubr.bf16.mxu1 %v6241_v23  ;;  %v2221_v8 = vmul.f32 %v5248_v5, %v6281_v49  ;;  %v2292_v23 = vpack.c.bf16 %v2220_v12, %v2212_v7  ;;  %v6285_v5 = vld [vmem:[#allocation32_spill] sm:$0xff] }
 0x2f3   :  { %2416 = vmatpush1.bf16.msra.mxu0 %v6243_v14  ;;  %2459 = vmatpush1.bf16.msra.mxu1 %v6246_v31  ;;  %v2213_v14 = vmul.f32 %v5246_v46, %v6285_v5  ;;  %v6287_v31 = vld [vmem:[#allocation87_spill] sm:$0xff] }
 0x2f4   :  { %2417 = vmatprep.subr.bf16.mxu0 %v6249_v11  ;;  %2460 = vmatprep.subr.bf16.mxu1 %v6252_v52  ;;  %v2230_v44 = vmul.f32 %v5266_v20, %v6287_v31  ;;  %v2229_v52 = vmul.f32 %v5266_v20, %v6291_v21 }
 0x2f5   :  { %v2293_v47 = vpack.c.bf16 %v2221_v8, %v2213_v14 }
 0x2f7   :  { %2418 = vmatpush1.bf16.msra.mxu0 %v6255_v29  ;;  %2461 = vmatpush1.bf16.msra.mxu1 %v6258_v62 }
 0x2f8   :  { %2419 = vmatprep.subr.bf16.mxu0 %v6261_v1  ;;  %2462 = vmatprep.subr.bf16.mxu1 %v6264_v22 }
 0x2fb   :  { %2420 = vmatpush1.bf16.msra.mxu0 %v6267_v35  ;;  %2463 = vmatpush1.bf16.msra.mxu1 %v6270_v56 }
 0x2fc   :  { %2421 = vmatprep.subr.bf16.mxu0 %v6271_v34  ;;  %2464 = vmatprep.subr.bf16.mxu1 %v6272_v17 }
 0x2ff   :  { %2422 = vmatpush1.bf16.msra.mxu0 %v6275_v4  ;;  %2465 = vmatpush1.bf16.msra.mxu1 %v6277_v42 }
 0x300   :  { %2423 = vmatprep.subr.bf16.mxu0 %v2284_v19  ;;  %2466 = vmatprep.subr.bf16.mxu1 %v2286_v59  ;;  %v6283_v19 = vld [vmem:[#allocation8_spill] sm:$0xff]  ;;  %v2211_v59 = vmul.f32 %v5246_v46, %v6284_v51  ;;  %v6290_v46 = vld [vmem:[#allocation137_spill] sm:$0xff] }
 0x301   :  { %v2238_v48 = vmul.f32 %v5268_v2, %v6283_v19  ;;  %v2227_v55 = vmul.f32 %v5266_v20, %v6290_v46 }
 0x302   :  { %v2291_v15 = vpack.c.bf16 %v2219_v24, %v2211_v59 }
 0x303   :  { %2424 = vmatpush1.bf16.msra.mxu0 %v2283_v43  ;;  %2467 = vmatpush1.bf16.msra.mxu1 %v2285_v61  ;;  %v6288_v43 = vld [vmem:[#allocation88_spill] sm:$0xff]  ;;  %v2237_v61 = vmul.f32 %v5268_v2, %v6289_v18  ;;  %v2302_v11 = vpack.c.bf16 %v2238_v48, %v2230_v44 }
 0x304   :  { %2425 = vmatprep.subr.bf16.mxu0 %v2292_v23  ;;  %2468 = vmatprep.subr.bf16.mxu1 %v2294_v45  ;;  %v2235_v16 = vmul.f32 %v5268_v2, %v6288_v43 }
 0x305   :  { %v2301_v53 = vpack.c.bf16 %v2237_v61, %v2229_v52 }
 0x306   :  { %v2299_v13 = vpack.c.bf16 %v2235_v16, %v2227_v55 }
 0x307   :  { %2426 = vmatpush1.bf16.msra.mxu0 %v2291_v15  ;;  %2469 = vmatpush1.bf16.msra.mxu1 %v2293_v47 }
 0x308   :  { %2427 = vmatprep.subr.bf16.mxu0 %v2300_v37  ;;  %2470 = vmatprep.subr.bf16.mxu1 %v2302_v11 }
 0x30b   :  { %2428 = vmatpush1.bf16.msra.mxu0 %v2299_v13  ;;  %2471 = vmatpush1.bf16.msra.mxu1 %v2301_v53 }
 0x30e   :  { %2446 = vmatmul.mubr.bf16.vlgmr.msra.gmra.mrb[4].mxu0 %v5289_v36  ;;  %2489 = vmatmul.mubr.bf16.vlgmr.msra.gmra.mrb[4].mxu1 %v5289_v36 }
 0x3c1   :  { %v2361_v2 = vpop.f32.mrb[0].mxu0  ;;  %v2404_v29 = vpop.f32.mrb[0].mxu1 }
 0x3c2   :  { %v2363_v33 = vpop.f32.mrb[1].mxu0  ;;  %v2406_v3 = vpop.f32.mrb[1].mxu1  ;;  %2515 = vst [vmem:[%s5452_s3] sm:$0xff] %v2361_v2  ;;  %2517 = vst [vmem:[%s5452_s3 + $0x10] sm:$0xff] %v2404_v29 }
 0x3c3   :  { %v2365_v62 = vpop.f32.mrb[2].mxu0  ;;  %v2408_v41 = vpop.f32.mrb[2].mxu1  ;;  %2516 = vst [vmem:[%s5452_s3 + $0x8] sm:$0xff] %v2363_v33  ;;  %2518 = vst [vmem:[%s5452_s3 + $0x18] sm:$0xff] %v2406_v3 }
 0x3c4   :  { %v2367_v20 = vpop.f32.mrb[3].mxu0  ;;  %v2410_v9 = vpop.f32.mrb[3].mxu1  ;;  %2523 = vst [vmem:[%s5452_s3 + $0x40] sm:$0xff] %v2365_v62  ;;  %2525 = vst [vmem:[%s5452_s3 + $0x50] sm:$0xff] %v2408_v41 }
 0x3c5   :  { %2524 = vst [vmem:[%s5452_s3 + $0x48] sm:$0xff] %v2367_v20  ;;  %2526 = vst [vmem:[%s5452_s3 + $0x58] sm:$0xff] %v2410_v9 }
 0x3e1   :  { %v2447_v36 = vpop.f32.mrb[4].mxu0  ;;  %v2490_v1 = vpop.f32.mrb[4].mxu1 }
 0x3e2   :  { %v2449_v6 = vpop.f32.mrb[5].mxu0  ;;  %v2492_v27 = vpop.f32.mrb[5].mxu1  ;;  %2519 = vst [vmem:[%s5452_s3 + $0x20] sm:$0xff] %v2447_v36  ;;  %2521 = vst [vmem:[%s5452_s3 + $0x30] sm:$0xff] %v2490_v1 }
 0x3e3   :  { %v2451_v22 = vpop.f32.mrb[6].mxu0  ;;  %v2494_v28 = vpop.f32.mrb[6].mxu1  ;;  %2520 = vst [vmem:[%s5452_s3 + $0x28] sm:$0xff] %v2449_v6  ;;  %2522 = vst [vmem:[%s5452_s3 + $0x38] sm:$0xff] %v2492_v27 }
 0x3e4   :  { %v2453_v26 = vpop.f32.mrb[7].mxu0  ;;  %v2496_v35 = vpop.f32.mrb[7].mxu1  ;;  %2527 = vst [vmem:[%s5452_s3 + $0x60] sm:$0xff] %v2451_v22  ;;  %2529 = vst [vmem:[%s5452_s3 + $0x70] sm:$0xff] %v2494_v28 }
 0x3e5   :  { %2528 = vst [vmem:[%s5452_s3 + $0x68] sm:$0xff] %v2453_v26  ;;  %2530 = vst [vmem:[%s5452_s3 + $0x78] sm:$0xff] %v2496_v35 }
 0x3e6   :  { %2535 = vsyncpa [#allocation3], 1 }

// kernel: cavity_forward.6
= control target key start
LH: loop header
LB: loop body
LE: loop exit
PB: predicated region body
PF: predicated region fallthrough
CT: control target
= control target key end

     0   :  { %v4428_v0 = vmov 0   ;;  %vm1510_vm0 = vcmask 277504   ;;  %vm1895_vm1 = vcmask 1040384   ;;  %s6177_s1 = inlined_call_operand.vmem [shape: bf16[162,128], index: 1, kind: input, shape index: {}]   ;;  %s6178_s0 = inlined_call_operand.vmem [shape: bf16[1,2048,162], index: 0, kind: input, shape index: {}]   ;;  %s6179_s2 = inlined_call_operand.vmem [shape: f32[1,128], index: 2, kind: input, shape index: {}]   ;;  %s6180_s3 = inlined_call_operand.vmem [shape: f32[1,128], index: 3, kind: input, shape index: {}]   ;;  %s6181_s4 = inlined_call_operand.vmem [shape: bf16[256,128], index: 4, kind: output, shape index: {}]  }
   0x1   :  { %1899 = vmatprep.subr.bf16.mxu0 %v4428_v0  ;;  %v4033_v1 = vld [vmem:[%s6177_s1] sm:$0xff]   ;;  %4010 = vmatprep.subr.bf16.mxu1 %v4428_v0  ;;  %v4034_v2 = vld [vmem:[%s6177_s1 + $0x8] sm:$0xff]   ;;  %v4035_v3 = vld [vmem:[%s6177_s1 + $0x10] sm:$0xff]  }
   0x2   :  { %1900 = vmatpush1.bf16.msra.mxu0 %v4033_v1  ;;  %4021 = vmatpush1.bf16.msra.mxu1 %v4033_v1  ;;  %v4036_v4 = vld [vmem:[%s6177_s1 + $0x18] sm:$0xff]   ;;  %v4046_v5 = vld [vmem:[%s6178_s0 + $0x4] ss:$8 sps:$4 sm:$0xff]   ;;  %v4039_v9 = vld [vmem:[%s6177_s1 + $0x30] sm:$0xff]  }
   0x3   :  { %1901 = vmatprep.subr.bf16.mxu0 %v4428_v0  ;;  %4011 = vmatprep.subr.bf16.mxu1 %v4428_v0  ;;  %v4049_v6 = vld [vmem:[%s6178_s0 + $0x404] ss:$8 sps:$4 sm:$0xff]   ;;  %v4040_v10 = vld [vmem:[%s6177_s1 + $0x38] sm:$0xff]   ;;  %v4043_v13 = vld [vmem:[%s6177_s1 + $0x50] ss:$0 sps:$4 sm:$0x11]  }
   0x4   :  { %3721 = vmatprep.mubr.msk.bf16.mxu0 %vm1510_vm0, %v4046_v5  ;;  %v4037_v7 = vld [vmem:[%s6177_s1 + $0x20] sm:$0xff]   ;;  %3785 = vmatprep.mubr.msk.bf16.mxu1 %vm1510_vm0, %v4049_v6  ;;  %v4038_v8 = vld [vmem:[%s6177_s1 + $0x28] sm:$0xff]   ;;  %v1897_v14 = vsel %vm1895_vm1, %v4043_v13, 0  ;;  %v4050_v17 = vld [vmem:[%s6178_s0 + $0x14] ss:$8 sps:$4 sm:$0xff]  }
   0x5   :  { %v4041_v11 = vld [vmem:[%s6177_s1 + $0x40] sm:$0xff]   ;;  %v4042_v12 = vld [vmem:[%s6177_s1 + $0x48] sm:$0xff]   ;;  %v4053_v18 = vld [vmem:[%s6178_s0 + $0x414] ss:$8 sps:$4 sm:$0xff]  }
   0x6   :  { %1902 = vmatpush1.bf16.msra.mxu0 %v4034_v2  ;;  %4022 = vmatpush1.bf16.msra.mxu1 %v4034_v2  ;;  %v4044_v15 = vld [vmem:[%s6178_s0] ss:$8 sps:$4 sm:$0xff]   ;;  %v4052_v19 = vld [vmem:[%s6178_s0 + $0x10] ss:$8 sps:$4 sm:$0xff]   ;;  %v4056_v21 = vld [vmem:[%s6178_s0 + $0x24] ss:$8 sps:$4 sm:$0xff]  }
   0x7   :  { %1903 = vmatprep.subr.bf16.mxu0 %v4428_v0  ;;  %4012 = vmatprep.subr.bf16.mxu1 %v4428_v0  ;;  %v4047_v16 = vld [vmem:[%s6178_s0 + $0x400] ss:$8 sps:$4 sm:$0xff]   ;;  %v4055_v20 = vld [vmem:[%s6178_s0 + $0x410] ss:$8 sps:$4 sm:$0xff]   ;;  %v4059_v22 = vld [vmem:[%s6178_s0 + $0x424] ss:$8 sps:$4 sm:$0xff]  }
   0x8   :  { %v4058_v23 = vld [vmem:[%s6178_s0 + $0x20] ss:$8 sps:$4 sm:$0xff]   ;;  %v4062_v25 = vld [vmem:[%s6178_s0 + $0x34] ss:$8 sps:$4 sm:$0xff]   ;;  %v4064_v27 = vld [vmem:[%s6178_s0 + $0x30] ss:$8 sps:$4 sm:$0xff]  }
   0x9   :  { %v4061_v24 = vld [vmem:[%s6178_s0 + $0x420] ss:$8 sps:$4 sm:$0xff]   ;;  %v4065_v26 = vld [vmem:[%s6178_s0 + $0x434] ss:$8 sps:$4 sm:$0xff]   ;;  %v4067_v28 = vld [vmem:[%s6178_s0 + $0x430] ss:$8 sps:$4 sm:$0xff]  }
   0xa   :  { %1904 = vmatpush1.bf16.msra.mxu0 %v4035_v3  ;;  %4023 = vmatpush1.bf16.msra.mxu1 %v4035_v3  ;;  %v4068_v29 = vld [vmem:[%s6178_s0 + $0x44] ss:$8 sps:$4 sm:$0xff]   ;;  %v4070_v31 = vld [vmem:[%s6178_s0 + $0x40] ss:$8 sps:$4 sm:$0xff]   ;;  %v4074_v33 = vld [vmem:[%s6178_s0 + $0x54] ss:$8 sps:$4 sm:$0xff]  }
   0xb   :  { %1905 = vmatprep.subr.bf16.mxu0 %v4428_v0  ;;  %4013 = vmatprep.subr.bf16.mxu1 %v4428_v0  ;;  %v4071_v30 = vld [vmem:[%s6178_s0 + $0x444] ss:$8 sps:$4 sm:$0xff]   ;;  %v4073_v32 = vld [vmem:[%s6178_s0 + $0x440] ss:$8 sps:$4 sm:$0xff]   ;;  %v4077_v34 = vld [vmem:[%s6178_s0 + $0x454] ss:$8 sps:$4 sm:$0xff]  }
   0xc   :  { %v4076_v35 = vld [vmem:[%s6178_s0 + $0x50] ss:$8 sps:$4 sm:$0xff]   ;;  %v4080_v37 = vld [vmem:[%s6178_s0 + $0x64] ss:$8 sps:$4 sm:$0xff]   ;;  %v4082_v39 = vld [vmem:[%s6178_s0 + $0x60] ss:$8 sps:$4 sm:$0xff]  }
   0xd   :  { %v4079_v36 = vld [vmem:[%s6178_s0 + $0x450] ss:$8 sps:$4 sm:$0xff]   ;;  %v4083_v38 = vld [vmem:[%s6178_s0 + $0x464] ss:$8 sps:$4 sm:$0xff]   ;;  %v4085_v40 = vld [vmem:[%s6178_s0 + $0x460] ss:$8 sps:$4 sm:$0xff]  }
   0xe   :  { %1906 = vmatpush1.bf16.msra.mxu0 %v4036_v4  ;;  %4024 = vmatpush1.bf16.msra.mxu1 %v4036_v4  ;;  %v4086_v41 = vld [vmem:[%s6178_s0 + $0x74] ss:$8 sps:$4 sm:$0xff]   ;;  %v4088_v43 = vld [vmem:[%s6178_s0 + $0x70] ss:$8 sps:$4 sm:$0xff]   ;;  %v4092_v45 = vld [vmem:[%s6178_s0 + $0x84] ss:$8 sps:$4 sm:$0xff]  }
   0xf   :  { %1907 = vmatprep.subr.bf16.mxu0 %v4428_v0  ;;  %4014 = vmatprep.subr.bf16.mxu1 %v4428_v0  ;;  %v4089_v42 = vld [vmem:[%s6178_s0 + $0x474] ss:$8 sps:$4 sm:$0xff]   ;;  %v4091_v44 = vld [vmem:[%s6178_s0 + $0x470] ss:$8 sps:$4 sm:$0xff]   ;;  %v4095_v46 = vld [vmem:[%s6178_s0 + $0x484] ss:$8 sps:$4 sm:$0xff]  }
  0x10   :  { %v4094_v47 = vld [vmem:[%s6178_s0 + $0x80] ss:$8 sps:$4 sm:$0xff]   ;;  %v4098_v49 = vld [vmem:[%s6178_s0 + $0x94] ss:$8 sps:$4 sm:$0xff]   ;;  %v4100_v51 = vld [vmem:[%s6178_s0 + $0x90] ss:$8 sps:$4 sm:$0xff]  }
  0x11   :  { %v4097_v48 = vld [vmem:[%s6178_s0 + $0x480] ss:$8 sps:$4 sm:$0xff]   ;;  %v4101_v50 = vld [vmem:[%s6178_s0 + $0x494] ss:$8 sps:$4 sm:$0xff]   ;;  %v4103_v52 = vld [vmem:[%s6178_s0 + $0x490] ss:$8 sps:$4 sm:$0xff]  }
  0x12   :  { %1908 = vmatpush1.bf16.msra.mxu0 %v4037_v7  ;;  %4025 = vmatpush1.bf16.msra.mxu1 %v4037_v7  ;;  %v4104_v53 = vld [vmem:[%s6178_s0 + $0xa4] ss:$8 sps:$4 sm:$0xff]   ;;  %v4106_v55 = vld [vmem:[%s6178_s0 + $0xa0] ss:$8 sps:$4 sm:$0xff]   ;;  %v4110_v57 = vld [vmem:[%s6178_s0 + $0xb4] ss:$8 sps:$4 sm:$0xff]  }
  0x13   :  { %1909 = vmatprep.subr.bf16.mxu0 %v4428_v0  ;;  %4015 = vmatprep.subr.bf16.mxu1 %v4428_v0  ;;  %v4107_v54 = vld [vmem:[%s6178_s0 + $0x4a4] ss:$8 sps:$4 sm:$0xff]   ;;  %v4109_v56 = vld [vmem:[%s6178_s0 + $0x4a0] ss:$8 sps:$4 sm:$0xff]   ;;  %v4113_v58 = vld [vmem:[%s6178_s0 + $0x4b4] ss:$8 sps:$4 sm:$0xff]  }
  0x14   :  { %v4112_v59 = vld [vmem:[%s6178_s0 + $0xb0] ss:$8 sps:$4 sm:$0xff]   ;;  %v4116_v61 = vld [vmem:[%s6178_s0 + $0xc4] ss:$8 sps:$4 sm:$0xff]   ;;  %v4118_v63 = vld [vmem:[%s6178_s0 + $0xc0] ss:$8 sps:$4 sm:$0xff]  }
  0x15   :  { %v4115_v60 = vld [vmem:[%s6178_s0 + $0x4b0] ss:$8 sps:$4 sm:$0xff]   ;;  %v4119_v62 = vld [vmem:[%s6178_s0 + $0x4c4] ss:$8 sps:$4 sm:$0xff]   ;;  %v4122_v1 = vld [vmem:[%s6178_s0 + $0xd4] ss:$8 sps:$4 sm:$0xff]  }
  0x16   :  { %1910 = vmatpush1.bf16.msra.mxu0 %v4038_v8  ;;  %4026 = vmatpush1.bf16.msra.mxu1 %v4038_v8  ;;  %v4125_v2 = vld [vmem:[%s6178_s0 + $0x4d4] ss:$8 sps:$4 sm:$0xff]   ;;  %v4124_v3 = vld [vmem:[%s6178_s0 + $0xd0] ss:$8 sps:$4 sm:$0xff]   ;;  %v4128_v5 = vld [vmem:[%s6178_s0 + $0xe4] ss:$8 sps:$4 sm:$0xff]  }
  0x17   :  { %1911 = vmatprep.subr.bf16.mxu0 %v4428_v0  ;;  %4016 = vmatprep.subr.bf16.mxu1 %v4428_v0  ;;  %v4127_v4 = vld [vmem:[%s6178_s0 + $0x4d0] ss:$8 sps:$4 sm:$0xff]   ;;  %v4131_v6 = vld [vmem:[%s6178_s0 + $0x4e4] ss:$8 sps:$4 sm:$0xff]   ;;  %v4130_v7 = vld [vmem:[%s6178_s0 + $0xe0] ss:$8 sps:$4 sm:$0xff]  }
  0x18   :  { %v4133_v8 = vld [vmem:[%s6178_s0 + $0x4e0] ss:$8 sps:$4 sm:$0xff]   ;;  %v4140_v13 = vld [vmem:[%s6178_s0 + $0x104] ss:$8 sps:$4 sm:$0xff]  }
  0x1a   :  { %1912 = vmatpush1.bf16.msra.mxu0 %v4039_v9  ;;  %4027 = vmatpush1.bf16.msra.mxu1 %v4039_v9  ;;  %v4134_v9 = vld [vmem:[%s6178_s0 + $0xf4] ss:$8 sps:$4 sm:$0xff]  }
  0x1b   :  { %1913 = vmatprep.subr.bf16.mxu0 %v4428_v0  ;;  %4017 = vmatprep.subr.bf16.mxu1 %v4428_v0 }
  0x1e   :  { %1914 = vmatpush1.bf16.msra.mxu0 %v4040_v10  ;;  %4028 = vmatpush1.bf16.msra.mxu1 %v4040_v10  ;;  %v4137_v10 = vld [vmem:[%s6178_s0 + $0x4f4] ss:$8 sps:$4 sm:$0xff]  }
  0x1f   :  { %1915 = vmatprep.subr.bf16.mxu0 %v4428_v0  ;;  %4018 = vmatprep.subr.bf16.mxu1 %v4428_v0 }
  0x22   :  { %1916 = vmatpush1.bf16.msra.mxu0 %v4041_v11  ;;  %4029 = vmatpush1.bf16.msra.mxu1 %v4041_v11  ;;  %v4136_v11 = vld [vmem:[%s6178_s0 + $0xf0] ss:$8 sps:$4 sm:$0xff]  }
  0x23   :  { %1917 = vmatprep.subr.bf16.mxu0 %v4428_v0  ;;  %4019 = vmatprep.subr.bf16.mxu1 %v4428_v0 }
  0x26   :  { %1918 = vmatpush1.bf16.msra.mxu0 %v4042_v12  ;;  %4030 = vmatpush1.bf16.msra.mxu1 %v4042_v12  ;;  %v4139_v12 = vld [vmem:[%s6178_s0 + $0x4f0] ss:$8 sps:$4 sm:$0xff]  }
  0x27   :  { %1919 = vmatprep.subr.bf16.mxu0 %v4428_v0  ;;  %4020 = vmatprep.subr.bf16.mxu1 %v4428_v0  ;;  %v4121_v0 = vld [vmem:[%s6178_s0 + $0x4c0] ss:$8 sps:$4 sm:$0xff]  }
  0x2a   :  { %1920 = vmatpush1.bf16.msra.mxu0 %v1897_v14  ;;  %4031 = vmatpush1.bf16.msra.mxu1 %v1897_v14  ;;  %v4143_v14 = vld [vmem:[%s6178_s0 + $0x504] ss:$8 sps:$4 sm:$0xff]  }
  0x2d   :  { %1932 = vmatmul.mubr.bf16.vlgmr.msra.gmra.mrb[0].mxu0 %v4044_v15  ;;  %2444 = vmatmul.mubr.bf16.vlgmr.msra.gmra.mrb[0].mxu1 %v4047_v16  ;;  %v4142_v15 = vld [vmem:[%s6178_s0 + $0x100] ss:$8 sps:$4 sm:$0xff]  }
  0x2e   :  { %3722 = vmatprep.mubr.msk.bf16.mxu0 %vm1510_vm0, %v4050_v17  ;;  %3786 = vmatprep.mubr.msk.bf16.mxu1 %vm1510_vm0, %v4053_v18  ;;  %v4145_v16 = vld [vmem:[%s6178_s0 + $0x500] ss:$8 sps:$4 sm:$0xff]   ;;  %v4146_v17 = vld [vmem:[%s6178_s0 + $0x114] ss:$8 sps:$4 sm:$0xff]  }
  0x2f   :  { %v4149_v18 = vld [vmem:[%s6178_s0 + $0x514] ss:$8 sps:$4 sm:$0xff]  }
  0x35   :  { %1940 = vmatmul.mubr.bf16.gmra.mrb[4].mxu0 %v4052_v19  ;;  %2452 = vmatmul.mubr.bf16.gmra.mrb[4].mxu1 %v4055_v20  ;;  %v4148_v19 = vld [vmem:[%s6178_s0 + $0x110] ss:$8 sps:$4 sm:$0xff]  }
  0x36   :  { %3723 = vmatprep.mubr.msk.bf16.mxu0 %vm1510_vm0, %v4056_v21  ;;  %3787 = vmatprep.mubr.msk.bf16.mxu1 %vm1510_vm0, %v4059_v22  ;;  %v4151_v20 = vld [vmem:[%s6178_s0 + $0x510] ss:$8 sps:$4 sm:$0xff]   ;;  %v4152_v21 = vld [vmem:[%s6178_s0 + $0x124] ss:$8 sps:$4 sm:$0xff]  }
  0x37   :  { %v4155_v22 = vld [vmem:[%s6178_s0 + $0x524] ss:$8 sps:$4 sm:$0xff]  }
  0x3d   :  { %1948 = vmatmul.mubr.bf16.gmra.mrb[8].mxu0 %v4058_v23  ;;  %2460 = vmatmul.mubr.bf16.gmra.mrb[8].mxu1 %v4061_v24  ;;  %v4154_v23 = vld [vmem:[%s6178_s0 + $0x120] ss:$8 sps:$4 sm:$0xff]  }
  0x3e   :  { %3724 = vmatprep.mubr.msk.bf16.mxu0 %vm1510_vm0, %v4062_v25  ;;  %3788 = vmatprep.mubr.msk.bf16.mxu1 %vm1510_vm0, %v4065_v26  ;;  %v4157_v24 = vld [vmem:[%s6178_s0 + $0x520] ss:$8 sps:$4 sm:$0xff]   ;;  %v4158_v25 = vld [vmem:[%s6178_s0 + $0x134] ss:$8 sps:$4 sm:$0xff]  }
  0x3f   :  { %v4161_v26 = vld [vmem:[%s6178_s0 + $0x534] ss:$8 sps:$4 sm:$0xff]  }
  0x45   :  { %1956 = vmatmul.mubr.bf16.gmra.mrb[12].mxu0 %v4064_v27  ;;  %2468 = vmatmul.mubr.bf16.gmra.mrb[12].mxu1 %v4067_v28  ;;  %v4160_v27 = vld [vmem:[%s6178_s0 + $0x130] ss:$8 sps:$4 sm:$0xff]  }
  0x46   :  { %3725 = vmatprep.mubr.msk.bf16.mxu0 %vm1510_vm0, %v4068_v29  ;;  %3789 = vmatprep.mubr.msk.bf16.mxu1 %vm1510_vm0, %v4071_v30  ;;  %v4163_v28 = vld [vmem:[%s6178_s0 + $0x530] ss:$8 sps:$4 sm:$0xff]   ;;  %v4164_v29 = vld [vmem:[%s6178_s0 + $0x144] ss:$8 sps:$4 sm:$0xff]  }
  0x47   :  { %v4167_v30 = vld [vmem:[%s6178_s0 + $0x544] ss:$8 sps:$4 sm:$0xff]  }
  0x4d   :  { %1964 = vmatmul.mubr.bf16.gmra.mrb[16].mxu0 %v4070_v31  ;;  %2476 = vmatmul.mubr.bf16.gmra.mrb[16].mxu1 %v4073_v32  ;;  %v4166_v31 = vld [vmem:[%s6178_s0 + $0x140] ss:$8 sps:$4 sm:$0xff]  }
  0x4e   :  { %3726 = vmatprep.mubr.msk.bf16.mxu0 %vm1510_vm0, %v4074_v33  ;;  %3790 = vmatprep.mubr.msk.bf16.mxu1 %vm1510_vm0, %v4077_v34  ;;  %v4169_v32 = vld [vmem:[%s6178_s0 + $0x540] ss:$8 sps:$4 sm:$0xff]   ;;  %v4170_v33 = vld [vmem:[%s6178_s0 + $0x154] ss:$8 sps:$4 sm:$0xff]  }
  0x4f   :  { %v4173_v34 = vld [vmem:[%s6178_s0 + $0x554] ss:$8 sps:$4 sm:$0xff]  }
  0x55   :  { %1972 = vmatmul.mubr.bf16.gmra.mrb[20].mxu0 %v4076_v35  ;;  %2484 = vmatmul.mubr.bf16.gmra.mrb[20].mxu1 %v4079_v36  ;;  %v4172_v35 = vld [vmem:[%s6178_s0 + $0x150] ss:$8 sps:$4 sm:$0xff]  }
  0x56   :  { %3727 = vmatprep.mubr.msk.bf16.mxu0 %vm1510_vm0, %v4080_v37  ;;  %3791 = vmatprep.mubr.msk.bf16.mxu1 %vm1510_vm0, %v4083_v38  ;;  %v4175_v36 = vld [vmem:[%s6178_s0 + $0x550] ss:$8 sps:$4 sm:$0xff]   ;;  %v4176_v37 = vld [vmem:[%s6178_s0 + $0x164] ss:$8 sps:$4 sm:$0xff]  }
  0x57   :  { %v4179_v38 = vld [vmem:[%s6178_s0 + $0x564] ss:$8 sps:$4 sm:$0xff]  }
  0x5d   :  { %1980 = vmatmul.mubr.bf16.gmra.mrb[24].mxu0 %v4082_v39  ;;  %2492 = vmatmul.mubr.bf16.gmra.mrb[24].mxu1 %v4085_v40  ;;  %v4178_v39 = vld [vmem:[%s6178_s0 + $0x160] ss:$8 sps:$4 sm:$0xff]  }
  0x5e   :  { %3728 = vmatprep.mubr.msk.bf16.mxu0 %vm1510_vm0, %v4086_v41  ;;  %3792 = vmatprep.mubr.msk.bf16.mxu1 %vm1510_vm0, %v4089_v42  ;;  %v4181_v40 = vld [vmem:[%s6178_s0 + $0x560] ss:$8 sps:$4 sm:$0xff]   ;;  %v4182_v41 = vld [vmem:[%s6178_s0 + $0x174] ss:$8 sps:$4 sm:$0xff]  }
  0x5f   :  { %v4185_v42 = vld [vmem:[%s6178_s0 + $0x574] ss:$8 sps:$4 sm:$0xff]  }
  0x65   :  { %1988 = vmatmul.mubr.bf16.gmra.mrb[28].mxu0 %v4088_v43  ;;  %2500 = vmatmul.mubr.bf16.gmra.mrb[28].mxu1 %v4091_v44  ;;  %v4184_v43 = vld [vmem:[%s6178_s0 + $0x170] ss:$8 sps:$4 sm:$0xff]  }
  0x66   :  { %3729 = vmatprep.mubr.msk.bf16.mxu0 %vm1510_vm0, %v4092_v45  ;;  %3793 = vmatprep.mubr.msk.bf16.mxu1 %vm1510_vm0, %v4095_v46  ;;  %v4187_v44 = vld [vmem:[%s6178_s0 + $0x570] ss:$8 sps:$4 sm:$0xff]   ;;  %v4188_v45 = vld [vmem:[%s6178_s0 + $0x184] ss:$8 sps:$4 sm:$0xff]  }
  0x67   :  { %v4191_v46 = vld [vmem:[%s6178_s0 + $0x584] ss:$8 sps:$4 sm:$0xff]  }
  0x6d   :  { %1996 = vmatmul.mubr.bf16.gmra.mrb[32].mxu0 %v4094_v47  ;;  %2508 = vmatmul.mubr.bf16.gmra.mrb[32].mxu1 %v4097_v48  ;;  %v4190_v47 = vld [vmem:[%s6178_s0 + $0x180] ss:$8 sps:$4 sm:$0xff]  }
  0x6e   :  { %3730 = vmatprep.mubr.msk.bf16.mxu0 %vm1510_vm0, %v4098_v49  ;;  %3794 = vmatprep.mubr.msk.bf16.mxu1 %vm1510_vm0, %v4101_v50  ;;  %v4193_v48 = vld [vmem:[%s6178_s0 + $0x580] ss:$8 sps:$4 sm:$0xff]   ;;  %v4194_v49 = vld [vmem:[%s6178_s0 + $0x194] ss:$8 sps:$4 sm:$0xff]  }
  0x6f   :  { %v4197_v50 = vld [vmem:[%s6178_s0 + $0x594] ss:$8 sps:$4 sm:$0xff]  }
  0x75   :  { %2004 = vmatmul.mubr.bf16.gmra.mrb[36].mxu0 %v4100_v51  ;;  %2516 = vmatmul.mubr.bf16.gmra.mrb[36].mxu1 %v4103_v52  ;;  %v4196_v51 = vld [vmem:[%s6178_s0 + $0x190] ss:$8 sps:$4 sm:$0xff]  }
  0x76   :  { %3731 = vmatprep.mubr.msk.bf16.mxu0 %vm1510_vm0, %v4104_v53  ;;  %3795 = vmatprep.mubr.msk.bf16.mxu1 %vm1510_vm0, %v4107_v54  ;;  %v4199_v52 = vld [vmem:[%s6178_s0 + $0x590] ss:$8 sps:$4 sm:$0xff]   ;;  %v4200_v53 = vld [vmem:[%s6178_s0 + $0x1a4] ss:$8 sps:$4 sm:$0xff]  }
  0x77   :  { %v4203_v54 = vld [vmem:[%s6178_s0 + $0x5a4] ss:$8 sps:$4 sm:$0xff]  }
  0x7d   :  { %2012 = vmatmul.mubr.bf16.gmra.mrb[40].mxu0 %v4106_v55  ;;  %2524 = vmatmul.mubr.bf16.gmra.mrb[40].mxu1 %v4109_v56  ;;  %v4202_v55 = vld [vmem:[%s6178_s0 + $0x1a0] ss:$8 sps:$4 sm:$0xff]  }
  0x7e   :  { %3732 = vmatprep.mubr.msk.bf16.mxu0 %vm1510_vm0, %v4110_v57  ;;  %3796 = vmatprep.mubr.msk.bf16.mxu1 %vm1510_vm0, %v4113_v58  ;;  %v4205_v56 = vld [vmem:[%s6178_s0 + $0x5a0] ss:$8 sps:$4 sm:$0xff]   ;;  %v4206_v57 = vld [vmem:[%s6178_s0 + $0x1b4] ss:$8 sps:$4 sm:$0xff]  }
  0x7f   :  { %v4209_v58 = vld [vmem:[%s6178_s0 + $0x5b4] ss:$8 sps:$4 sm:$0xff]  }
  0x85   :  { %2020 = vmatmul.mubr.bf16.gmra.mrb[44].mxu0 %v4112_v59  ;;  %2532 = vmatmul.mubr.bf16.gmra.mrb[44].mxu1 %v4115_v60 }
  0x86   :  { %3733 = vmatprep.mubr.msk.bf16.mxu0 %vm1510_vm0, %v4116_v61  ;;  %3797 = vmatprep.mubr.msk.bf16.mxu1 %vm1510_vm0, %v4119_v62  ;;  %v4208_v62 = vld [vmem:[%s6178_s0 + $0x1b0] ss:$8 sps:$4 sm:$0xff]  }
  0x8d   :  { %2028 = vmatmul.mubr.bf16.gmra.mrb[48].mxu0 %v4118_v63  ;;  %2540 = vmatmul.mubr.bf16.gmra.mrb[48].mxu1 %v4121_v0  ;;  %v4211_v0 = vld [vmem:[%s6178_s0 + $0x5b0] ss:$8 sps:$4 sm:$0xff]  }
  0x8e   :  { %3734 = vmatprep.mubr.msk.bf16.mxu0 %vm1510_vm0, %v4122_v1  ;;  %3798 = vmatprep.mubr.msk.bf16.mxu1 %vm1510_vm0, %v4125_v2 }
  0x95   :  { %2036 = vmatmul.mubr.bf16.gmra.mrb[52].mxu0 %v4124_v3  ;;  %2548 = vmatmul.mubr.bf16.gmra.mrb[52].mxu1 %v4127_v4  ;;  %v4212_v3 = vld [vmem:[%s6178_s0 + $0x1c4] ss:$8 sps:$4 sm:$0xff]  }
  0x96   :  { %3735 = vmatprep.mubr.msk.bf16.mxu0 %vm1510_vm0, %v4128_v5  ;;  %3799 = vmatprep.mubr.msk.bf16.mxu1 %vm1510_vm0, %v4131_v6  ;;  %v4215_v4 = vld [vmem:[%s6178_s0 + $0x5c4] ss:$8 sps:$4 sm:$0xff]  }
  0x9d   :  { %2044 = vmatmul.mubr.bf16.gmra.mrb[56].mxu0 %v4130_v7  ;;  %2556 = vmatmul.mubr.bf16.gmra.mrb[56].mxu1 %v4133_v8 }
  0x9e   :  { %3736 = vmatprep.mubr.msk.bf16.mxu0 %vm1510_vm0, %v4134_v9  ;;  %3800 = vmatprep.mubr.msk.bf16.mxu1 %vm1510_vm0, %v4137_v10  ;;  %v4214_v10 = vld [vmem:[%s6178_s0 + $0x1c0] ss:$8 sps:$4 sm:$0xff]  }
  0xa5   :  { %2052 = vmatmul.mubr.bf16.gmra.mrb[60].mxu0 %v4136_v11  ;;  %2564 = vmatmul.mubr.bf16.gmra.mrb[60].mxu1 %v4139_v12  ;;  %v4217_v12 = vld [vmem:[%s6178_s0 + $0x5c0] ss:$8 sps:$4 sm:$0xff]  }
  0xa6   :  { %3737 = vmatprep.mubr.msk.bf16.mxu0 %vm1510_vm0, %v4140_v13  ;;  %3801 = vmatprep.mubr.msk.bf16.mxu1 %vm1510_vm0, %v4143_v14 }
  0xad   :  { %2060 = vmatmul.mubr.bf16.gmra.mrb[64].mxu0 %v4142_v15  ;;  %2572 = vmatmul.mubr.bf16.gmra.mrb[64].mxu1 %v4145_v16  ;;  %v4218_v15 = vld [vmem:[%s6178_s0 + $0x1d4] ss:$8 sps:$4 sm:$0xff]  }
  0xae   :  { %3738 = vmatprep.mubr.msk.bf16.mxu0 %vm1510_vm0, %v4146_v17  ;;  %3802 = vmatprep.mubr.msk.bf16.mxu1 %vm1510_vm0, %v4149_v18  ;;  %v4221_v16 = vld [vmem:[%s6178_s0 + $0x5d4] ss:$8 sps:$4 sm:$0xff]  }
  0xb5   :  { %2068 = vmatmul.mubr.bf16.gmra.mrb[68].mxu0 %v4148_v19  ;;  %2580 = vmatmul.mubr.bf16.gmra.mrb[68].mxu1 %v4151_v20 }
  0xb6   :  { %3739 = vmatprep.mubr.msk.bf16.mxu0 %vm1510_vm0, %v4152_v21  ;;  %3803 = vmatprep.mubr.msk.bf16.mxu1 %vm1510_vm0, %v4155_v22  ;;  %v4220_v22 = vld [vmem:[%s6178_s0 + $0x1d0] ss:$8 sps:$4 sm:$0xff]  }
  0xbd   :  { %2076 = vmatmul.mubr.bf16.gmra.mrb[72].mxu0 %v4154_v23  ;;  %2588 = vmatmul.mubr.bf16.gmra.mrb[72].mxu1 %v4157_v24  ;;  %v4223_v24 = vld [vmem:[%s6178_s0 + $0x5d0] ss:$8 sps:$4 sm:$0xff]  }
  0xbe   :  { %3740 = vmatprep.mubr.msk.bf16.mxu0 %vm1510_vm0, %v4158_v25  ;;  %3804 = vmatprep.mubr.msk.bf16.mxu1 %vm1510_vm0, %v4161_v26 }
  0xc5   :  { %2084 = vmatmul.mubr.bf16.gmra.mrb[76].mxu0 %v4160_v27  ;;  %2596 = vmatmul.mubr.bf16.gmra.mrb[76].mxu1 %v4163_v28  ;;  %v4224_v27 = vld [vmem:[%s6178_s0 + $0x1e4] ss:$8 sps:$4 sm:$0xff]  }
  0xc6   :  { %3741 = vmatprep.mubr.msk.bf16.mxu0 %vm1510_vm0, %v4164_v29  ;;  %3805 = vmatprep.mubr.msk.bf16.mxu1 %vm1510_vm0, %v4167_v30  ;;  %v4227_v28 = vld [vmem:[%s6178_s0 + $0x5e4] ss:$8 sps:$4 sm:$0xff]  }
  0xcd   :  { %2092 = vmatmul.mubr.bf16.gmra.mrb[80].mxu0 %v4166_v31  ;;  %2604 = vmatmul.mubr.bf16.gmra.mrb[80].mxu1 %v4169_v32 }
  0xce   :  { %3742 = vmatprep.mubr.msk.bf16.mxu0 %vm1510_vm0, %v4170_v33  ;;  %3806 = vmatprep.mubr.msk.bf16.mxu1 %vm1510_vm0, %v4173_v34  ;;  %v4226_v34 = vld [vmem:[%s6178_s0 + $0x1e0] ss:$8 sps:$4 sm:$0xff]  }
  0xd5   :  { %2100 = vmatmul.mubr.bf16.gmra.mrb[84].mxu0 %v4172_v35  ;;  %2612 = vmatmul.mubr.bf16.gmra.mrb[84].mxu1 %v4175_v36  ;;  %v4229_v36 = vld [vmem:[%s6178_s0 + $0x5e0] ss:$8 sps:$4 sm:$0xff]  }
  0xd6   :  { %3743 = vmatprep.mubr.msk.bf16.mxu0 %vm1510_vm0, %v4176_v37  ;;  %3807 = vmatprep.mubr.msk.bf16.mxu1 %vm1510_vm0, %v4179_v38 }
  0xdd   :  { %2108 = vmatmul.mubr.bf16.gmra.mrb[88].mxu0 %v4178_v39  ;;  %2620 = vmatmul.mubr.bf16.gmra.mrb[88].mxu1 %v4181_v40  ;;  %v4230_v39 = vld [vmem:[%s6178_s0 + $0x1f4] ss:$8 sps:$4 sm:$0xff]  }
  0xde   :  { %3744 = vmatprep.mubr.msk.bf16.mxu0 %vm1510_vm0, %v4182_v41  ;;  %3808 = vmatprep.mubr.msk.bf16.mxu1 %vm1510_vm0, %v4185_v42  ;;  %v4233_v40 = vld [vmem:[%s6178_s0 + $0x5f4] ss:$8 sps:$4 sm:$0xff]  }
  0xe5   :  { %2116 = vmatmul.mubr.bf16.gmra.mrb[92].mxu0 %v4184_v43  ;;  %2628 = vmatmul.mubr.bf16.gmra.mrb[92].mxu1 %v4187_v44 }
  0xe6   :  { %3745 = vmatprep.mubr.msk.bf16.mxu0 %vm1510_vm0, %v4188_v45  ;;  %3809 = vmatprep.mubr.msk.bf16.mxu1 %vm1510_vm0, %v4191_v46  ;;  %v4232_v46 = vld [vmem:[%s6178_s0 + $0x1f0] ss:$8 sps:$4 sm:$0xff]  }
  0xed   :  { %2124 = vmatmul.mubr.bf16.gmra.mrb[96].mxu0 %v4190_v47  ;;  %2636 = vmatmul.mubr.bf16.gmra.mrb[96].mxu1 %v4193_v48  ;;  %v4235_v48 = vld [vmem:[%s6178_s0 + $0x5f0] ss:$8 sps:$4 sm:$0xff]  }
  0xee   :  { %3746 = vmatprep.mubr.msk.bf16.mxu0 %vm1510_vm0, %v4194_v49  ;;  %3810 = vmatprep.mubr.msk.bf16.mxu1 %vm1510_vm0, %v4197_v50 }
  0xf5   :  { %2132 = vmatmul.mubr.bf16.gmra.mrb[100].mxu0 %v4196_v51  ;;  %2644 = vmatmul.mubr.bf16.gmra.mrb[100].mxu1 %v4199_v52  ;;  %v4236_v51 = vld [vmem:[%s6178_s0 + $0x204] ss:$8 sps:$4 sm:$0xff]  }
  0xf6   :  { %3747 = vmatprep.mubr.msk.bf16.mxu0 %vm1510_vm0, %v4200_v53  ;;  %3811 = vmatprep.mubr.msk.bf16.mxu1 %vm1510_vm0, %v4203_v54  ;;  %v4239_v52 = vld [vmem:[%s6178_s0 + $0x604] ss:$8 sps:$4 sm:$0xff]  }
  0xfd   :  { %2140 = vmatmul.mubr.bf16.gmra.mrb[104].mxu0 %v4202_v55  ;;  %2652 = vmatmul.mubr.bf16.gmra.mrb[104].mxu1 %v4205_v56 }
  0xfe   :  { %3748 = vmatprep.mubr.msk.bf16.mxu0 %vm1510_vm0, %v4206_v57  ;;  %3812 = vmatprep.mubr.msk.bf16.mxu1 %vm1510_vm0, %v4209_v58  ;;  %v4238_v58 = vld [vmem:[%s6178_s0 + $0x200] ss:$8 sps:$4 sm:$0xff]  }
 0x100   :  { %v4873_v59 = vpop.f32.mrb[0].mxu0  ;;  %v4875_v60 = vpop.f32.mrb[0].mxu1 }
 0x101   :  { %6194 = vst [vmem:[#allocation2_spill] sm:$0xff] %v4875_v60  ;;  %v1935_v61 = vpop.f32.mrb[1].mxu0  ;;  %v2447_v63 = vpop.f32.mrb[1].mxu1 }
 0x102   :  { %v4883_v1 = vpop.f32.mrb[2].mxu0  ;;  %v4885_v2 = vpop.f32.mrb[2].mxu1 }
 0x103   :  { %6195 = vst [vmem:[#allocation3_spill] sm:$0xff] %v4885_v2  ;;  %v1938_v5 = vpop.f32.mrb[3].mxu0  ;;  %v2450_v6 = vpop.f32.mrb[3].mxu1 }
 0x105   :  { %2148 = vmatmul.mubr.bf16.gmra.mrb[108].mxu0 %v4208_v62  ;;  %2660 = vmatmul.mubr.bf16.gmra.mrb[108].mxu1 %v4211_v0  ;;  %v4241_v62 = vld [vmem:[%s6178_s0 + $0x600] ss:$8 sps:$4 sm:$0xff]  }
 0x106   :  { %3749 = vmatprep.mubr.msk.bf16.mxu0 %vm1510_vm0, %v4212_v3  ;;  %3813 = vmatprep.mubr.msk.bf16.mxu1 %vm1510_vm0, %v4215_v4  ;;  %v4242_v3 = vld [vmem:[%s6178_s0 + $0x214] ss:$8 sps:$4 sm:$0xff]  }
 0x107   :  { %v4245_v4 = vld [vmem:[%s6178_s0 + $0x614] ss:$8 sps:$4 sm:$0xff]  }
 0x108   :  { %v4895_v7 = vpop.f32.mrb[4].mxu0  ;;  %v4897_v8 = vpop.f32.mrb[4].mxu1 }
 0x109   :  { %6196 = vst [vmem:[#allocation4_spill] sm:$0xff] %v4897_v8  ;;  %v1943_v9 = vpop.f32.mrb[5].mxu0  ;;  %v2455_v11 = vpop.f32.mrb[5].mxu1 }
 0x10a   :  { %v4905_v13 = vpop.f32.mrb[6].mxu0  ;;  %v4907_v14 = vpop.f32.mrb[6].mxu1 }
 0x10b   :  { %6197 = vst [vmem:[#allocation5_spill] sm:$0xff] %v4907_v14  ;;  %v1946_v17 = vpop.f32.mrb[7].mxu0  ;;  %v2458_v18 = vpop.f32.mrb[7].mxu1 }
 0x10d   :  { %2156 = vmatmul.mubr.bf16.gmra.mrb[112].mxu0 %v4214_v10  ;;  %2668 = vmatmul.mubr.bf16.gmra.mrb[112].mxu1 %v4217_v12  ;;  %v4244_v12 = vld [vmem:[%s6178_s0 + $0x210] ss:$8 sps:$4 sm:$0xff]  }
 0x10e   :  { %3750 = vmatprep.mubr.msk.bf16.mxu0 %vm1510_vm0, %v4218_v15  ;;  %3814 = vmatprep.mubr.msk.bf16.mxu1 %vm1510_vm0, %v4221_v16  ;;  %v4247_v16 = vld [vmem:[%s6178_s0 + $0x610] ss:$8 sps:$4 sm:$0xff]  }
 0x110   :  { %v4917_v19 = vpop.f32.mrb[8].mxu0  ;;  %v4919_v20 = vpop.f32.mrb[8].mxu1 }
 0x111   :  { %6198 = vst [vmem:[#allocation6_spill] sm:$0xff] %v4919_v20  ;;  %v1951_v21 = vpop.f32.mrb[9].mxu0  ;;  %v2463_v23 = vpop.f32.mrb[9].mxu1 }
 0x112   :  { %v4927_v25 = vpop.f32.mrb[10].mxu0  ;;  %v4929_v26 = vpop.f32.mrb[10].mxu1  ;;  %v4248_v21 = vld [vmem:[%s6178_s0 + $0x224] ss:$8 sps:$4 sm:$0xff]  }
 0x113   :  { %6199 = vst [vmem:[#allocation7_spill] sm:$0xff] %v4929_v26  ;;  %v1954_v29 = vpop.f32.mrb[11].mxu0  ;;  %v2466_v30 = vpop.f32.mrb[11].mxu1 }
 0x114   :  { %v4250_v30 = vld [vmem:[%s6178_s0 + $0x220] ss:$8 sps:$4 sm:$0xff]  }
 0x115   :  { %2164 = vmatmul.mubr.bf16.gmra.mrb[116].mxu0 %v4220_v22  ;;  %2676 = vmatmul.mubr.bf16.gmra.mrb[116].mxu1 %v4223_v24  ;;  %v4251_v22 = vld [vmem:[%s6178_s0 + $0x624] ss:$8 sps:$4 sm:$0xff]  }
 0x116   :  { %3751 = vmatprep.mubr.msk.bf16.mxu0 %vm1510_vm0, %v4224_v27  ;;  %3815 = vmatprep.mubr.msk.bf16.mxu1 %vm1510_vm0, %v4227_v28 }
 0x118   :  { %v4939_v31 = vpop.f32.mrb[12].mxu0  ;;  %v4941_v32 = vpop.f32.mrb[12].mxu1 }
 0x119   :  { %6200 = vst [vmem:[#allocation8_spill] sm:$0xff] %v4941_v32  ;;  %v1959_v33 = vpop.f32.mrb[13].mxu0  ;;  %v2471_v35 = vpop.f32.mrb[13].mxu1 }
 0x11a   :  { %v4949_v37 = vpop.f32.mrb[14].mxu0  ;;  %v4951_v38 = vpop.f32.mrb[14].mxu1 }
 0x11b   :  { %6201 = vst [vmem:[#allocation9_spill] sm:$0xff] %v4951_v38  ;;  %v1962_v41 = vpop.f32.mrb[15].mxu0  ;;  %v2474_v42 = vpop.f32.mrb[15].mxu1 }
 0x11d   :  { %2172 = vmatmul.mubr.bf16.gmra.mrb[120].mxu0 %v4226_v34  ;;  %2684 = vmatmul.mubr.bf16.gmra.mrb[120].mxu1 %v4229_v36  ;;  %v4253_v34 = vld [vmem:[%s6178_s0 + $0x620] ss:$8 sps:$4 sm:$0xff]  }
 0x11e   :  { %3752 = vmatprep.mubr.msk.bf16.mxu0 %vm1510_vm0, %v4230_v39  ;;  %3816 = vmatprep.mubr.msk.bf16.mxu1 %vm1510_vm0, %v4233_v40  ;;  %v4254_v39 = vld [vmem:[%s6178_s0 + $0x234] ss:$8 sps:$4 sm:$0xff]  }
 0x11f   :  { %v4257_v40 = vld [vmem:[%s6178_s0 + $0x634] ss:$8 sps:$4 sm:$0xff]  }
 0x120   :  { %v4961_v43 = vpop.f32.mrb[16].mxu0  ;;  %v4963_v44 = vpop.f32.mrb[16].mxu1 }
 0x121   :  { %6202 = vst [vmem:[#allocation10_spill] sm:$0xff] %v4963_v44  ;;  %v1967_v45 = vpop.f32.mrb[17].mxu0  ;;  %v2479_v47 = vpop.f32.mrb[17].mxu1 }
 0x122   :  { %v4971_v49 = vpop.f32.mrb[18].mxu0  ;;  %v4973_v50 = vpop.f32.mrb[18].mxu1 }
 0x123   :  { %6203 = vst [vmem:[#allocation11_spill] sm:$0xff] %v4973_v50  ;;  %v1970_v53 = vpop.f32.mrb[19].mxu0  ;;  %v2482_v54 = vpop.f32.mrb[19].mxu1 }
 0x125   :  { %2180 = vmatmul.mubr.bf16.gmra.mrb[124].mxu0 %v4232_v46  ;;  %2692 = vmatmul.mubr.bf16.gmra.mrb[124].mxu1 %v4235_v48  ;;  %v4256_v48 = vld [vmem:[%s6178_s0 + $0x230] ss:$8 sps:$4 sm:$0xff]  }
 0x126   :  { %3753 = vmatprep.mubr.msk.bf16.mxu0 %vm1510_vm0, %v4236_v51  ;;  %3817 = vmatprep.mubr.msk.bf16.mxu1 %vm1510_vm0, %v4239_v52  ;;  %v4259_v52 = vld [vmem:[%s6178_s0 + $0x630] ss:$8 sps:$4 sm:$0xff]  }
 0x128   :  { %v4983_v55 = vpop.f32.mrb[20].mxu0  ;;  %v4985_v56 = vpop.f32.mrb[20].mxu1 }
 0x129   :  { %6204 = vst [vmem:[#allocation12_spill] sm:$0xff] %v4985_v56  ;;  %v1975_v57 = vpop.f32.mrb[21].mxu0  ;;  %v2487_v61 = vpop.f32.mrb[21].mxu1 }
 0x12a   :  { %v4993_v63 = vpop.f32.mrb[22].mxu0  ;;  %v4995_v0 = vpop.f32.mrb[22].mxu1  ;;  %v4260_v57 = vld [vmem:[%s6178_s0 + $0x244] ss:$8 sps:$4 sm:$0xff]  }
 0x12b   :  { %6205 = vst [vmem:[#allocation13_spill] sm:$0xff] %v4995_v0  ;;  %v1978_v5 = vpop.f32.mrb[23].mxu0  ;;  %v2490_v6 = vpop.f32.mrb[23].mxu1 }
 0x12c   :  { %v4262_v6 = vld [vmem:[%s6178_s0 + $0x240] ss:$8 sps:$4 sm:$0xff]  }
 0x12d   :  { %2188 = vmatmul.mubr.bf16.gmra.mrb[128].mxu0 %v4238_v58  ;;  %2700 = vmatmul.mubr.bf16.gmra.mrb[128].mxu1 %v4241_v62  ;;  %v4263_v58 = vld [vmem:[%s6178_s0 + $0x644] ss:$8 sps:$4 sm:$0xff]  }
 0x12e   :  { %3754 = vmatprep.mubr.msk.bf16.mxu0 %vm1510_vm0, %v4242_v3  ;;  %3818 = vmatprep.mubr.msk.bf16.mxu1 %vm1510_vm0, %v4245_v4 }
 0x130   :  { %v5005_v9 = vpop.f32.mrb[24].mxu0  ;;  %v5007_v10 = vpop.f32.mrb[24].mxu1 }
 0x131   :  { %6206 = vst [vmem:[#allocation14_spill] sm:$0xff] %v5007_v10  ;;  %v1983_v11 = vpop.f32.mrb[25].mxu0  ;;  %v2495_v15 = vpop.f32.mrb[25].mxu1 }
 0x132   :  { %v5015_v17 = vpop.f32.mrb[26].mxu0  ;;  %v5017_v18 = vpop.f32.mrb[26].mxu1 }
 0x133   :  { %6207 = vst [vmem:[#allocation15_spill] sm:$0xff] %v5017_v18  ;;  %v1986_v23 = vpop.f32.mrb[27].mxu0  ;;  %v2498_v24 = vpop.f32.mrb[27].mxu1 }
 0x135   :  { %2196 = vmatmul.mubr.bf16.gmra.mrb[132].mxu0 %v4244_v12  ;;  %2708 = vmatmul.mubr.bf16.gmra.mrb[132].mxu1 %v4247_v16  ;;  %v4265_v12 = vld [vmem:[%s6178_s0 + $0x640] ss:$8 sps:$4 sm:$0xff]  }
 0x136   :  { %3755 = vmatprep.mubr.msk.bf16.mxu0 %vm1510_vm0, %v4248_v21  ;;  %3819 = vmatprep.mubr.msk.bf16.mxu1 %vm1510_vm0, %v4251_v22  ;;  %v4266_v21 = vld [vmem:[%s6178_s0 + $0x254] ss:$8 sps:$4 sm:$0xff]  }
 0x137   :  { %v4269_v22 = vld [vmem:[%s6178_s0 + $0x654] ss:$8 sps:$4 sm:$0xff]  }
 0x138   :  { %v5027_v27 = vpop.f32.mrb[28].mxu0  ;;  %v5029_v28 = vpop.f32.mrb[28].mxu1 }
 0x139   :  { %6208 = vst [vmem:[#allocation16_spill] sm:$0xff] %v5029_v28  ;;  %v1991_v29 = vpop.f32.mrb[29].mxu0  ;;  %v2503_v33 = vpop.f32.mrb[29].mxu1 }
 0x13a   :  { %v5037_v35 = vpop.f32.mrb[30].mxu0  ;;  %v5039_v36 = vpop.f32.mrb[30].mxu1 }
 0x13b   :  { %6209 = vst [vmem:[#allocation17_spill] sm:$0xff] %v5039_v36  ;;  %v1994_v41 = vpop.f32.mrb[31].mxu0  ;;  %v2506_v42 = vpop.f32.mrb[31].mxu1 }
 0x13d   :  { %2204 = vmatmul.mubr.bf16.gmra.mrb[136].mxu0 %v4250_v30  ;;  %2716 = vmatmul.mubr.bf16.gmra.mrb[136].mxu1 %v4253_v34  ;;  %v4268_v34 = vld [vmem:[%s6178_s0 + $0x250] ss:$8 sps:$4 sm:$0xff]  }
 0x13e   :  { %3756 = vmatprep.mubr.msk.bf16.mxu0 %vm1510_vm0, %v4254_v39  ;;  %3820 = vmatprep.mubr.msk.bf16.mxu1 %vm1510_vm0, %v4257_v40  ;;  %v4271_v40 = vld [vmem:[%s6178_s0 + $0x650] ss:$8 sps:$4 sm:$0xff]  }
 0x140   :  { %v5049_v45 = vpop.f32.mrb[32].mxu0  ;;  %v5051_v46 = vpop.f32.mrb[32].mxu1 }
 0x141   :  { %6210 = vst [vmem:[#allocation18_spill] sm:$0xff] %v5051_v46  ;;  %v1999_v47 = vpop.f32.mrb[33].mxu0  ;;  %v2511_v51 = vpop.f32.mrb[33].mxu1 }
 0x142   :  { %v5059_v53 = vpop.f32.mrb[34].mxu0  ;;  %v5061_v54 = vpop.f32.mrb[34].mxu1  ;;  %v4272_v47 = vld [vmem:[%s6178_s0 + $0x264] ss:$8 sps:$4 sm:$0xff]  }
 0x143   :  { %6211 = vst [vmem:[#allocation19_spill] sm:$0xff] %v5061_v54  ;;  %v2002_v61 = vpop.f32.mrb[35].mxu0  ;;  %v2514_v62 = vpop.f32.mrb[35].mxu1 }
 0x144   :  { %v4274_v62 = vld [vmem:[%s6178_s0 + $0x260] ss:$8 sps:$4 sm:$0xff]  }
 0x145   :  { %2212 = vmatmul.mubr.bf16.gmra.mrb[140].mxu0 %v4256_v48  ;;  %2724 = vmatmul.mubr.bf16.gmra.mrb[140].mxu1 %v4259_v52  ;;  %v4275_v48 = vld [vmem:[%s6178_s0 + $0x664] ss:$8 sps:$4 sm:$0xff]  }
 0x146   :  { %3757 = vmatprep.mubr.msk.bf16.mxu0 %vm1510_vm0, %v4260_v57  ;;  %3821 = vmatprep.mubr.msk.bf16.mxu1 %vm1510_vm0, %v4263_v58 }
 0x148   :  { %v5071_v3 = vpop.f32.mrb[36].mxu0  ;;  %v5073_v4 = vpop.f32.mrb[36].mxu1 }
 0x149   :  { %6212 = vst [vmem:[#allocation20_spill] sm:$0xff] %v5073_v4  ;;  %v2007_v5 = vpop.f32.mrb[37].mxu0  ;;  %v2519_v11 = vpop.f32.mrb[37].mxu1 }
 0x14a   :  { %v5081_v15 = vpop.f32.mrb[38].mxu0  ;;  %v5083_v16 = vpop.f32.mrb[38].mxu1 }
 0x14b   :  { %6213 = vst [vmem:[#allocation21_spill] sm:$0xff] %v5083_v16  ;;  %v2010_v23 = vpop.f32.mrb[39].mxu0  ;;  %v2522_v24 = vpop.f32.mrb[39].mxu1 }
 0x14d   :  { %2220 = vmatmul.mubr.bf16.gmra.mrb[144].mxu0 %v4262_v6  ;;  %2732 = vmatmul.mubr.bf16.gmra.mrb[144].mxu1 %v4265_v12  ;;  %v4277_v6 = vld [vmem:[%s6178_s0 + $0x660] ss:$8 sps:$4 sm:$0xff]  }
 0x14e   :  { %3758 = vmatprep.mubr.msk.bf16.mxu0 %vm1510_vm0, %v4266_v21  ;;  %3822 = vmatprep.mubr.msk.bf16.mxu1 %vm1510_vm0, %v4269_v22  ;;  %v4278_v21 = vld [vmem:[%s6178_s0 + $0x274] ss:$8 sps:$4 sm:$0xff]  }
 0x14f   :  { %v4281_v22 = vld [vmem:[%s6178_s0 + $0x674] ss:$8 sps:$4 sm:$0xff]  }
 0x150   :  { %v5093_v29 = vpop.f32.mrb[40].mxu0  ;;  %v5095_v30 = vpop.f32.mrb[40].mxu1 }
 0x151   :  { %6214 = vst [vmem:[#allocation22_spill] sm:$0xff] %v5095_v30  ;;  %v2015_v33 = vpop.f32.mrb[41].mxu0  ;;  %v2527_v39 = vpop.f32.mrb[41].mxu1 }
 0x152   :  { %v5103_v41 = vpop.f32.mrb[42].mxu0  ;;  %v5105_v42 = vpop.f32.mrb[42].mxu1 }
 0x153   :  { %6215 = vst [vmem:[#allocation23_spill] sm:$0xff] %v5105_v42  ;;  %v2018_v51 = vpop.f32.mrb[43].mxu0  ;;  %v2530_v52 = vpop.f32.mrb[43].mxu1  ;;  %v4304_v42 = vld [vmem:[%s6178_s0 + $0x2b0] ss:$8 sps:$4 sm:$0xff]  }
 0x155   :  { %2228 = vmatmul.mubr.bf16.gmra.mrb[148].mxu0 %v4268_v34  ;;  %2740 = vmatmul.mubr.bf16.gmra.mrb[148].mxu1 %v4271_v40  ;;  %v4280_v40 = vld [vmem:[%s6178_s0 + $0x270] ss:$8 sps:$4 sm:$0xff]  }
 0x156   :  { %3759 = vmatprep.mubr.msk.bf16.mxu0 %vm1510_vm0, %v4272_v47  ;;  %3823 = vmatprep.mubr.msk.bf16.mxu1 %vm1510_vm0, %v4275_v48  ;;  %v4283_v48 = vld [vmem:[%s6178_s0 + $0x670] ss:$8 sps:$4 sm:$0xff]  }
 0x158   :  { %v5115_v57 = vpop.f32.mrb[44].mxu0  ;;  %v5117_v58 = vpop.f32.mrb[44].mxu1 }
 0x159   :  { %6216 = vst [vmem:[#allocation24_spill] sm:$0xff] %v5115_v57  ;;  %6217 = vst [vmem:[#allocation25_spill] sm:$0xff] %v5117_v58  ;;  %v2023_v61 = vpop.f32.mrb[45].mxu0  ;;  %v2535_v5 = vpop.f32.mrb[45].mxu1 }
 0x15a   :  { %v5125_v11 = vpop.f32.mrb[46].mxu0  ;;  %v5127_v12 = vpop.f32.mrb[46].mxu1  ;;  %v4284_v61 = vld [vmem:[%s6178_s0 + $0x284] ss:$8 sps:$4 sm:$0xff]  }
 0x15b   :  { %6218 = vst [vmem:[#allocation26_spill] sm:$0xff] %v5127_v12  ;;  %v2026_v23 = vpop.f32.mrb[47].mxu0  ;;  %v2538_v24 = vpop.f32.mrb[47].mxu1 }
 0x15c   :  { %v4286_v24 = vld [vmem:[%s6178_s0 + $0x280] ss:$8 sps:$4 sm:$0xff]  }
 0x15d   :  { %2236 = vmatmul.mubr.bf16.gmra.mrb[152].mxu0 %v4274_v62  ;;  %2748 = vmatmul.mubr.bf16.gmra.mrb[152].mxu1 %v4277_v6  ;;  %v4287_v62 = vld [vmem:[%s6178_s0 + $0x684] ss:$8 sps:$4 sm:$0xff]  }
 0x15e   :  { %3760 = vmatprep.mubr.msk.bf16.mxu0 %vm1510_vm0, %v4278_v21  ;;  %3824 = vmatprep.mubr.msk.bf16.mxu1 %vm1510_vm0, %v4281_v22 }
 0x160   :  { %v5137_v33 = vpop.f32.mrb[48].mxu0  ;;  %v5139_v34 = vpop.f32.mrb[48].mxu1 }
 0x161   :  { %6219 = vst [vmem:[#allocation27_spill] sm:$0xff] %v5137_v33  ;;  %6220 = vst [vmem:[#allocation28_spill] sm:$0xff] %v5139_v34  ;;  %v2031_v39 = vpop.f32.mrb[49].mxu0  ;;  %v2543_v47 = vpop.f32.mrb[49].mxu1  ;;  %v4298_v34 = vld [vmem:[%s6178_s0 + $0x2a0] ss:$8 sps:$4 sm:$0xff]  }
 0x162   :  { %v5147_v51 = vpop.f32.mrb[50].mxu0  ;;  %v5149_v52 = vpop.f32.mrb[50].mxu1  ;;  %v4289_v47 = vld [vmem:[%s6178_s0 + $0x680] ss:$8 sps:$4 sm:$0xff]  }
 0x163   :  { %6221 = vst [vmem:[#allocation29_spill] sm:$0xff] %v5149_v52  ;;  %v2034_v5 = vpop.f32.mrb[51].mxu0  ;;  %v2546_v6 = vpop.f32.mrb[51].mxu1 }
 0x165   :  { %2244 = vmatmul.mubr.bf16.gmra.mrb[156].mxu0 %v4280_v40  ;;  %2756 = vmatmul.mubr.bf16.gmra.mrb[156].mxu1 %v4283_v48 }
 0x166   :  { %3761 = vmatprep.mubr.msk.bf16.mxu0 %vm1510_vm0, %v4284_v61  ;;  %3825 = vmatprep.mubr.msk.bf16.mxu1 %vm1510_vm0, %v4287_v62  ;;  %v4290_v61 = vld [vmem:[%s6178_s0 + $0x294] ss:$8 sps:$4 sm:$0xff]  }
 0x167   :  { %v4293_v62 = vld [vmem:[%s6178_s0 + $0x694] ss:$8 sps:$4 sm:$0xff]  }
 0x168   :  { %v5159_v21 = vpop.f32.mrb[52].mxu0  ;;  %v5161_v22 = vpop.f32.mrb[52].mxu1 }
 0x169   :  { %6222 = vst [vmem:[#allocation30_spill] sm:$0xff] %v5159_v21  ;;  %6223 = vst [vmem:[#allocation31_spill] sm:$0xff] %v5161_v22  ;;  %v2039_v23 = vpop.f32.mrb[53].mxu0  ;;  %v2551_v39 = vpop.f32.mrb[53].mxu1  ;;  %v4292_v22 = vld [vmem:[%s6178_s0 + $0x290] ss:$8 sps:$4 sm:$0xff]  }
 0x16a   :  { %v5169_v40 = vpop.f32.mrb[54].mxu0  ;;  %v5171_v48 = vpop.f32.mrb[54].mxu1 }
 0x16b   :  { %6224 = vst [vmem:[#allocation32_spill] sm:$0xff] %v5171_v48  ;;  %v2042_v5 = vpop.f32.mrb[55].mxu0  ;;  %v2554_v6 = vpop.f32.mrb[55].mxu1 }
 0x16c   :  { %v4295_v5 = vld [vmem:[%s6178_s0 + $0x690] ss:$8 sps:$4 sm:$0xff]  }
 0x16d   :  { %2252 = vmatmul.mubr.bf16.gmra.mrb[160].mxu0 %v4286_v24  ;;  %2764 = vmatmul.mubr.bf16.gmra.mrb[160].mxu1 %v4289_v47 }
 0x16e   :  { %3762 = vmatprep.mubr.msk.bf16.mxu0 %vm1510_vm0, %v4290_v61  ;;  %3826 = vmatprep.mubr.msk.bf16.mxu1 %vm1510_vm0, %v4293_v62  ;;  %v4296_v61 = vld [vmem:[%s6178_s0 + $0x2a4] ss:$8 sps:$4 sm:$0xff]  }
 0x170   :  { %v5181_v23 = vpop.f32.mrb[56].mxu0  ;;  %v5183_v39 = vpop.f32.mrb[56].mxu1 }
 0x171   :  { %6225 = vst [vmem:[#allocation33_spill] sm:$0xff] %v5181_v23  ;;  %6226 = vst [vmem:[#allocation34_spill] sm:$0xff] %v5183_v39  ;;  %v2047_v48 = vpop.f32.mrb[57].mxu0  ;;  %v2559_v52 = vpop.f32.mrb[57].mxu1 }
 0x172   :  { %v5191_v24 = vpop.f32.mrb[58].mxu0  ;;  %v5193_v47 = vpop.f32.mrb[58].mxu1  ;;  %v4299_v48 = vld [vmem:[%s6178_s0 + $0x6a4] ss:$8 sps:$4 sm:$0xff]  }
 0x173   :  { %6227 = vst [vmem:[#allocation35_spill] sm:$0xff] %v5193_v47  ;;  %v2050_v62 = vpop.f32.mrb[59].mxu0  ;;  %v2562_v6 = vpop.f32.mrb[59].mxu1 }
 0x174   :  { %v4301_v62 = vld [vmem:[%s6178_s0 + $0x6a0] ss:$8 sps:$4 sm:$0xff]  }
 0x175   :  { %2260 = vmatmul.mubr.bf16.gmra.mrb[164].mxu0 %v4292_v22  ;;  %2772 = vmatmul.mubr.bf16.gmra.mrb[164].mxu1 %v4295_v5 }
 0x176   :  { %3763 = vmatprep.mubr.msk.bf16.mxu0 %vm1510_vm0, %v4296_v61  ;;  %3827 = vmatprep.mubr.msk.bf16.mxu1 %vm1510_vm0, %v4299_v48  ;;  %v4302_v61 = vld [vmem:[%s6178_s0 + $0x2b4] ss:$8 sps:$4 sm:$0xff]  }
 0x178   :  { %v5203_v52 = vpop.f32.mrb[60].mxu0  ;;  %v5205_v39 = vpop.f32.mrb[60].mxu1 }
 0x179   :  { %6228 = vst [vmem:[#allocation36_spill] sm:$0xff] %v5203_v52  ;;  %6229 = vst [vmem:[#allocation37_spill] sm:$0xff] %v5205_v39  ;;  %v2055_v47 = vpop.f32.mrb[61].mxu0  ;;  %v2567_v12 = vpop.f32.mrb[61].mxu1 }
 0x17a   :  { %v5213_v22 = vpop.f32.mrb[62].mxu0  ;;  %v5215_v5 = vpop.f32.mrb[62].mxu1  ;;  %v4305_v47 = vld [vmem:[%s6178_s0 + $0x6b4] ss:$8 sps:$4 sm:$0xff]  }
 0x17b   :  { %6230 = vst [vmem:[#allocation38_spill] sm:$0xff] %v5215_v5  ;;  %v2058_v48 = vpop.f32.mrb[63].mxu0  ;;  %v2570_v6 = vpop.f32.mrb[63].mxu1 }
 0x17c   :  { %v4310_v6 = vld [vmem:[%s6178_s0 + $0x2c0] ss:$8 sps:$4 sm:$0xff]  }
 0x17d   :  { %2268 = vmatmul.mubr.bf16.gmra.mrb[168].mxu0 %v4298_v34  ;;  %2780 = vmatmul.mubr.bf16.gmra.mrb[168].mxu1 %v4301_v62  ;;  %v4307_v34 = vld [vmem:[%s6178_s0 + $0x6b0] ss:$8 sps:$4 sm:$0xff]  }
 0x17e   :  { %3764 = vmatprep.mubr.msk.bf16.mxu0 %vm1510_vm0, %v4302_v61  ;;  %3828 = vmatprep.mubr.msk.bf16.mxu1 %vm1510_vm0, %v4305_v47  ;;  %v4308_v47 = vld [vmem:[%s6178_s0 + $0x2c4] ss:$8 sps:$4 sm:$0xff]  }
 0x180   :  { %v5225_v12 = vpop.f32.mrb[64].mxu0  ;;  %v5227_v39 = vpop.f32.mrb[64].mxu1 }
 0x181   :  { %6231 = vst [vmem:[#allocation39_spill] sm:$0xff] %v5227_v39  ;;  %v2063_v58 = vpop.f32.mrb[65].mxu0  ;;  %v2575_v48 = vpop.f32.mrb[65].mxu1 }
 0x182   :  { %v5237_v62 = vpop.f32.mrb[66].mxu0  ;;  %v5239_v61 = vpop.f32.mrb[66].mxu1  ;;  %v4311_v58 = vld [vmem:[%s6178_s0 + $0x6c4] ss:$8 sps:$4 sm:$0xff]  }
 0x183   :  { %6232 = vst [vmem:[#allocation40_spill] sm:$0xff] %v5239_v61  ;;  %v2066_v48 = vpop.f32.mrb[67].mxu0  ;;  %v2578_v5 = vpop.f32.mrb[67].mxu1 }
 0x185   :  { %2276 = vmatmul.mubr.bf16.gmra.mrb[172].mxu0 %v4304_v42  ;;  %2788 = vmatmul.mubr.bf16.gmra.mrb[172].mxu1 %v4307_v34  ;;  %v4313_v42 = vld [vmem:[%s6178_s0 + $0x6c0] ss:$8 sps:$4 sm:$0xff]  }
 0x186   :  { %3765 = vmatprep.mubr.msk.bf16.mxu0 %vm1510_vm0, %v4308_v47  ;;  %3829 = vmatprep.mubr.msk.bf16.mxu1 %vm1510_vm0, %v4311_v58  ;;  %v4314_v47 = vld [vmem:[%s6178_s0 + $0x2d4] ss:$8 sps:$4 sm:$0xff]   ;;  %v4316_v58 = vld [vmem:[%s6178_s0 + $0x2d0] ss:$8 sps:$4 sm:$0xff]  }
 0x188   :  { %v5251_v30 = vpop.f32.mrb[68].mxu0  ;;  %v5253_v16 = vpop.f32.mrb[68].mxu1 }
 0x189   :  { %6233 = vst [vmem:[#allocation41_spill] sm:$0xff] %v5253_v16  ;;  %v2071_v54 = vpop.f32.mrb[69].mxu0  ;;  %v2583_v48 = vpop.f32.mrb[69].mxu1 }
 0x18a   :  { %v5263_v5 = vpop.f32.mrb[70].mxu0  ;;  %v5265_v34 = vpop.f32.mrb[70].mxu1  ;;  %v4317_v54 = vld [vmem:[%s6178_s0 + $0x6d4] ss:$8 sps:$4 sm:$0xff]  }
 0x18b   :  { %6234 = vst [vmem:[#allocation42_spill] sm:$0xff] %v5265_v34  ;;  %v2074_v48 = vpop.f32.mrb[71].mxu0  ;;  %v2586_v4 = vpop.f32.mrb[71].mxu1 }
 0x18c   :  { %v4319_v4 = vld [vmem:[%s6178_s0 + $0x6d0] ss:$8 sps:$4 sm:$0xff]  }
 0x18d   :  { %2284 = vmatmul.mubr.bf16.gmra.mrb[176].mxu0 %v4310_v6  ;;  %2796 = vmatmul.mubr.bf16.gmra.mrb[176].mxu1 %v4313_v42 }
 0x18e   :  { %3766 = vmatprep.mubr.msk.bf16.mxu0 %vm1510_vm0, %v4314_v47  ;;  %3830 = vmatprep.mubr.msk.bf16.mxu1 %vm1510_vm0, %v4317_v54  ;;  %v4320_v47 = vld [vmem:[%s6178_s0 + $0x2e4] ss:$8 sps:$4 sm:$0xff]   ;;  %v4322_v54 = vld [vmem:[%s6178_s0 + $0x2e0] ss:$8 sps:$4 sm:$0xff]  }
 0x190   :  { %v5277_v46 = vpop.f32.mrb[72].mxu0  ;;  %v5279_v36 = vpop.f32.mrb[72].mxu1 }
 0x191   :  { %6235 = vst [vmem:[#allocation43_spill] sm:$0xff] %v5279_v36  ;;  %v2079_v18 = vpop.f32.mrb[73].mxu0  ;;  %v2591_v48 = vpop.f32.mrb[73].mxu1 }
 0x192   :  { %v5289_v6 = vpop.f32.mrb[74].mxu0  ;;  %v5291_v42 = vpop.f32.mrb[74].mxu1  ;;  %v4323_v18 = vld [vmem:[%s6178_s0 + $0x6e4] ss:$8 sps:$4 sm:$0xff]  }
 0x193   :  { %6236 = vst [vmem:[#allocation44_spill] sm:$0xff] %v5291_v42  ;;  %v2082_v48 = vpop.f32.mrb[75].mxu0  ;;  %v2594_v28 = vpop.f32.mrb[75].mxu1 }
 0x194   :  { %v4325_v28 = vld [vmem:[%s6178_s0 + $0x6e0] ss:$8 sps:$4 sm:$0xff]  }
 0x195   :  { %2292 = vmatmul.mubr.bf16.gmra.mrb[180].mxu0 %v4316_v58  ;;  %2804 = vmatmul.mubr.bf16.gmra.mrb[180].mxu1 %v4319_v4 }
 0x196   :  { %3767 = vmatprep.mubr.msk.bf16.mxu0 %vm1510_vm0, %v4320_v47  ;;  %3831 = vmatprep.mubr.msk.bf16.mxu1 %vm1510_vm0, %v4323_v18  ;;  %v4326_v47 = vld [vmem:[%s6178_s0 + $0x2f4] ss:$8 sps:$4 sm:$0xff]   ;;  %v4328_v18 = vld [vmem:[%s6178_s0 + $0x2f0] ss:$8 sps:$4 sm:$0xff]  }
 0x198   :  { %v5303_v10 = vpop.f32.mrb[76].mxu0  ;;  %v5305_v0 = vpop.f32.mrb[76].mxu1 }
 0x199   :  { %6237 = vst [vmem:[#allocation45_spill] sm:$0xff] %v5305_v0  ;;  %v2087_v50 = vpop.f32.mrb[77].mxu0  ;;  %v2599_v48 = vpop.f32.mrb[77].mxu1 }
 0x19a   :  { %v5315_v58 = vpop.f32.mrb[78].mxu0  ;;  %v5317_v4 = vpop.f32.mrb[78].mxu1  ;;  %v4329_v50 = vld [vmem:[%s6178_s0 + $0x6f4] ss:$8 sps:$4 sm:$0xff]  }
 0x19b   :  { %6238 = vst [vmem:[#allocation46_spill] sm:$0xff] %v5317_v4  ;;  %v2090_v48 = vpop.f32.mrb[79].mxu0  ;;  %v2602_v56 = vpop.f32.mrb[79].mxu1 }
 0x19c   :  { %v4331_v56 = vld [vmem:[%s6178_s0 + $0x6f0] ss:$8 sps:$4 sm:$0xff]  }
 0x19d   :  { %2300 = vmatmul.mubr.bf16.gmra.mrb[184].mxu0 %v4322_v54  ;;  %2812 = vmatmul.mubr.bf16.gmra.mrb[184].mxu1 %v4325_v28 }
 0x19e   :  { %3768 = vmatprep.mubr.msk.bf16.mxu0 %vm1510_vm0, %v4326_v47  ;;  %3832 = vmatprep.mubr.msk.bf16.mxu1 %vm1510_vm0, %v4329_v50  ;;  %v4332_v47 = vld [vmem:[%s6178_s0 + $0x304] ss:$8 sps:$4 sm:$0xff]   ;;  %v4334_v50 = vld [vmem:[%s6178_s0 + $0x300] ss:$8 sps:$4 sm:$0xff]  }
 0x1a0   :  { %v5329_v44 = vpop.f32.mrb[80].mxu0  ;;  %v5331_v4 = vpop.f32.mrb[80].mxu1 }
 0x1a1   :  { %6239 = vst [vmem:[#allocation47_spill] sm:$0xff] %v5331_v4  ;;  %v2095_v38 = vpop.f32.mrb[81].mxu0  ;;  %v2607_v48 = vpop.f32.mrb[81].mxu1 }
 0x1a2   :  { %v5341_v54 = vpop.f32.mrb[82].mxu0  ;;  %v5343_v28 = vpop.f32.mrb[82].mxu1  ;;  %v4335_v38 = vld [vmem:[%s6178_s0 + $0x704] ss:$8 sps:$4 sm:$0xff]  }
 0x1a3   :  { %6240 = vst [vmem:[#allocation48_spill] sm:$0xff] %v5343_v28  ;;  %v2098_v48 = vpop.f32.mrb[83].mxu0  ;;  %v2610_v0 = vpop.f32.mrb[83].mxu1 }
 0x1a4   :  { %v4337_v0 = vld [vmem:[%s6178_s0 + $0x700] ss:$8 sps:$4 sm:$0xff]  }
 0x1a5   :  { %2308 = vmatmul.mubr.bf16.gmra.mrb[188].mxu0 %v4328_v18  ;;  %2820 = vmatmul.mubr.bf16.gmra.mrb[188].mxu1 %v4331_v56 }
 0x1a6   :  { %3769 = vmatprep.mubr.msk.bf16.mxu0 %vm1510_vm0, %v4332_v47  ;;  %3833 = vmatprep.mubr.msk.bf16.mxu1 %vm1510_vm0, %v4335_v38  ;;  %v4338_v47 = vld [vmem:[%s6178_s0 + $0x314] ss:$8 sps:$4 sm:$0xff]   ;;  %v4340_v38 = vld [vmem:[%s6178_s0 + $0x310] ss:$8 sps:$4 sm:$0xff]  }
 0x1a8   :  { %v5355_v28 = vpop.f32.mrb[84].mxu0  ;;  %v5357_v4 = vpop.f32.mrb[84].mxu1 }
 0x1a9   :  { %6241 = vst [vmem:[#allocation49_spill] sm:$0xff] %v5357_v4  ;;  %v2103_v42 = vpop.f32.mrb[85].mxu0  ;;  %v2615_v48 = vpop.f32.mrb[85].mxu1 }
 0x1aa   :  { %v5367_v18 = vpop.f32.mrb[86].mxu0  ;;  %v5369_v56 = vpop.f32.mrb[86].mxu1  ;;  %v4341_v42 = vld [vmem:[%s6178_s0 + $0x714] ss:$8 sps:$4 sm:$0xff]  }
 0x1ab   :  { %6242 = vst [vmem:[#allocation50_spill] sm:$0xff] %v5369_v56  ;;  %v2106_v48 = vpop.f32.mrb[87].mxu0  ;;  %v2618_v32 = vpop.f32.mrb[87].mxu1 }
 0x1ac   :  { %v4343_v32 = vld [vmem:[%s6178_s0 + $0x710] ss:$8 sps:$4 sm:$0xff]  }
 0x1ad   :  { %2316 = vmatmul.mubr.bf16.gmra.mrb[192].mxu0 %v4334_v50  ;;  %2828 = vmatmul.mubr.bf16.gmra.mrb[192].mxu1 %v4337_v0 }
 0x1ae   :  { %3770 = vmatprep.mubr.msk.bf16.mxu0 %vm1510_vm0, %v4338_v47  ;;  %3834 = vmatprep.mubr.msk.bf16.mxu1 %vm1510_vm0, %v4341_v42  ;;  %v4344_v47 = vld [vmem:[%s6178_s0 + $0x324] ss:$8 sps:$4 sm:$0xff]   ;;  %v4346_v42 = vld [vmem:[%s6178_s0 + $0x320] ss:$8 sps:$4 sm:$0xff]  }
 0x1b0   :  { %v5381_v56 = vpop.f32.mrb[88].mxu0  ;;  %v5383_v4 = vpop.f32.mrb[88].mxu1 }
 0x1b1   :  { %6243 = vst [vmem:[#allocation51_spill] sm:$0xff] %v5383_v4  ;;  %v2111_v36 = vpop.f32.mrb[89].mxu0  ;;  %v2623_v48 = vpop.f32.mrb[89].mxu1 }
 0x1b2   :  { %v5393_v50 = vpop.f32.mrb[90].mxu0  ;;  %v5395_v0 = vpop.f32.mrb[90].mxu1  ;;  %v4347_v36 = vld [vmem:[%s6178_s0 + $0x724] ss:$8 sps:$4 sm:$0xff]  }
 0x1b3   :  { %6244 = vst [vmem:[#allocation52_spill] sm:$0xff] %v5395_v0  ;;  %v2114_v48 = vpop.f32.mrb[91].mxu0  ;;  %v2626_v26 = vpop.f32.mrb[91].mxu1 }
 0x1b4   :  { %v4349_v26 = vld [vmem:[%s6178_s0 + $0x720] ss:$8 sps:$4 sm:$0xff]  }
 0x1b5   :  { %2324 = vmatmul.mubr.bf16.gmra.mrb[196].mxu0 %v4340_v38  ;;  %2836 = vmatmul.mubr.bf16.gmra.mrb[196].mxu1 %v4343_v32 }
 0x1b6   :  { %3771 = vmatprep.mubr.msk.bf16.mxu0 %vm1510_vm0, %v4344_v47  ;;  %3835 = vmatprep.mubr.msk.bf16.mxu1 %vm1510_vm0, %v4347_v36  ;;  %v4350_v47 = vld [vmem:[%s6178_s0 + $0x334] ss:$8 sps:$4 sm:$0xff]   ;;  %v4352_v36 = vld [vmem:[%s6178_s0 + $0x330] ss:$8 sps:$4 sm:$0xff]  }
 0x1b8   :  { %v5407_v0 = vpop.f32.mrb[92].mxu0  ;;  %v5409_v4 = vpop.f32.mrb[92].mxu1 }
 0x1b9   :  { %6245 = vst [vmem:[#allocation53_spill] sm:$0xff] %v5409_v4  ;;  %v2119_v34 = vpop.f32.mrb[93].mxu0  ;;  %v2631_v48 = vpop.f32.mrb[93].mxu1 }
 0x1ba   :  { %v5419_v38 = vpop.f32.mrb[94].mxu0  ;;  %v5421_v32 = vpop.f32.mrb[94].mxu1  ;;  %v4353_v34 = vld [vmem:[%s6178_s0 + $0x734] ss:$8 sps:$4 sm:$0xff]  }
 0x1bb   :  { %6246 = vst [vmem:[#allocation54_spill] sm:$0xff] %v5421_v32  ;;  %v2122_v48 = vpop.f32.mrb[95].mxu0  ;;  %v2634_v20 = vpop.f32.mrb[95].mxu1 }
 0x1bc   :  { %v4355_v20 = vld [vmem:[%s6178_s0 + $0x730] ss:$8 sps:$4 sm:$0xff]  }
 0x1bd   :  { %2332 = vmatmul.mubr.bf16.gmra.mrb[200].mxu0 %v4346_v42  ;;  %2844 = vmatmul.mubr.bf16.gmra.mrb[200].mxu1 %v4349_v26 }
 0x1be   :  { %3772 = vmatprep.mubr.msk.bf16.mxu0 %vm1510_vm0, %v4350_v47  ;;  %3836 = vmatprep.mubr.msk.bf16.mxu1 %vm1510_vm0, %v4353_v34  ;;  %v4356_v47 = vld [vmem:[%s6178_s0 + $0x344] ss:$8 sps:$4 sm:$0xff]   ;;  %v4358_v34 = vld [vmem:[%s6178_s0 + $0x340] ss:$8 sps:$4 sm:$0xff]  }
 0x1c0   :  { %v5433_v32 = vpop.f32.mrb[96].mxu0  ;;  %v5435_v4 = vpop.f32.mrb[96].mxu1 }
 0x1c1   :  { %6247 = vst [vmem:[#allocation55_spill] sm:$0xff] %v5435_v4  ;;  %v2127_v14 = vpop.f32.mrb[97].mxu0  ;;  %v2639_v48 = vpop.f32.mrb[97].mxu1 }
 0x1c2   :  { %v5445_v42 = vpop.f32.mrb[98].mxu0  ;;  %v5447_v26 = vpop.f32.mrb[98].mxu1  ;;  %v4359_v14 = vld [vmem:[%s6178_s0 + $0x744] ss:$8 sps:$4 sm:$0xff]  }
 0x1c3   :  { %6248 = vst [vmem:[#allocation56_spill] sm:$0xff] %v5447_v26  ;;  %v2130_v48 = vpop.f32.mrb[99].mxu0  ;;  %v2642_v16 = vpop.f32.mrb[99].mxu1 }
 0x1c4   :  { %v4361_v16 = vld [vmem:[%s6178_s0 + $0x740] ss:$8 sps:$4 sm:$0xff]  }
 0x1c5   :  { %2340 = vmatmul.mubr.bf16.gmra.mrb[204].mxu0 %v4352_v36  ;;  %2852 = vmatmul.mubr.bf16.gmra.mrb[204].mxu1 %v4355_v20 }
 0x1c6   :  { %3773 = vmatprep.mubr.msk.bf16.mxu0 %vm1510_vm0, %v4356_v47  ;;  %3837 = vmatprep.mubr.msk.bf16.mxu1 %vm1510_vm0, %v4359_v14  ;;  %v4362_v47 = vld [vmem:[%s6178_s0 + $0x354] ss:$8 sps:$4 sm:$0xff]   ;;  %v4364_v14 = vld [vmem:[%s6178_s0 + $0x350] ss:$8 sps:$4 sm:$0xff]  }
 0x1c8   :  { %v5459_v26 = vpop.f32.mrb[100].mxu0  ;;  %v5461_v4 = vpop.f32.mrb[100].mxu1 }
 0x1c9   :  { %6249 = vst [vmem:[#allocation57_spill] sm:$0xff] %v5461_v4  ;;  %v2135_v61 = vpop.f32.mrb[101].mxu0  ;;  %v2647_v48 = vpop.f32.mrb[101].mxu1 }
 0x1ca   :  { %v5471_v36 = vpop.f32.mrb[102].mxu0  ;;  %v5473_v20 = vpop.f32.mrb[102].mxu1  ;;  %v4365_v61 = vld [vmem:[%s6178_s0 + $0x754] ss:$8 sps:$4 sm:$0xff]  }
 0x1cb   :  { %6250 = vst [vmem:[#allocation58_spill] sm:$0xff] %v5473_v20  ;;  %v2138_v48 = vpop.f32.mrb[103].mxu0  ;;  %v2650_v8 = vpop.f32.mrb[103].mxu1 }
 0x1cc   :  { %v4367_v8 = vld [vmem:[%s6178_s0 + $0x750] ss:$8 sps:$4 sm:$0xff]  }
 0x1cd   :  { %2348 = vmatmul.mubr.bf16.gmra.mrb[208].mxu0 %v4358_v34  ;;  %2860 = vmatmul.mubr.bf16.gmra.mrb[208].mxu1 %v4361_v16 }
 0x1ce   :  { %3774 = vmatprep.mubr.msk.bf16.mxu0 %vm1510_vm0, %v4362_v47  ;;  %3838 = vmatprep.mubr.msk.bf16.mxu1 %vm1510_vm0, %v4365_v61  ;;  %v4368_v47 = vld [vmem:[%s6178_s0 + $0x364] ss:$8 sps:$4 sm:$0xff]   ;;  %v4370_v61 = vld [vmem:[%s6178_s0 + $0x360] ss:$8 sps:$4 sm:$0xff]  }
 0x1d0   :  { %v5485_v20 = vpop.f32.mrb[104].mxu0  ;;  %v5487_v4 = vpop.f32.mrb[104].mxu1 }
 0x1d1   :  { %6251 = vst [vmem:[#allocation59_spill] sm:$0xff] %v5485_v20  ;;  %6252 = vst [vmem:[#allocation60_spill] sm:$0xff] %v5487_v4  ;;  %v2143_v2 = vpop.f32.mrb[105].mxu0  ;;  %v2655_v48 = vpop.f32.mrb[105].mxu1 }
 0x1d2   :  { %v5497_v34 = vpop.f32.mrb[106].mxu0  ;;  %v5499_v16 = vpop.f32.mrb[106].mxu1  ;;  %v4371_v2 = vld [vmem:[%s6178_s0 + $0x764] ss:$8 sps:$4 sm:$0xff]  }
 0x1d3   :  { %6253 = vst [vmem:[#allocation61_spill] sm:$0xff] %v5499_v16  ;;  %v2146_v48 = vpop.f32.mrb[107].mxu0  ;;  %v2658_v39 = vpop.f32.mrb[107].mxu1 }
 0x1d4   :  { %v4373_v39 = vld [vmem:[%s6178_s0 + $0x760] ss:$8 sps:$4 sm:$0xff]  }
 0x1d5   :  { %2356 = vmatmul.mubr.bf16.gmra.mrb[212].mxu0 %v4364_v14  ;;  %2868 = vmatmul.mubr.bf16.gmra.mrb[212].mxu1 %v4367_v8 }
 0x1d6   :  { %3775 = vmatprep.mubr.msk.bf16.mxu0 %vm1510_vm0, %v4368_v47  ;;  %3839 = vmatprep.mubr.msk.bf16.mxu1 %vm1510_vm0, %v4371_v2  ;;  %v4374_v47 = vld [vmem:[%s6178_s0 + $0x374] ss:$8 sps:$4 sm:$0xff]   ;;  %v4376_v2 = vld [vmem:[%s6178_s0 + $0x370] ss:$8 sps:$4 sm:$0xff]  }
 0x1d8   :  { %v5511_v16 = vpop.f32.mrb[108].mxu0  ;;  %v5513_v4 = vpop.f32.mrb[108].mxu1 }
 0x1d9   :  { %6254 = vst [vmem:[#allocation62_spill] sm:$0xff] %v5511_v16  ;;  %6255 = vst [vmem:[#allocation63_spill] sm:$0xff] %v5513_v4  ;;  %v2151_v20 = vpop.f32.mrb[109].mxu0  ;;  %v2663_v48 = vpop.f32.mrb[109].mxu1 }
 0x1da   :  { %v5523_v14 = vpop.f32.mrb[110].mxu0  ;;  %v5525_v8 = vpop.f32.mrb[110].mxu1  ;;  %v4377_v20 = vld [vmem:[%s6178_s0 + $0x774] ss:$8 sps:$4 sm:$0xff]  }
 0x1db   :  { %6256 = vst [vmem:[#allocation64_spill] sm:$0xff] %v5525_v8  ;;  %v2154_v48 = vpop.f32.mrb[111].mxu0  ;;  %v2666_v60 = vpop.f32.mrb[111].mxu1 }
 0x1dc   :  { %v4379_v60 = vld [vmem:[%s6178_s0 + $0x770] ss:$8 sps:$4 sm:$0xff]  }
 0x1dd   :  { %2364 = vmatmul.mubr.bf16.gmra.mrb[216].mxu0 %v4370_v61  ;;  %2876 = vmatmul.mubr.bf16.gmra.mrb[216].mxu1 %v4373_v39 }
 0x1de   :  { %3776 = vmatprep.mubr.msk.bf16.mxu0 %vm1510_vm0, %v4374_v47  ;;  %3840 = vmatprep.mubr.msk.bf16.mxu1 %vm1510_vm0, %v4377_v20  ;;  %v4380_v47 = vld [vmem:[%s6178_s0 + $0x384] ss:$8 sps:$4 sm:$0xff]   ;;  %v4382_v20 = vld [vmem:[%s6178_s0 + $0x380] ss:$8 sps:$4 sm:$0xff]  }
 0x1e0   :  { %v5537_v8 = vpop.f32.mrb[112].mxu0  ;;  %v5539_v4 = vpop.f32.mrb[112].mxu1 }
 0x1e1   :  { %6257 = vst [vmem:[#allocation65_spill] sm:$0xff] %v5537_v8  ;;  %6258 = vst [vmem:[#allocation66_spill] sm:$0xff] %v5539_v4  ;;  %v2159_v57 = vpop.f32.mrb[113].mxu0  ;;  %v2671_v48 = vpop.f32.mrb[113].mxu1 }
 0x1e2   :  { %v5549_v61 = vpop.f32.mrb[114].mxu0  ;;  %v5551_v39 = vpop.f32.mrb[114].mxu1  ;;  %v4383_v57 = vld [vmem:[%s6178_s0 + $0x784] ss:$8 sps:$4 sm:$0xff]  }
 0x1e3   :  { %6259 = vst [vmem:[#allocation67_spill] sm:$0xff] %v5551_v39  ;;  %v2162_v48 = vpop.f32.mrb[115].mxu0  ;;  %v2674_v16 = vpop.f32.mrb[115].mxu1 }
 0x1e4   :  { %v4385_v16 = vld [vmem:[%s6178_s0 + $0x780] ss:$8 sps:$4 sm:$0xff]  }
 0x1e5   :  { %2372 = vmatmul.mubr.bf16.gmra.mrb[220].mxu0 %v4376_v2  ;;  %2884 = vmatmul.mubr.bf16.gmra.mrb[220].mxu1 %v4379_v60 }
 0x1e6   :  { %3777 = vmatprep.mubr.msk.bf16.mxu0 %vm1510_vm0, %v4380_v47  ;;  %3841 = vmatprep.mubr.msk.bf16.mxu1 %vm1510_vm0, %v4383_v57  ;;  %v4386_v47 = vld [vmem:[%s6178_s0 + $0x394] ss:$8 sps:$4 sm:$0xff]   ;;  %v4388_v57 = vld [vmem:[%s6178_s0 + $0x390] ss:$8 sps:$4 sm:$0xff]  }
 0x1e8   :  { %v5563_v39 = vpop.f32.mrb[116].mxu0  ;;  %v5565_v4 = vpop.f32.mrb[116].mxu1 }
 0x1e9   :  { %6260 = vst [vmem:[#allocation68_spill] sm:$0xff] %v5563_v39  ;;  %6261 = vst [vmem:[#allocation69_spill] sm:$0xff] %v5565_v4  ;;  %v2167_v33 = vpop.f32.mrb[117].mxu0  ;;  %v2679_v48 = vpop.f32.mrb[117].mxu1 }
 0x1ea   :  { %v5575_v2 = vpop.f32.mrb[118].mxu0  ;;  %v5577_v60 = vpop.f32.mrb[118].mxu1  ;;  %v4389_v33 = vld [vmem:[%s6178_s0 + $0x794] ss:$8 sps:$4 sm:$0xff]  }
 0x1eb   :  { %6262 = vst [vmem:[#allocation70_spill] sm:$0xff] %v5577_v60  ;;  %v2170_v48 = vpop.f32.mrb[119].mxu0  ;;  %v2682_v8 = vpop.f32.mrb[119].mxu1 }
 0x1ec   :  { %v4391_v8 = vld [vmem:[%s6178_s0 + $0x790] ss:$8 sps:$4 sm:$0xff]  }
 0x1ed   :  { %2380 = vmatmul.mubr.bf16.gmra.mrb[224].mxu0 %v4382_v20  ;;  %2892 = vmatmul.mubr.bf16.gmra.mrb[224].mxu1 %v4385_v16 }
 0x1ee   :  { %3778 = vmatprep.mubr.msk.bf16.mxu0 %vm1510_vm0, %v4386_v47  ;;  %3842 = vmatprep.mubr.msk.bf16.mxu1 %vm1510_vm0, %v4389_v33  ;;  %v4392_v47 = vld [vmem:[%s6178_s0 + $0x3a4] ss:$8 sps:$4 sm:$0xff]   ;;  %v4394_v33 = vld [vmem:[%s6178_s0 + $0x3a0] ss:$8 sps:$4 sm:$0xff]  }
 0x1f0   :  { %v5589_v60 = vpop.f32.mrb[120].mxu0  ;;  %v5591_v4 = vpop.f32.mrb[120].mxu1 }
 0x1f1   :  { %6263 = vst [vmem:[#allocation71_spill] sm:$0xff] %v5589_v60  ;;  %6264 = vst [vmem:[#allocation72_spill] sm:$0xff] %v5591_v4  ;;  %v2175_v21 = vpop.f32.mrb[121].mxu0  ;;  %v2687_v48 = vpop.f32.mrb[121].mxu1 }
 0x1f2   :  { %v5601_v20 = vpop.f32.mrb[122].mxu0  ;;  %v5603_v16 = vpop.f32.mrb[122].mxu1  ;;  %v4395_v21 = vld [vmem:[%s6178_s0 + $0x7a4] ss:$8 sps:$4 sm:$0xff]  }
 0x1f3   :  { %6265 = vst [vmem:[#allocation73_spill] sm:$0xff] %v5601_v20  ;;  %6266 = vst [vmem:[#allocation74_spill] sm:$0xff] %v5603_v16  ;;  %v2178_v48 = vpop.f32.mrb[123].mxu0  ;;  %v2690_v39 = vpop.f32.mrb[123].mxu1 }
 0x1f4   :  { %v4397_v39 = vld [vmem:[%s6178_s0 + $0x7a0] ss:$8 sps:$4 sm:$0xff]  }
 0x1f5   :  { %2388 = vmatmul.mubr.bf16.gmra.mrb[228].mxu0 %v4388_v57  ;;  %2900 = vmatmul.mubr.bf16.gmra.mrb[228].mxu1 %v4391_v8 }
 0x1f6   :  { %3779 = vmatprep.mubr.msk.bf16.mxu0 %vm1510_vm0, %v4392_v47  ;;  %3843 = vmatprep.mubr.msk.bf16.mxu1 %vm1510_vm0, %v4395_v21  ;;  %v4398_v47 = vld [vmem:[%s6178_s0 + $0x3b4] ss:$8 sps:$4 sm:$0xff]  }
 0x1f8   :  { %v5615_v16 = vpop.f32.mrb[124].mxu0  ;;  %v5617_v4 = vpop.f32.mrb[124].mxu1 }
 0x1f9   :  { %6267 = vst [vmem:[#allocation75_spill] sm:$0xff] %v5615_v16  ;;  %6268 = vst [vmem:[#allocation76_spill] sm:$0xff] %v5617_v4  ;;  %v2183_v23 = vpop.f32.mrb[125].mxu0  ;;  %v2695_v48 = vpop.f32.mrb[125].mxu1  ;;  %v6271_v16 = vmax.f32 %v4873_v59, %v5225_v12  ;;  %v4407_v59 = vld [vmem:[%s6178_s0 + $0x7c4] ss:$8 sps:$4 sm:$0xff]   ;;  %v6274_v12 = vmax.f32 %v4883_v1, %v5237_v62 }
 0x1fa   :  { %v5627_v57 = vpop.f32.mrb[126].mxu0  ;;  %v5629_v8 = vpop.f32.mrb[126].mxu1  ;;  %v4401_v23 = vld [vmem:[%s6178_s0 + $0x7b4] ss:$8 sps:$4 sm:$0xff]   ;;  %v4406_v1 = vld [vmem:[%s6178_s0 + $0x3c0] ss:$8 sps:$4 sm:$0xff]  }
 0x1fb   :  { %6269 = vst [vmem:[#allocation77_spill] sm:$0xff] %v5629_v8  ;;  %v2186_v48 = vpop.f32.mrb[127].mxu0  ;;  %v2698_v60 = vpop.f32.mrb[127].mxu1 }
 0x1fc   :  { %v4400_v48 = vld [vmem:[%s6178_s0 + $0x3b0] ss:$8 sps:$4 sm:$0xff]  }
 0x1fd   :  { %2396 = vmatmul.mubr.bf16.gmra.mrb[232].mxu0 %v4394_v33  ;;  %2908 = vmatmul.mubr.bf16.gmra.mrb[232].mxu1 %v4397_v39  ;;  %v4403_v33 = vld [vmem:[%s6178_s0 + $0x7b0] ss:$8 sps:$4 sm:$0xff]  }
 0x1fe   :  { %3780 = vmatprep.mubr.msk.bf16.mxu0 %vm1510_vm0, %v4398_v47  ;;  %3844 = vmatprep.mubr.msk.bf16.mxu1 %vm1510_vm0, %v4401_v23  ;;  %v4404_v23 = vld [vmem:[%s6178_s0 + $0x3c4] ss:$8 sps:$4 sm:$0xff]  }
 0x200   :  { %v2189_v8 = vpop.f32.mrb[128].mxu0  ;;  %v5641_v4 = vpop.f32.mrb[128].mxu1 }
 0x201   :  { %6270 = vst [vmem:[#allocation78_spill] sm:$0xff] %v5641_v4  ;;  %v5646_v52 = vmax.f32 %v6271_v16, %v2189_v8  ;;  %v2191_v20 = vpop.f32.mrb[129].mxu0  ;;  %v2703_v60 = vpop.f32.mrb[129].mxu1 }
 0x202   :  { %v2192_v39 = vpop.f32.mrb[130].mxu0  ;;  %v5654_v47 = vpop.f32.mrb[130].mxu1 }
 0x203   :  { %6272 = vst [vmem:[#allocation79_spill] sm:$0xff] %v5646_v52  ;;  %6273 = vst [vmem:[#allocation80_spill] sm:$0xff] %v5654_v47  ;;  %v5665_v20 = vmax.f32 %v6274_v12, %v2192_v39  ;;  %v2194_v16 = vpop.f32.mrb[131].mxu0  ;;  %v2706_v8 = vpop.f32.mrb[131].mxu1  ;;  %v6275_v47 = vmax.f32 %v4895_v7, %v5251_v30  ;;  %v4413_v7 = vld [vmem:[%s6178_s0 + $0x7d4] ss:$8 sps:$4 sm:$0xff]   ;;  %v6276_v30 = vmax.f32 %v4905_v13, %v5263_v5 }
 0x204   :  { %v6277_v8 = vmax.f32 %v4917_v19, %v5277_v46  ;;  %v4412_v13 = vld [vmem:[%s6178_s0 + $0x3d0] ss:$8 sps:$4 sm:$0xff]   ;;  %v4419_v19 = vld [vmem:[%s6178_s0 + $0x7e4] ss:$8 sps:$4 sm:$0xff]   ;;  %v6278_v46 = vmax.f32 %v4927_v25, %v5289_v6  ;;  %v4418_v25 = vld [vmem:[%s6178_s0 + $0x3e0] ss:$8 sps:$4 sm:$0xff]  }
 0x205   :  { %2404 = vmatmul.mubr.bf16.gmra.mrb[236].mxu0 %v4400_v48  ;;  %2916 = vmatmul.mubr.bf16.gmra.mrb[236].mxu1 %v4403_v33  ;;  %v4409_v48 = vld [vmem:[%s6178_s0 + $0x7c0] ss:$8 sps:$4 sm:$0xff]  }
 0x206   :  { %3781 = vmatprep.mubr.msk.bf16.mxu0 %vm1510_vm0, %v4404_v23  ;;  %3845 = vmatprep.mubr.msk.bf16.mxu1 %vm1510_vm0, %v4407_v59  ;;  %v4410_v23 = vld [vmem:[%s6178_s0 + $0x3d4] ss:$8 sps:$4 sm:$0xff]  }
 0x208   :  { %v2197_v60 = vpop.f32.mrb[132].mxu0  ;;  %v5669_v21 = vpop.f32.mrb[132].mxu1 }
 0x209   :  { %v5674_v4 = vmax.f32 %v6275_v47, %v2197_v60  ;;  %v2199_v52 = vpop.f32.mrb[133].mxu0  ;;  %v2711_v62 = vpop.f32.mrb[133].mxu1 }
 0x20a   :  { %v2200_v33 = vpop.f32.mrb[134].mxu0  ;;  %v5682_v39 = vpop.f32.mrb[134].mxu1 }
 0x20b   :  { %v5693_v52 = vmax.f32 %v6276_v30, %v2200_v33  ;;  %v2202_v47 = vpop.f32.mrb[135].mxu0  ;;  %v2714_v59 = vpop.f32.mrb[135].mxu1 }
 0x20d   :  { %2412 = vmatmul.mubr.bf16.gmra.mrb[240].mxu0 %v4406_v1  ;;  %2924 = vmatmul.mubr.bf16.gmra.mrb[240].mxu1 %v4409_v48  ;;  %v4415_v1 = vld [vmem:[%s6178_s0 + $0x7d0] ss:$8 sps:$4 sm:$0xff]  }
 0x20e   :  { %3782 = vmatprep.mubr.msk.bf16.mxu0 %vm1510_vm0, %v4410_v23  ;;  %3846 = vmatprep.mubr.msk.bf16.mxu1 %vm1510_vm0, %v4413_v7  ;;  %v4416_v23 = vld [vmem:[%s6178_s0 + $0x3e4] ss:$8 sps:$4 sm:$0xff]  }
 0x210   :  { %v2205_v12 = vpop.f32.mrb[136].mxu0  ;;  %v5697_v16 = vpop.f32.mrb[136].mxu1 }
 0x211   :  { %v5702_v60 = vmax.f32 %v6277_v8, %v2205_v12  ;;  %v2207_v62 = vpop.f32.mrb[137].mxu0  ;;  %v2719_v5 = vpop.f32.mrb[137].mxu1  ;;  %v6279_v8 = vmax.f32 %v4939_v31, %v5303_v10  ;;  %v4425_v31 = vld [vmem:[%s6178_s0 + $0x7f4] ss:$8 sps:$4 sm:$0xff]   ;;  %v6280_v10 = vmax.f32 %v4949_v37, %v5315_v58  ;;  %v4424_v37 = vld [vmem:[%s6178_s0 + $0x3f0] ss:$8 sps:$4 sm:$0xff]  }
 0x212   :  { %v2208_v48 = vpop.f32.mrb[138].mxu0  ;;  %v5710_v33 = vpop.f32.mrb[138].mxu1 }
 0x213   :  { %v5721_v7 = vmax.f32 %v6278_v46, %v2208_v48  ;;  %v2210_v30 = vpop.f32.mrb[139].mxu0  ;;  %v2722_v47 = vpop.f32.mrb[139].mxu1 }
 0x215   :  { %2420 = vmatmul.mubr.bf16.gmra.mrb[244].mxu0 %v4412_v13  ;;  %2932 = vmatmul.mubr.bf16.gmra.mrb[244].mxu1 %v4415_v1  ;;  %v4421_v13 = vld [vmem:[%s6178_s0 + $0x7e0] ss:$8 sps:$4 sm:$0xff]  }
 0x216   :  { %3783 = vmatprep.mubr.msk.bf16.mxu0 %vm1510_vm0, %v4416_v23  ;;  %3847 = vmatprep.mubr.msk.bf16.mxu1 %vm1510_vm0, %v4419_v19  ;;  %v4422_v23 = vld [vmem:[%s6178_s0 + $0x3f4] ss:$8 sps:$4 sm:$0xff]  }
 0x218   :  { %v2213_v59 = vpop.f32.mrb[140].mxu0  ;;  %v5725_v12 = vpop.f32.mrb[140].mxu1 }
 0x219   :  { %v5730_v62 = vmax.f32 %v6279_v8, %v2213_v59  ;;  %v2215_v5 = vpop.f32.mrb[141].mxu0  ;;  %v2727_v6 = vpop.f32.mrb[141].mxu1  ;;  %v6281_v8 = vmax.f32 %v4961_v43, %v5329_v44 }
 0x21a   :  { %v2216_v1 = vpop.f32.mrb[142].mxu0  ;;  %v5738_v48 = vpop.f32.mrb[142].mxu1 }
 0x21b   :  { %v5749_v19 = vmax.f32 %v6280_v10, %v2216_v1  ;;  %v2218_v46 = vpop.f32.mrb[143].mxu0  ;;  %v2730_v30 = vpop.f32.mrb[143].mxu1 }
 0x21c   :  { %v6284_v30 = vmax.f32 %v4983_v55, %v5355_v28  ;;  %v6286_v55 = vmax.f32 %v5005_v9, %v5381_v56  ;;  %v6288_v9 = vmax.f32 %v5027_v27, %v5407_v0  ;;  %v6290_v27 = vmax.f32 %v5049_v45, %v5433_v32 }
 0x21d   :  { %2428 = vmatmul.mubr.bf16.gmra.mrb[248].mxu0 %v4418_v25  ;;  %2940 = vmatmul.mubr.bf16.gmra.mrb[248].mxu1 %v4421_v13  ;;  %v4427_v25 = vld [vmem:[%s6178_s0 + $0x7f0] ss:$8 sps:$4 sm:$0xff]   ;;  %v6292_v45 = vmax.f32 %v5071_v3, %v5459_v26 }
 0x21e   :  { %3784 = vmatprep.mubr.msk.bf16.mxu0 %vm1510_vm0, %v4422_v23  ;;  %3848 = vmatprep.mubr.msk.bf16.mxu1 %vm1510_vm0, %v4425_v31  ;;  %v6283_v23 = vmax.f32 %v4971_v49, %v5341_v54  ;;  %v6285_v49 = vmax.f32 %v4993_v63, %v5367_v18  ;;  %v6287_v63 = vmax.f32 %v5015_v17, %v5393_v50 }
 0x21f   :  { %v6289_v17 = vmax.f32 %v5037_v35, %v5419_v38  ;;  %v6291_v35 = vmax.f32 %v5059_v53, %v5445_v42  ;;  %v6293_v53 = vmax.f32 %v5081_v15, %v5471_v36  ;;  %v6298_v15 = vmax.f32 %v5103_v41, %v5497_v34 }
 0x220   :  { %v2221_v47 = vpop.f32.mrb[144].mxu0  ;;  %v5753_v59 = vpop.f32.mrb[144].mxu1  ;;  %v6304_v41 = vmax.f32 %v5125_v11, %v5523_v14  ;;  %v6310_v11 = vmax.f32 %v5147_v51, %v5549_v61  ;;  %v6317_v51 = vmax.f32 %v5169_v40, %v5575_v2 }
 0x221   :  { %v5758_v5 = vmax.f32 %v6281_v8, %v2221_v47  ;;  %v2223_v6 = vpop.f32.mrb[145].mxu0  ;;  %v2735_v58 = vpop.f32.mrb[145].mxu1 }
 0x222   :  { %v2224_v13 = vpop.f32.mrb[146].mxu0  ;;  %v5766_v1 = vpop.f32.mrb[146].mxu1 }
 0x223   :  { %6282 = vst [vmem:[#allocation81_spill] sm:$0xff] %v5766_v1  ;;  %v5771_v31 = vmax.f32 %v6283_v23, %v2224_v13  ;;  %v2226_v43 = vpop.f32.mrb[147].mxu0  ;;  %v2738_v44 = vpop.f32.mrb[147].mxu1 }
 0x225   :  { %2436 = vmatmul.mubr.bf16.gmra.mrb[252].mxu0 %v4424_v37  ;;  %2948 = vmatmul.mubr.bf16.gmra.mrb[252].mxu1 %v4427_v25 }
 0x228   :  { %v2229_v10 = vpop.f32.mrb[148].mxu0  ;;  %v5773_v46 = vpop.f32.mrb[148].mxu1 }
 0x229   :  { %v5778_v47 = vmax.f32 %v6284_v30, %v2229_v10  ;;  %v2231_v8 = vpop.f32.mrb[149].mxu0  ;;  %v2743_v6 = vpop.f32.mrb[149].mxu1 }
 0x22a   :  { %v2232_v58 = vpop.f32.mrb[150].mxu0  ;;  %v5780_v1 = vpop.f32.mrb[150].mxu1 }
 0x22b   :  { %v5785_v54 = vmax.f32 %v6285_v49, %v2232_v58  ;;  %v2234_v37 = vpop.f32.mrb[151].mxu0  ;;  %v2746_v25 = vpop.f32.mrb[151].mxu1 }
 0x230   :  { %v2237_v13 = vpop.f32.mrb[152].mxu0  ;;  %v5787_v23 = vpop.f32.mrb[152].mxu1 }
 0x231   :  { %v5792_v28 = vmax.f32 %v6286_v55, %v2237_v13  ;;  %v2239_v43 = vpop.f32.mrb[153].mxu0  ;;  %v2751_v44 = vpop.f32.mrb[153].mxu1 }
 0x232   :  { %v2240_v10 = vpop.f32.mrb[154].mxu0  ;;  %v5794_v30 = vpop.f32.mrb[154].mxu1 }
 0x233   :  { %v5799_v18 = vmax.f32 %v6287_v63, %v2240_v10  ;;  %v2242_v8 = vpop.f32.mrb[155].mxu0  ;;  %v2754_v6 = vpop.f32.mrb[155].mxu1 }
 0x238   :  { %v2245_v58 = vpop.f32.mrb[156].mxu0  ;;  %v5801_v49 = vpop.f32.mrb[156].mxu1 }
 0x239   :  { %v5806_v56 = vmax.f32 %v6288_v9, %v2245_v58  ;;  %v2247_v37 = vpop.f32.mrb[157].mxu0  ;;  %v2759_v25 = vpop.f32.mrb[157].mxu1 }
 0x23a   :  { %v2248_v13 = vpop.f32.mrb[158].mxu0  ;;  %v5808_v55 = vpop.f32.mrb[158].mxu1 }
 0x23b   :  { %v5813_v50 = vmax.f32 %v6289_v17, %v2248_v13  ;;  %v2250_v43 = vpop.f32.mrb[159].mxu0  ;;  %v2762_v44 = vpop.f32.mrb[159].mxu1 }
 0x240   :  { %v2253_v10 = vpop.f32.mrb[160].mxu0  ;;  %v5815_v63 = vpop.f32.mrb[160].mxu1 }
 0x241   :  { %v5820_v0 = vmax.f32 %v6290_v27, %v2253_v10  ;;  %v2255_v8 = vpop.f32.mrb[161].mxu0  ;;  %v2767_v6 = vpop.f32.mrb[161].mxu1 }
 0x242   :  { %v2256_v58 = vpop.f32.mrb[162].mxu0  ;;  %v5822_v9 = vpop.f32.mrb[162].mxu1 }
 0x243   :  { %v5827_v38 = vmax.f32 %v6291_v35, %v2256_v58  ;;  %v2258_v37 = vpop.f32.mrb[163].mxu0  ;;  %v2770_v25 = vpop.f32.mrb[163].mxu1 }
 0x244   :  { %v6295_v37 = vld [vmem:[#allocation59_spill] sm:$0xff] }
 0x245   :  { %v6296_v3 = vmax.f32 %v5093_v29, %v6295_v37 }
 0x248   :  { %v2261_v13 = vpop.f32.mrb[164].mxu0  ;;  %v5829_v17 = vpop.f32.mrb[164].mxu1 }
 0x249   :  { %v5834_v32 = vmax.f32 %v6292_v45, %v2261_v13  ;;  %v2263_v43 = vpop.f32.mrb[165].mxu0  ;;  %v2775_v44 = vpop.f32.mrb[165].mxu1 }
 0x24a   :  { %v2264_v10 = vpop.f32.mrb[166].mxu0  ;;  %v5836_v27 = vpop.f32.mrb[166].mxu1 }
 0x24b   :  { %v5841_v42 = vmax.f32 %v6293_v53, %v2264_v10  ;;  %v2266_v8 = vpop.f32.mrb[167].mxu0  ;;  %v2778_v6 = vpop.f32.mrb[167].mxu1 }
 0x24c   :  { %v6300_v6 = vld [vmem:[#allocation24_spill] sm:$0xff] }
 0x250   :  { %v2269_v58 = vpop.f32.mrb[168].mxu0  ;;  %v5843_v35 = vpop.f32.mrb[168].mxu1 }
 0x251   :  { %6294 = vst [vmem:[#allocation82_spill] sm:$0xff] %v5843_v35  ;;  %v5848_v26 = vmax.f32 %v6296_v3, %v2269_v58  ;;  %v2271_v25 = vpop.f32.mrb[169].mxu0  ;;  %v2783_v13 = vpop.f32.mrb[169].mxu1  ;;  %v6301_v35 = vld [vmem:[#allocation62_spill] sm:$0xff] }
 0x252   :  { %v2272_v45 = vpop.f32.mrb[170].mxu0  ;;  %v5850_v43 = vpop.f32.mrb[170].mxu1  ;;  %v6302_v29 = vmax.f32 %v6300_v6, %v6301_v35 }
 0x253   :  { %6297 = vst [vmem:[#allocation59_spill] sm:$0xff] %v5850_v43  ;;  %v5855_v36 = vmax.f32 %v6298_v15, %v2272_v45  ;;  %v2274_v44 = vpop.f32.mrb[171].mxu0  ;;  %v2786_v10 = vpop.f32.mrb[171].mxu1  ;;  %v6307_v43 = vld [vmem:[#allocation65_spill] sm:$0xff] }
 0x258   :  { %v2277_v53 = vpop.f32.mrb[172].mxu0  ;;  %v5857_v8 = vpop.f32.mrb[172].mxu1 }
 0x259   :  { %6299 = vst [vmem:[#allocation83_spill] sm:$0xff] %v5857_v8  ;;  %v5862_v58 = vmax.f32 %v6302_v29, %v2277_v53  ;;  %v2279_v37 = vpop.f32.mrb[173].mxu0  ;;  %v2791_v3 = vpop.f32.mrb[173].mxu1  ;;  %v6306_v8 = vld [vmem:[#allocation27_spill] sm:$0xff] }
 0x25a   :  { %v2280_v25 = vpop.f32.mrb[174].mxu0  ;;  %v5864_v13 = vpop.f32.mrb[174].mxu1  ;;  %v6308_v35 = vmax.f32 %v6306_v8, %v6307_v43 }
 0x25b   :  { %6303 = vst [vmem:[#allocation24_spill] sm:$0xff] %v5864_v13  ;;  %v5869_v34 = vmax.f32 %v6304_v41, %v2280_v25  ;;  %v2282_v45 = vpop.f32.mrb[175].mxu0  ;;  %v2794_v15 = vpop.f32.mrb[175].mxu1  ;;  %v6313_v13 = vld [vmem:[#allocation68_spill] sm:$0xff] }
 0x260   :  { %v2285_v44 = vpop.f32.mrb[176].mxu0  ;;  %v5871_v10 = vpop.f32.mrb[176].mxu1 }
 0x261   :  { %6305 = vst [vmem:[#allocation62_spill] sm:$0xff] %v5871_v10  ;;  %v5876_v53 = vmax.f32 %v6308_v35, %v2285_v44  ;;  %v2287_v6 = vpop.f32.mrb[177].mxu0  ;;  %v2799_v29 = vpop.f32.mrb[177].mxu1  ;;  %v6312_v10 = vld [vmem:[#allocation30_spill] sm:$0xff] }
 0x262   :  { %v2288_v37 = vpop.f32.mrb[178].mxu0  ;;  %v5878_v3 = vpop.f32.mrb[178].mxu1  ;;  %v6314_v43 = vmax.f32 %v6312_v10, %v6313_v13 }
 0x263   :  { %6309 = vst [vmem:[#allocation27_spill] sm:$0xff] %v5878_v3  ;;  %v5883_v14 = vmax.f32 %v6310_v11, %v2288_v37  ;;  %v2290_v25 = vpop.f32.mrb[179].mxu0  ;;  %v2802_v41 = vpop.f32.mrb[179].mxu1  ;;  %v6321_v3 = vld [vmem:[#allocation71_spill] sm:$0xff] }
 0x268   :  { %v2293_v45 = vpop.f32.mrb[180].mxu0  ;;  %v5885_v15 = vpop.f32.mrb[180].mxu1 }
 0x269   :  { %6311 = vst [vmem:[#allocation65_spill] sm:$0xff] %v5885_v15  ;;  %v5890_v8 = vmax.f32 %v6314_v43, %v2293_v45  ;;  %v2295_v44 = vpop.f32.mrb[181].mxu0  ;;  %v2807_v35 = vpop.f32.mrb[181].mxu1  ;;  %v6320_v15 = vld [vmem:[#allocation33_spill] sm:$0xff] }
 0x26a   :  { %v2296_v6 = vpop.f32.mrb[182].mxu0  ;;  %v5892_v29 = vpop.f32.mrb[182].mxu1  ;;  %v6322_v13 = vmax.f32 %v6320_v15, %v6321_v3 }
 0x26b   :  { %6315 = vst [vmem:[#allocation30_spill] sm:$0xff] %v5890_v8  ;;  %6316 = vst [vmem:[#allocation68_spill] sm:$0xff] %v5892_v29  ;;  %v5897_v61 = vmax.f32 %v6317_v51, %v2296_v6  ;;  %v2298_v37 = vpop.f32.mrb[183].mxu0  ;;  %v2810_v11 = vpop.f32.mrb[183].mxu1  ;;  %v6325_v29 = vld [vmem:[#allocation73_spill] sm:$0xff] }
 0x26c   :  { %v6326_v40 = vmax.f32 %v5191_v24, %v6325_v29  ;;  %v6334_v24 = vmax.f32 %v5213_v22, %v5627_v57  ;;  %v6339_v57 = vld [vmem:[#allocation39_spill] sm:$0xff] }
 0x26d   :  { %6318 = vst [vmem:[#allocation84_spill] sm:$0xff] %v5897_v61  ;;  %v6330_v61 = vld [vmem:[#allocation75_spill] sm:$0xff] }
 0x270   :  { %v2301_v25 = vpop.f32.mrb[184].mxu0  ;;  %v5899_v41 = vpop.f32.mrb[184].mxu1 }
 0x271   :  { %6319 = vst [vmem:[#allocation85_spill] sm:$0xff] %v5899_v41  ;;  %v5904_v10 = vmax.f32 %v6322_v13, %v2301_v25  ;;  %v2303_v45 = vpop.f32.mrb[185].mxu0  ;;  %v2815_v43 = vpop.f32.mrb[185].mxu1  ;;  %v6329_v41 = vld [vmem:[#allocation36_spill] sm:$0xff] }
 0x272   :  { %v2304_v44 = vpop.f32.mrb[186].mxu0  ;;  %v5906_v35 = vpop.f32.mrb[186].mxu1  ;;  %v6331_v3 = vmax.f32 %v6329_v41, %v6330_v61 }
 0x273   :  { %6323 = vst [vmem:[#allocation33_spill] sm:$0xff] %v5904_v10  ;;  %6324 = vst [vmem:[#allocation71_spill] sm:$0xff] %v5906_v35  ;;  %v5911_v2 = vmax.f32 %v6326_v40, %v2304_v44  ;;  %v2306_v6 = vpop.f32.mrb[187].mxu0  ;;  %v2818_v51 = vpop.f32.mrb[187].mxu1  ;;  %v6338_v10 = vld [vmem:[#allocation3_spill] sm:$0xff] }
 0x275   :  { %6327 = vst [vmem:[#allocation73_spill] sm:$0xff] %v5911_v2 }
 0x278   :  { %v2309_v37 = vpop.f32.mrb[188].mxu0  ;;  %v5913_v11 = vpop.f32.mrb[188].mxu1 }
 0x279   :  { %6328 = vst [vmem:[#allocation86_spill] sm:$0xff] %v5913_v11  ;;  %v5918_v15 = vmax.f32 %v6331_v3, %v2309_v37  ;;  %v2311_v25 = vpop.f32.mrb[189].mxu0  ;;  %v2823_v13 = vpop.f32.mrb[189].mxu1  ;;  %v6336_v11 = vld [vmem:[#allocation79_spill] sm:$0xff]  ;;  %v6337_v3 = vld [vmem:[#allocation2_spill] sm:$0xff] }
 0x27a   :  { %v2312_v45 = vpop.f32.mrb[190].mxu0  ;;  %v5920_v43 = vpop.f32.mrb[190].mxu1 }
 0x27b   :  { %6332 = vst [vmem:[#allocation36_spill] sm:$0xff] %v5918_v15  ;;  %6333 = vst [vmem:[#allocation75_spill] sm:$0xff] %v5920_v43  ;;  %v5925_v29 = vmax.f32 %v6334_v24, %v2312_v45  ;;  %v2314_v44 = vpop.f32.mrb[191].mxu0  ;;  %v2826_v40 = vpop.f32.mrb[191].mxu1  ;;  %v6340_v24 = vld [vmem:[#allocation78_spill] sm:$0xff] }
 0x27c   :  { %v6341_v40 = vld [vmem:[#allocation40_spill] sm:$0xff] }
 0x27d   :  { %6335 = vst [vmem:[#allocation87_spill] sm:$0xff] %v5925_v29 }
 0x280   :  { %v2317_v6 = vpop.f32.mrb[192].mxu0  ;;  %v2829_v51 = vpop.f32.mrb[192].mxu1 }
 0x281   :  { %v3020_v35 = vmax.f32 %v6336_v11, %v2317_v6  ;;  %v2319_v2 = vpop.f32.mrb[193].mxu0  ;;  %v2831_v61 = vpop.f32.mrb[193].mxu1 }
 0x282   :  { %v2320_v41 = vpop.f32.mrb[194].mxu0  ;;  %v2832_v37 = vpop.f32.mrb[194].mxu1  ;;  %v5937_v2 = vld [vmem:[%s6179_s2] ss:$0 sm:$0xff]  ;;  %v6342_v61 = vld [vmem:[#allocation80_spill] sm:$0xff] }
 0x283   :  { %v3052_v25 = vmax.f32 %v3020_v35, %v6337_v3  ;;  %v3021_v13 = vmax.f32 %v5665_v20, %v2320_v41  ;;  %v2322_v43 = vpop.f32.mrb[195].mxu0  ;;  %v2834_v15 = vpop.f32.mrb[195].mxu1  ;;  %v5944_v41 = vld [vmem:[%s6180_s3] ss:$0 sm:$0xff] }
 0x285   :  { %v3053_v22 = vmax.f32 %v3021_v13, %v6338_v10  ;;  %v3084_v45 = vmax.f32 %v3052_v25, %v6339_v57  ;;  %v6343_v57 = vld [vmem:[#allocation4_spill] sm:$0xff] }
 0x287   :  { %v3116_v44 = vmax.f32 %v3084_v45, %v6340_v24  ;;  %v3085_v29 = vmax.f32 %v3053_v22, %v6341_v40  ;;  %v6344_v40 = vld [vmem:[#allocation5_spill] sm:$0xff] }
 0x288   :  { %v2325_v11 = vpop.f32.mrb[196].mxu0  ;;  %v2837_v6 = vpop.f32.mrb[196].mxu1 }
 0x289   :  { %v3148_v35 = vmax.f32 %v3116_v44, %v2829_v51  ;;  %v3117_v20 = vmax.f32 %v3085_v29, %v6342_v61  ;;  %v3022_v15 = vmax.f32 %v5674_v4, %v2325_v11  ;;  %v2327_v43 = vpop.f32.mrb[197].mxu0  ;;  %v2839_v10 = vpop.f32.mrb[197].mxu1  ;;  %v6345_v61 = vld [vmem:[#allocation41_spill] sm:$0xff] }
 0x28a   :  { %v2328_v3 = vpop.f32.mrb[198].mxu0  ;;  %v2840_v25 = vpop.f32.mrb[198].mxu1 }
 0x28b   :  { %v3187_v13 = vmul.f32 %v5937_v2, %v3148_v35  ;;  %v3149_v22 = vmax.f32 %v3117_v20, %v2832_v37  ;;  %v3054_v45 = vmax.f32 %v3022_v15, %v6343_v57  ;;  %v3023_v51 = vmax.f32 %v5693_v52, %v2328_v3  ;;  %v2330_v24 = vpop.f32.mrb[199].mxu0  ;;  %v2842_v29 = vpop.f32.mrb[199].mxu1  ;;  %v6346_v35 = vld [vmem:[#allocation42_spill] sm:$0xff] }
 0x28d   :  { %v3226_v4 = vadd.f32 %v5944_v41, %v3187_v13  ;;  %v3188_v44 = vmul.f32 %v5937_v2, %v3149_v22  ;;  %v3055_v11 = vmax.f32 %v3023_v51, %v6344_v40  ;;  %v3086_v43 = vmax.f32 %v3054_v45, %v6345_v61 }
 0x28f   :  { %v3227_v10 = vadd.f32 %v5944_v41, %v3188_v44  ;;  %v3118_v8 = vmax.f32 %v3086_v43, %v5669_v21  ;;  %v3087_v37 = vmax.f32 %v3055_v11, %v6346_v35  ;;  %v3258_v20 = vmax.f32 %v3226_v4, 0.0  ;;  %v6347_v21 = vld [vmem:[#allocation6_spill] sm:$0xff] }
 0x290   :  { %v2333_v15 = vpop.f32.mrb[200].mxu0  ;;  %v2845_v57 = vpop.f32.mrb[200].mxu1 }
 0x291   :  { %v3259_v52 = vmax.f32 %v3227_v10, 0.0  ;;  %v3150_v3 = vmax.f32 %v3118_v8, %v2837_v6  ;;  %v3119_v24 = vmax.f32 %v3087_v37, %v5682_v39  ;;  %v3024_v13 = vmax.f32 %v5702_v60, %v2333_v15  ;;  %v2335_v22 = vpop.f32.mrb[201].mxu0  ;;  %v2847_v29 = vpop.f32.mrb[201].mxu1  ;;  %v6348_v8 = vld [vmem:[#allocation43_spill] sm:$0xff]  ;;  %v6350_v15 = vld [vmem:[#allocation44_spill] sm:$0xff] }
 0x292   :  { %v2336_v51 = vpop.f32.mrb[202].mxu0  ;;  %v2848_v40 = vpop.f32.mrb[202].mxu1  ;;  %v6349_v10 = vld [vmem:[#allocation7_spill] sm:$0xff] }
 0x293   :  { %v3918_v45 = vpack.c.bf16 %v3259_v52, %v3258_v20  ;;  %v3189_v44 = vmul.f32 %v5937_v2, %v3150_v3  ;;  %v3151_v61 = vmax.f32 %v3119_v24, %v2840_v25  ;;  %v3056_v43 = vmax.f32 %v3024_v13, %v6347_v21  ;;  %v2338_v11 = vpop.f32.mrb[203].mxu0  ;;  %v2850_v4 = vpop.f32.mrb[203].mxu1 }
 0x294   :  { %v3025_v35 = vmax.f32 %v5721_v7, %v2336_v51  ;;  %v6351_v4 = vld [vmem:[#allocation8_spill] sm:$0xff] }
 0x295   :  { %3919 = vst [vmem:[%s6181_s4] sm:$0xff] %v3918_v45   ;;  %v3228_v39 = vadd.f32 %v5944_v41, %v3189_v44  ;;  %v3190_v60 = vmul.f32 %v5937_v2, %v3151_v61  ;;  %v3088_v6 = vmax.f32 %v3056_v43, %v6348_v8 }
 0x296   :  { %v3057_v37 = vmax.f32 %v3025_v35, %v6349_v10 }
 0x297   :  { %v3229_v25 = vadd.f32 %v5944_v41, %v3190_v60  ;;  %v3120_v20 = vmax.f32 %v3088_v6, %v5697_v16  ;;  %v3260_v24 = vmax.f32 %v3228_v39, 0.0  ;;  %v6353_v6 = vld [vmem:[#allocation45_spill] sm:$0xff] }
 0x298   :  { %v3089_v52 = vmax.f32 %v3057_v37, %v6350_v15  ;;  %v2341_v3 = vpop.f32.mrb[204].mxu0  ;;  %v2853_v7 = vpop.f32.mrb[204].mxu1 }
 0x299   :  { %v3261_v13 = vmax.f32 %v3229_v25, 0.0  ;;  %v3152_v22 = vmax.f32 %v3120_v20, %v2845_v57  ;;  %v3026_v29 = vmax.f32 %v5730_v62, %v2341_v3  ;;  %v2343_v51 = vpop.f32.mrb[205].mxu0  ;;  %v2855_v45 = vpop.f32.mrb[205].mxu1  ;;  %v6352_v62 = vld [vmem:[#allocation9_spill] sm:$0xff]  ;;  %v6354_v20 = vld [vmem:[#allocation46_spill] sm:$0xff] }
 0x29a   :  { %v3121_v44 = vmax.f32 %v3089_v52, %v5710_v33  ;;  %v2344_v61 = vpop.f32.mrb[206].mxu0  ;;  %v2856_v21 = vpop.f32.mrb[206].mxu1 }
 0x29b   :  { %v3923_v43 = vpack.c.bf16 %v3261_v13, %v3260_v24  ;;  %v3191_v11 = vmul.f32 %v5937_v2, %v3152_v22  ;;  %v3058_v16 = vmax.f32 %v3026_v29, %v6351_v4  ;;  %v3027_v35 = vmax.f32 %v5749_v19, %v2344_v61  ;;  %v2346_v60 = vpop.f32.mrb[207].mxu0  ;;  %v2858_v8 = vpop.f32.mrb[207].mxu1 }
 0x29c   :  { %v3153_v39 = vmax.f32 %v3121_v44, %v2848_v40  ;;  %v6356_v8 = vld [vmem:[#allocation11_spill] sm:$0xff] }
 0x29d   :  { %3995 = vst [vmem:[%s6181_s4 + $0x8] sm:$0xff] %v3923_v43   ;;  %v3059_v57 = vmax.f32 %v3027_v35, %v6352_v62  ;;  %v3090_v33 = vmax.f32 %v3058_v16, %v6353_v6  ;;  %v3230_v10 = vadd.f32 %v5944_v41, %v3191_v11  ;;  %v6355_v11 = vld [vmem:[#allocation10_spill] sm:$0xff]  ;;  %v6357_v62 = vld [vmem:[#allocation47_spill] sm:$0xff] }
 0x29e   :  { %v3192_v37 = vmul.f32 %v5937_v2, %v3153_v39 }
 0x29f   :  { %v3122_v25 = vmax.f32 %v3090_v33, %v5725_v12  ;;  %v3091_v15 = vmax.f32 %v3059_v57, %v6354_v20  ;;  %v3262_v51 = vmax.f32 %v3230_v10, 0.0 }
 0x2a0   :  { %v3231_v19 = vadd.f32 %v5944_v41, %v3192_v37  ;;  %v2349_v52 = vpop.f32.mrb[208].mxu0  ;;  %v2861_v40 = vpop.f32.mrb[208].mxu1 }
 0x2a1   :  { %v3154_v3 = vmax.f32 %v3122_v25, %v2853_v7  ;;  %v3123_v24 = vmax.f32 %v3091_v15, %v5738_v48  ;;  %v3028_v13 = vmax.f32 %v5758_v5, %v2349_v52  ;;  %v2351_v22 = vpop.f32.mrb[209].mxu0  ;;  %v2863_v29 = vpop.f32.mrb[209].mxu1 }
 0x2a2   :  { %v3263_v45 = vmax.f32 %v3231_v19, 0.0  ;;  %v2352_v44 = vpop.f32.mrb[210].mxu0  ;;  %v2864_v61 = vpop.f32.mrb[210].mxu1  ;;  %v6359_v19 = vld [vmem:[#allocation81_spill] sm:$0xff] }
 0x2a3   :  { %v3193_v43 = vmul.f32 %v5937_v2, %v3154_v3  ;;  %v3155_v12 = vmax.f32 %v3123_v24, %v2856_v21  ;;  %v3060_v4 = vmax.f32 %v3028_v13, %v6355_v11  ;;  %v3029_v16 = vmax.f32 %v5771_v31, %v2352_v44  ;;  %v2354_v35 = vpop.f32.mrb[211].mxu0  ;;  %v2866_v60 = vpop.f32.mrb[211].mxu1  ;;  %v6358_v31 = vld [vmem:[#allocation48_spill] sm:$0xff] }
 0x2a4   :  { %v3928_v7 = vpack.c.bf16 %v3263_v45, %v3262_v51  ;;  %v6362_v60 = vld [vmem:[#allocation13_spill] sm:$0xff] }
 0x2a5   :  { %v3232_v48 = vadd.f32 %v5944_v41, %v3193_v43  ;;  %v3194_v5 = vmul.f32 %v5937_v2, %v3155_v12  ;;  %v3061_v39 = vmax.f32 %v3029_v16, %v6356_v8  ;;  %v3092_v57 = vmax.f32 %v3060_v4, %v6357_v62  ;;  %v6361_v16 = vld [vmem:[#allocation49_spill] sm:$0xff] }
 0x2a6   :  { %3996 = vst [vmem:[%s6181_s4 + $0x10] sm:$0xff] %v3928_v7  }
 0x2a7   :  { %v3233_v21 = vadd.f32 %v5944_v41, %v3194_v5  ;;  %v3124_v6 = vmax.f32 %v3092_v57, %v5753_v59  ;;  %v3093_v33 = vmax.f32 %v3061_v39, %v6358_v31  ;;  %v3264_v10 = vmax.f32 %v3232_v48, 0.0  ;;  %v6360_v59 = vld [vmem:[#allocation12_spill] sm:$0xff]  ;;  %v6363_v5 = vld [vmem:[#allocation50_spill] sm:$0xff] }
 0x2a8   :  { %v2357_v37 = vpop.f32.mrb[212].mxu0  ;;  %v2869_v25 = vpop.f32.mrb[212].mxu1 }
 0x2a9   :  { %v3265_v20 = vmax.f32 %v3233_v21, 0.0  ;;  %v3156_v15 = vmax.f32 %v3124_v6, %v2861_v40  ;;  %v3125_v52 = vmax.f32 %v3093_v33, %v6359_v19  ;;  %v3030_v3 = vmax.f32 %v5778_v47, %v2357_v37  ;;  %v2359_v24 = vpop.f32.mrb[213].mxu0  ;;  %v2871_v13 = vpop.f32.mrb[213].mxu1 }
 0x2aa   :  { %v2360_v22 = vpop.f32.mrb[214].mxu0  ;;  %v2872_v29 = vpop.f32.mrb[214].mxu1 }
 0x2ab   :  { %v3933_v51 = vpack.c.bf16 %v3265_v20, %v3264_v10  ;;  %v3195_v45 = vmul.f32 %v5937_v2, %v3156_v15  ;;  %v3157_v44 = vmax.f32 %v3125_v52, %v2864_v61  ;;  %v3062_v43 = vmax.f32 %v3030_v3, %v6360_v59  ;;  %v2362_v12 = vpop.f32.mrb[215].mxu0  ;;  %v2874_v11 = vpop.f32.mrb[215].mxu1  ;;  %v6364_v52 = vld [vmem:[#allocation14_spill] sm:$0xff] }
 0x2ac   :  { %v3031_v4 = vmax.f32 %v5785_v54, %v2360_v22 }
 0x2ad   :  { %3997 = vst [vmem:[%s6181_s4 + $0x18] sm:$0xff] %v3933_v51   ;;  %v3234_v47 = vadd.f32 %v5944_v41, %v3195_v45  ;;  %v3196_v40 = vmul.f32 %v5937_v2, %v3157_v44  ;;  %v3094_v35 = vmax.f32 %v3062_v43, %v6361_v16  ;;  %v6366_v51 = vld [vmem:[#allocation51_spill] sm:$0xff]  ;;  %v6367_v43 = vld [vmem:[#allocation52_spill] sm:$0xff] }
 0x2ae   :  { %v3063_v7 = vmax.f32 %v3031_v4, %v6362_v60 }
 0x2af   :  { %v3235_v61 = vadd.f32 %v5944_v41, %v3196_v40  ;;  %v3126_v48 = vmax.f32 %v3094_v35, %v5773_v46  ;;  %v3266_v62 = vmax.f32 %v3234_v47, 0.0 }
 0x2b0   :  { %v3095_v8 = vmax.f32 %v3063_v7, %v6363_v5  ;;  %v2365_v39 = vpop.f32.mrb[216].mxu0  ;;  %v2877_v54 = vpop.f32.mrb[216].mxu1 }
 0x2b1   :  { %v3267_v57 = vmax.f32 %v3235_v61, 0.0  ;;  %v3158_v21 = vmax.f32 %v3126_v48, %v2869_v25  ;;  %v3032_v6 = vmax.f32 %v5792_v28, %v2365_v39  ;;  %v2367_v31 = vpop.f32.mrb[217].mxu0  ;;  %v2879_v33 = vpop.f32.mrb[217].mxu1  ;;  %v6365_v28 = vld [vmem:[#allocation15_spill] sm:$0xff] }
 0x2b2   :  { %v3127_v10 = vmax.f32 %v3095_v8, %v5780_v1  ;;  %v2368_v37 = vpop.f32.mrb[218].mxu0  ;;  %v2880_v20 = vpop.f32.mrb[218].mxu1  ;;  %v6368_v8 = vld [vmem:[#allocation16_spill] sm:$0xff]  ;;  %v6370_v33 = vld [vmem:[#allocation53_spill] sm:$0xff] }
 0x2b3   :  { %v3938_v15 = vpack.c.bf16 %v3267_v57, %v3266_v62  ;;  %v3197_v19 = vmul.f32 %v5937_v2, %v3158_v21  ;;  %v3064_v46 = vmax.f32 %v3032_v6, %v6364_v52  ;;  %v3033_v3 = vmax.f32 %v5799_v18, %v2368_v37  ;;  %v2370_v24 = vpop.f32.mrb[219].mxu0  ;;  %v2882_v13 = vpop.f32.mrb[219].mxu1  ;;  %v6369_v6 = vld [vmem:[#allocation17_spill] sm:$0xff] }
 0x2b4   :  { %v3159_v22 = vmax.f32 %v3127_v10, %v2872_v29 }
 0x2b5   :  { %3998 = vst [vmem:[%s6181_s4 + $0x20] sm:$0xff] %v3938_v15   ;;  %v3065_v25 = vmax.f32 %v3033_v3, %v6365_v28  ;;  %v3096_v1 = vmax.f32 %v3064_v46, %v6366_v51  ;;  %v3236_v45 = vadd.f32 %v5944_v41, %v3197_v19 }
 0x2b6   :  { %v3198_v44 = vmul.f32 %v5937_v2, %v3159_v22 }
 0x2b7   :  { %v3128_v59 = vmax.f32 %v3096_v1, %v5787_v23  ;;  %v3097_v12 = vmax.f32 %v3065_v25, %v6367_v43  ;;  %v3268_v60 = vmax.f32 %v3236_v45, 0.0 }
 0x2b8   :  { %v3237_v18 = vadd.f32 %v5944_v41, %v3198_v44  ;;  %v2373_v11 = vpop.f32.mrb[220].mxu0  ;;  %v2885_v29 = vpop.f32.mrb[220].mxu1 }
 0x2b9   :  { %v3160_v4 = vmax.f32 %v3128_v59, %v2877_v54  ;;  %v3129_v47 = vmax.f32 %v3097_v12, %v5794_v30  ;;  %v3034_v40 = vmax.f32 %v5806_v56, %v2373_v11  ;;  %v2375_v16 = vpop.f32.mrb[221].mxu0  ;;  %v2887_v35 = vpop.f32.mrb[221].mxu1 }
 0x2ba   :  { %v3269_v7 = vmax.f32 %v3237_v18, 0.0  ;;  %v2376_v61 = vpop.f32.mrb[222].mxu0  ;;  %v2888_v48 = vpop.f32.mrb[222].mxu1 }
 0x2bb   :  { %v3199_v5 = vmul.f32 %v5937_v2, %v3160_v4  ;;  %v3161_v23 = vmax.f32 %v3129_v47, %v2880_v20  ;;  %v3066_v39 = vmax.f32 %v3034_v40, %v6368_v8  ;;  %v3035_v62 = vmax.f32 %v5813_v50, %v2376_v61  ;;  %v2378_v57 = vpop.f32.mrb[223].mxu0  ;;  %v2890_v21 = vpop.f32.mrb[223].mxu1  ;;  %v6371_v50 = vld [vmem:[#allocation54_spill] sm:$0xff]  ;;  %v6374_v47 = vld [vmem:[#allocation19_spill] sm:$0xff] }
 0x2bc   :  { %v3943_v54 = vpack.c.bf16 %v3269_v7, %v3268_v60  ;;  %v6375_v60 = vld [vmem:[#allocation56_spill] sm:$0xff] }
 0x2bd   :  { %v3238_v30 = vadd.f32 %v5944_v41, %v3199_v5  ;;  %v3200_v56 = vmul.f32 %v5937_v2, %v3161_v23  ;;  %v3067_v31 = vmax.f32 %v3035_v62, %v6369_v6  ;;  %v3098_v10 = vmax.f32 %v3066_v39, %v6370_v33  ;;  %v6376_v6 = vld [vmem:[#allocation20_spill] sm:$0xff] }
 0x2be   :  { %3999 = vst [vmem:[%s6181_s4 + $0x28] sm:$0xff] %v3943_v54  }
 0x2bf   :  { %v3239_v37 = vadd.f32 %v5944_v41, %v3200_v56  ;;  %v3130_v20 = vmax.f32 %v3098_v10, %v5801_v49  ;;  %v3099_v15 = vmax.f32 %v3067_v31, %v6371_v50  ;;  %v3270_v19 = vmax.f32 %v3238_v30, 0.0  ;;  %v6372_v49 = vld [vmem:[#allocation18_spill] sm:$0xff]  ;;  %v6378_v50 = vld [vmem:[#allocation57_spill] sm:$0xff] }
 0x2c0   :  { %v2381_v52 = vpop.f32.mrb[224].mxu0  ;;  %v2893_v46 = vpop.f32.mrb[224].mxu1 }
 0x2c1   :  { %v3271_v3 = vmax.f32 %v3239_v37, 0.0  ;;  %v3162_v24 = vmax.f32 %v3130_v20, %v2885_v29  ;;  %v3131_v13 = vmax.f32 %v3099_v15, %v5808_v55  ;;  %v3036_v22 = vmax.f32 %v5820_v0, %v2381_v52  ;;  %v2383_v28 = vpop.f32.mrb[225].mxu0  ;;  %v2895_v25 = vpop.f32.mrb[225].mxu1  ;;  %v6373_v29 = vld [vmem:[#allocation55_spill] sm:$0xff] }
 0x2c2   :  { %v2384_v51 = vpop.f32.mrb[226].mxu0  ;;  %v2896_v1 = vpop.f32.mrb[226].mxu1 }
 0x2c3   :  { %v3948_v45 = vpack.c.bf16 %v3271_v3, %v3270_v19  ;;  %v3201_v44 = vmul.f32 %v5937_v2, %v3162_v24  ;;  %v3163_v59 = vmax.f32 %v3131_v13, %v2888_v48  ;;  %v3068_v43 = vmax.f32 %v3036_v22, %v6372_v49  ;;  %v2386_v12 = vpop.f32.mrb[227].mxu0  ;;  %v2898_v18 = vpop.f32.mrb[227].mxu1 }
 0x2c4   :  { %v3037_v11 = vmax.f32 %v5827_v38, %v2384_v51  ;;  %v6380_v12 = vld [vmem:[#allocation22_spill] sm:$0xff] }
 0x2c5   :  { %4000 = vst [vmem:[%s6181_s4 + $0x30] sm:$0xff] %v3948_v45   ;;  %v3240_v55 = vadd.f32 %v5944_v41, %v3201_v44  ;;  %v3202_v0 = vmul.f32 %v5937_v2, %v3163_v59  ;;  %v3100_v4 = vmax.f32 %v3068_v43, %v6373_v29 }
 0x2c6   :  { %v3069_v40 = vmax.f32 %v3037_v11, %v6374_v47 }
 0x2c7   :  { %v3241_v16 = vadd.f32 %v5944_v41, %v3202_v0  ;;  %v3132_v35 = vmax.f32 %v3100_v4, %v5815_v63  ;;  %v3272_v48 = vmax.f32 %v3240_v55, 0.0  ;;  %v6381_v4 = vld [vmem:[#allocation23_spill] sm:$0xff] }
 0x2c8   :  { %v3101_v7 = vmax.f32 %v3069_v40, %v6375_v60  ;;  %v2389_v61 = vpop.f32.mrb[228].mxu0  ;;  %v2901_v38 = vpop.f32.mrb[228].mxu1  ;;  %v6382_v40 = vld [vmem:[#allocation60_spill] sm:$0xff]  ;;  %v6383_v60 = vld [vmem:[#allocation82_spill] sm:$0xff] }
 0x2c9   :  { %v3273_v5 = vmax.f32 %v3241_v16, 0.0  ;;  %v3164_v23 = vmax.f32 %v3132_v35, %v2893_v46  ;;  %v3038_v8 = vmax.f32 %v5834_v32, %v2389_v61  ;;  %v2391_v39 = vpop.f32.mrb[229].mxu0  ;;  %v2903_v62 = vpop.f32.mrb[229].mxu1  ;;  %v6377_v32 = vld [vmem:[#allocation21_spill] sm:$0xff]  ;;  %v6379_v46 = vld [vmem:[#allocation58_spill] sm:$0xff] }
 0x2ca   :  { %v3133_v57 = vmax.f32 %v3101_v7, %v5822_v9  ;;  %v2392_v21 = vpop.f32.mrb[230].mxu0  ;;  %v2904_v54 = vpop.f32.mrb[230].mxu1  ;;  %v6385_v39 = vld [vmem:[#allocation59_spill] sm:$0xff] }
 0x2cb   :  { %v3953_v30 = vpack.c.bf16 %v3273_v5, %v3272_v48  ;;  %v3203_v56 = vmul.f32 %v5937_v2, %v3164_v23  ;;  %v3070_v63 = vmax.f32 %v3038_v8, %v6376_v6  ;;  %v3039_v31 = vmax.f32 %v5841_v42, %v2392_v21  ;;  %v2394_v33 = vpop.f32.mrb[231].mxu0  ;;  %v2906_v10 = vpop.f32.mrb[231].mxu1 }
 0x2cc   :  { %v3165_v37 = vmax.f32 %v3133_v57, %v2896_v1  ;;  %v6386_v33 = vld [vmem:[#allocation25_spill] sm:$0xff] }
 0x2cd   :  { %4001 = vst [vmem:[%s6181_s4 + $0x38] sm:$0xff] %v3953_v30   ;;  %v3071_v20 = vmax.f32 %v3039_v31, %v6377_v32  ;;  %v3102_v9 = vmax.f32 %v3070_v63, %v6378_v50  ;;  %v3242_v15 = vadd.f32 %v5944_v41, %v3203_v56 }
 0x2ce   :  { %v3204_v19 = vmul.f32 %v5937_v2, %v3165_v37 }
 0x2cf   :  { %v3134_v52 = vmax.f32 %v3102_v9, %v5829_v17  ;;  %v3103_v3 = vmax.f32 %v3071_v20, %v6379_v46  ;;  %v3274_v45 = vmax.f32 %v3242_v15, 0.0  ;;  %v6387_v9 = vld [vmem:[#allocation63_spill] sm:$0xff] }
 0x2d0   :  { %v3243_v42 = vadd.f32 %v5944_v41, %v3204_v19  ;;  %v2397_v24 = vpop.f32.mrb[232].mxu0  ;;  %v2909_v13 = vpop.f32.mrb[232].mxu1  ;;  %v6388_v19 = vld [vmem:[#allocation26_spill] sm:$0xff] }
 0x2d1   :  { %v3166_v22 = vmax.f32 %v3134_v52, %v2901_v38  ;;  %v3135_v28 = vmax.f32 %v3103_v3, %v5836_v27  ;;  %v3040_v25 = vmax.f32 %v5848_v26, %v2397_v24  ;;  %v2399_v51 = vpop.f32.mrb[233].mxu0  ;;  %v2911_v1 = vpop.f32.mrb[233].mxu1  ;;  %v6389_v3 = vld [vmem:[#allocation83_spill] sm:$0xff]  ;;  %v6390_v24 = vld [vmem:[#allocation64_spill] sm:$0xff] }
 0x2d2   :  { %v3275_v44 = vmax.f32 %v3243_v42, 0.0  ;;  %v2400_v59 = vpop.f32.mrb[234].mxu0  ;;  %v2912_v49 = vpop.f32.mrb[234].mxu1 }
 0x2d3   :  { %v3205_v43 = vmul.f32 %v5937_v2, %v3166_v22  ;;  %v3167_v17 = vmax.f32 %v3135_v28, %v2904_v54  ;;  %v3072_v18 = vmax.f32 %v3040_v25, %v6380_v12  ;;  %v3041_v11 = vmax.f32 %v5855_v36, %v2400_v59  ;;  %v2402_v55 = vpop.f32.mrb[235].mxu0  ;;  %v2914_v0 = vpop.f32.mrb[235].mxu1  ;;  %v6384_v36 = vld [vmem:[#allocation61_spill] sm:$0xff]  ;;  %v6391_v59 = vld [vmem:[#allocation24_spill] sm:$0xff] }
 0x2d4   :  { %v3958_v29 = vpack.c.bf16 %v3275_v44, %v3274_v45 }
 0x2d5   :  { %v3244_v27 = vadd.f32 %v5944_v41, %v3205_v43  ;;  %v3206_v26 = vmul.f32 %v5937_v2, %v3167_v17  ;;  %v3073_v47 = vmax.f32 %v3041_v11, %v6381_v4  ;;  %v3104_v16 = vmax.f32 %v3072_v18, %v6382_v40  ;;  %v6392_v11 = vld [vmem:[#allocation28_spill] sm:$0xff] }
 0x2d6   :  { %4002 = vst [vmem:[%s6181_s4 + $0x40] sm:$0xff] %v3958_v29  }
 0x2d7   :  { %v3245_v35 = vadd.f32 %v5944_v41, %v3206_v26  ;;  %v3136_v7 = vmax.f32 %v3104_v16, %v6383_v60  ;;  %v3105_v61 = vmax.f32 %v3073_v47, %v6384_v36  ;;  %v3276_v38 = vmax.f32 %v3244_v27, 0.0  ;;  %v6394_v47 = vld [vmem:[#allocation66_spill] sm:$0xff]  ;;  %v6396_v36 = vld [vmem:[#allocation67_spill] sm:$0xff] }
 0x2d8   :  { %v2405_v48 = vpop.f32.mrb[236].mxu0  ;;  %v2917_v5 = vpop.f32.mrb[236].mxu1  ;;  %v6395_v60 = vld [vmem:[#allocation62_spill] sm:$0xff] }
 0x2d9   :  { %v3277_v23 = vmax.f32 %v3245_v35, 0.0  ;;  %v3168_v8 = vmax.f32 %v3136_v7, %v2909_v13  ;;  %v3137_v62 = vmax.f32 %v3105_v61, %v6385_v39  ;;  %v3042_v57 = vmax.f32 %v5862_v58, %v2405_v48  ;;  %v2407_v21 = vpop.f32.mrb[237].mxu0  ;;  %v2919_v54 = vpop.f32.mrb[237].mxu1  ;;  %v6398_v39 = vld [vmem:[#allocation30_spill] sm:$0xff] }
 0x2da   :  { %v2408_v30 = vpop.f32.mrb[238].mxu0  ;;  %v2920_v56 = vpop.f32.mrb[238].mxu1 }
 0x2db   :  { %v3963_v6 = vpack.c.bf16 %v3277_v23, %v3276_v38  ;;  %v3207_v63 = vmul.f32 %v5937_v2, %v3168_v8  ;;  %v3169_v31 = vmax.f32 %v3137_v62, %v2912_v49  ;;  %v3074_v10 = vmax.f32 %v3042_v57, %v6386_v33  ;;  %v2410_v37 = vpop.f32.mrb[239].mxu0  ;;  %v2922_v32 = vpop.f32.mrb[239].mxu1  ;;  %v6397_v23 = vld [vmem:[#allocation27_spill] sm:$0xff] }
 0x2dc   :  { %v3043_v20 = vmax.f32 %v5869_v34, %v2408_v30  ;;  %v6399_v33 = vld [vmem:[#allocation31_spill] sm:$0xff]  ;;  %v6400_v37 = vld [vmem:[#allocation84_spill] sm:$0xff] }
 0x2dd   :  { %4003 = vst [vmem:[%s6181_s4 + $0x48] sm:$0xff] %v3963_v6   ;;  %v3246_v58 = vadd.f32 %v5944_v41, %v3207_v63  ;;  %v3208_v50 = vmul.f32 %v5937_v2, %v3169_v31  ;;  %v3106_v15 = vmax.f32 %v3074_v10, %v6387_v9 }
 0x2de   :  { %v3075_v52 = vmax.f32 %v3043_v20, %v6388_v19  ;;  %v6401_v19 = vld [vmem:[#allocation32_spill] sm:$0xff] }
 0x2df   :  { %v3247_v46 = vadd.f32 %v5944_v41, %v3208_v50  ;;  %v3138_v42 = vmax.f32 %v3106_v15, %v6389_v3  ;;  %v3278_v28 = vmax.f32 %v3246_v58, 0.0 }
 0x2e0   :  { %v3107_v13 = vmax.f32 %v3075_v52, %v6390_v24  ;;  %v2413_v22 = vpop.f32.mrb[240].mxu0  ;;  %v2925_v34 = vpop.f32.mrb[240].mxu1  ;;  %v6403_v24 = vld [vmem:[#allocation65_spill] sm:$0xff] }
 0x2e1   :  { %v3279_v25 = vmax.f32 %v3247_v46, 0.0  ;;  %v3170_v51 = vmax.f32 %v3138_v42, %v2917_v5  ;;  %v3044_v1 = vmax.f32 %v5876_v53, %v2413_v22  ;;  %v2415_v45 = vpop.f32.mrb[241].mxu0  ;;  %v2927_v44 = vpop.f32.mrb[241].mxu1  ;;  %v6393_v53 = vld [vmem:[#allocation29_spill] sm:$0xff]  ;;  %v6404_v22 = vld [vmem:[#allocation70_spill] sm:$0xff] }
 0x2e2   :  { %v3139_v49 = vmax.f32 %v3107_v13, %v6391_v59  ;;  %v2416_v43 = vpop.f32.mrb[242].mxu0  ;;  %v2928_v17 = vpop.f32.mrb[242].mxu1  ;;  %v6402_v46 = vld [vmem:[#allocation69_spill] sm:$0xff]  ;;  %v6405_v44 = vld [vmem:[#allocation68_spill] sm:$0xff] }
 0x2e3   :  { %v3968_v12 = vpack.c.bf16 %v3279_v25, %v3278_v28  ;;  %v3209_v18 = vmul.f32 %v5937_v2, %v3170_v51  ;;  %v3076_v55 = vmax.f32 %v3044_v1, %v6392_v11  ;;  %v3045_v0 = vmax.f32 %v5883_v14, %v2416_v43  ;;  %v2418_v29 = vpop.f32.mrb[243].mxu0  ;;  %v2930_v27 = vpop.f32.mrb[243].mxu1 }
 0x2e4   :  { %v3171_v26 = vmax.f32 %v3139_v49, %v2920_v56  ;;  %v6406_v49 = vld [vmem:[#allocation33_spill] sm:$0xff]  ;;  %v6407_v27 = vld [vmem:[#allocation34_spill] sm:$0xff] }
 0x2e5   :  { %4004 = vst [vmem:[%s6181_s4 + $0x50] sm:$0xff] %v3968_v12   ;;  %v3077_v4 = vmax.f32 %v3045_v0, %v6393_v53  ;;  %v3108_v40 = vmax.f32 %v3076_v55, %v6394_v47  ;;  %v3248_v16 = vadd.f32 %v5944_v41, %v3209_v18  ;;  %v6408_v47 = vld [vmem:[#allocation73_spill] sm:$0xff] }
 0x2e6   :  { %v3210_v35 = vmul.f32 %v5937_v2, %v3171_v26 }
 0x2e7   :  { %v3140_v7 = vmax.f32 %v3108_v40, %v6395_v60  ;;  %v3109_v61 = vmax.f32 %v3077_v4, %v6396_v36  ;;  %v3280_v54 = vmax.f32 %v3248_v16, 0.0  ;;  %v6409_v60 = vld [vmem:[#allocation72_spill] sm:$0xff]  ;;  %v6410_v36 = vld [vmem:[#allocation35_spill] sm:$0xff] }
 0x2e8   :  { %v3249_v14 = vadd.f32 %v5944_v41, %v3210_v35  ;;  %v2421_v38 = vpop.f32.mrb[244].mxu0  ;;  %v2933_v48 = vpop.f32.mrb[244].mxu1 }
 0x2e9   :  { %v3172_v5 = vmax.f32 %v3140_v7, %v2925_v34  ;;  %v3141_v8 = vmax.f32 %v3109_v61, %v6397_v23  ;;  %v3046_v62 = vmax.f32 %v6398_v39, %v2421_v38  ;;  %v2423_v57 = vpop.f32.mrb[245].mxu0  ;;  %v2935_v21 = vpop.f32.mrb[245].mxu1  ;;  %v6411_v38 = vld [vmem:[#allocation85_spill] sm:$0xff] }
 0x2ea   :  { %v3281_v30 = vmax.f32 %v3249_v14, 0.0  ;;  %v2424_v56 = vpop.f32.mrb[246].mxu0  ;;  %v2936_v6 = vpop.f32.mrb[246].mxu1 }
 0x2eb   :  { %v3211_v63 = vmul.f32 %v5937_v2, %v3172_v5  ;;  %v3173_v31 = vmax.f32 %v3141_v8, %v2928_v17  ;;  %v3078_v10 = vmax.f32 %v3046_v62, %v6399_v33  ;;  %v3047_v32 = vmax.f32 %v6400_v37, %v2424_v56  ;;  %v2426_v20 = vpop.f32.mrb[247].mxu0  ;;  %v2938_v58 = vpop.f32.mrb[247].mxu1  ;;  %v6412_v5 = vld [vmem:[#allocation74_spill] sm:$0xff] }
 0x2ec   :  { %v3973_v50 = vpack.c.bf16 %v3281_v30, %v3280_v54  ;;  %v6413_v54 = vld [vmem:[#allocation36_spill] sm:$0xff]  ;;  %v6415_v20 = vld [vmem:[#allocation37_spill] sm:$0xff] }
 0x2ed   :  { %v3250_v9 = vadd.f32 %v5944_v41, %v3211_v63  ;;  %v3212_v15 = vmul.f32 %v5937_v2, %v3173_v31  ;;  %v3079_v52 = vmax.f32 %v3047_v32, %v6401_v19  ;;  %v3110_v3 = vmax.f32 %v3078_v10, %v6402_v46  ;;  %v6414_v63 = vld [vmem:[#allocation71_spill] sm:$0xff]  ;;  %v6417_v46 = vld [vmem:[#allocation38_spill] sm:$0xff] }
 0x2ee   :  { %4005 = vst [vmem:[%s6181_s4 + $0x58] sm:$0xff] %v3973_v50   ;;  %v6416_v50 = vld [vmem:[#allocation87_spill] sm:$0xff] }
 0x2ef   :  { %v3251_v42 = vadd.f32 %v5944_v41, %v3212_v15  ;;  %v3142_v13 = vmax.f32 %v3110_v3, %v6403_v24  ;;  %v3111_v34 = vmax.f32 %v3079_v52, %v6404_v22  ;;  %v3282_v28 = vmax.f32 %v3250_v9, 0.0 }
 0x2f0   :  { %v2429_v25 = vpop.f32.mrb[248].mxu0  ;;  %v2941_v51 = vpop.f32.mrb[248].mxu1 }
 0x2f1   :  { %v3283_v1 = vmax.f32 %v3251_v42, 0.0  ;;  %v3174_v45 = vmax.f32 %v3142_v13, %v2933_v48  ;;  %v3143_v59 = vmax.f32 %v3111_v34, %v6405_v44  ;;  %v3048_v43 = vmax.f32 %v6406_v49, %v2429_v25  ;;  %v2431_v17 = vpop.f32.mrb[249].mxu0  ;;  %v2943_v12 = vpop.f32.mrb[249].mxu1  ;;  %v6418_v42 = vld [vmem:[#allocation76_spill] sm:$0xff]  ;;  %v6419_v34 = vld [vmem:[#allocation86_spill] sm:$0xff]  ;;  %v6420_v25 = vld [vmem:[#allocation77_spill] sm:$0xff] }
 0x2f2   :  { %v2432_v18 = vpop.f32.mrb[250].mxu0  ;;  %v2944_v11 = vpop.f32.mrb[250].mxu1  ;;  %v6421_v44 = vld [vmem:[#allocation75_spill] sm:$0xff] }
 0x2f3   :  { %v3978_v55 = vpack.c.bf16 %v3283_v1, %v3282_v28  ;;  %v3213_v0 = vmul.f32 %v5937_v2, %v3174_v45  ;;  %v3175_v29 = vmax.f32 %v3143_v59, %v2936_v6  ;;  %v3080_v26 = vmax.f32 %v3048_v43, %v6407_v27  ;;  %v2434_v53 = vpop.f32.mrb[251].mxu0  ;;  %v2946_v4 = vpop.f32.mrb[251].mxu1 }
 0x2f4   :  { %v3049_v40 = vmax.f32 %v6408_v47, %v2432_v18 }
 0x2f5   :  { %4006 = vst [vmem:[%s6181_s4 + $0x60] sm:$0xff] %v3978_v55   ;;  %v3252_v16 = vadd.f32 %v5944_v41, %v3213_v0  ;;  %v3214_v35 = vmul.f32 %v5937_v2, %v3175_v29  ;;  %v3112_v7 = vmax.f32 %v3080_v26, %v6409_v60 }
 0x2f6   :  { %v3081_v61 = vmax.f32 %v3049_v40, %v6410_v36 }
 0x2f7   :  { %v3253_v14 = vadd.f32 %v5944_v41, %v3214_v35  ;;  %v3144_v48 = vmax.f32 %v3112_v7, %v6411_v38  ;;  %v3284_v62 = vmax.f32 %v3252_v16, 0.0 }
 0x2f8   :  { %v3113_v23 = vmax.f32 %v3081_v61, %v6412_v5  ;;  %v2437_v8 = vpop.f32.mrb[252].mxu0  ;;  %v2949_v39 = vpop.f32.mrb[252].mxu1 }
 0x2f9   :  { %v3285_v57 = vmax.f32 %v3253_v14, 0.0  ;;  %v3176_v21 = vmax.f32 %v3144_v48, %v2941_v51  ;;  %v3050_v30 = vmax.f32 %v6413_v54, %v2437_v8  ;;  %v2439_v56 = vpop.f32.mrb[253].mxu0  ;;  %v2951_v6 = vpop.f32.mrb[253].mxu1 }
 0x2fa   :  { %v3145_v31 = vmax.f32 %v3113_v23, %v6414_v63  ;;  %v2440_v33 = vpop.f32.mrb[254].mxu0  ;;  %v2952_v10 = vpop.f32.mrb[254].mxu1 }
 0x2fb   :  { %v3983_v37 = vpack.c.bf16 %v3285_v57, %v3284_v62  ;;  %v3215_v32 = vmul.f32 %v5937_v2, %v3176_v21  ;;  %v3082_v58 = vmax.f32 %v3050_v30, %v6415_v20  ;;  %v3051_v9 = vmax.f32 %v6416_v50, %v2440_v33  ;;  %v2442_v15 = vpop.f32.mrb[255].mxu0  ;;  %v2954_v19 = vpop.f32.mrb[255].mxu1 }
 0x2fc   :  { %v3177_v52 = vmax.f32 %v3145_v31, %v2944_v11 }
 0x2fd   :  { %4007 = vst [vmem:[%s6181_s4 + $0x68] sm:$0xff] %v3983_v37   ;;  %v3083_v3 = vmax.f32 %v3051_v9, %v6417_v46  ;;  %v3114_v24 = vmax.f32 %v3082_v58, %v6418_v42  ;;  %v3254_v13 = vadd.f32 %v5944_v41, %v3215_v32 }
 0x2fe   :  { %v3216_v22 = vmul.f32 %v5937_v2, %v3177_v52 }
 0x2ff   :  { %v3146_v28 = vmax.f32 %v3114_v24, %v6419_v34  ;;  %v3115_v51 = vmax.f32 %v3083_v3, %v6420_v25  ;;  %v3286_v49 = vmax.f32 %v3254_v13, 0.0 }
 0x300   :  { %v3255_v1 = vadd.f32 %v5944_v41, %v3216_v22 }
 0x301   :  { %v3178_v45 = vmax.f32 %v3146_v28, %v2949_v39  ;;  %v3147_v59 = vmax.f32 %v3115_v51, %v6421_v44 }
 0x302   :  { %v3287_v43 = vmax.f32 %v3255_v1, 0.0 }
 0x303   :  { %v3217_v17 = vmul.f32 %v5937_v2, %v3178_v45  ;;  %v3179_v12 = vmax.f32 %v3147_v59, %v2952_v10 }
 0x304   :  { %v3988_v18 = vpack.c.bf16 %v3287_v43, %v3286_v49 }
 0x305   :  { %v3256_v11 = vadd.f32 %v5944_v41, %v3217_v17  ;;  %v3218_v55 = vmul.f32 %v5937_v2, %v3179_v12 }
 0x306   :  { %4008 = vst [vmem:[%s6181_s4 + $0x70] sm:$0xff] %v3988_v18  }
 0x307   :  { %v3257_v0 = vadd.f32 %v5944_v41, %v3218_v55  ;;  %v3288_v29 = vmax.f32 %v3256_v11, 0.0 }
 0x309   :  { %v3289_v27 = vmax.f32 %v3257_v0, 0.0 }
 0x30b   :  { %v3993_v26 = vpack.c.bf16 %v3289_v27, %v3288_v29 }
 0x30d   :  { %4009 = vst [vmem:[%s6181_s4 + $0x78] sm:$0xff] %v3993_v26  }

// kernel: cavity_forward.7
= control target key start
LH: loop header
LB: loop body
LE: loop exit
PB: predicated region body
PF: predicated region fallthrough
CT: control target
= control target key end

     0   :  { %v1415_v0 = vmov 0   ;;  %vm602_vm0 = vcmask 392192   ;;  %s1753_s1 = inlined_call_operand.vmem [shape: bf16[432,128], index: 1, kind: input, shape index: {}]   ;;  %s1754_s0 = inlined_call_operand.vmem [shape: bf16[1,256,432], index: 0, kind: input, shape index: {}]   ;;  %s1755_s2 = inlined_call_operand.vmem [shape: f32[1,128], index: 2, kind: input, shape index: {}]   ;;  %s1756_s3 = inlined_call_operand.vmem [shape: f32[1,128], index: 3, kind: input, shape index: {}]   ;;  %s1757_s4 = inlined_call_operand.vmem [shape: bf16[32,128], index: 4, kind: output, shape index: {}]  }
   0x1   :  { %812 = vmatprep.subr.bf16.mxu1 %v1415_v0  ;;  %v1292_v1 = vld [vmem:[%s1753_s1 + $0x80] sm:$0xff]   ;;  %v1293_v2 = vld [vmem:[%s1753_s1 + $0x88] sm:$0xff]   ;;  %v1296_v5 = vld [vmem:[%s1753_s1 + $0x90] sm:$0xff]  }
   0x2   :  { %813 = vmatpush1.bf16.msra.mxu1 %v1292_v1  ;;  %v1294_v3 = vld [vmem:[%s1753_s1 + $0x40] sm:$0xff]   ;;  %v1297_v6 = vld [vmem:[%s1753_s1 + $0x48] sm:$0xff]   ;;  %v1300_v8 = vld [vmem:[%s1753_s1 + $0x50] sm:$0xff]  }
   0x3   :  { %814 = vmatprep.subr.bf16.mxu1 %v1415_v0  ;;  %v1295_v4 = vld [vmem:[%s1753_s1] sm:$0xff]   ;;  %1179 = vmatprep.subr.bf16.mxu0 %v1294_v3  ;;  %v1298_v7 = vld [vmem:[%s1753_s1 + $0x8] sm:$0xff]   ;;  %v1301_v9 = vld [vmem:[%s1753_s1 + $0x10] sm:$0xff]  }
   0x4   :  { %1180 = vmatpush3.bf16.msra.mxu0 %v1295_v4  ;;  %v1299_v10 = vld [vmem:[%s1753_s1 + $0x98] sm:$0xff]   ;;  %v1302_v12 = vld [vmem:[%s1753_s1 + $0xa0] sm:$0xff]   ;;  %v1305_v15 = vld [vmem:[%s1753_s1 + $0xa8] sm:$0xff]  }
   0x5   :  { %1181 = vmatprep.subr.bf16.mxu0 %v1297_v6  ;;  %v1303_v11 = vld [vmem:[%s1753_s1 + $0x58] sm:$0xff]   ;;  %v1306_v14 = vld [vmem:[%s1753_s1 + $0x60] sm:$0xff]   ;;  %v1309_v17 = vld [vmem:[%s1753_s1 + $0x68] sm:$0xff]  }
   0x6   :  { %815 = vmatpush1.bf16.msra.mxu1 %v1293_v2  ;;  %v1304_v13 = vld [vmem:[%s1753_s1 + $0x18] sm:$0xff]   ;;  %v1307_v16 = vld [vmem:[%s1753_s1 + $0x20] sm:$0xff]   ;;  %v1308_v18 = vld [vmem:[%s1753_s1 + $0xb0] sm:$0xff]  }
   0x7   :  { %816 = vmatprep.subr.bf16.mxu1 %v1415_v0  ;;  %v1310_v19 = vld [vmem:[%s1753_s1 + $0x28] sm:$0xff]   ;;  %v1312_v20 = vld [vmem:[%s1753_s1 + $0x70] sm:$0xff]   ;;  %v1311_v21 = vld [vmem:[%s1753_s1 + $0xb8] sm:$0xff]  }
   0x8   :  { %1182 = vmatpush3.bf16.msra.mxu0 %v1298_v7  ;;  %v1313_v22 = vld [vmem:[%s1753_s1 + $0x30] sm:$0xff]   ;;  %v1315_v23 = vld [vmem:[%s1753_s1 + $0x78] sm:$0xff]   ;;  %v1314_v27 = vld [vmem:[%s1753_s1 + $0xc0] sm:$0xff]  }
   0x9   :  { %1183 = vmatprep.subr.bf16.mxu0 %v1300_v8  ;;  %v1319_v24 = vld [vmem:[%s1754_s0 + $0x4] ss:$16 sps:$4 sm:$0xff]   ;;  %v1316_v25 = vld [vmem:[%s1753_s1 + $0x38] sm:$0xff]   ;;  %v1317_v28 = vld [vmem:[%s1754_s0] ss:$16 sps:$4 sm:$0xff]  }
   0xa   :  { %817 = vmatpush1.bf16.msra.mxu1 %v1296_v5  ;;  %683 = vmatprep.mubr.bf16.mxu0 %v1319_v24  ;;  %v1324_v26 = vld [vmem:[%s1754_s0 + $0xc] ss:$16 sps:$4 sm:$0xff]   ;;  %v1325_v29 = vld [vmem:[%s1754_s0 + $0x24] ss:$16 sps:$4 sm:$0xff]   ;;  %v1327_v32 = vld [vmem:[%s1754_s0 + $0x20] ss:$16 sps:$4 sm:$0xff]  }
   0xb   :  { %818 = vmatprep.subr.bf16.mxu1 %v1415_v0  ;;  %1142 = vmatprep.mubr.msk.bf16.mxu1 %vm602_vm0, %v1324_v26  ;;  %v1320_v30 = vld [vmem:[%s1753_s1 + $0xc8] sm:$0xff]   ;;  %v1321_v31 = vld [vmem:[%s1753_s1 + $0xd0] sm:$0xff]  }
   0xc   :  { %1184 = vmatpush3.bf16.msra.mxu0 %v1301_v9  ;;  %v1322_v33 = vld [vmem:[%s1754_s0 + $0x8] ss:$16 sps:$4 sm:$0xff]   ;;  %v1331_v34 = vld [vmem:[%s1754_s0 + $0x44] ss:$16 sps:$4 sm:$0xff]   ;;  %v1328_v35 = vld [vmem:[%s1754_s0 + $0x2c] ss:$16 sps:$4 sm:$0xff]  }
   0xd   :  { %1185 = vmatprep.subr.bf16.mxu0 %v1303_v11  ;;  %v1333_v36 = vld [vmem:[%s1754_s0 + $0x40] ss:$16 sps:$4 sm:$0xff]   ;;  %v1330_v37 = vld [vmem:[%s1754_s0 + $0x28] ss:$16 sps:$4 sm:$0xff]   ;;  %v1337_v38 = vld [vmem:[%s1754_s0 + $0x64] ss:$16 sps:$4 sm:$0xff]  }
   0xe   :  { %819 = vmatpush1.bf16.msra.mxu1 %v1299_v10  ;;  %v1334_v39 = vld [vmem:[%s1754_s0 + $0x4c] ss:$16 sps:$4 sm:$0xff]   ;;  %v1339_v40 = vld [vmem:[%s1754_s0 + $0x60] ss:$16 sps:$4 sm:$0xff]   ;;  %v1336_v41 = vld [vmem:[%s1754_s0 + $0x48] ss:$16 sps:$4 sm:$0xff]  }
   0xf   :  { %820 = vmatprep.subr.bf16.mxu1 %v1415_v0  ;;  %v1343_v42 = vld [vmem:[%s1754_s0 + $0x84] ss:$16 sps:$4 sm:$0xff]   ;;  %v1340_v43 = vld [vmem:[%s1754_s0 + $0x6c] ss:$16 sps:$4 sm:$0xff]   ;;  %v1345_v44 = vld [vmem:[%s1754_s0 + $0x80] ss:$16 sps:$4 sm:$0xff]  }
  0x10   :  { %1186 = vmatpush3.bf16.msra.mxu0 %v1304_v13  ;;  %v1342_v45 = vld [vmem:[%s1754_s0 + $0x68] ss:$16 sps:$4 sm:$0xff]   ;;  %v1349_v46 = vld [vmem:[%s1754_s0 + $0xa4] ss:$16 sps:$4 sm:$0xff]   ;;  %v1346_v47 = vld [vmem:[%s1754_s0 + $0x8c] ss:$16 sps:$4 sm:$0xff]  }
  0x11   :  { %1187 = vmatprep.subr.bf16.mxu0 %v1306_v14  ;;  %v1351_v48 = vld [vmem:[%s1754_s0 + $0xa0] ss:$16 sps:$4 sm:$0xff]   ;;  %v1348_v49 = vld [vmem:[%s1754_s0 + $0x88] ss:$16 sps:$4 sm:$0xff]   ;;  %v1355_v50 = vld [vmem:[%s1754_s0 + $0xc4] ss:$16 sps:$4 sm:$0xff]  }
  0x12   :  { %821 = vmatpush1.bf16.msra.mxu1 %v1302_v12  ;;  %v1352_v51 = vld [vmem:[%s1754_s0 + $0xac] ss:$16 sps:$4 sm:$0xff]   ;;  %v1357_v52 = vld [vmem:[%s1754_s0 + $0xc0] ss:$16 sps:$4 sm:$0xff]   ;;  %v1354_v53 = vld [vmem:[%s1754_s0 + $0xa8] ss:$16 sps:$4 sm:$0xff]  }
  0x13   :  { %822 = vmatprep.subr.bf16.mxu1 %v1415_v0  ;;  %v1361_v54 = vld [vmem:[%s1754_s0 + $0xe4] ss:$16 sps:$4 sm:$0xff]   ;;  %v1358_v55 = vld [vmem:[%s1754_s0 + $0xcc] ss:$16 sps:$4 sm:$0xff]   ;;  %v1363_v56 = vld [vmem:[%s1754_s0 + $0xe0] ss:$16 sps:$4 sm:$0xff]  }
  0x14   :  { %1188 = vmatpush3.bf16.msra.mxu0 %v1307_v16  ;;  %v1360_v57 = vld [vmem:[%s1754_s0 + $0xc8] ss:$16 sps:$4 sm:$0xff]   ;;  %v1367_v58 = vld [vmem:[%s1754_s0 + $0x104] ss:$16 sps:$4 sm:$0xff]   ;;  %v1364_v59 = vld [vmem:[%s1754_s0 + $0xec] ss:$16 sps:$4 sm:$0xff]  }
  0x15   :  { %1189 = vmatprep.subr.bf16.mxu0 %v1309_v17  ;;  %v1369_v60 = vld [vmem:[%s1754_s0 + $0x100] ss:$16 sps:$4 sm:$0xff]   ;;  %v1366_v61 = vld [vmem:[%s1754_s0 + $0xe8] ss:$16 sps:$4 sm:$0xff]   ;;  %v1373_v62 = vld [vmem:[%s1754_s0 + $0x124] ss:$16 sps:$4 sm:$0xff]  }
  0x16   :  { %823 = vmatpush1.bf16.msra.mxu1 %v1305_v15  ;;  %v1370_v63 = vld [vmem:[%s1754_s0 + $0x10c] ss:$16 sps:$4 sm:$0xff]   ;;  %v1372_v1 = vld [vmem:[%s1754_s0 + $0x108] ss:$16 sps:$4 sm:$0xff]   ;;  %v1379_v2 = vld [vmem:[%s1754_s0 + $0x144] ss:$16 sps:$4 sm:$0xff]  }
  0x17   :  { %824 = vmatprep.subr.bf16.mxu1 %v1415_v0  ;;  %v1376_v3 = vld [vmem:[%s1754_s0 + $0x12c] ss:$16 sps:$4 sm:$0xff]   ;;  %v1381_v4 = vld [vmem:[%s1754_s0 + $0x140] ss:$16 sps:$4 sm:$0xff]   ;;  %v1378_v5 = vld [vmem:[%s1754_s0 + $0x128] ss:$16 sps:$4 sm:$0xff]  }
  0x18   :  { %1190 = vmatpush3.bf16.msra.mxu0 %v1310_v19  ;;  %v1385_v6 = vld [vmem:[%s1754_s0 + $0x164] ss:$16 sps:$4 sm:$0xff]   ;;  %v1382_v7 = vld [vmem:[%s1754_s0 + $0x14c] ss:$16 sps:$4 sm:$0xff]   ;;  %v1387_v8 = vld [vmem:[%s1754_s0 + $0x160] ss:$16 sps:$4 sm:$0xff]  }
  0x19   :  { %1191 = vmatprep.subr.bf16.mxu0 %v1312_v20  ;;  %v1384_v9 = vld [vmem:[%s1754_s0 + $0x148] ss:$16 sps:$4 sm:$0xff]   ;;  %v1391_v10 = vld [vmem:[%s1754_s0 + $0x184] ss:$16 sps:$4 sm:$0xff]   ;;  %v1388_v11 = vld [vmem:[%s1754_s0 + $0x16c] ss:$16 sps:$4 sm:$0xff]  }
  0x1a   :  { %825 = vmatpush1.bf16.msra.mxu1 %v1308_v18  ;;  %v1393_v12 = vld [vmem:[%s1754_s0 + $0x180] ss:$16 sps:$4 sm:$0xff]   ;;  %v1390_v13 = vld [vmem:[%s1754_s0 + $0x168] ss:$16 sps:$4 sm:$0xff]   ;;  %v1397_v14 = vld [vmem:[%s1754_s0 + $0x1a4] ss:$16 sps:$4 sm:$0xff]  }
  0x1b   :  { %826 = vmatprep.subr.bf16.mxu1 %v1415_v0  ;;  %v1394_v15 = vld [vmem:[%s1754_s0 + $0x18c] ss:$16 sps:$4 sm:$0xff]   ;;  %v1399_v16 = vld [vmem:[%s1754_s0 + $0x1a0] ss:$16 sps:$4 sm:$0xff]   ;;  %v1396_v17 = vld [vmem:[%s1754_s0 + $0x188] ss:$16 sps:$4 sm:$0xff]  }
  0x1c   :  { %1192 = vmatpush3.bf16.msra.mxu0 %v1313_v22  ;;  %v1403_v18 = vld [vmem:[%s1754_s0 + $0x1c4] ss:$16 sps:$4 sm:$0xff]   ;;  %v1400_v19 = vld [vmem:[%s1754_s0 + $0x1ac] ss:$16 sps:$4 sm:$0xff]   ;;  %v1405_v20 = vld [vmem:[%s1754_s0 + $0x1c0] ss:$16 sps:$4 sm:$0xff]  }
  0x1d   :  { %1193 = vmatprep.subr.bf16.mxu0 %v1315_v23  ;;  %v1409_v22 = vld [vmem:[%s1754_s0 + $0x1e4] ss:$16 sps:$4 sm:$0xff]   ;;  %v1406_v23 = vld [vmem:[%s1754_s0 + $0x1cc] ss:$16 sps:$4 sm:$0xff]   ;;  %v1411_v24 = vld [vmem:[%s1754_s0 + $0x1e0] ss:$16 sps:$4 sm:$0xff]  }
  0x1e   :  { %827 = vmatpush1.bf16.msra.mxu1 %v1311_v21  ;;  %v1402_v21 = vld [vmem:[%s1754_s0 + $0x1a8] ss:$16 sps:$4 sm:$0xff]   ;;  %v1412_v26 = vld [vmem:[%s1754_s0 + $0x1ec] ss:$16 sps:$4 sm:$0xff]  }
  0x1f   :  { %828 = vmatprep.subr.bf16.mxu1 %v1415_v0 }
  0x20   :  { %1194 = vmatpush3.bf16.msra.mxu0 %v1316_v25  ;;  %v1408_v25 = vld [vmem:[%s1754_s0 + $0x1c8] ss:$16 sps:$4 sm:$0xff]  }
  0x22   :  { %829 = vmatpush1.bf16.msra.mxu1 %v1314_v27  ;;  %v1414_v27 = vld [vmem:[%s1754_s0 + $0x1e8] ss:$16 sps:$4 sm:$0xff]  }
  0x23   :  { %830 = vmatprep.subr.bf16.mxu1 %v1415_v0  ;;  %684 = vmatmul.mubr.bf16.vlgmr.msra.gmra.mrb[0].mxu0 %v1317_v28 }
  0x24   :  { %691 = vmatprep.mubr.bf16.mxu0 %v1325_v29 }
  0x26   :  { %831 = vmatpush1.bf16.msra.mxu1 %v1320_v30 }
  0x27   :  { %832 = vmatprep.subr.bf16.mxu1 %v1415_v0  ;;  %v1375_v0 = vld [vmem:[%s1754_s0 + $0x120] ss:$16 sps:$4 sm:$0xff]  }
  0x2a   :  { %833 = vmatpush1.bf16.msra.mxu1 %v1321_v31 }
  0x2b   :  { %692 = vmatmul.mubr.bf16.gmra.mrb[4].mxu0 %v1327_v32 }
  0x2c   :  { %699 = vmatprep.mubr.bf16.mxu0 %v1331_v34 }
  0x2d   :  { %845 = vmatmul.mubr.bf16.vlgmr.msra.gmra.mrb[0].mxu1 %v1322_v33 }
  0x2e   :  { %1143 = vmatprep.mubr.msk.bf16.mxu1 %vm602_vm0, %v1328_v35 }
  0x33   :  { %700 = vmatmul.mubr.bf16.gmra.mrb[8].mxu0 %v1333_v36 }
  0x34   :  { %707 = vmatprep.mubr.bf16.mxu0 %v1337_v38 }
  0x35   :  { %853 = vmatmul.mubr.bf16.gmra.mrb[4].mxu1 %v1330_v37 }
  0x36   :  { %1144 = vmatprep.mubr.msk.bf16.mxu1 %vm602_vm0, %v1334_v39 }
  0x3b   :  { %708 = vmatmul.mubr.bf16.gmra.mrb[12].mxu0 %v1339_v40 }
  0x3c   :  { %715 = vmatprep.mubr.bf16.mxu0 %v1343_v42 }
  0x3d   :  { %861 = vmatmul.mubr.bf16.gmra.mrb[8].mxu1 %v1336_v41 }
  0x3e   :  { %1145 = vmatprep.mubr.msk.bf16.mxu1 %vm602_vm0, %v1340_v43 }
  0x43   :  { %716 = vmatmul.mubr.bf16.gmra.mrb[16].mxu0 %v1345_v44 }
  0x44   :  { %723 = vmatprep.mubr.bf16.mxu0 %v1349_v46 }
  0x45   :  { %869 = vmatmul.mubr.bf16.gmra.mrb[12].mxu1 %v1342_v45 }
  0x46   :  { %1146 = vmatprep.mubr.msk.bf16.mxu1 %vm602_vm0, %v1346_v47 }
  0x4b   :  { %724 = vmatmul.mubr.bf16.gmra.mrb[20].mxu0 %v1351_v48 }
  0x4c   :  { %731 = vmatprep.mubr.bf16.mxu0 %v1355_v50 }
  0x4d   :  { %877 = vmatmul.mubr.bf16.gmra.mrb[16].mxu1 %v1348_v49 }
  0x4e   :  { %1147 = vmatprep.mubr.msk.bf16.mxu1 %vm602_vm0, %v1352_v51 }
  0x53   :  { %732 = vmatmul.mubr.bf16.gmra.mrb[24].mxu0 %v1357_v52 }
  0x54   :  { %739 = vmatprep.mubr.bf16.mxu0 %v1361_v54 }
  0x55   :  { %885 = vmatmul.mubr.bf16.gmra.mrb[20].mxu1 %v1354_v53 }
  0x56   :  { %1148 = vmatprep.mubr.msk.bf16.mxu1 %vm602_vm0, %v1358_v55 }
  0x5b   :  { %740 = vmatmul.mubr.bf16.gmra.mrb[28].mxu0 %v1363_v56 }
  0x5c   :  { %747 = vmatprep.mubr.bf16.mxu0 %v1367_v58 }
  0x5d   :  { %893 = vmatmul.mubr.bf16.gmra.mrb[24].mxu1 %v1360_v57 }
  0x5e   :  { %1149 = vmatprep.mubr.msk.bf16.mxu1 %vm602_vm0, %v1364_v59 }
  0x63   :  { %748 = vmatmul.mubr.bf16.gmra.mrb[32].mxu0 %v1369_v60 }
  0x64   :  { %755 = vmatprep.mubr.bf16.mxu0 %v1373_v62 }
  0x65   :  { %901 = vmatmul.mubr.bf16.gmra.mrb[28].mxu1 %v1366_v61 }
  0x66   :  { %1150 = vmatprep.mubr.msk.bf16.mxu1 %vm602_vm0, %v1370_v63 }
  0x6b   :  { %756 = vmatmul.mubr.bf16.gmra.mrb[36].mxu0 %v1375_v0 }
  0x6c   :  { %763 = vmatprep.mubr.bf16.mxu0 %v1379_v2 }
  0x6d   :  { %909 = vmatmul.mubr.bf16.gmra.mrb[32].mxu1 %v1372_v1 }
  0x6e   :  { %1151 = vmatprep.mubr.msk.bf16.mxu1 %vm602_vm0, %v1376_v3 }
  0x73   :  { %764 = vmatmul.mubr.bf16.gmra.mrb[40].mxu0 %v1381_v4 }
  0x74   :  { %771 = vmatprep.mubr.bf16.mxu0 %v1385_v6 }
  0x75   :  { %917 = vmatmul.mubr.bf16.gmra.mrb[36].mxu1 %v1378_v5 }
  0x76   :  { %1152 = vmatprep.mubr.msk.bf16.mxu1 %vm602_vm0, %v1382_v7 }
  0x7b   :  { %772 = vmatmul.mubr.bf16.gmra.mrb[44].mxu0 %v1387_v8 }
  0x7c   :  { %779 = vmatprep.mubr.bf16.mxu0 %v1391_v10 }
  0x7d   :  { %925 = vmatmul.mubr.bf16.gmra.mrb[40].mxu1 %v1384_v9 }
  0x7e   :  { %1153 = vmatprep.mubr.msk.bf16.mxu1 %vm602_vm0, %v1388_v11 }
  0x83   :  { %780 = vmatmul.mubr.bf16.gmra.mrb[48].mxu0 %v1393_v12 }
  0x84   :  { %787 = vmatprep.mubr.bf16.mxu0 %v1397_v14 }
  0x85   :  { %933 = vmatmul.mubr.bf16.gmra.mrb[44].mxu1 %v1390_v13 }
  0x86   :  { %1154 = vmatprep.mubr.msk.bf16.mxu1 %vm602_vm0, %v1394_v15 }
  0x8b   :  { %788 = vmatmul.mubr.bf16.gmra.mrb[52].mxu0 %v1399_v16 }
  0x8c   :  { %795 = vmatprep.mubr.bf16.mxu0 %v1403_v18 }
  0x8d   :  { %941 = vmatmul.mubr.bf16.gmra.mrb[48].mxu1 %v1396_v17 }
  0x8e   :  { %1155 = vmatprep.mubr.msk.bf16.mxu1 %vm602_vm0, %v1400_v19 }
  0x93   :  { %796 = vmatmul.mubr.bf16.gmra.mrb[56].mxu0 %v1405_v20 }
  0x94   :  { %803 = vmatprep.mubr.bf16.mxu0 %v1409_v22 }
  0x95   :  { %949 = vmatmul.mubr.bf16.gmra.mrb[52].mxu1 %v1402_v21 }
  0x96   :  { %1156 = vmatprep.mubr.msk.bf16.mxu1 %vm602_vm0, %v1406_v23 }
  0x9b   :  { %804 = vmatmul.mubr.bf16.gmra.mrb[60].mxu0 %v1411_v24 }
  0x9d   :  { %957 = vmatmul.mubr.bf16.gmra.mrb[56].mxu1 %v1408_v25 }
  0x9e   :  { %1157 = vmatprep.mubr.msk.bf16.mxu1 %vm602_vm0, %v1412_v26 }
  0xa5   :  { %965 = vmatmul.mubr.bf16.gmra.mrb[60].mxu1 %v1414_v27 }
  0xf6   :  { %v1195_v28 = vpop.f32.mrb[0].mxu0 }
  0xf7   :  { %v1196_v29 = vpop.f32.mrb[1].mxu0 }
  0xf8   :  { %v1197_v30 = vadd.f32 %v1196_v29, %v1195_v28  ;;  %v1198_v31 = vpop.f32.mrb[2].mxu0 }
  0xf9   :  { %v1199_v32 = vpop.f32.mrb[3].mxu0 }
  0xfa   :  { %v1200_v33 = vadd.f32 %v1199_v32, %v1198_v31 }
  0xfe   :  { %v1201_v34 = vpop.f32.mrb[4].mxu0 }
  0xff   :  { %v1202_v36 = vpop.f32.mrb[5].mxu0 }
 0x100   :  { %v846_v35 = vpop.f32.mrb[0].mxu1  ;;  %v1203_v39 = vadd.f32 %v1202_v36, %v1201_v34  ;;  %v1204_v40 = vpop.f32.mrb[6].mxu0 }
 0x101   :  { %v847_v37 = vadd.f32 %v1197_v30, %v846_v35  ;;  %v848_v38 = vpop.f32.mrb[1].mxu1  ;;  %v1205_v42 = vpop.f32.mrb[7].mxu0 }
 0x102   :  { %v849_v41 = vpop.f32.mrb[2].mxu1  ;;  %v1206_v45 = vadd.f32 %v1205_v42, %v1204_v40 }
 0x103   :  { %v850_v43 = vadd.f32 %v1200_v33, %v849_v41  ;;  %v851_v44 = vpop.f32.mrb[3].mxu1 }
 0x106   :  { %v1207_v46 = vpop.f32.mrb[8].mxu0 }
 0x107   :  { %v1208_v48 = vpop.f32.mrb[9].mxu0 }
 0x108   :  { %v854_v47 = vpop.f32.mrb[4].mxu1  ;;  %v1209_v51 = vadd.f32 %v1208_v48, %v1207_v46  ;;  %v1210_v52 = vpop.f32.mrb[10].mxu0 }
 0x109   :  { %v855_v49 = vadd.f32 %v1203_v39, %v854_v47  ;;  %v856_v50 = vpop.f32.mrb[5].mxu1  ;;  %v1211_v54 = vpop.f32.mrb[11].mxu0 }
 0x10a   :  { %v857_v53 = vpop.f32.mrb[6].mxu1  ;;  %v1212_v57 = vadd.f32 %v1211_v54, %v1210_v52 }
 0x10b   :  { %v858_v55 = vadd.f32 %v1206_v45, %v857_v53  ;;  %v859_v56 = vpop.f32.mrb[7].mxu1 }
 0x10e   :  { %v1213_v58 = vpop.f32.mrb[12].mxu0 }
 0x10f   :  { %v1214_v60 = vpop.f32.mrb[13].mxu0 }
 0x110   :  { %v862_v59 = vpop.f32.mrb[8].mxu1  ;;  %v1215_v63 = vadd.f32 %v1214_v60, %v1213_v58  ;;  %v1216_v0 = vpop.f32.mrb[14].mxu0 }
 0x111   :  { %v863_v61 = vadd.f32 %v1209_v51, %v862_v59  ;;  %v864_v62 = vpop.f32.mrb[9].mxu1  ;;  %v1217_v2 = vpop.f32.mrb[15].mxu0 }
 0x112   :  { %v865_v1 = vpop.f32.mrb[10].mxu1  ;;  %v1218_v6 = vadd.f32 %v1217_v2, %v1216_v0 }
 0x113   :  { %v973_v3 = vmax.f32 %v847_v37, %v863_v61  ;;  %v866_v4 = vadd.f32 %v1212_v57, %v865_v1  ;;  %v867_v5 = vpop.f32.mrb[11].mxu1 }
 0x115   :  { %v974_v7 = vmax.f32 %v850_v43, %v866_v4 }
 0x116   :  { %v1219_v8 = vpop.f32.mrb[16].mxu0 }
 0x117   :  { %v1220_v10 = vpop.f32.mrb[17].mxu0 }
 0x118   :  { %v870_v9 = vpop.f32.mrb[12].mxu1  ;;  %v1221_v13 = vadd.f32 %v1220_v10, %v1219_v8  ;;  %v1222_v14 = vpop.f32.mrb[18].mxu0 }
 0x119   :  { %v871_v11 = vadd.f32 %v1215_v63, %v870_v9  ;;  %v872_v12 = vpop.f32.mrb[13].mxu1  ;;  %v1223_v16 = vpop.f32.mrb[19].mxu0 }
 0x11a   :  { %v873_v15 = vpop.f32.mrb[14].mxu1  ;;  %v1224_v20 = vadd.f32 %v1223_v16, %v1222_v14 }
 0x11b   :  { %v975_v17 = vmax.f32 %v855_v49, %v871_v11  ;;  %v874_v18 = vadd.f32 %v1218_v6, %v873_v15  ;;  %v875_v19 = vpop.f32.mrb[15].mxu1 }
 0x11d   :  { %v976_v21 = vmax.f32 %v858_v55, %v874_v18 }
 0x11e   :  { %v1225_v22 = vpop.f32.mrb[20].mxu0 }
 0x11f   :  { %v1226_v24 = vpop.f32.mrb[21].mxu0 }
 0x120   :  { %v878_v23 = vpop.f32.mrb[16].mxu1  ;;  %v1227_v27 = vadd.f32 %v1226_v24, %v1225_v22  ;;  %v1228_v28 = vpop.f32.mrb[22].mxu0 }
 0x121   :  { %v879_v25 = vadd.f32 %v1221_v13, %v878_v23  ;;  %v880_v26 = vpop.f32.mrb[17].mxu1  ;;  %v1229_v30 = vpop.f32.mrb[23].mxu0 }
 0x122   :  { %v881_v29 = vpop.f32.mrb[18].mxu1  ;;  %v1230_v34 = vadd.f32 %v1229_v30, %v1228_v28 }
 0x123   :  { %v977_v31 = vmax.f32 %v973_v3, %v879_v25  ;;  %v882_v32 = vadd.f32 %v1224_v20, %v881_v29  ;;  %v883_v33 = vpop.f32.mrb[19].mxu1 }
 0x125   :  { %v978_v35 = vmax.f32 %v974_v7, %v882_v32 }
 0x126   :  { %v1231_v36 = vpop.f32.mrb[24].mxu0 }
 0x127   :  { %v1232_v38 = vpop.f32.mrb[25].mxu0 }
 0x128   :  { %v886_v37 = vpop.f32.mrb[20].mxu1  ;;  %v1233_v41 = vadd.f32 %v1232_v38, %v1231_v36  ;;  %v1234_v42 = vpop.f32.mrb[26].mxu0 }
 0x129   :  { %v887_v39 = vadd.f32 %v1227_v27, %v886_v37  ;;  %v888_v40 = vpop.f32.mrb[21].mxu1  ;;  %v1235_v44 = vpop.f32.mrb[27].mxu0 }
 0x12a   :  { %v889_v43 = vpop.f32.mrb[22].mxu1  ;;  %v1236_v48 = vadd.f32 %v1235_v44, %v1234_v42 }
 0x12b   :  { %v979_v45 = vmax.f32 %v975_v17, %v887_v39  ;;  %v890_v46 = vadd.f32 %v1230_v34, %v889_v43  ;;  %v891_v47 = vpop.f32.mrb[23].mxu1 }
 0x12d   :  { %v980_v49 = vmax.f32 %v976_v21, %v890_v46 }
 0x12e   :  { %v1237_v50 = vpop.f32.mrb[28].mxu0 }
 0x12f   :  { %v1238_v52 = vpop.f32.mrb[29].mxu0 }
 0x130   :  { %v894_v51 = vpop.f32.mrb[24].mxu1  ;;  %v1239_v55 = vadd.f32 %v1238_v52, %v1237_v50  ;;  %v1240_v56 = vpop.f32.mrb[30].mxu0 }
 0x131   :  { %v895_v53 = vadd.f32 %v1233_v41, %v894_v51  ;;  %v896_v54 = vpop.f32.mrb[25].mxu1  ;;  %v1241_v58 = vpop.f32.mrb[31].mxu0 }
 0x132   :  { %v897_v57 = vpop.f32.mrb[26].mxu1  ;;  %v1242_v62 = vadd.f32 %v1241_v58, %v1240_v56 }
 0x133   :  { %v981_v59 = vmax.f32 %v977_v31, %v895_v53  ;;  %v898_v60 = vadd.f32 %v1236_v48, %v897_v57  ;;  %v899_v61 = vpop.f32.mrb[27].mxu1 }
 0x135   :  { %v982_v63 = vmax.f32 %v978_v35, %v898_v60 }
 0x136   :  { %v1243_v0 = vpop.f32.mrb[32].mxu0 }
 0x137   :  { %v1244_v2 = vpop.f32.mrb[33].mxu0 }
 0x138   :  { %v902_v1 = vpop.f32.mrb[28].mxu1  ;;  %v1245_v5 = vadd.f32 %v1244_v2, %v1243_v0  ;;  %v1246_v6 = vpop.f32.mrb[34].mxu0 }
 0x139   :  { %v903_v3 = vadd.f32 %v1239_v55, %v902_v1  ;;  %v904_v4 = vpop.f32.mrb[29].mxu1  ;;  %v1247_v8 = vpop.f32.mrb[35].mxu0 }
 0x13a   :  { %v905_v7 = vpop.f32.mrb[30].mxu1  ;;  %v1248_v12 = vadd.f32 %v1247_v8, %v1246_v6 }
 0x13b   :  { %v983_v9 = vmax.f32 %v979_v45, %v903_v3  ;;  %v906_v10 = vadd.f32 %v1242_v62, %v905_v7  ;;  %v907_v11 = vpop.f32.mrb[31].mxu1 }
 0x13d   :  { %v984_v13 = vmax.f32 %v980_v49, %v906_v10 }
 0x13e   :  { %v1249_v14 = vpop.f32.mrb[36].mxu0 }
 0x13f   :  { %v1250_v16 = vpop.f32.mrb[37].mxu0 }
 0x140   :  { %v910_v15 = vpop.f32.mrb[32].mxu1  ;;  %v1251_v19 = vadd.f32 %v1250_v16, %v1249_v14  ;;  %v1252_v20 = vpop.f32.mrb[38].mxu0 }
 0x141   :  { %v911_v17 = vadd.f32 %v1245_v5, %v910_v15  ;;  %v912_v18 = vpop.f32.mrb[33].mxu1  ;;  %v1253_v22 = vpop.f32.mrb[39].mxu0 }
 0x142   :  { %v913_v21 = vpop.f32.mrb[34].mxu1  ;;  %v1254_v26 = vadd.f32 %v1253_v22, %v1252_v20 }
 0x143   :  { %v985_v23 = vmax.f32 %v981_v59, %v911_v17  ;;  %v914_v24 = vadd.f32 %v1248_v12, %v913_v21  ;;  %v915_v25 = vpop.f32.mrb[35].mxu1 }
 0x145   :  { %v986_v27 = vmax.f32 %v982_v63, %v914_v24 }
 0x146   :  { %v1255_v28 = vpop.f32.mrb[40].mxu0 }
 0x147   :  { %v1256_v30 = vpop.f32.mrb[41].mxu0 }
 0x148   :  { %v918_v29 = vpop.f32.mrb[36].mxu1  ;;  %v1257_v33 = vadd.f32 %v1256_v30, %v1255_v28  ;;  %v1258_v34 = vpop.f32.mrb[42].mxu0 }
 0x149   :  { %v919_v31 = vadd.f32 %v1251_v19, %v918_v29  ;;  %v920_v32 = vpop.f32.mrb[37].mxu1  ;;  %v1259_v36 = vpop.f32.mrb[43].mxu0 }
 0x14a   :  { %v921_v35 = vpop.f32.mrb[38].mxu1  ;;  %v1260_v40 = vadd.f32 %v1259_v36, %v1258_v34 }
 0x14b   :  { %v987_v37 = vmax.f32 %v983_v9, %v919_v31  ;;  %v922_v38 = vadd.f32 %v1254_v26, %v921_v35  ;;  %v923_v39 = vpop.f32.mrb[39].mxu1 }
 0x14d   :  { %v988_v41 = vmax.f32 %v984_v13, %v922_v38 }
 0x14e   :  { %v1261_v42 = vpop.f32.mrb[44].mxu0 }
 0x14f   :  { %v1262_v44 = vpop.f32.mrb[45].mxu0 }
 0x150   :  { %v926_v43 = vpop.f32.mrb[40].mxu1  ;;  %v1263_v47 = vadd.f32 %v1262_v44, %v1261_v42  ;;  %v1264_v48 = vpop.f32.mrb[46].mxu0 }
 0x151   :  { %v927_v45 = vadd.f32 %v1257_v33, %v926_v43  ;;  %v928_v46 = vpop.f32.mrb[41].mxu1  ;;  %v1265_v50 = vpop.f32.mrb[47].mxu0 }
 0x152   :  { %v929_v49 = vpop.f32.mrb[42].mxu1  ;;  %v1266_v54 = vadd.f32 %v1265_v50, %v1264_v48  ;;  %v1159_v48 = vld [vmem:[%s1756_s3] ss:$0 sm:$0xff] }
 0x153   :  { %v989_v51 = vmax.f32 %v985_v23, %v927_v45  ;;  %v930_v52 = vadd.f32 %v1260_v40, %v929_v49  ;;  %v931_v53 = vpop.f32.mrb[43].mxu1 }
 0x155   :  { %v990_v55 = vmax.f32 %v986_v27, %v930_v52 }
 0x156   :  { %v1267_v56 = vpop.f32.mrb[48].mxu0 }
 0x157   :  { %v1268_v58 = vpop.f32.mrb[49].mxu0 }
 0x158   :  { %v934_v57 = vpop.f32.mrb[44].mxu1  ;;  %v1269_v61 = vadd.f32 %v1268_v58, %v1267_v56  ;;  %v1270_v62 = vpop.f32.mrb[50].mxu0 }
 0x159   :  { %v935_v59 = vadd.f32 %v1263_v47, %v934_v57  ;;  %v936_v60 = vpop.f32.mrb[45].mxu1  ;;  %v1271_v0 = vpop.f32.mrb[51].mxu0 }
 0x15a   :  { %v937_v63 = vpop.f32.mrb[46].mxu1  ;;  %v1272_v4 = vadd.f32 %v1271_v0, %v1270_v62 }
 0x15b   :  { %v991_v1 = vmax.f32 %v987_v37, %v935_v59  ;;  %v938_v2 = vadd.f32 %v1266_v54, %v937_v63  ;;  %v939_v3 = vpop.f32.mrb[47].mxu1 }
 0x15d   :  { %v992_v5 = vmax.f32 %v988_v41, %v938_v2  ;;  %v1158_v41 = vld [vmem:[%s1755_s2] ss:$0 sm:$0xff] }
 0x15e   :  { %v1273_v6 = vpop.f32.mrb[52].mxu0 }
 0x15f   :  { %v1274_v8 = vpop.f32.mrb[53].mxu0 }
 0x160   :  { %v942_v7 = vpop.f32.mrb[48].mxu1  ;;  %v1275_v11 = vadd.f32 %v1274_v8, %v1273_v6  ;;  %v1276_v12 = vpop.f32.mrb[54].mxu0 }
 0x161   :  { %v943_v9 = vadd.f32 %v1269_v61, %v942_v7  ;;  %v944_v10 = vpop.f32.mrb[49].mxu1  ;;  %v1277_v14 = vpop.f32.mrb[55].mxu0 }
 0x162   :  { %v945_v13 = vpop.f32.mrb[50].mxu1  ;;  %v1278_v18 = vadd.f32 %v1277_v14, %v1276_v12 }
 0x163   :  { %v993_v15 = vmax.f32 %v989_v51, %v943_v9  ;;  %v946_v16 = vadd.f32 %v1272_v4, %v945_v13  ;;  %v947_v17 = vpop.f32.mrb[51].mxu1 }
 0x165   :  { %v994_v19 = vmax.f32 %v990_v55, %v946_v16 }
 0x166   :  { %v1279_v20 = vpop.f32.mrb[56].mxu0 }
 0x167   :  { %v1280_v22 = vpop.f32.mrb[57].mxu0 }
 0x168   :  { %v950_v21 = vpop.f32.mrb[52].mxu1  ;;  %v1281_v25 = vadd.f32 %v1280_v22, %v1279_v20  ;;  %v1282_v26 = vpop.f32.mrb[58].mxu0 }
 0x169   :  { %v951_v23 = vadd.f32 %v1275_v11, %v950_v21  ;;  %v952_v24 = vpop.f32.mrb[53].mxu1  ;;  %v1283_v28 = vpop.f32.mrb[59].mxu0 }
 0x16a   :  { %v953_v27 = vpop.f32.mrb[54].mxu1  ;;  %v1284_v32 = vadd.f32 %v1283_v28, %v1282_v26 }
 0x16b   :  { %v995_v29 = vmax.f32 %v991_v1, %v951_v23  ;;  %v954_v30 = vadd.f32 %v1278_v18, %v953_v27  ;;  %v955_v31 = vpop.f32.mrb[55].mxu1 }
 0x16d   :  { %v996_v33 = vmax.f32 %v992_v5, %v954_v30 }
 0x16e   :  { %v1285_v34 = vpop.f32.mrb[60].mxu0 }
 0x16f   :  { %v1286_v36 = vpop.f32.mrb[61].mxu0 }
 0x170   :  { %v958_v35 = vpop.f32.mrb[56].mxu1  ;;  %v1287_v39 = vadd.f32 %v1286_v36, %v1285_v34  ;;  %v1288_v40 = vpop.f32.mrb[62].mxu0 }
 0x171   :  { %v959_v37 = vadd.f32 %v1281_v25, %v958_v35  ;;  %v960_v38 = vpop.f32.mrb[57].mxu1  ;;  %v1289_v43 = vpop.f32.mrb[63].mxu0 }
 0x172   :  { %v961_v42 = vpop.f32.mrb[58].mxu1  ;;  %v1290_v47 = vadd.f32 %v1289_v43, %v1288_v40 }
 0x173   :  { %v997_v44 = vmax.f32 %v993_v15, %v959_v37  ;;  %v962_v45 = vadd.f32 %v1284_v32, %v961_v42  ;;  %v963_v46 = vpop.f32.mrb[59].mxu1 }
 0x175   :  { %v1008_v49 = vmul.f32 %v1158_v41, %v997_v44  ;;  %v998_v50 = vmax.f32 %v994_v19, %v962_v45 }
 0x177   :  { %v1019_v51 = vadd.f32 %v1159_v48, %v1008_v49  ;;  %v1009_v52 = vmul.f32 %v1158_v41, %v998_v50 }
 0x178   :  { %v966_v53 = vpop.f32.mrb[60].mxu1 }
 0x179   :  { %v1020_v54 = vadd.f32 %v1159_v48, %v1009_v52  ;;  %v967_v55 = vadd.f32 %v1287_v39, %v966_v53  ;;  %v968_v56 = vpop.f32.mrb[61].mxu1  ;;  %v1023_v58 = vmax.f32 %v1019_v51, 0.0 }
 0x17a   :  { %v969_v57 = vpop.f32.mrb[62].mxu1 }
 0x17b   :  { %v1024_v59 = vmax.f32 %v1020_v54, 0.0  ;;  %v999_v60 = vmax.f32 %v995_v29, %v967_v55  ;;  %v970_v61 = vadd.f32 %v1290_v47, %v969_v57  ;;  %v971_v62 = vpop.f32.mrb[63].mxu1 }
 0x17d   :  { %v1171_v63 = vpack.c.bf16 %v1024_v59, %v1023_v58  ;;  %v1010_v0 = vmul.f32 %v1158_v41, %v999_v60  ;;  %v1000_v1 = vmax.f32 %v996_v33, %v970_v61 }
 0x17f   :  { %1172 = vst [vmem:[%s1757_s4] sm:$0xff] %v1171_v63   ;;  %v1021_v2 = vadd.f32 %v1159_v48, %v1010_v0  ;;  %v1011_v3 = vmul.f32 %v1158_v41, %v1000_v1 }
 0x181   :  { %v1022_v4 = vadd.f32 %v1159_v48, %v1011_v3  ;;  %v1025_v5 = vmax.f32 %v1021_v2, 0.0 }
 0x183   :  { %v1026_v6 = vmax.f32 %v1022_v4, 0.0 }
 0x185   :  { %v1176_v7 = vpack.c.bf16 %v1026_v6, %v1025_v5 }
 0x187   :  { %1178 = vst [vmem:[%s1757_s4 + $0x8] sm:$0xff] %v1176_v7  }

// kernel: cavity_forward.8
= control target key start
LH: loop header
LB: loop body
LE: loop exit
PB: predicated region body
PF: predicated region fallthrough
CT: control target
= control target key end

     0   :  { %vm794_vm0 = vcmask 785408   ;;  %s2172_s1 = inlined_call_operand.vmem [shape: bf16[864,128], index: 1, kind: input, shape index: {}]   ;;  %s2173_s0 = inlined_call_operand.vmem [shape: bf16[1,128,864], index: 0, kind: input, shape index: {}]   ;;  %s2174_s2 = inlined_call_operand.vmem [shape: f32[1,128], index: 2, kind: input, shape index: {}]   ;;  %s2175_s3 = inlined_call_operand.vmem [shape: f32[1,128], index: 3, kind: input, shape index: {}]   ;;  %s2176_s4 = inlined_call_operand.vmem [shape: bf16[16,128], index: 4, kind: output, shape index: {}]  }
   0x1   :  { %v1618_v0 = vld [vmem:[%s2172_s1 + $0x40] sm:$0xff]   ;;  %v1622_v4 = vld [vmem:[%s2172_s1 + $0x48] sm:$0xff]   ;;  %v1626_v8 = vld [vmem:[%s2172_s1 + $0x50] sm:$0xff]  }
   0x2   :  { %v1619_v1 = vld [vmem:[%s2172_s1 + $0xc0] sm:$0xff]   ;;  %1384 = vmatprep.subr.bf16.mxu0 %v1618_v0  ;;  %v1623_v5 = vld [vmem:[%s2172_s1 + $0xc8] sm:$0xff]   ;;  %v1627_v9 = vld [vmem:[%s2172_s1 + $0xd0] sm:$0xff]  }
   0x3   :  { %v1620_v2 = vld [vmem:[%s2172_s1] sm:$0xff]   ;;  %1448 = vmatprep.subr.bf16.mxu1 %v1619_v1  ;;  %v1624_v6 = vld [vmem:[%s2172_s1 + $0x8] sm:$0xff]   ;;  %v1628_v10 = vld [vmem:[%s2172_s1 + $0x10] sm:$0xff]  }
   0x4   :  { %v1621_v3 = vld [vmem:[%s2172_s1 + $0x80] sm:$0xff]   ;;  %1385 = vmatpush3.bf16.msra.mxu0 %v1620_v2  ;;  %v1625_v7 = vld [vmem:[%s2172_s1 + $0x88] sm:$0xff]   ;;  %v1629_v11 = vld [vmem:[%s2172_s1 + $0x90] sm:$0xff]  }
   0x5   :  { %1449 = vmatpush3.bf16.msra.mxu1 %v1621_v3  ;;  %1386 = vmatprep.subr.bf16.mxu0 %v1622_v4  ;;  %v1630_v12 = vld [vmem:[%s2172_s1 + $0x58] sm:$0xff]   ;;  %v1634_v16 = vld [vmem:[%s2172_s1 + $0x60] sm:$0xff]   ;;  %v1638_v20 = vld [vmem:[%s2172_s1 + $0x68] sm:$0xff]  }
   0x6   :  { %1450 = vmatprep.subr.bf16.mxu1 %v1623_v5  ;;  %v1631_v13 = vld [vmem:[%s2172_s1 + $0xd8] sm:$0xff]   ;;  %v1635_v17 = vld [vmem:[%s2172_s1 + $0xe0] sm:$0xff]   ;;  %v1639_v21 = vld [vmem:[%s2172_s1 + $0xe8] sm:$0xff]  }
   0x7   :  { %v1632_v14 = vld [vmem:[%s2172_s1 + $0x18] sm:$0xff]   ;;  %v1636_v18 = vld [vmem:[%s2172_s1 + $0x20] sm:$0xff]   ;;  %v1640_v22 = vld [vmem:[%s2172_s1 + $0x28] sm:$0xff]  }
   0x8   :  { %1387 = vmatpush3.bf16.msra.mxu0 %v1624_v6  ;;  %v1633_v15 = vld [vmem:[%s2172_s1 + $0x98] sm:$0xff]   ;;  %v1637_v19 = vld [vmem:[%s2172_s1 + $0xa0] sm:$0xff]   ;;  %v1641_v23 = vld [vmem:[%s2172_s1 + $0xa8] sm:$0xff]  }
   0x9   :  { %1451 = vmatpush3.bf16.msra.mxu1 %v1625_v7  ;;  %1388 = vmatprep.subr.bf16.mxu0 %v1626_v8  ;;  %v1642_v24 = vld [vmem:[%s2172_s1 + $0x70] sm:$0xff]   ;;  %v1646_v28 = vld [vmem:[%s2172_s1 + $0x78] sm:$0xff]   ;;  %v1652_v33 = vld [vmem:[%s2173_s0 + $0x4] ss:$28 sps:$4 sm:$0xff]  }
   0xa   :  { %1452 = vmatprep.subr.bf16.mxu1 %v1627_v9  ;;  %v1643_v25 = vld [vmem:[%s2172_s1 + $0xf0] sm:$0xff]   ;;  %v1647_v29 = vld [vmem:[%s2172_s1 + $0xf8] sm:$0xff]   ;;  %v1653_v34 = vld [vmem:[%s2173_s0 + $0x8] ss:$28 sps:$4 sm:$0xff]   ;;  %851 = vmatprep.mubr.bf16.mxu0 %v1652_v33 }
   0xb   :  { %v1644_v26 = vld [vmem:[%s2172_s1 + $0x30] sm:$0xff]   ;;  %v1648_v30 = vld [vmem:[%s2172_s1 + $0x38] sm:$0xff]   ;;  %v1655_v35 = vld [vmem:[%s2173_s0 + $0xc] ss:$28 sps:$4 sm:$0xff]  }
   0xc   :  { %1389 = vmatpush3.bf16.msra.mxu0 %v1628_v10  ;;  %v1645_v27 = vld [vmem:[%s2172_s1 + $0xb0] sm:$0xff]   ;;  %v1649_v31 = vld [vmem:[%s2172_s1 + $0xb8] sm:$0xff]   ;;  %v1656_v36 = vld [vmem:[%s2172_s1 + $0x140] sm:$0xff]   ;;  %948 = vmatprep.mubr.bf16.mxu1 %v1655_v35 }
   0xd   :  { %1453 = vmatpush3.bf16.msra.mxu1 %v1629_v11  ;;  %1390 = vmatprep.subr.bf16.mxu0 %v1630_v12  ;;  %v1650_v32 = vld [vmem:[%s2173_s0] ss:$28 sps:$4 sm:$0xff]   ;;  %v1662_v40 = vld [vmem:[%s2173_s0 + $0x38] ss:$28 sps:$4 sm:$0xff]   ;;  %v1664_v42 = vld [vmem:[%s2172_s1 + $0x148] sm:$0xff]  }
   0xe   :  { %1454 = vmatprep.subr.bf16.mxu1 %v1631_v13  ;;  %v1657_v37 = vld [vmem:[%s2172_s1 + $0x100] sm:$0xff]   ;;  %v1658_v38 = vld [vmem:[%s2173_s0 + $0x3c] ss:$28 sps:$4 sm:$0xff]   ;;  %v1665_v43 = vld [vmem:[%s2172_s1 + $0x108] sm:$0xff]  }
   0xf   :  { %v1660_v39 = vld [vmem:[%s2173_s0 + $0x44] ss:$28 sps:$4 sm:$0xff]   ;;  %v1666_v44 = vld [vmem:[%s2173_s0 + $0x74] ss:$28 sps:$4 sm:$0xff]   ;;  %v1668_v45 = vld [vmem:[%s2173_s0 + $0x7c] ss:$28 sps:$4 sm:$0xff]  }
  0x10   :  { %1391 = vmatpush3.bf16.msra.mxu0 %v1632_v14  ;;  %v1663_v41 = vld [vmem:[%s2173_s0 + $0x40] ss:$28 sps:$4 sm:$0xff]   ;;  %v1672_v46 = vld [vmem:[%s2172_s1 + $0x150] sm:$0xff]   ;;  %v1674_v50 = vld [vmem:[%s2173_s0 + $0xac] ss:$28 sps:$4 sm:$0xff]  }
  0x11   :  { %1455 = vmatpush3.bf16.msra.mxu1 %v1633_v15  ;;  %1392 = vmatprep.subr.bf16.mxu0 %v1634_v16  ;;  %v1673_v47 = vld [vmem:[%s2172_s1 + $0x110] sm:$0xff]   ;;  %v1680_v52 = vld [vmem:[%s2172_s1 + $0x158] sm:$0xff]   ;;  %v1678_v54 = vld [vmem:[%s2173_s0 + $0xa8] ss:$28 sps:$4 sm:$0xff]  }
  0x12   :  { %1456 = vmatprep.subr.bf16.mxu1 %v1635_v17  ;;  %v1670_v48 = vld [vmem:[%s2173_s0 + $0x70] ss:$28 sps:$4 sm:$0xff]   ;;  %v1671_v49 = vld [vmem:[%s2173_s0 + $0x78] ss:$28 sps:$4 sm:$0xff]   ;;  %v1688_v55 = vld [vmem:[%s2172_s1 + $0x160] sm:$0xff]  }
  0x13   :  { %v1676_v51 = vld [vmem:[%s2173_s0 + $0xb4] ss:$28 sps:$4 sm:$0xff]   ;;  %v1681_v53 = vld [vmem:[%s2172_s1 + $0x118] sm:$0xff]   ;;  %v1689_v57 = vld [vmem:[%s2172_s1 + $0x120] sm:$0xff]  }
  0x14   :  { %1393 = vmatpush3.bf16.msra.mxu0 %v1636_v18  ;;  %v1679_v56 = vld [vmem:[%s2173_s0 + $0xb0] ss:$28 sps:$4 sm:$0xff]   ;;  %v1690_v58 = vld [vmem:[%s2172_s1 + $0x180] sm:$0xff]   ;;  %v1691_v2 = vld [vmem:[%s2173_s0 + $0x11c] ss:$28 sps:$4 sm:$0xff]  }
  0x15   :  { %1457 = vmatpush3.bf16.msra.mxu1 %v1637_v19  ;;  %1394 = vmatprep.subr.bf16.mxu0 %v1638_v20  ;;  %v1682_v59 = vld [vmem:[%s2173_s0 + $0xe4] ss:$28 sps:$4 sm:$0xff]   ;;  %v1684_v60 = vld [vmem:[%s2173_s0 + $0xec] ss:$28 sps:$4 sm:$0xff]   ;;  %v1706_v4 = vld [vmem:[%s2172_s1 + $0x170] sm:$0xff]  }
  0x16   :  { %1458 = vmatprep.subr.bf16.mxu1 %v1639_v21  ;;  %v1697_v61 = vld [vmem:[%s2172_s1 + $0x168] sm:$0xff]   ;;  %v1686_v0 = vld [vmem:[%s2173_s0 + $0xe0] ss:$28 sps:$4 sm:$0xff]   ;;  %v1707_v5 = vld [vmem:[%s2172_s1 + $0x130] sm:$0xff]  }
  0x17   :  { %v1698_v62 = vld [vmem:[%s2172_s1 + $0x128] sm:$0xff]   ;;  %v1693_v3 = vld [vmem:[%s2173_s0 + $0x124] ss:$28 sps:$4 sm:$0xff]   ;;  %v1708_v6 = vld [vmem:[%s2172_s1 + $0x190] sm:$0xff]  }
  0x18   :  { %1395 = vmatpush3.bf16.msra.mxu0 %v1640_v22  ;;  %v1699_v63 = vld [vmem:[%s2172_s1 + $0x188] sm:$0xff]   ;;  %v1695_v7 = vld [vmem:[%s2173_s0 + $0x118] ss:$28 sps:$4 sm:$0xff]   ;;  %v1696_v8 = vld [vmem:[%s2173_s0 + $0x120] ss:$28 sps:$4 sm:$0xff]  }
  0x19   :  { %1459 = vmatpush3.bf16.msra.mxu1 %v1641_v23  ;;  %1396 = vmatprep.subr.bf16.mxu0 %v1642_v24  ;;  %v1687_v1 = vld [vmem:[%s2173_s0 + $0xe8] ss:$28 sps:$4 sm:$0xff]   ;;  %v1700_v9 = vld [vmem:[%s2173_s0 + $0x154] ss:$28 sps:$4 sm:$0xff]   ;;  %v1715_v10 = vld [vmem:[%s2172_s1 + $0x178] sm:$0xff]  }
  0x1a   :  { %1460 = vmatprep.subr.bf16.mxu1 %v1643_v25  ;;  %v1702_v11 = vld [vmem:[%s2173_s0 + $0x15c] ss:$28 sps:$4 sm:$0xff]   ;;  %v1718_v14 = vld [vmem:[%s2172_s1 + $0x1a0] sm:$0xff]   ;;  %v1722_v15 = vld [vmem:[%s2172_s1 + $0x1a8] sm:$0xff]  }
  0x1b   :  { %v1716_v12 = vld [vmem:[%s2172_s1 + $0x198] sm:$0xff]   ;;  %v1704_v16 = vld [vmem:[%s2173_s0 + $0x150] ss:$28 sps:$4 sm:$0xff]   ;;  %v1713_v20 = vld [vmem:[%s2173_s0 + $0x188] ss:$28 sps:$4 sm:$0xff]  }
  0x1c   :  { %1397 = vmatpush3.bf16.msra.mxu0 %v1644_v26  ;;  %v1717_v13 = vld [vmem:[%s2172_s1 + $0x138] sm:$0xff]   ;;  %v1709_v18 = vld [vmem:[%s2173_s0 + $0x18c] ss:$28 sps:$4 sm:$0xff]   ;;  %v1711_v19 = vld [vmem:[%s2173_s0 + $0x194] ss:$28 sps:$4 sm:$0xff]  }
  0x1d   :  { %1461 = vmatpush3.bf16.msra.mxu1 %v1645_v27  ;;  %1398 = vmatprep.subr.bf16.mxu0 %v1646_v28  ;;  %v1705_v17 = vld [vmem:[%s2173_s0 + $0x158] ss:$28 sps:$4 sm:$0xff]   ;;  %v1714_v21 = vld [vmem:[%s2173_s0 + $0x190] ss:$28 sps:$4 sm:$0xff]   ;;  %v1731_v27 = vld [vmem:[%s2173_s0 + $0x88] ss:$28 sps:$4 sm:$0xff]  }
  0x1e   :  { %1462 = vmatprep.subr.bf16.mxu1 %v1647_v29  ;;  %v1721_v22 = vld [vmem:[%s2173_s0 + $0x14] ss:$28 sps:$4 sm:$0xff]   ;;  %v1725_v26 = vld [vmem:[%s2173_s0 + $0x4c] ss:$28 sps:$4 sm:$0xff]   ;;  %v1728_v29 = vld [vmem:[%s2173_s0 + $0x84] ss:$28 sps:$4 sm:$0xff]  }
  0x1f   :  { %v1723_v23 = vld [vmem:[%s2173_s0 + $0x18] ss:$28 sps:$4 sm:$0xff]   ;;  %v1719_v24 = vld [vmem:[%s2173_s0 + $0x10] ss:$28 sps:$4 sm:$0xff]   ;;  %v1727_v28 = vld [vmem:[%s2173_s0 + $0x48] ss:$28 sps:$4 sm:$0xff]  }
  0x20   :  { %1399 = vmatpush3.bf16.msra.mxu0 %v1648_v30  ;;  %v1724_v25 = vld [vmem:[%s2173_s0 + $0x50] ss:$28 sps:$4 sm:$0xff]   ;;  %v1732_v30 = vld [vmem:[%s2173_s0 + $0xc0] ss:$28 sps:$4 sm:$0xff]   ;;  %v1747_v35 = vld [vmem:[%s2173_s0 + $0x168] ss:$28 sps:$4 sm:$0xff]  }
  0x21   :  { %1463 = vmatpush3.bf16.msra.mxu1 %v1649_v31  ;;  %1512 = vmatprep.subr.bf16.mxu0 %v1656_v36  ;;  %v1739_v31 = vld [vmem:[%s2173_s0 + $0xf8] ss:$28 sps:$4 sm:$0xff]  }
  0x22   :  { %1590 = vmatprep.subr.bf16.mxu1 %v1690_v58  ;;  %v1733_v33 = vld [vmem:[%s2173_s0 + $0xbc] ss:$28 sps:$4 sm:$0xff]  }
  0x23   :  { %852 = vmatmul.mubr.bf16.vlgmr.msra.gmra.mrb[0].mxu0 %v1650_v32  ;;  %v1730_v32 = vld [vmem:[%s2173_s0 + $0x80] ss:$28 sps:$4 sm:$0xff]   ;;  %v1735_v36 = vld [vmem:[%s2173_s0 + $0xb8] ss:$28 sps:$4 sm:$0xff]  }
  0x24   :  { %949 = vmatmul.mubr.bf16.vlgmr.msra.gmra.mrb[0].mxu1 %v1653_v34  ;;  %1513 = vmatpush3.bf16.msra.mxu0 %v1657_v37  ;;  %v1740_v34 = vld [vmem:[%s2173_s0 + $0x130] ss:$28 sps:$4 sm:$0xff]  }
  0x25   :  { %859 = vmatprep.mubr.bf16.mxu0 %v1658_v38  ;;  %956 = vmatprep.mubr.bf16.mxu1 %v1660_v39  ;;  %v1736_v37 = vld [vmem:[%s2173_s0 + $0xf4] ss:$28 sps:$4 sm:$0xff]   ;;  %v1748_v38 = vld [vmem:[%s2173_s0 + $0x1a0] ss:$28 sps:$4 sm:$0xff]  }
  0x26   :  { %1514 = vmatprep.subr.bf16.mxu0 %v1664_v42  ;;  %1591 = vmatpush3.bf16.msra.mxu1 %v1690_v58  ;;  %v1738_v39 = vld [vmem:[%s2173_s0 + $0xf0] ss:$28 sps:$4 sm:$0xff]   ;;  %v1744_v42 = vld [vmem:[%s2173_s0 + $0x164] ss:$28 sps:$4 sm:$0xff]  }
  0x27   :  { %1592 = vmatprep.subr.bf16.mxu1 %v1699_v63 }
  0x28   :  { %1515 = vmatpush3.bf16.msra.mxu0 %v1665_v43  ;;  %v1746_v43 = vld [vmem:[%s2173_s0 + $0x160] ss:$28 sps:$4 sm:$0xff]  }
  0x29   :  { %1516 = vmatprep.subr.bf16.mxu0 %v1672_v46 }
  0x2a   :  { %1593 = vmatpush3.bf16.msra.mxu1 %v1699_v63 }
  0x2b   :  { %860 = vmatmul.mubr.bf16.gmra.mrb[4].mxu0 %v1662_v40  ;;  %1594 = vmatprep.subr.bf16.mxu1 %v1708_v6  ;;  %v1741_v40 = vld [vmem:[%s2173_s0 + $0x12c] ss:$28 sps:$4 sm:$0xff]  }
  0x2c   :  { %957 = vmatmul.mubr.bf16.gmra.mrb[4].mxu1 %v1663_v41  ;;  %867 = vmatprep.mubr.bf16.mxu0 %v1666_v44  ;;  %v1743_v41 = vld [vmem:[%s2173_s0 + $0x128] ss:$28 sps:$4 sm:$0xff]   ;;  %v1749_v44 = vld [vmem:[%s2173_s0 + $0x19c] ss:$28 sps:$4 sm:$0xff]  }
  0x2d   :  { %964 = vmatprep.mubr.bf16.mxu1 %v1668_v45  ;;  %1517 = vmatpush3.bf16.msra.mxu0 %v1673_v47  ;;  %v1751_v45 = vld [vmem:[%s2173_s0 + $0x198] ss:$28 sps:$4 sm:$0xff]  }
  0x2e   :  { %1518 = vmatprep.subr.bf16.mxu0 %v1680_v52  ;;  %1595 = vmatpush3.bf16.msra.mxu1 %v1708_v6 }
  0x2f   :  { %1596 = vmatprep.subr.bf16.mxu1 %v1716_v12 }
  0x31   :  { %1519 = vmatpush3.bf16.msra.mxu0 %v1681_v53 }
  0x32   :  { %1520 = vmatprep.subr.bf16.mxu0 %v1688_v55  ;;  %1597 = vmatpush3.bf16.msra.mxu1 %v1716_v12 }
  0x33   :  { %868 = vmatmul.mubr.bf16.gmra.mrb[8].mxu0 %v1670_v48  ;;  %1598 = vmatprep.subr.bf16.mxu1 %v1718_v14 }
  0x34   :  { %965 = vmatmul.mubr.bf16.gmra.mrb[8].mxu1 %v1671_v49  ;;  %875 = vmatprep.mubr.bf16.mxu0 %v1674_v50 }
  0x35   :  { %972 = vmatprep.mubr.bf16.mxu1 %v1676_v51  ;;  %1521 = vmatpush3.bf16.msra.mxu0 %v1689_v57 }
  0x36   :  { %1522 = vmatprep.subr.bf16.mxu0 %v1697_v61  ;;  %1599 = vmatpush3.bf16.msra.mxu1 %v1718_v14 }
  0x37   :  { %1600 = vmatprep.subr.bf16.mxu1 %v1722_v15 }
  0x39   :  { %1523 = vmatpush3.bf16.msra.mxu0 %v1698_v62 }
  0x3a   :  { %1524 = vmatprep.subr.bf16.mxu0 %v1706_v4  ;;  %1601 = vmatpush3.bf16.msra.mxu1 %v1722_v15 }
  0x3b   :  { %876 = vmatmul.mubr.bf16.gmra.mrb[12].mxu0 %v1678_v54 }
  0x3c   :  { %973 = vmatmul.mubr.bf16.gmra.mrb[12].mxu1 %v1679_v56  ;;  %883 = vmatprep.mubr.bf16.mxu0 %v1682_v59 }
  0x3d   :  { %980 = vmatprep.mubr.bf16.mxu1 %v1684_v60  ;;  %1525 = vmatpush3.bf16.msra.mxu0 %v1707_v5 }
  0x3e   :  { %1526 = vmatprep.subr.bf16.mxu0 %v1715_v10 }
  0x41   :  { %1527 = vmatpush3.bf16.msra.mxu0 %v1717_v13 }
  0x43   :  { %884 = vmatmul.mubr.bf16.gmra.mrb[16].mxu0 %v1686_v0 }
  0x44   :  { %981 = vmatmul.mubr.bf16.gmra.mrb[16].mxu1 %v1687_v1  ;;  %891 = vmatprep.mubr.bf16.mxu0 %v1691_v2 }
  0x45   :  { %988 = vmatprep.mubr.bf16.mxu1 %v1693_v3 }
  0x4b   :  { %892 = vmatmul.mubr.bf16.gmra.mrb[20].mxu0 %v1695_v7 }
  0x4c   :  { %989 = vmatmul.mubr.bf16.gmra.mrb[20].mxu1 %v1696_v8  ;;  %899 = vmatprep.mubr.bf16.mxu0 %v1700_v9 }
  0x4d   :  { %996 = vmatprep.mubr.bf16.mxu1 %v1702_v11 }
  0x53   :  { %900 = vmatmul.mubr.bf16.gmra.mrb[24].mxu0 %v1704_v16 }
  0x54   :  { %997 = vmatmul.mubr.bf16.gmra.mrb[24].mxu1 %v1705_v17  ;;  %907 = vmatprep.mubr.bf16.mxu0 %v1709_v18 }
  0x55   :  { %1004 = vmatprep.mubr.bf16.mxu1 %v1711_v19 }
  0x5b   :  { %908 = vmatmul.mubr.bf16.gmra.mrb[28].mxu0 %v1713_v20 }
  0x5c   :  { %1005 = vmatmul.mubr.bf16.gmra.mrb[28].mxu1 %v1714_v21  ;;  %1045 = vmatprep.mubr.bf16.mxu0 %v1721_v22 }
  0x5d   :  { %1602 = vmatprep.mubr.msk.bf16.mxu1 %vm794_vm0, %v1723_v23 }
  0x63   :  { %1046 = vmatmul.mubr.bf16.vlgmr.msra.gmra.mrb[32].mxu0 %v1719_v24 }
  0x64   :  { %1603 = vmatmul.mubr.msk.bf16.vlgmr.msra.gmra.mrb[32].mxu1 %vm794_vm0, %v1724_v25  ;;  %1053 = vmatprep.mubr.bf16.mxu0 %v1725_v26 }
  0x65   :  { %1606 = vmatprep.mubr.msk.bf16.mxu1 %vm794_vm0, %v1731_v27 }
  0x6b   :  { %1054 = vmatmul.mubr.bf16.gmra.mrb[36].mxu0 %v1727_v28 }
  0x6c   :  { %1061 = vmatprep.mubr.bf16.mxu0 %v1728_v29  ;;  %1607 = vmatmul.mubr.msk.bf16.gmra.mrb[36].mxu1 %vm794_vm0, %v1732_v30 }
  0x6d   :  { %1610 = vmatprep.mubr.msk.bf16.mxu1 %vm794_vm0, %v1739_v31 }
  0x73   :  { %1062 = vmatmul.mubr.bf16.gmra.mrb[40].mxu0 %v1730_v32 }
  0x74   :  { %1069 = vmatprep.mubr.bf16.mxu0 %v1733_v33  ;;  %1611 = vmatmul.mubr.msk.bf16.gmra.mrb[40].mxu1 %vm794_vm0, %v1740_v34 }
  0x75   :  { %1614 = vmatprep.mubr.msk.bf16.mxu1 %vm794_vm0, %v1747_v35 }
  0x7b   :  { %1070 = vmatmul.mubr.bf16.gmra.mrb[44].mxu0 %v1735_v36 }
  0x7c   :  { %1077 = vmatprep.mubr.bf16.mxu0 %v1736_v37  ;;  %1615 = vmatmul.mubr.msk.bf16.gmra.mrb[44].mxu1 %vm794_vm0, %v1748_v38 }
  0x83   :  { %1078 = vmatmul.mubr.bf16.gmra.mrb[48].mxu0 %v1738_v39 }
  0x84   :  { %1085 = vmatprep.mubr.bf16.mxu0 %v1741_v40 }
  0x8b   :  { %1086 = vmatmul.mubr.bf16.gmra.mrb[52].mxu0 %v1743_v41 }
  0x8c   :  { %1093 = vmatprep.mubr.bf16.mxu0 %v1744_v42 }
  0x93   :  { %1094 = vmatmul.mubr.bf16.gmra.mrb[56].mxu0 %v1746_v43 }
  0x94   :  { %1101 = vmatprep.mubr.bf16.mxu0 %v1749_v44 }
  0x9b   :  { %1102 = vmatmul.mubr.bf16.gmra.mrb[60].mxu0 %v1751_v45 }
  0xf6   :  { %v1400_v46 = vpop.f32.mrb[0].mxu0 }
  0xf7   :  { %v1464_v47 = vpop.f32.mrb[0].mxu1  ;;  %v1401_v48 = vpop.f32.mrb[1].mxu0 }
  0xf8   :  { %v1402_v49 = vadd.f32 %v1401_v48, %v1400_v46  ;;  %v1465_v50 = vpop.f32.mrb[1].mxu1  ;;  %v1403_v51 = vpop.f32.mrb[2].mxu0 }
  0xf9   :  { %v1466_v52 = vadd.f32 %v1465_v50, %v1464_v47  ;;  %v1467_v53 = vpop.f32.mrb[2].mxu1  ;;  %v1404_v54 = vpop.f32.mrb[3].mxu0 }
  0xfa   :  { %v1405_v55 = vadd.f32 %v1404_v54, %v1403_v51  ;;  %v1468_v56 = vpop.f32.mrb[3].mxu1 }
  0xfb   :  { %v2115_v57 = vadd.f32 %v1466_v52, %v1402_v49  ;;  %v1469_v58 = vadd.f32 %v1468_v56, %v1467_v53 }
  0xfd   :  { %v2117_v59 = vadd.f32 %v1469_v58, %v1405_v55 }
  0xfe   :  { %v1406_v60 = vpop.f32.mrb[4].mxu0 }
  0xff   :  { %v1470_v61 = vpop.f32.mrb[4].mxu1  ;;  %v1407_v62 = vpop.f32.mrb[5].mxu0 }
 0x100   :  { %v1408_v63 = vadd.f32 %v1407_v62, %v1406_v60  ;;  %v1471_v0 = vpop.f32.mrb[5].mxu1  ;;  %v1409_v1 = vpop.f32.mrb[6].mxu0 }
 0x101   :  { %v1472_v2 = vadd.f32 %v1471_v0, %v1470_v61  ;;  %v1473_v3 = vpop.f32.mrb[6].mxu1  ;;  %v1410_v4 = vpop.f32.mrb[7].mxu0 }
 0x102   :  { %v1411_v5 = vadd.f32 %v1410_v4, %v1409_v1  ;;  %v1474_v6 = vpop.f32.mrb[7].mxu1 }
 0x103   :  { %v2119_v7 = vadd.f32 %v1472_v2, %v1408_v63  ;;  %v1475_v8 = vadd.f32 %v1474_v6, %v1473_v3 }
 0x105   :  { %v2121_v9 = vadd.f32 %v1475_v8, %v1411_v5 }
 0x106   :  { %v1412_v10 = vpop.f32.mrb[8].mxu0 }
 0x107   :  { %v1476_v11 = vpop.f32.mrb[8].mxu1  ;;  %v1413_v12 = vpop.f32.mrb[9].mxu0 }
 0x108   :  { %v1414_v13 = vadd.f32 %v1413_v12, %v1412_v10  ;;  %v1477_v14 = vpop.f32.mrb[9].mxu1  ;;  %v1415_v15 = vpop.f32.mrb[10].mxu0 }
 0x109   :  { %v1478_v16 = vadd.f32 %v1477_v14, %v1476_v11  ;;  %v1479_v17 = vpop.f32.mrb[10].mxu1  ;;  %v1416_v18 = vpop.f32.mrb[11].mxu0 }
 0x10a   :  { %v1417_v19 = vadd.f32 %v1416_v18, %v1415_v15  ;;  %v1480_v20 = vpop.f32.mrb[11].mxu1 }
 0x10b   :  { %v2123_v21 = vadd.f32 %v1478_v16, %v1414_v13  ;;  %v1481_v22 = vadd.f32 %v1480_v20, %v1479_v17 }
 0x10d   :  { %v2125_v23 = vadd.f32 %v1481_v22, %v1417_v19 }
 0x10e   :  { %v1418_v24 = vpop.f32.mrb[12].mxu0 }
 0x10f   :  { %v1482_v25 = vpop.f32.mrb[12].mxu1  ;;  %v1419_v26 = vpop.f32.mrb[13].mxu0 }
 0x110   :  { %v1420_v27 = vadd.f32 %v1419_v26, %v1418_v24  ;;  %v1483_v28 = vpop.f32.mrb[13].mxu1  ;;  %v1421_v29 = vpop.f32.mrb[14].mxu0 }
 0x111   :  { %v1484_v30 = vadd.f32 %v1483_v28, %v1482_v25  ;;  %v1485_v31 = vpop.f32.mrb[14].mxu1  ;;  %v1422_v32 = vpop.f32.mrb[15].mxu0 }
 0x112   :  { %v1423_v33 = vadd.f32 %v1422_v32, %v1421_v29  ;;  %v1486_v34 = vpop.f32.mrb[15].mxu1 }
 0x113   :  { %v2127_v35 = vadd.f32 %v1484_v30, %v1420_v27  ;;  %v1487_v36 = vadd.f32 %v1486_v34, %v1485_v31 }
 0x115   :  { %v2129_v37 = vadd.f32 %v1487_v36, %v1423_v33 }
 0x116   :  { %v1424_v38 = vpop.f32.mrb[16].mxu0 }
 0x117   :  { %v1488_v39 = vpop.f32.mrb[16].mxu1  ;;  %v1425_v40 = vpop.f32.mrb[17].mxu0 }
 0x118   :  { %v1426_v41 = vadd.f32 %v1425_v40, %v1424_v38  ;;  %v1489_v42 = vpop.f32.mrb[17].mxu1  ;;  %v1427_v43 = vpop.f32.mrb[18].mxu0 }
 0x119   :  { %v1490_v44 = vadd.f32 %v1489_v42, %v1488_v39  ;;  %v1491_v45 = vpop.f32.mrb[18].mxu1  ;;  %v1428_v46 = vpop.f32.mrb[19].mxu0 }
 0x11a   :  { %v1429_v47 = vadd.f32 %v1428_v46, %v1427_v43  ;;  %v1492_v48 = vpop.f32.mrb[19].mxu1 }
 0x11b   :  { %v2131_v49 = vadd.f32 %v1490_v44, %v1426_v41  ;;  %v1493_v50 = vadd.f32 %v1492_v48, %v1491_v45 }
 0x11d   :  { %v2133_v51 = vadd.f32 %v1493_v50, %v1429_v47 }
 0x11e   :  { %v1430_v52 = vpop.f32.mrb[20].mxu0 }
 0x11f   :  { %v1494_v53 = vpop.f32.mrb[20].mxu1  ;;  %v1431_v54 = vpop.f32.mrb[21].mxu0 }
 0x120   :  { %v1432_v55 = vadd.f32 %v1431_v54, %v1430_v52  ;;  %v1495_v56 = vpop.f32.mrb[21].mxu1  ;;  %v1433_v58 = vpop.f32.mrb[22].mxu0 }
 0x121   :  { %v1496_v60 = vadd.f32 %v1495_v56, %v1494_v53  ;;  %v1497_v61 = vpop.f32.mrb[22].mxu1  ;;  %v1434_v62 = vpop.f32.mrb[23].mxu0 }
 0x122   :  { %v1435_v63 = vadd.f32 %v1434_v62, %v1433_v58  ;;  %v1498_v0 = vpop.f32.mrb[23].mxu1 }
 0x123   :  { %v2135_v1 = vadd.f32 %v1496_v60, %v1432_v55  ;;  %v1499_v2 = vadd.f32 %v1498_v0, %v1497_v61 }
 0x125   :  { %v2137_v3 = vadd.f32 %v1499_v2, %v1435_v63 }
 0x126   :  { %v1436_v4 = vpop.f32.mrb[24].mxu0 }
 0x127   :  { %v1500_v5 = vpop.f32.mrb[24].mxu1  ;;  %v1437_v6 = vpop.f32.mrb[25].mxu0 }
 0x128   :  { %v1438_v8 = vadd.f32 %v1437_v6, %v1436_v4  ;;  %v1501_v10 = vpop.f32.mrb[25].mxu1  ;;  %v1439_v11 = vpop.f32.mrb[26].mxu0 }
 0x129   :  { %v1502_v12 = vadd.f32 %v1501_v10, %v1500_v5  ;;  %v1503_v13 = vpop.f32.mrb[26].mxu1  ;;  %v1440_v14 = vpop.f32.mrb[27].mxu0 }
 0x12a   :  { %v1441_v15 = vadd.f32 %v1440_v14, %v1439_v11  ;;  %v1504_v16 = vpop.f32.mrb[27].mxu1 }
 0x12b   :  { %v2139_v17 = vadd.f32 %v1502_v12, %v1438_v8  ;;  %v1505_v18 = vadd.f32 %v1504_v16, %v1503_v13 }
 0x12d   :  { %v2141_v19 = vadd.f32 %v1505_v18, %v1441_v15 }
 0x12e   :  { %v1442_v20 = vpop.f32.mrb[28].mxu0 }
 0x12f   :  { %v1506_v22 = vpop.f32.mrb[28].mxu1  ;;  %v1443_v24 = vpop.f32.mrb[29].mxu0 }
 0x130   :  { %v1444_v25 = vadd.f32 %v1443_v24, %v1442_v20  ;;  %v1507_v26 = vpop.f32.mrb[29].mxu1  ;;  %v1445_v27 = vpop.f32.mrb[30].mxu0 }
 0x131   :  { %v1508_v28 = vadd.f32 %v1507_v26, %v1506_v22  ;;  %v1509_v29 = vpop.f32.mrb[30].mxu1  ;;  %v1446_v30 = vpop.f32.mrb[31].mxu0 }
 0x132   :  { %v1447_v31 = vadd.f32 %v1446_v30, %v1445_v27  ;;  %v1510_v32 = vpop.f32.mrb[31].mxu1 }
 0x133   :  { %v2143_v33 = vadd.f32 %v1508_v28, %v1444_v25  ;;  %v1511_v34 = vadd.f32 %v1510_v32, %v1509_v29 }
 0x135   :  { %v2145_v36 = vadd.f32 %v1511_v34, %v1447_v31 }
 0x136   :  { %v1528_v38 = vpop.f32.mrb[32].mxu0 }
 0x137   :  { %v1529_v39 = vpop.f32.mrb[33].mxu0  ;;  %v1604_v40 = vpop.f32.mrb[32].mxu1 }
 0x138   :  { %v1530_v41 = vadd.f32 %v1529_v39, %v1528_v38  ;;  %v1531_v42 = vpop.f32.mrb[34].mxu0  ;;  %v1144_v43 = vpop.f32.mrb[33].mxu1 }
 0x139   :  { %v1532_v44 = vpop.f32.mrb[35].mxu0  ;;  %v1605_v45 = vpop.f32.mrb[34].mxu1 }
 0x13a   :  { %v1533_v46 = vadd.f32 %v1532_v44, %v1531_v42  ;;  %v1048_v47 = vadd.f32 %v1530_v41, %v2115_v57  ;;  %v1147_v48 = vpop.f32.mrb[35].mxu1 }
 0x13c   :  { %v1145_v50 = vadd.f32 %v1144_v43, %v1048_v47  ;;  %v1051_v52 = vadd.f32 %v1533_v46, %v2117_v59 }
 0x13e   :  { %v1148_v53 = vadd.f32 %v1147_v48, %v1051_v52  ;;  %v1534_v54 = vpop.f32.mrb[36].mxu0 }
 0x13f   :  { %v1535_v55 = vpop.f32.mrb[37].mxu0  ;;  %v1608_v56 = vpop.f32.mrb[36].mxu1 }
 0x140   :  { %v1536_v58 = vadd.f32 %v1535_v55, %v1534_v54  ;;  %v1537_v60 = vpop.f32.mrb[38].mxu0  ;;  %v1160_v61 = vpop.f32.mrb[37].mxu1 }
 0x141   :  { %v1538_v62 = vpop.f32.mrb[39].mxu0  ;;  %v1609_v63 = vpop.f32.mrb[38].mxu1 }
 0x142   :  { %v1056_v0 = vadd.f32 %v1536_v58, %v2119_v7  ;;  %v1539_v2 = vadd.f32 %v1538_v62, %v1537_v60  ;;  %v1163_v4 = vpop.f32.mrb[39].mxu1 }
 0x144   :  { %v1153_v5 = vadd.f32 %v1604_v40, %v1056_v0  ;;  %v1059_v57 = vadd.f32 %v1539_v2, %v2121_v9 }
 0x146   :  { %v1156_v6 = vadd.f32 %v1605_v45, %v1059_v57  ;;  %v1540_v8 = vpop.f32.mrb[40].mxu0  ;;  %v1207_v10 = vmax.f32 %v1145_v50, %v1153_v5 }
 0x147   :  { %v1541_v59 = vpop.f32.mrb[41].mxu0  ;;  %v1612_v11 = vpop.f32.mrb[40].mxu1 }
 0x148   :  { %v1542_v12 = vadd.f32 %v1541_v59, %v1540_v8  ;;  %v1543_v13 = vpop.f32.mrb[42].mxu0  ;;  %v1208_v14 = vmax.f32 %v1148_v53, %v1156_v6  ;;  %v1176_v15 = vpop.f32.mrb[41].mxu1 }
 0x149   :  { %v1544_v16 = vpop.f32.mrb[43].mxu0  ;;  %v1613_v18 = vpop.f32.mrb[42].mxu1 }
 0x14a   :  { %v1545_v20 = vadd.f32 %v1544_v16, %v1543_v13  ;;  %v1064_v22 = vadd.f32 %v1542_v12, %v2123_v21  ;;  %v1179_v7 = vpop.f32.mrb[43].mxu1 }
 0x14c   :  { %v1161_v24 = vadd.f32 %v1160_v61, %v1064_v22  ;;  %v1067_v25 = vadd.f32 %v1545_v20, %v2125_v23 }
 0x14e   :  { %v1209_v26 = vmax.f32 %v1207_v10, %v1161_v24  ;;  %v1164_v9 = vadd.f32 %v1163_v4, %v1067_v25  ;;  %v1546_v27 = vpop.f32.mrb[44].mxu0 }
 0x14f   :  { %v1547_v28 = vpop.f32.mrb[45].mxu0  ;;  %v1616_v29 = vpop.f32.mrb[44].mxu1 }
 0x150   :  { %v1210_v30 = vmax.f32 %v1208_v14, %v1164_v9  ;;  %v1548_v31 = vadd.f32 %v1547_v28, %v1546_v27  ;;  %v1549_v32 = vpop.f32.mrb[46].mxu0  ;;  %v1192_v34 = vpop.f32.mrb[45].mxu1 }
 0x151   :  { %v1550_v38 = vpop.f32.mrb[47].mxu0  ;;  %v1617_v39 = vpop.f32.mrb[46].mxu1 }
 0x152   :  { %v1072_v40 = vadd.f32 %v1548_v31, %v2127_v35  ;;  %v1551_v41 = vadd.f32 %v1550_v38, %v1549_v32  ;;  %v1195_v42 = vpop.f32.mrb[47].mxu1  ;;  %v1374_v31 = vld [vmem:[%s2175_s3] ss:$0 sm:$0xff] }
 0x154   :  { %v1169_v21 = vadd.f32 %v1608_v56, %v1072_v40  ;;  %v1075_v43 = vadd.f32 %v1551_v41, %v2129_v37 }
 0x156   :  { %v1172_v44 = vadd.f32 %v1609_v63, %v1075_v43  ;;  %v1552_v23 = vpop.f32.mrb[48].mxu0  ;;  %v1211_v45 = vmax.f32 %v1209_v26, %v1169_v21 }
 0x157   :  { %v1553_v46 = vpop.f32.mrb[49].mxu0 }
 0x158   :  { %v1554_v47 = vadd.f32 %v1553_v46, %v1552_v23  ;;  %v1555_v48 = vpop.f32.mrb[50].mxu0  ;;  %v1212_v50 = vmax.f32 %v1210_v30, %v1172_v44 }
 0x159   :  { %v1556_v52 = vpop.f32.mrb[51].mxu0 }
 0x15a   :  { %v1557_v53 = vadd.f32 %v1556_v52, %v1555_v48  ;;  %v1080_v54 = vadd.f32 %v1554_v47, %v2131_v49 }
 0x15c   :  { %v1177_v55 = vadd.f32 %v1176_v15, %v1080_v54  ;;  %v1083_v58 = vadd.f32 %v1557_v53, %v2133_v51 }
 0x15e   :  { %v1213_v35 = vmax.f32 %v1211_v45, %v1177_v55  ;;  %v1180_v60 = vadd.f32 %v1179_v7, %v1083_v58  ;;  %v1558_v61 = vpop.f32.mrb[52].mxu0 }
 0x15f   :  { %v1559_v56 = vpop.f32.mrb[53].mxu0 }
 0x160   :  { %v1214_v62 = vmax.f32 %v1212_v50, %v1180_v60  ;;  %v1560_v37 = vadd.f32 %v1559_v56, %v1558_v61  ;;  %v1561_v63 = vpop.f32.mrb[54].mxu0 }
 0x161   :  { %v1562_v0 = vpop.f32.mrb[55].mxu0 }
 0x162   :  { %v1088_v2 = vadd.f32 %v1560_v37, %v2135_v1  ;;  %v1563_v4 = vadd.f32 %v1562_v0, %v1561_v63 }
 0x164   :  { %v1185_v5 = vadd.f32 %v1612_v11, %v1088_v2  ;;  %v1091_v57 = vadd.f32 %v1563_v4, %v2137_v3 }
 0x166   :  { %v1188_v6 = vadd.f32 %v1613_v18, %v1091_v57  ;;  %v1564_v8 = vpop.f32.mrb[56].mxu0  ;;  %v1215_v49 = vmax.f32 %v1213_v35, %v1185_v5 }
 0x167   :  { %v1565_v10 = vpop.f32.mrb[57].mxu0 }
 0x168   :  { %v1566_v59 = vadd.f32 %v1565_v10, %v1564_v8  ;;  %v1567_v51 = vpop.f32.mrb[58].mxu0  ;;  %v1216_v12 = vmax.f32 %v1214_v62, %v1188_v6 }
 0x169   :  { %v1568_v13 = vpop.f32.mrb[59].mxu0 }
 0x16a   :  { %v1569_v14 = vadd.f32 %v1568_v13, %v1567_v51  ;;  %v1096_v15 = vadd.f32 %v1566_v59, %v2139_v17  ;;  %v1373_v17 = vld [vmem:[%s2174_s2] ss:$0 sm:$0xff] }
 0x16c   :  { %v1193_v16 = vadd.f32 %v1192_v34, %v1096_v15  ;;  %v1099_v20 = vadd.f32 %v1569_v14, %v2141_v19 }
 0x16e   :  { %v1217_v22 = vmax.f32 %v1215_v49, %v1193_v16  ;;  %v1196_v1 = vadd.f32 %v1195_v42, %v1099_v20  ;;  %v1570_v7 = vpop.f32.mrb[60].mxu0 }
 0x16f   :  { %v1571_v11 = vpop.f32.mrb[61].mxu0 }
 0x170   :  { %v1218_v24 = vmax.f32 %v1216_v12, %v1196_v1  ;;  %v1572_v3 = vadd.f32 %v1571_v11, %v1570_v7  ;;  %v1573_v18 = vpop.f32.mrb[62].mxu0 }
 0x171   :  { %v1574_v25 = vpop.f32.mrb[63].mxu0 }
 0x172   :  { %v1104_v26 = vadd.f32 %v1572_v3, %v2143_v33  ;;  %v1575_v9 = vadd.f32 %v1574_v25, %v1573_v18 }
 0x174   :  { %v1201_v27 = vadd.f32 %v1616_v29, %v1104_v26  ;;  %v1107_v28 = vadd.f32 %v1575_v9, %v2145_v36 }
 0x176   :  { %v1219_v30 = vmax.f32 %v1217_v22, %v1201_v27  ;;  %v1204_v19 = vadd.f32 %v1617_v39, %v1107_v28 }
 0x178   :  { %v1228_v32 = vmul.f32 %v1373_v17, %v1219_v30  ;;  %v1220_v34 = vmax.f32 %v1218_v24, %v1204_v19 }
 0x17a   :  { %v1237_v38 = vadd.f32 %v1374_v31, %v1228_v32  ;;  %v1229_v40 = vmul.f32 %v1373_v17, %v1220_v34 }
 0x17c   :  { %v1238_v41 = vadd.f32 %v1374_v31, %v1229_v40  ;;  %v1239_v33 = vmax.f32 %v1237_v38, 0.0 }
 0x17e   :  { %v1240_v42 = vmax.f32 %v1238_v41, 0.0 }
 0x180   :  { %v1382_v29 = vpack.c.bf16 %v1240_v42, %v1239_v33 }
 0x182   :  { %1383 = vst [vmem:[%s2176_s4] sm:$0xff] %v1382_v29  }

// kernel: cavity_forward.9
= control target key start
LH: loop header
LB: loop body
LE: loop exit
PB: predicated region body
PF: predicated region fallthrough
CT: control target
= control target key end

     0   :  { %v273_v50 = vlaneseq  ;;  %s831_s1 = inlined_call_operand.vmem [shape: bf16[256,256], index: 1, kind: input, shape index: {}]   ;;  %s832_s0 = inlined_call_operand.vmem [shape: bf16[16,256], index: 0, kind: input, shape index: {}]   ;;  %s833_s4 = inlined_call_operand.vmem [shape: bf16[256,128], index: 4, kind: input, shape index: {}]   ;;  %s834_s2 = inlined_call_operand.vmem [shape: f32[1,256], index: 2, kind: input, shape index: {}]   ;;  %s835_s3 = inlined_call_operand.vmem [shape: f32[1,256], index: 3, kind: input, shape index: {}]   ;;  %s836_s5 = inlined_call_operand.vmem [shape: f32[1,128], index: 5, kind: input, shape index: {}]   ;;  %s837_s6 = inlined_call_operand.vmem [shape: f32[16,128], index: 6, kind: output, shape index: {}]  }
   0x1   :  { %v564_v0 = vld [vmem:[%s831_s1 + $0x4] ss:$8 sps:$4 sm:$0xff]   ;;  %v566_v1 = vld [vmem:[%s831_s1] ss:$8 sps:$4 sm:$0xff]   ;;  %v567_v2 = vld [vmem:[%s831_s1 + $0x14] ss:$8 sps:$4 sm:$0xff]  }
   0x2   :  { %228 = vmatprep.subr.bf16.mxu0 %v564_v0  ;;  %v569_v3 = vld [vmem:[%s831_s1 + $0x10] ss:$8 sps:$4 sm:$0xff]   ;;  %v570_v4 = vld [vmem:[%s831_s1 + $0x24] ss:$8 sps:$4 sm:$0xff]   ;;  %v572_v5 = vld [vmem:[%s831_s1 + $0x20] ss:$8 sps:$4 sm:$0xff]  }
   0x3   :  { %229 = vmatpush1.bf16.msra.mxu0 %v566_v1  ;;  %v573_v6 = vld [vmem:[%s831_s1 + $0x34] ss:$8 sps:$4 sm:$0xff]   ;;  %v575_v7 = vld [vmem:[%s831_s1 + $0x30] ss:$8 sps:$4 sm:$0xff]   ;;  %v576_v8 = vld [vmem:[%s831_s1 + $0x44] ss:$8 sps:$4 sm:$0xff]  }
   0x4   :  { %230 = vmatprep.subr.bf16.mxu0 %v567_v2  ;;  %v578_v9 = vld [vmem:[%s831_s1 + $0x40] ss:$8 sps:$4 sm:$0xff]   ;;  %v579_v10 = vld [vmem:[%s831_s1 + $0x54] ss:$8 sps:$4 sm:$0xff]   ;;  %v581_v11 = vld [vmem:[%s831_s1 + $0x50] ss:$8 sps:$4 sm:$0xff]  }
   0x5   :  { %v582_v12 = vld [vmem:[%s831_s1 + $0x64] ss:$8 sps:$4 sm:$0xff]   ;;  %v584_v13 = vld [vmem:[%s831_s1 + $0x60] ss:$8 sps:$4 sm:$0xff]   ;;  %v585_v14 = vld [vmem:[%s831_s1 + $0x74] ss:$8 sps:$4 sm:$0xff]  }
   0x6   :  { %v614_v15 = vld [vmem:[%s832_s0 + $0x4] ss:$8 sps:$4 sm:$0xff]   ;;  %v587_v18 = vld [vmem:[%s831_s1 + $0x70] ss:$8 sps:$4 sm:$0xff]   ;;  %v590_v23 = vld [vmem:[%s831_s1 + $0x80] ss:$8 sps:$4 sm:$0xff]  }
   0x7   :  { %231 = vmatpush1.bf16.msra.mxu0 %v569_v3  ;;  %v615_v16 = vld [vmem:[%s833_s4 + $0x40] sm:$0xff]   ;;  %260 = vmatprep.mubr.bf16.mxu0 %v614_v15  ;;  %v617_v19 = vld [vmem:[%s833_s4 + $0x48] sm:$0xff]   ;;  %v619_v21 = vld [vmem:[%s833_s4 + $0x50] sm:$0xff]   ;;  %v274_v51 = vshrl.u32 %v273_v50, 7 }
   0x8   :  { %232 = vmatprep.subr.bf16.mxu0 %v570_v4  ;;  %v616_v17 = vld [vmem:[%s833_s4] sm:$0xff]   ;;  %542 = vmatprep.subr.bf16.mxu1 %v615_v16  ;;  %v618_v20 = vld [vmem:[%s833_s4 + $0x8] sm:$0xff]   ;;  %v591_v24 = vld [vmem:[%s831_s1 + $0x94] ss:$8 sps:$4 sm:$0xff]  }
   0x9   :  { %543 = vmatpush3.bf16.msra.mxu1 %v616_v17  ;;  %v588_v22 = vld [vmem:[%s831_s1 + $0x84] ss:$8 sps:$4 sm:$0xff]   ;;  %v620_v25 = vld [vmem:[%s833_s4 + $0x10] sm:$0xff]   ;;  %v621_v26 = vld [vmem:[%s833_s4 + $0x58] sm:$0xff]   ;;  %v275_v52 = vsub.s32 0, %v274_v51  ;;  %v279_v54 = vsub.s32 1, %v274_v51 }
   0xa   :  { %544 = vmatprep.subr.bf16.mxu1 %v617_v19  ;;  %v622_v27 = vld [vmem:[%s833_s4 + $0x18] sm:$0xff]   ;;  %v623_v29 = vld [vmem:[%s833_s4 + $0x60] sm:$0xff]   ;;  %v625_v44 = vld [vmem:[%s833_s4 + $0x68] sm:$0xff]  }
   0xb   :  { %233 = vmatpush1.bf16.msra.mxu0 %v572_v5  ;;  %v593_v28 = vld [vmem:[%s831_s1 + $0x90] ss:$8 sps:$4 sm:$0xff]   ;;  %v594_v30 = vld [vmem:[%s831_s1 + $0xa4] ss:$8 sps:$4 sm:$0xff]   ;;  %v596_v32 = vld [vmem:[%s831_s1 + $0xa0] ss:$8 sps:$4 sm:$0xff]  }
   0xc   :  { %234 = vmatprep.subr.bf16.mxu0 %v573_v6  ;;  %v624_v31 = vld [vmem:[%s833_s4 + $0x20] sm:$0xff]   ;;  %v597_v33 = vld [vmem:[%s831_s1 + $0xb4] ss:$8 sps:$4 sm:$0xff]   ;;  %v599_v34 = vld [vmem:[%s831_s1 + $0xb0] ss:$8 sps:$4 sm:$0xff]  }
   0xd   :  { %545 = vmatpush3.bf16.msra.mxu1 %v618_v20  ;;  %v600_v35 = vld [vmem:[%s831_s1 + $0xc4] ss:$8 sps:$4 sm:$0xff]   ;;  %v602_v36 = vld [vmem:[%s831_s1 + $0xc0] ss:$8 sps:$4 sm:$0xff]   ;;  %v603_v37 = vld [vmem:[%s831_s1 + $0xd4] ss:$8 sps:$4 sm:$0xff]  }
   0xe   :  { %546 = vmatprep.subr.bf16.mxu1 %v619_v21  ;;  %v605_v38 = vld [vmem:[%s831_s1 + $0xd0] ss:$8 sps:$4 sm:$0xff]   ;;  %v606_v39 = vld [vmem:[%s831_s1 + $0xe4] ss:$8 sps:$4 sm:$0xff]   ;;  %v608_v40 = vld [vmem:[%s831_s1 + $0xe0] ss:$8 sps:$4 sm:$0xff]  }
   0xf   :  { %235 = vmatpush1.bf16.msra.mxu0 %v575_v7  ;;  %v609_v41 = vld [vmem:[%s831_s1 + $0xf4] ss:$8 sps:$4 sm:$0xff]   ;;  %v611_v42 = vld [vmem:[%s831_s1 + $0xf0] ss:$8 sps:$4 sm:$0xff]   ;;  %v612_v43 = vld [vmem:[%s832_s0] ss:$8 sps:$4 sm:$0xff]  }
  0x10   :  { %236 = vmatprep.subr.bf16.mxu0 %v576_v8  ;;  %v626_v45 = vld [vmem:[%s833_s4 + $0x28] sm:$0xff]   ;;  %v627_v46 = vld [vmem:[%s833_s4 + $0x70] sm:$0xff]   ;;  %v629_v48 = vld [vmem:[%s833_s4 + $0x78] sm:$0xff]  }
  0x11   :  { %547 = vmatpush3.bf16.msra.mxu1 %v620_v25  ;;  %v628_v47 = vld [vmem:[%s833_s4 + $0x30] sm:$0xff]   ;;  %v630_v49 = vld [vmem:[%s833_s4 + $0x38] sm:$0xff]   ;;  %v271_v53 = vld [vmem:[%s834_s2] sm:$0x3] }
  0x12   :  { %548 = vmatprep.subr.bf16.mxu1 %v621_v26  ;;  %v287_v55 = vld [vmem:[%s835_s3] sm:$0x3]  ;;  %v276_v56 = vrot.slane %v271_v53, %v275_v52  ;;  %v280_v57 = vrot.slane %v271_v53, %v279_v54 }
  0x13   :  { %237 = vmatpush1.bf16.msra.mxu0 %v578_v9  ;;  %v292_v58 = vrot.slane %v287_v55, %v275_v52  ;;  %v296_v60 = vrot.slane %v287_v55, %v279_v54  ;;  %v525_v15 = vld [vmem:[%s836_s5] ss:$0 sm:$0xff] }
  0x14   :  { %238 = vmatprep.subr.bf16.mxu0 %v579_v10 }
  0x15   :  { %549 = vmatpush3.bf16.msra.mxu1 %v622_v27 }
  0x16   :  { %550 = vmatprep.subr.bf16.mxu1 %v623_v29 }
  0x17   :  { %239 = vmatpush1.bf16.msra.mxu0 %v581_v11 }
  0x18   :  { %240 = vmatprep.subr.bf16.mxu0 %v582_v12 }
  0x19   :  { %551 = vmatpush3.bf16.msra.mxu1 %v624_v31 }
  0x1a   :  { %552 = vmatprep.subr.bf16.mxu1 %v625_v44 }
  0x1b   :  { %241 = vmatpush1.bf16.msra.mxu0 %v584_v13 }
  0x1c   :  { %242 = vmatprep.subr.bf16.mxu0 %v585_v14 }
  0x1d   :  { %553 = vmatpush3.bf16.msra.mxu1 %v626_v45 }
  0x1e   :  { %554 = vmatprep.subr.bf16.mxu1 %v627_v46 }
  0x1f   :  { %243 = vmatpush1.bf16.msra.mxu0 %v587_v18 }
  0x20   :  { %244 = vmatprep.subr.bf16.mxu0 %v588_v22 }
  0x21   :  { %555 = vmatpush3.bf16.msra.mxu1 %v628_v47 }
  0x22   :  { %556 = vmatprep.subr.bf16.mxu1 %v629_v48 }
  0x23   :  { %245 = vmatpush1.bf16.msra.mxu0 %v590_v23 }
  0x24   :  { %246 = vmatprep.subr.bf16.mxu0 %v591_v24 }
  0x25   :  { %557 = vmatpush3.bf16.msra.mxu1 %v630_v49 }
  0x27   :  { %247 = vmatpush1.bf16.msra.mxu0 %v593_v28 }
  0x28   :  { %248 = vmatprep.subr.bf16.mxu0 %v594_v30 }
  0x2b   :  { %249 = vmatpush1.bf16.msra.mxu0 %v596_v32 }
  0x2c   :  { %250 = vmatprep.subr.bf16.mxu0 %v597_v33 }
  0x2f   :  { %251 = vmatpush1.bf16.msra.mxu0 %v599_v34 }
  0x30   :  { %252 = vmatprep.subr.bf16.mxu0 %v600_v35 }
  0x33   :  { %253 = vmatpush1.bf16.msra.mxu0 %v602_v36 }
  0x34   :  { %254 = vmatprep.subr.bf16.mxu0 %v603_v37 }
  0x37   :  { %255 = vmatpush1.bf16.msra.mxu0 %v605_v38 }
  0x38   :  { %256 = vmatprep.subr.bf16.mxu0 %v606_v39 }
  0x3b   :  { %257 = vmatpush1.bf16.msra.mxu0 %v608_v40 }
  0x3c   :  { %258 = vmatprep.subr.bf16.mxu0 %v609_v41 }
  0x3f   :  { %259 = vmatpush1.bf16.msra.mxu0 %v611_v42 }
  0x42   :  { %261 = vmatmul.mubr.bf16.vlgmr.msra.gmra.mrb[0].mxu0 %v612_v43 }
 0x115   :  { %v262_v59 = vpop.f32.mrb[0].mxu0 }
 0x116   :  { %v283_v61 = vmul.f32 %v276_v56, %v262_v59  ;;  %v264_v62 = vpop.f32.mrb[1].mxu0 }
 0x117   :  { %v284_v63 = vmul.f32 %v280_v57, %v264_v62  ;;  %v266_v0 = vpop.f32.mrb[2].mxu0 }
 0x118   :  { %v299_v1 = vadd.f32 %v292_v58, %v283_v61  ;;  %v285_v2 = vmul.f32 %v276_v56, %v266_v0  ;;  %v268_v3 = vpop.f32.mrb[3].mxu0 }
 0x119   :  { %v286_v4 = vmul.f32 %v280_v57, %v268_v3  ;;  %v300_v5 = vadd.f32 %v296_v60, %v284_v63 }
 0x11a   :  { %v301_v6 = vadd.f32 %v292_v58, %v285_v2  ;;  %v303_v8 = vmax.f32 %v299_v1, 0.0 }
 0x11b   :  { %v302_v7 = vadd.f32 %v296_v60, %v286_v4  ;;  %v304_v10 = vmax.f32 %v300_v5, 0.0 }
 0x11c   :  { %v305_v9 = vmax.f32 %v301_v6, 0.0 }
 0x11d   :  { %v306_v11 = vmax.f32 %v302_v7, 0.0 }
 0x11e   :  { %v307_v12 = vpack.c.bf16 %v305_v9, %v303_v8 }
 0x11f   :  { %v308_v13 = vpack.c.bf16 %v306_v11, %v304_v10 }
 0x121   :  { %476 = vmatprep.mubr.bf16.mxu1 %v308_v13 }
 0x122   :  { %477 = vmatmul.mubr.bf16.vlgmr.msra.gmra.mrb[0].mxu1 %v307_v12 }
 0x1f5   :  { %v558_v14 = vpop.f32.mrb[0].mxu1 }
 0x1f6   :  { %v559_v16 = vpop.f32.mrb[1].mxu1 }
 0x1f7   :  { %v560_v17 = vadd.f32 %v559_v16, %v558_v14  ;;  %v561_v18 = vpop.f32.mrb[2].mxu1 }
 0x1f8   :  { %v562_v19 = vpop.f32.mrb[3].mxu1 }
 0x1f9   :  { %v479_v20 = vadd.f32 %v560_v17, %v525_v15  ;;  %v563_v21 = vadd.f32 %v562_v19, %v561_v18 }
 0x1fb   :  { %485 = vst [vmem:[%s837_s6] sm:$0xff] %v479_v20  ;;  %v482_v22 = vadd.f32 %v563_v21, %v525_v15 }
 0x1fd   :  { %486 = vst [vmem:[%s837_s6 + $0x8] sm:$0xff] %v482_v22 }

</bundles_post_ra>
